<compile_context>
chip_gen: v7x
topology: tpu7x:2x2x1
jax: 0.10.0
libtpu: 0.0.40
codegen_flags: <defaults>
</compile_context>

<pallas_src>
import numpy as np
import jax
import jax.numpy as jnp
from jax import lax
from jax.experimental import pallas as pl
from jax.experimental.pallas import tpu as pltpu


# Honest VMEM budget (worst per-program working set: ~6 MiB lowres, ~1.5 MiB final).
_VMEM_LIMIT_BYTES = 16 * 1024 * 1024


# -----------------------------------------------------------------------------
# Kernel 1: fused low-resolution branch (conv2∘conv1 -> maxpool -> 3 convs).
# -----------------------------------------------------------------------------
def _make_lowres_kernel(f, W, Ho, Wo, hs, ws):
    def colsel(win, wout, start, stride):
        # 0/1 column-selection matrix from iota: [w, j] = (w == stride*j + start)
        r = lax.broadcasted_iota(jnp.int32, (win, wout), 0)
        c = lax.broadcasted_iota(jnp.int32, (win, wout), 1)
        return (r == stride * c + start).astype(jnp.float32)

    def kernel(x_ref, lc_ref, bc_ref, lmx_ref, bmx_ref, l3_ref, b3_ref,
               l3p_ref, b3p_ref, o_ref):
        f32 = jnp.float32
        x2 = x_ref[0]                                            # (C*H, W)

        # conv2 ∘ conv1 : 3x3, stride 2, valid, C -> f.
        acc = jnp.zeros((f * Ho, Wo), f32)
        for kw in range(3):
            t = jnp.dot(lc_ref[kw], x2, preferred_element_type=f32)       # (f*Ho, W)
            acc = acc + jnp.dot(t, colsel(W, Wo, kw, 2),
                                preferred_element_type=f32)               # (f*Ho, Wo)
        c1 = acc + bc_ref[...]

        # max_pool2d(kernel=7, stride=3), separable slice-max.
        c1s = c1.reshape(f, Ho, Wo)
        rm = jnp.stack([jnp.max(c1s[:, 3 * i:3 * i + 7, :], axis=1)
                        for i in range(hs)], axis=1)                      # (f, hs, Wo)
        vm = jnp.stack([jnp.max(rm[:, :, 3 * j:3 * j + 7], axis=2)
                        for j in range(ws)], axis=2)                      # (f, hs, ws)
        v = vm.reshape(f * hs, ws)

        # 3x3 'same' convs (zero padding folded into the shift matrices in L).
        def conv_same(inp, l_ref, b_ref, relu):
            out = jnp.zeros((f * hs, ws), f32)
            for kw in range(3):
                t = jnp.dot(l_ref[kw], inp, preferred_element_type=f32)   # (f*hs, ws)
                out = out + jnp.dot(t, colsel(ws, ws, kw - 1, 1),
                                    preferred_element_type=f32)
            out = out + b_ref[...]
            return jnp.maximum(out, 0.0) if relu else out

        vr = conv_same(v, lmx_ref, bmx_ref, True)        # relu(conv_max(v_max))
        c3 = conv_same(vr, l3_ref, b3_ref, True)         # relu(conv3(.))
        c3 = conv_same(c3, l3p_ref, b3p_ref, False)      # conv3_(.)
        o_ref[0] = c3.astype(o_ref.dtype)                # (f*hs, ws)
    return kernel


def lowres_branch(x_rows, Lc, bc, Lmx, bmx, L3, b3, L3p, b3p,
                  *, f, W, Ho, Wo, hs, ws):
    N, CH, _ = x_rows.shape
    kernel = _make_lowres_kernel(f, W, Ho, Wo, hs, ws)
    return pl.pallas_call(
        kernel,
        out_shape=jax.ShapeDtypeStruct((N, f * hs, ws), jnp.float32),
        grid=(N,),
        in_specs=[
            pl.BlockSpec((1, CH, W), lambda n: (n, 0, 0)),          # x (per-image tile)
            pl.BlockSpec((3, f * Ho, CH), lambda n: (0, 0, 0)),     # conv2∘conv1 L (resident)
            pl.BlockSpec((f * Ho, 1), lambda n: (0, 0)),
            pl.BlockSpec((3, f * hs, f * hs), lambda n: (0, 0, 0)),  # conv_max L
            pl.BlockSpec((f * hs, 1), lambda n: (0, 0)),
            pl.BlockSpec((3, f * hs, f * hs), lambda n: (0, 0, 0)),  # conv3 L
            pl.BlockSpec((f * hs, 1), lambda n: (0, 0)),
            pl.BlockSpec((3, f * hs, f * hs), lambda n: (0, 0, 0)),  # conv3_ L
            pl.BlockSpec((f * hs, 1), lambda n: (0, 0)),
        ],
        out_specs=pl.BlockSpec((1, f * hs, ws), lambda n: (n, 0, 0)),
        compiler_params=pltpu.CompilerParams(
            dimension_semantics=("parallel",),
            vmem_limit_bytes=_VMEM_LIMIT_BYTES),
    )(x_rows, Lc, bc, Lmx, bmx, L3, b3, L3p, b3p)


# -----------------------------------------------------------------------------
# Kernel 2: fused tail, streamed over lane-dense pixel tiles.
#   cf = Wcf @ x + bcf ; up = c3 @ Kr ; c4 = W4 @ (up + cf) + b4 ; out = x*sigmoid(c4)
# -----------------------------------------------------------------------------
def _final_kernel(x_ref, c3_ref, kr_ref, wcf_ref, bcf_ref, w4_ref, b4_ref, o_ref):
    f32 = jnp.float32
    x = x_ref[0]                                                         # (C, tpix)
    cf = jnp.dot(wcf_ref[...], x, preferred_element_type=f32) + bcf_ref[...]
    up = jnp.dot(c3_ref[0], kr_ref[...], preferred_element_type=f32)     # (f, tpix)
    c4 = jnp.dot(w4_ref[...], up + cf, preferred_element_type=f32) + b4_ref[...]
    o_ref[0] = (x * jax.nn.sigmoid(c4)).astype(o_ref.dtype)


def _num_pixel_tiles(P, C, budget_bytes=4 * 1024 * 1024):
    """Whole-image pixel tile unless it would blow the budget; tiles must be
    128-lane aligned (BlockSpec constraint).  For 40x40 inputs this returns 1."""
    if 4 * C * P * 4 <= budget_bytes or P % 128:
        return 1
    for n in range(2, 65):
        if P % n == 0 and (P // n) % 128 == 0 and 4 * C * (P // n) * 4 <= budget_bytes:
            return n
    return 1


def esa_final(x_flat, c3f, Kr, Wcf, bcf, W4m, b4, *, n_tiles):
    N, C, P = x_flat.shape
    f, S = c3f.shape[1], c3f.shape[2]
    tpix = P // n_tiles
    return pl.pallas_call(
        _final_kernel,
        out_shape=jax.ShapeDtypeStruct((N, C, P), x_flat.dtype),
        grid=(N, n_tiles),
        in_specs=[
            pl.BlockSpec((1, C, tpix), lambda n, i: (n, 0, i)),   # x (streamed, lane-dense)
            pl.BlockSpec((1, f, S), lambda n, i: (n, 0, 0)),      # c3 (tiny, per-image resident)
            pl.BlockSpec((S, tpix), lambda n, i: (0, i)),         # bilinear kron matrix
            pl.BlockSpec((f, C), lambda n, i: (0, 0)),            # conv_f∘conv1 weight
            pl.BlockSpec((f, 1), lambda n, i: (0, 0)),
            pl.BlockSpec((C, f), lambda n, i: (0, 0)),            # conv4 weight
            pl.BlockSpec((C, 1), lambda n, i: (0, 0)),
        ],
        out_specs=pl.BlockSpec((1, C, tpix), lambda n, i: (n, 0, i)),
        compiler_params=pltpu.CompilerParams(
            dimension_semantics=("parallel", "parallel"),
            vmem_limit_bytes=_VMEM_LIMIT_BYTES),
    )(x_flat, c3f, Kr, Wcf, bcf, W4m, b4)


# -----------------------------------------------------------------------------
# Wrapper-side weight folding (exact algebra; done once, outside jit).
# -----------------------------------------------------------------------------
def bilinear_matrix(out_size, in_size):
    """PyTorch F.interpolate(mode='bilinear', align_corners=False) 1-D matrix."""
    A = np.zeros((out_size, in_size), dtype=np.float32)
    scale = in_size / out_size
    for i in range(out_size):
        src = (i + 0.5) * scale - 0.5
        src = max(src, 0.0)
        h1 = min(int(np.floor(src)), in_size - 1)
        h1p = 1 if h1 < in_size - 1 else 0
        l1 = src - h1
        A[i, h1] += 1.0 - l1
        A[i, h1 + h1p] += l1
    return A


def prepare_esa_weights(params, H, W):
    Ho, Wo = (H - 3) // 2 + 1, (W - 3) // 2 + 1
    hs, ws = (Ho - 7) // 3 + 1, (Wo - 7) // 3 + 1
    assert hs >= 1 and ws >= 1, "input spatially too small for the ESA pooling chain"

    w1, b1 = params["conv1"]
    w2, b2 = params["conv2"]
    wmx, bmx = params["conv_max"]
    w3, b3 = params["conv3"]
    w3_, b3_ = params["conv3_"]
    wf, bf = params["conv_f"]
    w4, b4 = params["conv4"]
    C, f = w1.shape[2], w1.shape[3]

    W1m = w1[0, 0].T                          # (f, C)
    Wfm = wf[0, 0].T                          # (f, f)
    W4m = w4[0, 0].T                          # (C, f)

    def tapT(w, kh, kw):                      # HWIO tap -> (cout, cin)
        return w[kh, kw].T

    # 0/1 row-selection matrices (static numpy).
    i_o, h_i = np.arange(Ho)[:, None], np.arange(H)[None, :]
    R2 = [jnp.asarray((h_i == 2 * i_o + kh).astype(np.float32)) for kh in range(3)]
    i_s, h_s = np.arange(hs)[:, None], np.arange(hs)[None, :]
    Ss = [jnp.asarray((h_s == i_s + kh - 1).astype(np.float32)) for kh in range(3)]

    # conv2 ∘ conv1 (exact composition of the 1x1 into the 3x3 stride-2 taps).
    Wc = [[tapT(w2, kh, kw) @ W1m for kw in range(3)] for kh in range(3)]
    bc = b2 + sum(tapT(w2, kh, kw) @ b1 for kh in range(3) for kw in range(3))
    Lc = jnp.stack([sum(jnp.kron(Wc[kh][kw], R2[kh]) for kh in range(3))
                    for kw in range(3)])                              # (3, f*Ho, C*H)
    bck = jnp.kron(bc.reshape(f, 1), jnp.ones((Ho, 1), jnp.float32))

    def same_conv_L(w, b):
        L = jnp.stack([sum(jnp.kron(tapT(w, kh, kw), Ss[kh]) for kh in range(3))
                       for kw in range(3)])                           # (3, f*hs, f*hs)
        return L, jnp.kron(b.reshape(f, 1), jnp.ones((hs, 1), jnp.float32))

    Lmx, bmk = same_conv_L(wmx, bmx)
    L3, b3k = same_conv_L(w3, b3)
    L3p, b3pk = same_conv_L(w3_, b3_)

    # Bilinear upsample (align_corners=False): up_flat = c3_flat @ kron(Ah^T, Aw^T)
    Ah = jnp.asarray(bilinear_matrix(H, hs))
    Aw = jnp.asarray(bilinear_matrix(W, ws))
    Kr = jnp.kron(Ah.T, Aw.T)                                         # (hs*ws, H*W)

    Wcf = Wfm @ W1m                                                   # conv_f ∘ conv1
    bcf = (Wfm @ b1 + bf).reshape(f, 1)

    return dict(Lc=Lc, bc=bck, Lmx=Lmx, bmx=bmk, L3=L3, b3=b3k, L3p=L3p, b3p=b3pk,
                Kr=Kr, Wcf=Wcf, bcf=bcf, W4=W4m, b4=b4.reshape(C, 1))


def esa_forward_pallas(x_nchw, prep):
    N, C, H, W = x_nchw.shape
    f = prep["Wcf"].shape[0]
    Ho, Wo = (H - 3) // 2 + 1, (W - 3) // 2 + 1
    hs, ws = (Ho - 7) // 3 + 1, (Wo - 7) // 3 + 1

    x = x_nchw.astype(jnp.float32)
    x_rows = x.reshape(N, C * H, W)      # free view: (channel*row, col) for kernel 1
    x_flat = x.reshape(N, C, H * W)      # free view: lane-dense pixels for kernel 2

    c3 = lowres_branch(x_rows, prep["Lc"], prep["bc"], prep["Lmx"], prep["bmx"],
                       prep["L3"], prep["b3"], prep["L3p"], prep["b3p"],
                       f=f, W=W, Ho=Ho, Wo=Wo, hs=hs, ws=ws)
    c3f = c3.reshape(N, f, hs * ws)      # free view

    n_tiles = _num_pixel_tiles(H * W, C)
    out = esa_final(x_flat, c3f, prep["Kr"], prep["Wcf"], prep["bcf"],
                    prep["W4"], prep["b4"], n_tiles=n_tiles)
    return out.reshape(N, C, H, W)


# -----------------------------------------------------------------------------
# Parameter init (HWIO) and pure-JAX reference for correctness.
# -----------------------------------------------------------------------------
def init_params(key, n_feats):
    f = n_feats // 4
    specs = {
        "conv1": (1, n_feats, f),
        "conv_f": (1, f, f),
        "conv_max": (3, f, f),
        "conv2": (3, f, f),
        "conv3": (3, f, f),
        "conv3_": (3, f, f),
        "conv4": (1, f, n_feats),
    }
    params = {}
    for name, (k, cin, cout) in specs.items():
        key, kw_, kb_ = jax.random.split(key, 3)
        fan_in = cin * k * k
        w = jax.random.normal(kw_, (k, k, cin, cout), jnp.float32) / np.sqrt(fan_in)
        b = 0.1 * jax.random.normal(kb_, (cout,), jnp.float32)
        params[name] = (w, b)
    return params


def esa_forward_ref(x_nchw, params):
    x = jnp.transpose(x_nchw, (0, 2, 3, 1)).astype(jnp.float32)

    def conv(h, name, stride=1, pad=0):
        w, b = params[name]
        y = lax.conv_general_dilated(
            h, w, (stride, stride), [(pad, pad), (pad, pad)],
            dimension_numbers=("NHWC", "HWIO", "NHWC"),
            precision=lax.Precision.HIGHEST)
        return y + b

    c1_ = conv(x, "conv1")
    c1 = conv(c1_, "conv2", stride=2)
    v_max = lax.reduce_window(c1, -jnp.inf, lax.max, (1, 7, 7, 1), (1, 3, 3, 1), "VALID")
    v_range = jax.nn.relu(conv(v_max, "conv_max", pad=1))
    c3 = jax.nn.relu(conv(v_range, "conv3", pad=1))
    c3 = conv(c3, "conv3_", pad=1)
    N, H, W, C = x.shape
    hs, ws = c3.shape[1], c3.shape[2]
    Ah = jnp.asarray(bilinear_matrix(H, hs))
    Aw = jnp.asarray(bilinear_matrix(W, ws))
    c3_up = jnp.einsum("hp,wq,npqf->nhwf", Ah, Aw, c3)
    cf = conv(c1_, "conv_f")
    c4 = conv(c3_up + cf, "conv4")
    m = jax.nn.sigmoid(c4)
    return jnp.transpose(x * m, (0, 3, 1, 2))


if __name__ == "__main__":
    key = jax.random.PRNGKey(0)
    kx, kp = jax.random.split(key)
    N, C, H, W = 2, 32, 40, 40            # n_feats = 32 -> f = 8
    x = jax.random.normal(kx, (N, C, H, W), jnp.float32)
    params = init_params(kp, C)

    prep = prepare_esa_weights(params, H, W)   # one-time weight folding (outside jit)
    fwd = jax.jit(esa_forward_pallas)
    out = jax.block_until_ready(fwd(x, prep))

    ref = esa_forward_ref(x, params)
    np.testing.assert_allclose(np.asarray(out), np.asarray(ref), rtol=1e-2, atol=1e-2)
    print("KERNEL_OK")
</pallas_src>

<mosaic_0001>
module attributes {stable_mosaic.version = 11 : i64} {
  func.func @_final_kernel(%arg0: i32, %arg1: i32, %arg2: memref<1x32x1600xf32, #tpu.memory_space<vmem>>, %arg3: memref<1x8x25xf32, #tpu.memory_space<vmem>>, %arg4: memref<25x1600xf32, #tpu.memory_space<vmem>>, %arg5: memref<8x32xf32, #tpu.memory_space<vmem>>, %arg6: memref<8x1xf32, #tpu.memory_space<vmem>>, %arg7: memref<32x8xf32, #tpu.memory_space<vmem>>, %arg8: memref<32x1xf32, #tpu.memory_space<vmem>>, %arg9: memref<1x32x1600xf32, #tpu.memory_space<vmem>>) attributes {dimension_semantics = [#tpu.dimension_semantics<parallel>, #tpu.dimension_semantics<parallel>], iteration_bounds = array<i64: 2, 1>, scalar_prefetch = 0 : i64, scratch_operands = 0 : i64, tpu.core_type = #tpu.core_type<tc>, window_params = [{transform_indices = @transform_0, window_bounds = array<i64: 1, 32, 1600>}, {transform_indices = @transform_1, window_bounds = array<i64: 1, 8, 25>}, {transform_indices = @transform_2, window_bounds = array<i64: 25, 1600>}, {pipeline_mode = #tpu.pipeline_mode<synchronous>, transform_indices = @transform_3, window_bounds = array<i64: 8, 32>}, {pipeline_mode = #tpu.pipeline_mode<synchronous>, transform_indices = @transform_4, window_bounds = array<i64: 8, 1>}, {pipeline_mode = #tpu.pipeline_mode<synchronous>, transform_indices = @transform_5, window_bounds = array<i64: 32, 8>}, {pipeline_mode = #tpu.pipeline_mode<synchronous>, transform_indices = @transform_6, window_bounds = array<i64: 32, 1>}, {transform_indices = @transform_7, window_bounds = array<i64: 1, 32, 1600>}]} {
    %c0 = arith.constant 0 : index
    %c0_0 = arith.constant 0 : index
    %c0_1 = arith.constant 0 : index
    %0 = vector.load %arg2[%c0, %c0_0, %c0_1] : memref<1x32x1600xf32, #tpu.memory_space<vmem>>, vector<1x32x1600xf32>
    %1 = vector.shape_cast %0 : vector<1x32x1600xf32> to vector<32x1600xf32>
    %c0_2 = arith.constant 0 : index
    %c0_3 = arith.constant 0 : index
    %2 = vector.load %arg5[%c0_2, %c0_3] : memref<8x32xf32, #tpu.memory_space<vmem>>, vector<8x32xf32>
    %cst = arith.constant dense<0.000000e+00> : vector<8x1600xf32>
    %3 = tpu.matmul %2, %1, %cst {dimension_numbers = #tpu.dot_dimension_numbers<[1], [0], [0], [1], [0, 0, 1, 1], [], []>} : vector<8x32xf32>, vector<32x1600xf32>, vector<8x1600xf32> -> vector<8x1600xf32>
    %c0_4 = arith.constant 0 : index
    %c0_5 = arith.constant 0 : index
    %4 = vector.load %arg6[%c0_4, %c0_5] : memref<8x1xf32, #tpu.memory_space<vmem>>, vector<8x1xf32>
    %5 = vector.broadcast %4 : vector<8x1xf32> to vector<8x1600xf32>
    %6 = arith.addf %3, %5 : vector<8x1600xf32>
    %c0_6 = arith.constant 0 : index
    %c0_7 = arith.constant 0 : index
    %c0_8 = arith.constant 0 : index
    %7 = vector.load %arg3[%c0_6, %c0_7, %c0_8] : memref<1x8x25xf32, #tpu.memory_space<vmem>>, vector<1x8x25xf32>
    %8 = vector.shape_cast %7 : vector<1x8x25xf32> to vector<8x25xf32>
    %c0_9 = arith.constant 0 : index
    %c0_10 = arith.constant 0 : index
    %9 = vector.load %arg4[%c0_9, %c0_10] : memref<25x1600xf32, #tpu.memory_space<vmem>>, vector<25x1600xf32>
    %cst_11 = arith.constant dense<0.000000e+00> : vector<8x1600xf32>
    %10 = tpu.matmul %8, %9, %cst_11 {dimension_numbers = #tpu.dot_dimension_numbers<[1], [0], [0], [1], [0, 0, 1, 1], [], []>} : vector<8x25xf32>, vector<25x1600xf32>, vector<8x1600xf32> -> vector<8x1600xf32>
    %c0_12 = arith.constant 0 : index
    %c0_13 = arith.constant 0 : index
    %11 = vector.load %arg7[%c0_12, %c0_13] : memref<32x8xf32, #tpu.memory_space<vmem>>, vector<32x8xf32>
    %12 = arith.addf %10, %6 : vector<8x1600xf32>
    %cst_14 = arith.constant dense<0.000000e+00> : vector<32x1600xf32>
    %13 = tpu.matmul %11, %12, %cst_14 {dimension_numbers = #tpu.dot_dimension_numbers<[1], [0], [0], [1], [0, 0, 1, 1], [], []>} : vector<32x8xf32>, vector<8x1600xf32>, vector<32x1600xf32> -> vector<32x1600xf32>
    %c0_15 = arith.constant 0 : index
    %c0_16 = arith.constant 0 : index
    %14 = vector.load %arg8[%c0_15, %c0_16] : memref<32x1xf32, #tpu.memory_space<vmem>>, vector<32x1xf32>
    %15 = vector.broadcast %14 : vector<32x1xf32> to vector<32x1600xf32>
    %16 = arith.addf %13, %15 : vector<32x1600xf32>
    %17 = arith.negf %16 : vector<32x1600xf32>
    %18 = math.exp %17 : vector<32x1600xf32>
    %cst_17 = arith.constant 1.000000e+00 : f32
    %19 = vector.broadcast %cst_17 : f32 to vector<32x1600xf32>
    %20 = arith.addf %19, %18 : vector<32x1600xf32>
    %21 = arith.divf %19, %20 : vector<32x1600xf32>
    %22 = arith.mulf %1, %21 : vector<32x1600xf32>
    %c0_18 = arith.constant 0 : index
    %c0_19 = arith.constant 0 : index
    %c0_20 = arith.constant 0 : index
    %23 = vector.load %arg9[%c0_18, %c0_19, %c0_20] : memref<1x32x1600xf32, #tpu.memory_space<vmem>>, vector<1x32x1600xf32>
    %24 = vector.shape_cast %23 : vector<1x32x1600xf32> to vector<32x1600xf32>
    %25 = vector.shape_cast %22 : vector<32x1600xf32> to vector<1x32x1600xf32>
    tpu.vector_store %arg9[%c0_18, %c0_19, %c0_20], %25 {strides = array<i32>} : memref<1x32x1600xf32, #tpu.memory_space<vmem>>, vector<1x32x1600xf32>,
    return
  }
  func.func @transform_0(%arg0: i32, %arg1: i32) -> (i32, i32, i32) {
    %c0_i32 = arith.constant 0 : i32
    %c0_i32_0 = arith.constant 0 : i32
    return %arg0, %c0_i32, %arg1 : i32, i32, i32
  }
  func.func @transform_1(%arg0: i32, %arg1: i32) -> (i32, i32, i32) {
    %c0_i32 = arith.constant 0 : i32
    %c0_i32_0 = arith.constant 0 : i32
    %c0_i32_1 = arith.constant 0 : i32
    return %arg0, %c0_i32, %c0_i32_0 : i32, i32, i32
  }
  func.func @transform_2(%arg0: i32, %arg1: i32) -> (i32, i32) {
    %c0_i32 = arith.constant 0 : i32
    %c0_i32_0 = arith.constant 0 : i32
    return %c0_i32, %arg1 : i32, i32
  }
  func.func @transform_3(%arg0: i32, %arg1: i32) -> (i32, i32) {
    %c0_i32 = arith.constant 0 : i32
    %c0_i32_0 = arith.constant 0 : i32
    %c0_i32_1 = arith.constant 0 : i32
    return %c0_i32, %c0_i32_0 : i32, i32
  }
  func.func @transform_4(%arg0: i32, %arg1: i32) -> (i32, i32) {
    %c0_i32 = arith.constant 0 : i32
    %c0_i32_0 = arith.constant 0 : i32
    %c0_i32_1 = arith.constant 0 : i32
    return %c0_i32, %c0_i32_0 : i32, i32
  }
  func.func @transform_5(%arg0: i32, %arg1: i32) -> (i32, i32) {
    %c0_i32 = arith.constant 0 : i32
    %c0_i32_0 = arith.constant 0 : i32
    %c0_i32_1 = arith.constant 0 : i32
    return %c0_i32, %c0_i32_0 : i32, i32
  }
  func.func @transform_6(%arg0: i32, %arg1: i32) -> (i32, i32) {
    %c0_i32 = arith.constant 0 : i32
    %c0_i32_0 = arith.constant 0 : i32
    %c0_i32_1 = arith.constant 0 : i32
    return %c0_i32, %c0_i32_0 : i32, i32
  }
  func.func @transform_7(%arg0: i32, %arg1: i32) -> (i32, i32, i32) {
    %c0_i32 = arith.constant 0 : i32
    %c0_i32_0 = arith.constant 0 : i32
    return %arg0, %c0_i32, %arg1 : i32, i32, i32
  }
}

module attributes {stable_mosaic.version = 11 : i64} {
  func.func @kernel(%arg0: i32, %arg1: memref<1x1280x40xf32, #tpu.memory_space<vmem>>, %arg2: memref<3x152x1280xf32, #tpu.memory_space<vmem>>, %arg3: memref<152x1xf32, #tpu.memory_space<vmem>>, %arg4: memref<3x40x40xf32, #tpu.memory_space<vmem>>, %arg5: memref<40x1xf32, #tpu.memory_space<vmem>>, %arg6: memref<3x40x40xf32, #tpu.memory_space<vmem>>, %arg7: memref<40x1xf32, #tpu.memory_space<vmem>>, %arg8: memref<3x40x40xf32, #tpu.memory_space<vmem>>, %arg9: memref<40x1xf32, #tpu.memory_space<vmem>>, %arg10: memref<1x40x5xf32, #tpu.memory_space<vmem>>) attributes {dimension_semantics = [#tpu.dimension_semantics<parallel>], iteration_bounds = array<i64: 2>, scalar_prefetch = 0 : i64, scratch_operands = 0 : i64, tpu.core_type = #tpu.core_type<tc>, window_params = [{transform_indices = @transform_0, window_bounds = array<i64: 1, 1280, 40>}, {pipeline_mode = #tpu.pipeline_mode<synchronous>, transform_indices = @transform_1, window_bounds = array<i64: 3, 152, 1280>}, {pipeline_mode = #tpu.pipeline_mode<synchronous>, transform_indices = @transform_2, window_bounds = array<i64: 152, 1>}, {pipeline_mode = #tpu.pipeline_mode<synchronous>, transform_indices = @transform_3, window_bounds = array<i64: 3, 40, 40>}, {pipeline_mode = #tpu.pipeline_mode<synchronous>, transform_indices = @transform_4, window_bounds = array<i64: 40, 1>}, {pipeline_mode = #tpu.pipeline_mode<synchronous>, transform_indices = @transform_5, window_bounds = array<i64: 3, 40, 40>}, {pipeline_mode = #tpu.pipeline_mode<synchronous>, transform_indices = @transform_6, window_bounds = array<i64: 40, 1>}, {pipeline_mode = #tpu.pipeline_mode<synchronous>, transform_indices = @transform_7, window_bounds = array<i64: 3, 40, 40>}, {pipeline_mode = #tpu.pipeline_mode<synchronous>, transform_indices = @transform_8, window_bounds = array<i64: 40, 1>}, {transform_indices = @transform_9, window_bounds = array<i64: 1, 40, 5>}]} {
    %c0 = arith.constant 0 : index
    %c0_0 = arith.constant 0 : index
    %c0_1 = arith.constant 0 : index
    %0 = vector.load %arg1[%c0, %c0_0, %c0_1] : memref<1x1280x40xf32, #tpu.memory_space<vmem>>, vector<1x1280x40xf32>
    %1 = vector.shape_cast %0 : vector<1x1280x40xf32> to vector<1280x40xf32>
    %cst = arith.constant 0.000000e+00 : f32
    %2 = vector.broadcast %cst : f32 to vector<152x19xf32>
    %c0_2 = arith.constant 0 : index
    %c0_3 = arith.constant 0 : index
    %c0_4 = arith.constant 0 : index
    %3 = vector.load %arg2[%c0_2, %c0_3, %c0_4] : memref<3x152x1280xf32, #tpu.memory_space<vmem>>, vector<1x152x1280xf32>
    %4 = vector.shape_cast %3 : vector<1x152x1280xf32> to vector<152x1280xf32>
    %cst_5 = arith.constant dense<0.000000e+00> : vector<152x40xf32>
    %5 = tpu.matmul %4, %1, %cst_5 {dimension_numbers = #tpu.dot_dimension_numbers<[1], [0], [0], [1], [0, 0, 1, 1], [], []>} : vector<152x1280xf32>, vector<1280x40xf32>, vector<152x40xf32> -> vector<152x40xf32>
    %6 = tpu.iota {dimensions = array<i32: 0>} : vector<40x19xi32>
    %7 = tpu.iota {dimensions = array<i32: 1>} : vector<40x19xi32>
    %c2_i32 = arith.constant 2 : i32
    %8 = vector.broadcast %c2_i32 : i32 to vector<40x19xi32>
    %9 = arith.muli %8, %7 : vector<40x19xi32>
    %c0_i32 = arith.constant 0 : i32
    %10 = vector.broadcast %c0_i32 : i32 to vector<40x19xi32>
    %11 = arith.addi %9, %10 : vector<40x19xi32>
    %12 = arith.cmpi eq, %6, %11 : vector<40x19xi32>
    %13 = arith.extui %12 : vector<40x19xi1> to vector<40x19xi32>
    %14 = arith.sitofp %13 : vector<40x19xi32> to vector<40x19xf32>
    %cst_6 = arith.constant dense<0.000000e+00> : vector<152x19xf32>
    %15 = tpu.matmul %5, %14, %cst_6 {dimension_numbers = #tpu.dot_dimension_numbers<[1], [0], [0], [1], [0, 0, 1, 1], [], []>} : vector<152x40xf32>, vector<40x19xf32>, vector<152x19xf32> -> vector<152x19xf32>
    %16 = arith.addf %2, %15 : vector<152x19xf32>
    %c1 = arith.constant 1 : index
    %c0_7 = arith.constant 0 : index
    %c0_8 = arith.constant 0 : index
    %17 = vector.load %arg2[%c1, %c0_7, %c0_8] : memref<3x152x1280xf32, #tpu.memory_space<vmem>>, vector<1x152x1280xf32>
    %18 = vector.shape_cast %17 : vector<1x152x1280xf32> to vector<152x1280xf32>
    %cst_9 = arith.constant dense<0.000000e+00> : vector<152x40xf32>
    %19 = tpu.matmul %18, %1, %cst_9 {dimension_numbers = #tpu.dot_dimension_numbers<[1], [0], [0], [1], [0, 0, 1, 1], [], []>} : vector<152x1280xf32>, vector<1280x40xf32>, vector<152x40xf32> -> vector<152x40xf32>
    %20 = tpu.iota {dimensions = array<i32: 0>} : vector<40x19xi32>
    %21 = tpu.iota {dimensions = array<i32: 1>} : vector<40x19xi32>
    %c2_i32_10 = arith.constant 2 : i32
    %22 = vector.broadcast %c2_i32_10 : i32 to vector<40x19xi32>
    %23 = arith.muli %22, %21 : vector<40x19xi32>
    %c1_i32 = arith.constant 1 : i32
    %24 = vector.broadcast %c1_i32 : i32 to vector<40x19xi32>
    %25 = arith.addi %23, %24 : vector<40x19xi32>
    %26 = arith.cmpi eq, %20, %25 : vector<40x19xi32>
    %27 = arith.extui %26 : vector<40x19xi1> to vector<40x19xi32>
    %28 = arith.sitofp %27 : vector<40x19xi32> to vector<40x19xf32>
    %cst_11 = arith.constant dense<0.000000e+00> : vector<152x19xf32>
    %29 = tpu.matmul %19, %28, %cst_11 {dimension_numbers = #tpu.dot_dimension_numbers<[1], [0], [0], [1], [0, 0, 1, 1], [], []>} : vector<152x40xf32>, vector<40x19xf32>, vector<152x19xf32> -> vector<152x19xf32>
    %30 = arith.addf %16, %29 : vector<152x19xf32>
    %c2 = arith.constant 2 : index
    %c0_12 = arith.constant 0 : index
    %c0_13 = arith.constant 0 : index
    %31 = vector.load %arg2[%c2, %c0_12, %c0_13] : memref<3x152x1280xf32, #tpu.memory_space<vmem>>, vector<1x152x1280xf32>
    %32 = vector.shape_cast %31 : vector<1x152x1280xf32> to vector<152x1280xf32>
    %cst_14 = arith.constant dense<0.000000e+00> : vector<152x40xf32>
    %33 = tpu.matmul %32, %1, %cst_14 {dimension_numbers = #tpu.dot_dimension_numbers<[1], [0], [0], [1], [0, 0, 1, 1], [], []>} : vector<152x1280xf32>, vector<1280x40xf32>, vector<152x40xf32> -> vector<152x40xf32>
    %34 = tpu.iota {dimensions = array<i32: 0>} : vector<40x19xi32>
    %35 = tpu.iota {dimensions = array<i32: 1>} : vector<40x19xi32>
    %c2_i32_15 = arith.constant 2 : i32
    %36 = vector.broadcast %c2_i32_15 : i32 to vector<40x19xi32>
    %37 = arith.muli %36, %35 : vector<40x19xi32>
    %c2_i32_16 = arith.constant 2 : i32
    %38 = vector.broadcast %c2_i32_16 : i32 to vector<40x19xi32>
    %39 = arith.addi %37, %38 : vector<40x19xi32>
    %40 = arith.cmpi eq, %34, %39 : vector<40x19xi32>
    %41 = arith.extui %40 : vector<40x19xi1> to vector<40x19xi32>
    %42 = arith.sitofp %41 : vector<40x19xi32> to vector<40x19xf32>
    %cst_17 = arith.constant dense<0.000000e+00> : vector<152x19xf32>
    %43 = tpu.matmul %33, %42, %cst_17 {dimension_numbers = #tpu.dot_dimension_numbers<[1], [0], [0], [1], [0, 0, 1, 1], [], []>} : vector<152x40xf32>, vector<40x19xf32>, vector<152x19xf32> -> vector<152x19xf32>
    %44 = arith.addf %30, %43 : vector<152x19xf32>
    %c0_18 = arith.constant 0 : index
    %c0_19 = arith.constant 0 : index
    %45 = vector.load %arg3[%c0_18, %c0_19] : memref<152x1xf32, #tpu.memory_space<vmem>>, vector<152x1xf32>
    %46 = vector.broadcast %45 : vector<152x1xf32> to vector<152x19xf32>
    %47 = arith.addf %44, %46 : vector<152x19xf32>
    %48 = vector.shape_cast %47 : vector<152x19xf32> to vector<8x19x19xf32>
    %49 = vector.extract_strided_slice %48 {offsets = [0, 0, 0], sizes = [8, 7, 19], strides = [1, 1, 1]} : vector<8x19x19xf32> to vector<8x7x19xf32>
    %cst_20 = arith.constant dense<0xFF800000> : vector<8x19xf32>
    %50 = vector.multi_reduction <maximumf>, %49, %cst_20 [1] : vector<8x7x19xf32> to vector<8x19xf32>
    %51 = vector.extract_strided_slice %48 {offsets = [0, 3, 0], sizes = [8, 7, 19], strides = [1, 1, 1]} : vector<8x19x19xf32> to vector<8x7x19xf32>
    %cst_21 = arith.constant dense<0xFF800000> : vector<8x19xf32>
    %52 = vector.multi_reduction <maximumf>, %51, %cst_21 [1] : vector<8x7x19xf32> to vector<8x19xf32>
    %53 = vector.extract_strided_slice %48 {offsets = [0, 6, 0], sizes = [8, 7, 19], strides = [1, 1, 1]} : vector<8x19x19xf32> to vector<8x7x19xf32>
    %cst_22 = arith.constant dense<0xFF800000> : vector<8x19xf32>
    %54 = vector.multi_reduction <maximumf>, %53, %cst_22 [1] : vector<8x7x19xf32> to vector<8x19xf32>
    %55 = vector.extract_strided_slice %48 {offsets = [0, 9, 0], sizes = [8, 7, 19], strides = [1, 1, 1]} : vector<8x19x19xf32> to vector<8x7x19xf32>
    %cst_23 = arith.constant dense<0xFF800000> : vector<8x19xf32>
    %56 = vector.multi_reduction <maximumf>, %55, %cst_23 [1] : vector<8x7x19xf32> to vector<8x19xf32>
    %57 = vector.extract_strided_slice %48 {offsets = [0, 12, 0], sizes = [8, 7, 19], strides = [1, 1, 1]} : vector<8x19x19xf32> to vector<8x7x19xf32>
    %cst_24 = arith.constant dense<0xFF800000> : vector<8x19xf32>
    %58 = vector.multi_reduction <maximumf>, %57, %cst_24 [1] : vector<8x7x19xf32> to vector<8x19xf32>
    %59 = vector.shape_cast %50 : vector<8x19xf32> to vector<8x1x19xf32>
    %60 = vector.shape_cast %52 : vector<8x19xf32> to vector<8x1x19xf32>
    %61 = vector.shape_cast %54 : vector<8x19xf32> to vector<8x1x19xf32>
    %62 = vector.shape_cast %56 : vector<8x19xf32> to vector<8x1x19xf32>
    %63 = vector.shape_cast %58 : vector<8x19xf32> to vector<8x1x19xf32>
    %64 = tpu.concatenate %59, %60, %61, %62, %63 in 1 : vector<8x1x19xf32>, vector<8x1x19xf32>, vector<8x1x19xf32>, vector<8x1x19xf32>, vector<8x1x19xf32> -> vector<8x5x19xf32>
    %65 = vector.extract_strided_slice %64 {offsets = [0, 0, 0], sizes = [8, 5, 7], strides = [1, 1, 1]} : vector<8x5x19xf32> to vector<8x5x7xf32>
    %cst_25 = arith.constant dense<0xFF800000> : vector<8x5xf32>
    %66 = vector.multi_reduction <maximumf>, %65, %cst_25 [2] : vector<8x5x7xf32> to vector<8x5xf32>
    %67 = vector.extract_strided_slice %64 {offsets = [0, 0, 3], sizes = [8, 5, 7], strides = [1, 1, 1]} : vector<8x5x19xf32> to vector<8x5x7xf32>
    %cst_26 = arith.constant dense<0xFF800000> : vector<8x5xf32>
    %68 = vector.multi_reduction <maximumf>, %67, %cst_26 [2] : vector<8x5x7xf32> to vector<8x5xf32>
    %69 = vector.extract_strided_slice %64 {offsets = [0, 0, 6], sizes = [8, 5, 7], strides = [1, 1, 1]} : vector<8x5x19xf32> to vector<8x5x7xf32>
    %cst_27 = arith.constant dense<0xFF800000> : vector<8x5xf32>
    %70 = vector.multi_reduction <maximumf>, %69, %cst_27 [2] : vector<8x5x7xf32> to vector<8x5xf32>
    %71 = vector.extract_strided_slice %64 {offsets = [0, 0, 9], sizes = [8, 5, 7], strides = [1, 1, 1]} : vector<8x5x19xf32> to vector<8x5x7xf32>
    %cst_28 = arith.constant dense<0xFF800000> : vector<8x5xf32>
    %72 = vector.multi_reduction <maximumf>, %71, %cst_28 [2] : vector<8x5x7xf32> to vector<8x5xf32>
    %73 = vector.extract_strided_slice %64 {offsets = [0, 0, 12], sizes = [8, 5, 7], strides = [1, 1, 1]} : vector<8x5x19xf32> to vector<8x5x7xf32>
    %cst_29 = arith.constant dense<0xFF800000> : vector<8x5xf32>
    %74 = vector.multi_reduction <maximumf>, %73, %cst_29 [2] : vector<8x5x7xf32> to vector<8x5xf32>
    %75 = vector.shape_cast %66 : vector<8x5xf32> to vector<8x5x1xf32>
    %76 = vector.shape_cast %68 : vector<8x5xf32> to vector<8x5x1xf32>
    %77 = vector.shape_cast %70 : vector<8x5xf32> to vector<8x5x1xf32>
    %78 = vector.shape_cast %72 : vector<8x5xf32> to vector<8x5x1xf32>
    %79 = vector.shape_cast %74 : vector<8x5xf32> to vector<8x5x1xf32>
    %80 = tpu.concatenate %75, %76, %77, %78, %79 in 2 : vector<8x5x1xf32>, vector<8x5x1xf32>, vector<8x5x1xf32>, vector<8x5x1xf32>, vector<8x5x1xf32> -> vector<8x5x5xf32>
    %81 = vector.shape_cast %80 : vector<8x5x5xf32> to vector<40x5xf32>
    %cst_30 = arith.constant 0.000000e+00 : f32
    %82 = vector.broadcast %cst_30 : f32 to vector<40x5xf32>
    %c0_31 = arith.constant 0 : index
    %c0_32 = arith.constant 0 : index
    %c0_33 = arith.constant 0 : index
    %83 = vector.load %arg4[%c0_31, %c0_32, %c0_33] : memref<3x40x40xf32, #tpu.memory_space<vmem>>, vector<1x40x40xf32>
    %84 = vector.shape_cast %83 : vector<1x40x40xf32> to vector<40x40xf32>
    %cst_34 = arith.constant dense<0.000000e+00> : vector<40x5xf32>
    %85 = tpu.matmul %84, %81, %cst_34 {dimension_numbers = #tpu.dot_dimension_numbers<[1], [0], [0], [1], [0, 0, 1, 1], [], []>} : vector<40x40xf32>, vector<40x5xf32>, vector<40x5xf32> -> vector<40x5xf32>
    %86 = tpu.iota {dimensions = array<i32: 0>} : vector<5x5xi32>
    %87 = tpu.iota {dimensions = array<i32: 1>} : vector<5x5xi32>
    %c1_i32_35 = arith.constant 1 : i32
    %88 = vector.broadcast %c1_i32_35 : i32 to vector<5x5xi32>
    %89 = arith.muli %88, %87 : vector<5x5xi32>
    %c-1_i32 = arith.constant -1 : i32
    %90 = vector.broadcast %c-1_i32 : i32 to vector<5x5xi32>
    %91 = arith.addi %89, %90 : vector<5x5xi32>
    %92 = arith.cmpi eq, %86, %91 : vector<5x5xi32>
    %93 = arith.extui %92 : vector<5x5xi1> to vector<5x5xi32>
    %94 = arith.sitofp %93 : vector<5x5xi32> to vector<5x5xf32>
    %cst_36 = arith.constant dense<0.000000e+00> : vector<40x5xf32>
    %95 = tpu.matmul %85, %94, %cst_36 {dimension_numbers = #tpu.dot_dimension_numbers<[1], [0], [0], [1], [0, 0, 1, 1], [], []>} : vector<40x5xf32>, vector<5x5xf32>, vector<40x5xf32> -> vector<40x5xf32>
    %96 = arith.addf %82, %95 : vector<40x5xf32>
    %c1_37 = arith.constant 1 : index
    %c0_38 = arith.constant 0 : index
    %c0_39 = arith.constant 0 : index
    %97 = vector.load %arg4[%c1_37, %c0_38, %c0_39] : memref<3x40x40xf32, #tpu.memory_space<vmem>>, vector<1x40x40xf32>
    %98 = vector.shape_cast %97 : vector<1x40x40xf32> to vector<40x40xf32>
    %cst_40 = arith.constant dense<0.000000e+00> : vector<40x5xf32>
    %99 = tpu.matmul %98, %81, %cst_40 {dimension_numbers = #tpu.dot_dimension_numbers<[1], [0], [0], [1], [0, 0, 1, 1], [], []>} : vector<40x40xf32>, vector<40x5xf32>, vector<40x5xf32> -> vector<40x5xf32>
    %100 = tpu.iota {dimensions = array<i32: 0>} : vector<5x5xi32>
    %101 = tpu.iota {dimensions = array<i32: 1>} : vector<5x5xi32>
    %c1_i32_41 = arith.constant 1 : i32
    %102 = vector.broadcast %c1_i32_41 : i32 to vector<5x5xi32>
    %103 = arith.muli %102, %101 : vector<5x5xi32>
    %c0_i32_42 = arith.constant 0 : i32
    %104 = vector.broadcast %c0_i32_42 : i32 to vector<5x5xi32>
    %105 = arith.addi %103, %104 : vector<5x5xi32>
    %106 = arith.cmpi eq, %100, %105 : vector<5x5xi32>
    %107 = arith.extui %106 : vector<5x5xi1> to vector<5x5xi32>
    %108 = arith.sitofp %107 : vector<5x5xi32> to vector<5x5xf32>
    %cst_43 = arith.constant dense<0.000000e+00> : vector<40x5xf32>
    %109 = tpu.matmul %99, %108, %cst_43 {dimension_numbers = #tpu.dot_dimension_numbers<[1], [0], [0], [1], [0, 0, 1, 1], [], []>} : vector<40x5xf32>, vector<5x5xf32>, vector<40x5xf32> -> vector<40x5xf32>
    %110 = arith.addf %96, %109 : vector<40x5xf32>
    %c2_44 = arith.constant 2 : index
    %c0_45 = arith.constant 0 : index
    %c0_46 = arith.constant 0 : index
    %111 = vector.load %arg4[%c2_44, %c0_45, %c0_46] : memref<3x40x40xf32, #tpu.memory_space<vmem>>, vector<1x40x40xf32>
    %112 = vector.shape_cast %111 : vector<1x40x40xf32> to vector<40x40xf32>
    %cst_47 = arith.constant dense<0.000000e+00> : vector<40x5xf32>
    %113 = tpu.matmul %112, %81, %cst_47 {dimension_numbers = #tpu.dot_dimension_numbers<[1], [0], [0], [1], [0, 0, 1, 1], [], []>} : vector<40x40xf32>, vector<40x5xf32>, vector<40x5xf32> -> vector<40x5xf32>
    %114 = tpu.iota {dimensions = array<i32: 0>} : vector<5x5xi32>
    %115 = tpu.iota {dimensions = array<i32: 1>} : vector<5x5xi32>
    %c1_i32_48 = arith.constant 1 : i32
    %116 = vector.broadcast %c1_i32_48 : i32 to vector<5x5xi32>
    %117 = arith.muli %116, %115 : vector<5x5xi32>
    %c1_i32_49 = arith.constant 1 : i32
    %118 = vector.broadcast %c1_i32_49 : i32 to vector<5x5xi32>
    %119 = arith.addi %117, %118 : vector<5x5xi32>
    %120 = arith.cmpi eq, %114, %119 : vector<5x5xi32>
    %121 = arith.extui %120 : vector<5x5xi1> to vector<5x5xi32>
    %122 = arith.sitofp %121 : vector<5x5xi32> to vector<5x5xf32>
    %cst_50 = arith.constant dense<0.000000e+00> : vector<40x5xf32>
    %123 = tpu.matmul %113, %122, %cst_50 {dimension_numbers = #tpu.dot_dimension_numbers<[1], [0], [0], [1], [0, 0, 1, 1], [], []>} : vector<40x5xf32>, vector<5x5xf32>, vector<40x5xf32> -> vector<40x5xf32>
    %124 = arith.addf %110, %123 : vector<40x5xf32>
    %c0_51 = arith.constant 0 : index
    %c0_52 = arith.constant 0 : index
    %125 = vector.load %arg5[%c0_51, %c0_52] : memref<40x1xf32, #tpu.memory_space<vmem>>, vector<40x1xf32>
    %126 = vector.broadcast %125 : vector<40x1xf32> to vector<40x5xf32>
    %127 = arith.addf %124, %126 : vector<40x5xf32>
    %cst_53 = arith.constant 0.000000e+00 : f32
    %128 = vector.broadcast %cst_53 : f32 to vector<40x5xf32>
    %129 = arith.maximumf %127, %128 : vector<40x5xf32>
    %cst_54 = arith.constant 0.000000e+00 : f32
    %130 = vector.broadcast %cst_54 : f32 to vector<40x5xf32>
    %c0_55 = arith.constant 0 : index
    %c0_56 = arith.constant 0 : index
    %c0_57 = arith.constant 0 : index
    %131 = vector.load %arg6[%c0_55, %c0_56, %c0_57] : memref<3x40x40xf32, #tpu.memory_space<vmem>>, vector<1x40x40xf32>
    %132 = vector.shape_cast %131 : vector<1x40x40xf32> to vector<40x40xf32>
    %cst_58 = arith.constant dense<0.000000e+00> : vector<40x5xf32>
    %133 = tpu.matmul %132, %129, %cst_58 {dimension_numbers = #tpu.dot_dimension_numbers<[1], [0], [0], [1], [0, 0, 1, 1], [], []>} : vector<40x40xf32>, vector<40x5xf32>, vector<40x5xf32> -> vector<40x5xf32>
    %134 = tpu.iota {dimensions = array<i32: 0>} : vector<5x5xi32>
    %135 = tpu.iota {dimensions = array<i32: 1>} : vector<5x5xi32>
    %c1_i32_59 = arith.constant 1 : i32
    %136 = vector.broadcast %c1_i32_59 : i32 to vector<5x5xi32>
    %137 = arith.muli %136, %135 : vector<5x5xi32>
    %c-1_i32_60 = arith.constant -1 : i32
    %138 = vector.broadcast %c-1_i32_60 : i32 to vector<5x5xi32>
    %139 = arith.addi %137, %138 : vector<5x5xi32>
    %140 = arith.cmpi eq, %134, %139 : vector<5x5xi32>
    %141 = arith.extui %140 : vector<5x5xi1> to vector<5x5xi32>
    %142 = arith.sitofp %141 : vector<5x5xi32> to vector<5x5xf32>
    %cst_61 = arith.constant dense<0.000000e+00> : vector<40x5xf32>
    %143 = tpu.matmul %133, %142, %cst_61 {dimension_numbers = #tpu.dot_dimension_numbers<[1], [0], [0], [1], [0, 0, 1, 1], [], []>} : vector<40x5xf32>, vector<5x5xf32>, vector<40x5xf32> -> vector<40x5xf32>
    %144 = arith.addf %130, %143 : vector<40x5xf32>
    %c1_62 = arith.constant 1 : index
    %c0_63 = arith.constant 0 : index
    %c0_64 = arith.constant 0 : index
    %145 = vector.load %arg6[%c1_62, %c0_63, %c0_64] : memref<3x40x40xf32, #tpu.memory_space<vmem>>, vector<1x40x40xf32>
    %146 = vector.shape_cast %145 : vector<1x40x40xf32> to vector<40x40xf32>
    %cst_65 = arith.constant dense<0.000000e+00> : vector<40x5xf32>
    %147 = tpu.matmul %146, %129, %cst_65 {dimension_numbers = #tpu.dot_dimension_numbers<[1], [0], [0], [1], [0, 0, 1, 1], [], []>} : vector<40x40xf32>, vector<40x5xf32>, vector<40x5xf32> -> vector<40x5xf32>
    %148 = tpu.iota {dimensions = array<i32: 0>} : vector<5x5xi32>
    %149 = tpu.iota {dimensions = array<i32: 1>} : vector<5x5xi32>
    %c1_i32_66 = arith.constant 1 : i32
    %150 = vector.broadcast %c1_i32_66 : i32 to vector<5x5xi32>
    %151 = arith.muli %150, %149 : vector<5x5xi32>
    %c0_i32_67 = arith.constant 0 : i32
    %152 = vector.broadcast %c0_i32_67 : i32 to vector<5x5xi32>
    %153 = arith.addi %151, %152 : vector<5x5xi32>
    %154 = arith.cmpi eq, %148, %153 : vector<5x5xi32>
    %155 = arith.extui %154 : vector<5x5xi1> to vector<5x5xi32>
    %156 = arith.sitofp %155 : vector<5x5xi32> to vector<5x5xf32>
    %cst_68 = arith.constant dense<0.000000e+00> : vector<40x5xf32>
    %157 = tpu.matmul %147, %156, %cst_68 {dimension_numbers = #tpu.dot_dimension_numbers<[1], [0], [0], [1], [0, 0, 1, 1], [], []>} : vector<40x5xf32>, vector<5x5xf32>, vector<40x5xf32> -> vector<40x5xf32>
    %158 = arith.addf %144, %157 : vector<40x5xf32>
    %c2_69 = arith.constant 2 : index
    %c0_70 = arith.constant 0 : index
    %c0_71 = arith.constant 0 : index
    %159 = vector.load %arg6[%c2_69, %c0_70, %c0_71] : memref<3x40x40xf32, #tpu.memory_space<vmem>>, vector<1x40x40xf32>
    %160 = vector.shape_cast %159 : vector<1x40x40xf32> to vector<40x40xf32>
    %cst_72 = arith.constant dense<0.000000e+00> : vector<40x5xf32>
    %161 = tpu.matmul %160, %129, %cst_72 {dimension_numbers = #tpu.dot_dimension_numbers<[1], [0], [0], [1], [0, 0, 1, 1], [], []>} : vector<40x40xf32>, vector<40x5xf32>, vector<40x5xf32> -> vector<40x5xf32>
    %162 = tpu.iota {dimensions = array<i32: 0>} : vector<5x5xi32>
    %163 = tpu.iota {dimensions = array<i32: 1>} : vector<5x5xi32>
    %c1_i32_73 = arith.constant 1 : i32
    %164 = vector.broadcast %c1_i32_73 : i32 to vector<5x5xi32>
    %165 = arith.muli %164, %163 : vector<5x5xi32>
    %c1_i32_74 = arith.constant 1 : i32
    %166 = vector.broadcast %c1_i32_74 : i32 to vector<5x5xi32>
    %167 = arith.addi %165, %166 : vector<5x5xi32>
    %168 = arith.cmpi eq, %162, %167 : vector<5x5xi32>
    %169 = arith.extui %168 : vector<5x5xi1> to vector<5x5xi32>
    %170 = arith.sitofp %169 : vector<5x5xi32> to vector<5x5xf32>
    %cst_75 = arith.constant dense<0.000000e+00> : vector<40x5xf32>
    %171 = tpu.matmul %161, %170, %cst_75 {dimension_numbers = #tpu.dot_dimension_numbers<[1], [0], [0], [1], [0, 0, 1, 1], [], []>} : vector<40x5xf32>, vector<5x5xf32>, vector<40x5xf32> -> vector<40x5xf32>
    %172 = arith.addf %158, %171 : vector<40x5xf32>
    %c0_76 = arith.constant 0 : index
    %c0_77 = arith.constant 0 : index
    %173 = vector.load %arg7[%c0_76, %c0_77] : memref<40x1xf32, #tpu.memory_space<vmem>>, vector<40x1xf32>
    %174 = vector.broadcast %173 : vector<40x1xf32> to vector<40x5xf32>
    %175 = arith.addf %172, %174 : vector<40x5xf32>
    %cst_78 = arith.constant 0.000000e+00 : f32
    %176 = vector.broadcast %cst_78 : f32 to vector<40x5xf32>
    %177 = arith.maximumf %175, %176 : vector<40x5xf32>
    %cst_79 = arith.constant 0.000000e+00 : f32
    %178 = vector.broadcast %cst_79 : f32 to vector<40x5xf32>
    %c0_80 = arith.constant 0 : index
    %c0_81 = arith.constant 0 : index
    %c0_82 = arith.constant 0 : index
    %179 = vector.load %arg8[%c0_80, %c0_81, %c0_82] : memref<3x40x40xf32, #tpu.memory_space<vmem>>, vector<1x40x40xf32>
    %180 = vector.shape_cast %179 : vector<1x40x40xf32> to vector<40x40xf32>
    %cst_83 = arith.constant dense<0.000000e+00> : vector<40x5xf32>
    %181 = tpu.matmul %180, %177, %cst_83 {dimension_numbers = #tpu.dot_dimension_numbers<[1], [0], [0], [1], [0, 0, 1, 1], [], []>} : vector<40x40xf32>, vector<40x5xf32>, vector<40x5xf32> -> vector<40x5xf32>
    %182 = tpu.iota {dimensions = array<i32: 0>} : vector<5x5xi32>
    %183 = tpu.iota {dimensions = array<i32: 1>} : vector<5x5xi32>
    %c1_i32_84 = arith.constant 1 : i32
    %184 = vector.broadcast %c1_i32_84 : i32 to vector<5x5xi32>
    %185 = arith.muli %184, %183 : vector<5x5xi32>
    %c-1_i32_85 = arith.constant -1 : i32
    %186 = vector.broadcast %c-1_i32_85 : i32 to vector<5x5xi32>
    %187 = arith.addi %185, %186 : vector<5x5xi32>
    %188 = arith.cmpi eq, %182, %187 : vector<5x5xi32>
    %189 = arith.extui %188 : vector<5x5xi1> to vector<5x5xi32>
    %190 = arith.sitofp %189 : vector<5x5xi32> to vector<5x5xf32>
    %cst_86 = arith.constant dense<0.000000e+00> : vector<40x5xf32>
    %191 = tpu.matmul %181, %190, %cst_86 {dimension_numbers = #tpu.dot_dimension_numbers<[1], [0], [0], [1], [0, 0, 1, 1], [], []>} : vector<40x5xf32>, vector<5x5xf32>, vector<40x5xf32> -> vector<40x5xf32>
    %192 = arith.addf %178, %191 : vector<40x5xf32>
    %c1_87 = arith.constant 1 : index
    %c0_88 = arith.constant 0 : index
    %c0_89 = arith.constant 0 : index
    %193 = vector.load %arg8[%c1_87, %c0_88, %c0_89] : memref<3x40x40xf32, #tpu.memory_space<vmem>>, vector<1x40x40xf32>
    %194 = vector.shape_cast %193 : vector<1x40x40xf32> to vector<40x40xf32>
    %cst_90 = arith.constant dense<0.000000e+00> : vector<40x5xf32>
    %195 = tpu.matmul %194, %177, %cst_90 {dimension_numbers = #tpu.dot_dimension_numbers<[1], [0], [0], [1], [0, 0, 1, 1], [], []>} : vector<40x40xf32>, vector<40x5xf32>, vector<40x5xf32> -> vector<40x5xf32>
    %196 = tpu.iota {dimensions = array<i32: 0>} : vector<5x5xi32>
    %197 = tpu.iota {dimensions = array<i32: 1>} : vector<5x5xi32>
    %c1_i32_91 = arith.constant 1 : i32
    %198 = vector.broadcast %c1_i32_91 : i32 to vector<5x5xi32>
    %199 = arith.muli %198, %197 : vector<5x5xi32>
    %c0_i32_92 = arith.constant 0 : i32
    %200 = vector.broadcast %c0_i32_92 : i32 to vector<5x5xi32>
    %201 = arith.addi %199, %200 : vector<5x5xi32>
    %202 = arith.cmpi eq, %196, %201 : vector<5x5xi32>
    %203 = arith.extui %202 : vector<5x5xi1> to vector<5x5xi32>
    %204 = arith.sitofp %203 : vector<5x5xi32> to vector<5x5xf32>
    %cst_93 = arith.constant dense<0.000000e+00> : vector<40x5xf32>
    %205 = tpu.matmul %195, %204, %cst_93 {dimension_numbers = #tpu.dot_dimension_numbers<[1], [0], [0], [1], [0, 0, 1, 1], [], []>} : vector<40x5xf32>, vector<5x5xf32>, vector<40x5xf32> -> vector<40x5xf32>
    %206 = arith.addf %192, %205 : vector<40x5xf32>
    %c2_94 = arith.constant 2 : index
    %c0_95 = arith.constant 0 : index
    %c0_96 = arith.constant 0 : index
    %207 = vector.load %arg8[%c2_94, %c0_95, %c0_96] : memref<3x40x40xf32, #tpu.memory_space<vmem>>, vector<1x40x40xf32>
    %208 = vector.shape_cast %207 : vector<1x40x40xf32> to vector<40x40xf32>
    %cst_97 = arith.constant dense<0.000000e+00> : vector<40x5xf32>
    %209 = tpu.matmul %208, %177, %cst_97 {dimension_numbers = #tpu.dot_dimension_numbers<[1], [0], [0], [1], [0, 0, 1, 1], [], []>} : vector<40x40xf32>, vector<40x5xf32>, vector<40x5xf32> -> vector<40x5xf32>
    %210 = tpu.iota {dimensions = array<i32: 0>} : vector<5x5xi32>
    %211 = tpu.iota {dimensions = array<i32: 1>} : vector<5x5xi32>
    %c1_i32_98 = arith.constant 1 : i32
    %212 = vector.broadcast %c1_i32_98 : i32 to vector<5x5xi32>
    %213 = arith.muli %212, %211 : vector<5x5xi32>
    %c1_i32_99 = arith.constant 1 : i32
    %214 = vector.broadcast %c1_i32_99 : i32 to vector<5x5xi32>
    %215 = arith.addi %213, %214 : vector<5x5xi32>
    %216 = arith.cmpi eq, %210, %215 : vector<5x5xi32>
    %217 = arith.extui %216 : vector<5x5xi1> to vector<5x5xi32>
    %218 = arith.sitofp %217 : vector<5x5xi32> to vector<5x5xf32>
    %cst_100 = arith.constant dense<0.000000e+00> : vector<40x5xf32>
    %219 = tpu.matmul %209, %218, %cst_100 {dimension_numbers = #tpu.dot_dimension_numbers<[1], [0], [0], [1], [0, 0, 1, 1], [], []>} : vector<40x5xf32>, vector<5x5xf32>, vector<40x5xf32> -> vector<40x5xf32>
    %220 = arith.addf %206, %219 : vector<40x5xf32>
    %c0_101 = arith.constant 0 : index
    %c0_102 = arith.constant 0 : index
    %221 = vector.load %arg9[%c0_101, %c0_102] : memref<40x1xf32, #tpu.memory_space<vmem>>, vector<40x1xf32>
    %222 = vector.broadcast %221 : vector<40x1xf32> to vector<40x5xf32>
    %223 = arith.addf %220, %222 : vector<40x5xf32>
    %c0_103 = arith.constant 0 : index
    %c0_104 = arith.constant 0 : index
    %c0_105 = arith.constant 0 : index
    %224 = vector.load %arg10[%c0_103, %c0_104, %c0_105] : memref<1x40x5xf32, #tpu.memory_space<vmem>>, vector<1x40x5xf32>
    %225 = vector.shape_cast %224 : vector<1x40x5xf32> to vector<40x5xf32>
    %226 = vector.shape_cast %223 : vector<40x5xf32> to vector<1x40x5xf32>
    tpu.vector_store %arg10[%c0_103, %c0_104, %c0_105], %226 {strides = array<i32>} : memref<1x40x5xf32, #tpu.memory_space<vmem>>, vector<1x40x5xf32>,
    return
  }
  func.func @transform_0(%arg0: i32) -> (i32, i32, i32) {
    %c0_i32 = arith.constant 0 : i32
    %c0_i32_0 = arith.constant 0 : i32
    %c0_i32_1 = arith.constant 0 : i32
    return %arg0, %c0_i32, %c0_i32_0 : i32, i32, i32
  }
  func.func @transform_1(%arg0: i32) -> (i32, i32, i32) {
    %c0_i32 = arith.constant 0 : i32
    %c0_i32_0 = arith.constant 0 : i32
    %c0_i32_1 = arith.constant 0 : i32
    %c0_i32_2 = arith.constant 0 : i32
    return %c0_i32, %c0_i32_0, %c0_i32_1 : i32, i32, i32
  }
  func.func @transform_2(%arg0: i32) -> (i32, i32) {
    %c0_i32 = arith.constant 0 : i32
    %c0_i32_0 = arith.constant 0 : i32
    %c0_i32_1 = arith.constant 0 : i32
    return %c0_i32, %c0_i32_0 : i32, i32
  }
  func.func @transform_3(%arg0: i32) -> (i32, i32, i32) {
    %c0_i32 = arith.constant 0 : i32
    %c0_i32_0 = arith.constant 0 : i32
    %c0_i32_1 = arith.constant 0 : i32
    %c0_i32_2 = arith.constant 0 : i32
    return %c0_i32, %c0_i32_0, %c0_i32_1 : i32, i32, i32
  }
  func.func @transform_4(%arg0: i32) -> (i32, i32) {
    %c0_i32 = arith.constant 0 : i32
    %c0_i32_0 = arith.constant 0 : i32
    %c0_i32_1 = arith.constant 0 : i32
    return %c0_i32, %c0_i32_0 : i32, i32
  }
  func.func @transform_5(%arg0: i32) -> (i32, i32, i32) {
    %c0_i32 = arith.constant 0 : i32
    %c0_i32_0 = arith.constant 0 : i32
    %c0_i32_1 = arith.constant 0 : i32
    %c0_i32_2 = arith.constant 0 : i32
    return %c0_i32, %c0_i32_0, %c0_i32_1 : i32, i32, i32
  }
  func.func @transform_6(%arg0: i32) -> (i32, i32) {
    %c0_i32 = arith.constant 0 : i32
    %c0_i32_0 = arith.constant 0 : i32
    %c0_i32_1 = arith.constant 0 : i32
    return %c0_i32, %c0_i32_0 : i32, i32
  }
  func.func @transform_7(%arg0: i32) -> (i32, i32, i32) {
    %c0_i32 = arith.constant 0 : i32
    %c0_i32_0 = arith.constant 0 : i32
    %c0_i32_1 = arith.constant 0 : i32
    %c0_i32_2 = arith.constant 0 : i32
    return %c0_i32, %c0_i32_0, %c0_i32_1 : i32, i32, i32
  }
  func.func @transform_8(%arg0: i32) -> (i32, i32) {
    %c0_i32 = arith.constant 0 : i32
    %c0_i32_0 = arith.constant 0 : i32
    %c0_i32_1 = arith.constant 0 : i32
    return %c0_i32, %c0_i32_0 : i32, i32
  }
  func.func @transform_9(%arg0: i32) -> (i32, i32, i32) {
    %c0_i32 = arith.constant 0 : i32
    %c0_i32_0 = arith.constant 0 : i32
    %c0_i32_1 = arith.constant 0 : i32
    return %arg0, %c0_i32, %c0_i32_0 : i32, i32, i32
  }
}

</mosaic_0001>

<bundles_post_ra>
// kernel: esa_forward_pallas.3
= control target key start
LH: loop header
LB: loop body
LE: loop exit
PB: predicated region body
PF: predicated region fallthrough
CT: control target
= control target key end

     0   :  { %s3366_s24 = smov 0   ;;  %s3368_s25 = smov 0   ;;  %s4108_s0 = inlined_call_operand.vmem [shape: f32[2,32,1600], index: 0, kind: input, shape index: {}]   ;;  %s4109_s1 = inlined_call_operand.vmem [shape: f32[2,8,25], index: 1, kind: input, shape index: {}]   ;;  %s4110_s2 = inlined_call_operand.vmem [shape: f32[25,1600], index: 2, kind: input, shape index: {}]   ;;  %s4111_s3 = inlined_call_operand.vmem [shape: f32[8,32], index: 3, kind: input, shape index: {}]   ;;  %s4112_s4 = inlined_call_operand.vmem [shape: f32[8,1], index: 4, kind: input, shape index: {}]   ;;  %s4113_s5 = inlined_call_operand.vmem [shape: f32[32,8], index: 5, kind: input, shape index: {}]   ;;  %s4114_s6 = inlined_call_operand.vmem [shape: f32[32,1], index: 6, kind: input, shape index: {}]   ;;  %s4115_s7 = inlined_call_operand.vmem [shape: f32[2,32,1600], index: 7, kind: output, shape index: {}]  }
   0x1   :  { %s3370_s26 = smov 0  }
   0x2 LB: > { %s29_s27 = sadd.s32 1, %s3315_s25  ;;  %p2705_p0 = scmp.ge.s32.totalorder %s3319_s26, 1  ;;  %s3319_s26 = sphi %s3370_s26, %s17_s26   ;;  %s3315_s25 = sphi %s3368_s25, %s4119_s25   ;;  %s3311_s24 = sphi %s3366_s24, %s4118_s24  }
   0x3   : > { %p31_p1 = scmp.ge.s32.totalorder %s29_s27, 2  ;;  %p278_p2 = scmp.lt.s32.totalorder %s3319_s26, 3 }
   0x5   : > { %s4121_s27 = smov (%p31_p1, %s29_s27), 0  ;;  %p279_p3 = pnand %p2705_p0, %p278_p2 }
   0x6   : > { %p328_p4 = scmp.lt.s32.totalorder (!%p279_p3), %s3311_s24, 1  ;;  %v3321_v0 = vmov (!%p279_p3), 0.0   ;;  %v3322_v1 = vmov (!%p279_p3), 0   ;;  %v3440_v31 = vld [vmem:[%s4111_s3] sm:$0xff] (!%p279_p3)  ;;  %vm416_vm0 = vcmask (!%p279_p3), 261120   ;;  %vm977_vm1 = vcmask (!%p279_p3), 1040384  }
   0x7   : > { %282 = sbr.rel (%p279_p3) target bundleno = 612 (0x264), region = 48  ;;  %484 = vmatprep.mubr.f32.mxu0 (!%p279_p3), %v3321_v0  ;;  %555 = vmatprep.mubr.f32.mxu1 (!%p279_p3), %v3321_v0  ;;  %vm3324_vm2 = vmmov (!%p279_p3), 1   ;;  %vm3325_vm4 = vmmov (!%p279_p3), 0   ;;  %vm973_vm5 = vcmask (!%p279_p3), 203776   ;;  %vm1537_vm6 = vcmask (!%p279_p3), 64512  }
   0x8   : > { %3043 = vset.pattern.permute.xlu0 (!%p279_p3), %v3322_v1  ;;  %3044 = vset.pattern.permute.xlu1 (!%p279_p3), %v3322_v1  ;;  %vm3524_vm3 = vmpackc.low (!%p279_p3), %vm977_vm1, %vm3324_vm2  ;;  %vm2545_vm7 = vcmask (!%p279_p3), 523264  }
   0xe   : > { %s4123_s24 = smov (!%p328_p4, %s3311_s24), 1 }
   0xf   : > { %s3013_s28 = smul.u32 416, %s4123_s24  ;;  %s2707_s14 = sshll.u32 %s4123_s24, 3 }
  0x10   : > { %s340_s23 = scalar_lea.vmem %s4109_s1, %s2707_s14 }
  0x11   : > { %s3394_s8 = scalar_lea.vmem %s4108_s0, %s3013_s28  ;;  %s3870_s20 = scalar_lea.vmem %s4115_s7, %s3013_s28 }
  0x12   : > { %v358_v2 = vld [vmem:[%s3394_s8 + $0x8] sm:$0xff]  ;;  %v371_v3 = vld [vmem:[%s3394_s8 + $0x70] sm:$0xff]  ;;  %v3399_v4 = vld [vmem:[%s3394_s8 + $0x18] sm:$0xff] }
  0x13   : > { %v2863_v5 = vpack.c.bf16 %v371_v3, %v358_v2  ;;  %v3402_v6 = vld [vmem:[%s3394_s8 + $0x80] sm:$0xff]  ;;  %v370_v8 = vld [vmem:[%s3394_s8 + $0x68] sm:$0xff]  ;;  %v3412_v11 = vld [vmem:[%s3394_s8 + $0x10] sm:$0xff] }
  0x14   : > { %v3405_v7 = vld [vmem:[%s3394_s8] sm:$0xff]  ;;  %v2871_v9 = vpack.c.bf16 %v3402_v6, %v3399_v4  ;;  %v3415_v12 = vld [vmem:[%s3394_s8 + $0x78] sm:$0xff]  ;;  %v3422_v16 = vld [vmem:[%s3394_s8 + $0xe8] sm:$0xff] }
  0x15   : > { %v2865_v10 = vpack.c.bf16 %v370_v8, %v3405_v7  ;;  %v384_v13 = vld [vmem:[%s3394_s8 + $0xd8] sm:$0xff]  ;;  %2864 = vmatprep.subr.bf16.mxu0 %v2863_v5  ;;  %v2873_v14 = vpack.c.bf16 %v3415_v12, %v3412_v11  ;;  %v397_v15 = vld [vmem:[%s3394_s8 + $0x140] sm:$0xff]  ;;  %v399_v17 = vld [vmem:[%s3394_s8 + $0x150] sm:$0xff] }
  0x16   : > { %2872 = vmatprep.subr.bf16.mxu1 %v2871_v9  ;;  %v2867_v18 = vpack.c.bf16 %v397_v15, %v384_v13  ;;  %v2875_v19 = vpack.c.bf16 %v399_v17, %v3422_v16  ;;  %v383_v20 = vld [vmem:[%s3394_s8 + $0xd0] sm:$0xff]  ;;  %v396_v21 = vld [vmem:[%s3394_s8 + $0x138] sm:$0xff]  ;;  %v3429_v22 = vld [vmem:[%s3394_s8 + $0xe0] sm:$0xff] }
  0x17   : > { %2866 = vmatpush1.bf16.msra.mxu0 %v2865_v10  ;;  %2874 = vmatpush1.bf16.msra.mxu1 %v2873_v14  ;;  %v2869_v23 = vpack.c.bf16 %v396_v21, %v383_v20  ;;  %v398_v24 = vld [vmem:[%s3394_s8 + $0x148] sm:$0xff]  ;;  %v375_v26 = vld [vmem:[%s3394_s8 + $0x90] sm:$0xff]  ;;  %v364_v29 = vld [vmem:[%s3394_s8 + $0x38] sm:$0xff] }
  0x18   : > { %v362_v25 = vld [vmem:[%s3394_s8 + $0x28] sm:$0xff]  ;;  %2868 = vmatprep.subr.bf16.mxu0 %v2867_v18  ;;  %2876 = vmatprep.subr.bf16.mxu1 %v2875_v19  ;;  %v2877_v27 = vpack.c.bf16 %v398_v24, %v3429_v22  ;;  %v377_v30 = vld [vmem:[%s3394_s8 + $0xa0] sm:$0xff]  ;;  %v3445_v35 = vld [vmem:[%s3394_s8 + $0x30] sm:$0xff] }
  0x19   : > { %v2879_v28 = vpack.c.bf16 %v375_v26, %v362_v25  ;;  %v361_v32 = vld [vmem:[%s3394_s8 + $0x20] sm:$0xff]  ;;  %v2887_v33 = vpack.c.bf16 %v377_v30, %v364_v29  ;;  %v374_v34 = vld [vmem:[%s3394_s8 + $0x88] sm:$0xff]  ;;  %v376_v36 = vld [vmem:[%s3394_s8 + $0x98] sm:$0xff]  ;;  %v3323_v29 = vmov 0.0|0.0  }
  0x1a   : > { %v2881_v37 = vpack.c.bf16 %v374_v34, %v361_v32  ;;  %v388_v38 = vld [vmem:[%s3394_s8 + $0xf8] sm:$0xff]  ;;  %v401_v39 = vld [vmem:[%s3394_s8 + $0x160] sm:$0xff]  ;;  %v390_v40 = vld [vmem:[%s3394_s8 + $0x108] sm:$0xff]  ;;  %v2889_v41 = vpack.c.bf16 %v376_v36, %v3445_v35 }
  0x1b   : > { %2870 = vmatpush1.bf16.msra.mxu0 %v2869_v23  ;;  %2878 = vmatpush1.bf16.msra.mxu1 %v2877_v27  ;;  %v2883_v42 = vpack.c.bf16 %v401_v39, %v388_v38  ;;  %v403_v43 = vld [vmem:[%s3394_s8 + $0x170] sm:$0xff]  ;;  %v400_v45 = vld [vmem:[%s3394_s8 + $0x158] sm:$0xff]  ;;  %v389_v47 = vld [vmem:[%s3394_s8 + $0x100] sm:$0xff] }
  0x1c   : > { %2880 = vmatprep.subr.bf16.mxu0 %v2879_v28  ;;  %v387_v44 = vld [vmem:[%s3394_s8 + $0xf0] sm:$0xff]  ;;  %2888 = vmatprep.subr.bf16.mxu1 %v2887_v33  ;;  %v2891_v46 = vpack.c.bf16 %v403_v43, %v390_v40  ;;  %v402_v48 = vld [vmem:[%s3394_s8 + $0x168] sm:$0xff]  ;;  %v368_v51 = vld [vmem:[%s3394_s8 + $0x58] sm:$0xff] }
  0x1d   : > { %v366_v49 = vld [vmem:[%s3394_s8 + $0x48] sm:$0xff]  ;;  %v379_v50 = vld [vmem:[%s3394_s8 + $0xb0] sm:$0xff]  ;;  %v381_v52 = vld [vmem:[%s3394_s8 + $0xc0] sm:$0xff]  ;;  %v2885_v53 = vpack.c.bf16 %v400_v45, %v387_v44  ;;  %v2893_v54 = vpack.c.bf16 %v402_v48, %v389_v47 }
  0x1e   : > { %2709 = vmatmul.mubr.msk.f32.vlgmr.msra.gmra.mrb[0].mxu0 %vm416_vm0, %v3440_v31  ;;  %2710 = vmatmul.mubr.msk.f32.vlgmr.msra.gmra.mrb[0].mxu1 %vm416_vm0, %v3440_v31  ;;  %v2895_v55 = vpack.c.bf16 %v379_v50, %v366_v49  ;;  %v365_v56 = vld [vmem:[%s3394_s8 + $0x40] sm:$0xff]  ;;  %v378_v57 = vld [vmem:[%s3394_s8 + $0xa8] sm:$0xff]  ;;  %v367_v58 = vld [vmem:[%s3394_s8 + $0x50] sm:$0xff]  ;;  %v2903_v59 = vpack.c.bf16 %v381_v52, %v368_v51 }
  0x1f   : > { %2882 = vmatpush1.bf16.msra.mxu0 %v2881_v37  ;;  %2890 = vmatpush1.bf16.msra.mxu1 %v2889_v41  ;;  %v380_v60 = vld [vmem:[%s3394_s8 + $0xb8] sm:$0xff]  ;;  %v405_v62 = vld [vmem:[%s3394_s8 + $0x180] sm:$0xff]  ;;  %v394_v63 = vld [vmem:[%s3394_s8 + $0x128] sm:$0xff]  ;;  %v2897_v2 = vpack.c.bf16 %v378_v57, %v365_v56 }
  0x20   : > { %2884 = vmatprep.subr.bf16.mxu0 %v2883_v42  ;;  %2892 = vmatprep.subr.bf16.mxu1 %v2891_v46  ;;  %v392_v61 = vld [vmem:[%s3394_s8 + $0x118] sm:$0xff]  ;;  %v407_v1 = vld [vmem:[%s3394_s8 + $0x190] sm:$0xff]  ;;  %v2905_v3 = vpack.c.bf16 %v380_v60, %v367_v58  ;;  %v393_v13 = vld [vmem:[%s3394_s8 + $0x120] sm:$0xff] }
  0x21   : > { %626 = vmatprep.mubr.f32.mxu0 %v3321_v0  ;;  %697 = vmatprep.mubr.f32.mxu1 %v3321_v0  ;;  %v2899_v5 = vpack.c.bf16 %v405_v62, %v392_v61  ;;  %v391_v8 = vld [vmem:[%s3394_s8 + $0x110] sm:$0xff]  ;;  %v404_v9 = vld [vmem:[%s3394_s8 + $0x178] sm:$0xff]  ;;  %v2907_v10 = vpack.c.bf16 %v407_v1, %v394_v63  ;;  %v406_v14 = vld [vmem:[%s3394_s8 + $0x188] sm:$0xff] }
  0x22   : > { %v920_v15 = vld [vmem:[%s4110_s2 + $0x18] sm:$0xff]  ;;  %v933_v17 = vld [vmem:[%s4110_s2 + $0x80] sm:$0xff]  ;;  %v2901_v18 = vpack.c.bf16 %v404_v9, %v391_v8  ;;  %v2909_v19 = vpack.c.bf16 %v406_v14, %v393_v13  ;;  %v382_v21 = vld [vmem:[%s3394_s8 + $0xc8] sm:$0xff] }
  0x23   : > { %2886 = vmatpush1.bf16.msra.mxu0 %v2885_v53  ;;  %2894 = vmatpush1.bf16.msra.mxu1 %v2893_v54  ;;  %v369_v20 = vld [vmem:[%s3394_s8 + $0x60] sm:$0xff]  ;;  %v2927_v23 = vpack.c.bf16 %v933_v17, %v920_v15  ;;  %v919_v24 = vld [vmem:[%s4110_s2 + $0x10] sm:$0xff]  ;;  %v932_v25 = vld [vmem:[%s4110_s2 + $0x78] sm:$0xff] }
  0x24   : > { %2896 = vmatprep.subr.bf16.mxu0 %v2895_v55  ;;  %2904 = vmatprep.subr.bf16.mxu1 %v2903_v59  ;;  %v946_v26 = vld [vmem:[%s4110_s2 + $0xe8] sm:$0xff]  ;;  %v959_v27 = vld [vmem:[%s4110_s2 + $0x150] sm:$0x1]  ;;  %v2912_v28 = vpack.c.bf16 %v382_v21, %v369_v20  ;;  %v2929_v30 = vpack.c.bf16 %v932_v25, %v919_v24  ;;  %v408_v33 = vld [vmem:[%s3394_s8 + $0x198] sm:$0xff] }
  0x25   : > { %v395_v32 = vld [vmem:[%s3394_s8 + $0x130] sm:$0xff]  ;;  %v945_v34 = vld [vmem:[%s4110_s2 + $0xe0] sm:$0xff]  ;;  %v2931_v36 = vpack.c.bf16 %v959_v27, %v946_v26  ;;  %v958_v37 = vld [vmem:[%s4110_s2 + $0x148] sm:$0x1] }
  0x26   : > { %2711 = vmatmul.mubr.msk.f32.vlgmr.msra.gmra.mrb[2].mxu0 %vm416_vm0, %v3440_v31  ;;  %2712 = vmatmul.mubr.msk.f32.vlgmr.msra.gmra.mrb[2].mxu1 %vm416_vm0, %v3440_v31  ;;  %v918_v38 = vld [vmem:[%s4110_s2 + $0x8] sm:$0xff]  ;;  %v931_v39 = vld [vmem:[%s4110_s2 + $0x70] sm:$0xff]  ;;  %v924_v41 = vld [vmem:[%s4110_s2 + $0x38] sm:$0xff]  ;;  %v2915_v43 = vpack.c.bf16 %v408_v33, %v395_v32  ;;  %v2934_v45 = vpack.c.bf16 %v958_v37, %v945_v34 }
  0x27   : > { %2898 = vmatpush1.bf16.msra.mxu0 %v2897_v2  ;;  %2906 = vmatpush1.bf16.msra.mxu1 %v2905_v3  ;;  %v937_v42 = vld [vmem:[%s4110_s2 + $0xa0] sm:$0xff]  ;;  %v2917_v46 = vpack.c.bf16 %v931_v39, %v918_v38  ;;  %v930_v47 = vld [vmem:[%s4110_s2 + $0x68] sm:$0xff]  ;;  %v923_v48 = vld [vmem:[%s4110_s2 + $0x30] sm:$0xff] }
  0x28   : > { %2900 = vmatprep.subr.bf16.mxu0 %v2899_v5  ;;  %2908 = vmatprep.subr.bf16.mxu1 %v2907_v10  ;;  %v917_v44 = vld [vmem:[%s4110_s2] sm:$0xff]  ;;  %v2947_v50 = vpack.c.bf16 %v937_v42, %v924_v41  ;;  %v936_v51 = vld [vmem:[%s4110_s2 + $0x98] sm:$0xff]  ;;  %v950_v54 = vld [vmem:[%s4110_s2 + $0x108] sm:$0xff] }
  0x29   : > { %768 = vmatprep.mubr.f32.mxu0 %v3321_v0  ;;  %839 = vmatprep.mubr.f32.mxu1 %v3321_v0  ;;  %v410_v49 = vld [vmem:[%s4112_s4] sm:$0xff]  ;;  %v944_v52 = vld [vmem:[%s4110_s2 + $0xd8] sm:$0xff]  ;;  %v963_v55 = vld [vmem:[%s4110_s2 + $0x170] sm:$0x1]  ;;  %v2919_v57 = vpack.c.bf16 %v930_v47, %v917_v44  ;;  %v2949_v59 = vpack.c.bf16 %v936_v51, %v923_v48 }
  0x2a   : > { %v957_v53 = vld [vmem:[%s4110_s2 + $0x140] sm:$0x1]  ;;  %413 = vperm.xlu0 %3043, %v410_v49   ;;  %v943_v61 = vld [vmem:[%s4110_s2 + $0xd0] sm:$0xff]  ;;  %v956_v62 = vld [vmem:[%s4110_s2 + $0x138] sm:$0x1]  ;;  %v2951_v1 = vpack.c.bf16 %v963_v55, %v950_v54 }
  0x2b   : > { %2902 = vmatpush1.bf16.msra.mxu0 %v2901_v18  ;;  %2910 = vmatpush1.bf16.msra.mxu1 %v2909_v19  ;;  %v3572_v56 = vld [vmem:[%s340_s23] sm:$0xff]  ;;  %v2921_v60 = vpack.c.bf16 %v957_v53, %v944_v52  ;;  %v962_v2 = vld [vmem:[%s4110_s2 + $0x168] sm:$0x1]  ;;  %v935_v5 = vld [vmem:[%s4110_s2 + $0x90] sm:$0xff]  ;;  %v2924_v10 = vpack.c.bf16 %v956_v62, %v943_v61 }
  0x2c   : > { %2911 = vmatprep.subr.bf16.mxu0 %v3323_v29  ;;  %2928 = vmatprep.subr.bf16.mxu1 %v2927_v23  ;;  %v1513_v58 = vld [vmem:[%s4114_s6] sm:$0xff]  ;;  %v922_v3 = vld [vmem:[%s4110_s2 + $0x28] sm:$0xff]  ;;  %v928_v8 = vld [vmem:[%s4110_s2 + $0x58] sm:$0xff] }
  0x2d   : > { %v949_v63 = vld [vmem:[%s4110_s2 + $0x100] sm:$0xff]  ;;  %v1516_v13 = vld [vmem:[%s4114_s6 + $0x18] sm:$0xff]  ;;  %v2937_v14 = vpack.c.bf16 %v935_v5, %v922_v3  ;;  %v934_v17 = vld [vmem:[%s4110_s2 + $0x88] sm:$0xff] }
  0x2e   : > { %2713 = vmatmul.mubr.msk.f32.vlgmr.msra.gmra.mrb[4].mxu0 %vm416_vm0, %v3440_v31  ;;  %2714 = vmatmul.mubr.msk.f32.vlgmr.msra.gmra.mrb[4].mxu1 %vm416_vm0, %v3440_v31  ;;  %v941_v9 = vld [vmem:[%s4110_s2 + $0xc0] sm:$0xff]  ;;  %v927_v18 = vld [vmem:[%s4110_s2 + $0x50] sm:$0xff]  ;;  %v940_v20 = vld [vmem:[%s4110_s2 + $0xb8] sm:$0xff] }
  0x2f   : > { %2913 = vmatpush3.bf16.msra.mxu0 %v2912_v28  ;;  %2930 = vmatpush1.bf16.msra.mxu1 %v2929_v30  ;;  %v921_v15 = vld [vmem:[%s4110_s2 + $0x20] sm:$0xff]  ;;  %v2967_v19 = vpack.c.bf16 %v941_v9, %v928_v8  ;;  %v948_v21 = vld [vmem:[%s4110_s2 + $0xf8] sm:$0xff]  ;;  %v954_v24 = vld [vmem:[%s4110_s2 + $0x128] sm:$0xff]  ;;  %v2969_v27 = vpack.c.bf16 %v940_v20, %v927_v18 }
  0x30   : > { %2914 = vmatprep.subr.bf16.mxu0 %v3323_v29  ;;  %2933 = vmatprep.subr.msk.bf16.mxu1 %vm3524_vm3, %v2931_v36  ;;  %v961_v23 = vld [vmem:[%s4110_s2 + $0x160] sm:$0x1]  ;;  %v967_v25 = vld [vmem:[%s4110_s2 + $0x190] sm:$0x1]  ;;  %v2939_v26 = vpack.c.bf16 %v934_v17, %v921_v15  ;;  %v960_v32 = vld [vmem:[%s4110_s2 + $0x158] sm:$0x1] }
  0x31   : > { %1152 = vmatprep.mubr.f32.mxu1 %v3321_v0  ;;  %2841 = vmatprep.mubr.msk.f32.mxu0 %vm3325_vm4, %v3321_v0  ;;  %v2941_v28 = vpack.c.bf16 %v961_v23, %v948_v21  ;;  %v947_v30 = vld [vmem:[%s4110_s2 + $0xf0] sm:$0xff]  ;;  %v953_v33 = vld [vmem:[%s4110_s2 + $0x120] sm:$0xff]  ;;  %v2971_v34 = vpack.c.bf16 %v967_v25, %v954_v24  ;;  %v966_v36 = vld [vmem:[%s4110_s2 + $0x188] sm:$0x1] }
  0x32   : > { %1519 = vperm.xlu0 %3043, %v1513_v58   ;;  %v926_v37 = vld [vmem:[%s4110_s2 + $0x48] sm:$0xff]  ;;  %v939_v38 = vld [vmem:[%s4110_s2 + $0xb0] sm:$0xff]  ;;  %v2944_v39 = vpack.c.bf16 %v960_v32, %v947_v30  ;;  %v2974_v41 = vpack.c.bf16 %v966_v36, %v953_v33  ;;  %v929_v52 = vld [vmem:[%s4110_s2 + $0x60] sm:$0xff] }
  0x33   : > { %2916 = vmatpush3.bf16.msra.mxu0 %v2915_v43  ;;  %2936 = vmatpush1.bf16.msk.msra.mxu1 %vm3524_vm3, %v2934_v45  ;;  %v2957_v42 = vpack.c.bf16 %v939_v38, %v926_v37  ;;  %v925_v43 = vld [vmem:[%s4110_s2 + $0x40] sm:$0xff]  ;;  %v938_v44 = vld [vmem:[%s4110_s2 + $0xa8] sm:$0xff]  ;;  %v952_v45 = vld [vmem:[%s4110_s2 + $0x118] sm:$0xff] }
  0x34   : > { %2918 = vmatprep.subr.bf16.mxu0 %v2917_v46  ;;  %2948 = vmatprep.subr.bf16.mxu1 %v2947_v50  ;;  %v965_v46 = vld [vmem:[%s4110_s2 + $0x180] sm:$0x1]  ;;  %v2959_v47 = vpack.c.bf16 %v938_v44, %v925_v43  ;;  %v951_v49 = vld [vmem:[%s4110_s2 + $0x110] sm:$0xff]  ;;  %v964_v50 = vld [vmem:[%s4110_s2 + $0x178] sm:$0x1] }
  0x35   : > { %v2961_v48 = vpack.c.bf16 %v965_v46, %v952_v45  ;;  %v2964_v51 = vpack.c.bf16 %v964_v50, %v951_v49  ;;  %v942_v53 = vld [vmem:[%s4110_s2 + $0xc8] sm:$0xff]  ;;  %v955_v55 = vld [vmem:[%s4110_s2 + $0x130] sm:$0xff]  ;;  %v972_v24 = vld [vmem:[%s4113_s5 + $0x18] sm:$0xff] }
  0x36   : > { %2842 = vmatmul.mubr.msk.f32.vlgmr.msra.gmra.mrb[6].mxu0 %vm416_vm0, %v3440_v31  ;;  %2721 = vmatmul.mubr.msk.f32.vlgmr.msra.gmra.mrb[0].mxu1 %vm973_vm5, %v3572_v56  ;;  %v2954_v31 = vpack.c.bf16 %v962_v2, %v949_v63  ;;  %v2978_v54 = vpack.c.bf16 %v942_v53, %v929_v52  ;;  %v3740_v63 = vld [vmem:[%s4113_s5] sm:$0xff]  ;;  %v3748_v2 = vld [vmem:[%s4113_s5 + $0x8] sm:$0xff] }
  0x37   : > { %2920 = vmatpush1.bf16.msra.mxu0 %v2919_v57  ;;  %2950 = vmatpush1.bf16.msra.mxu1 %v2949_v59  ;;  %v968_v57 = vld [vmem:[%s4110_s2 + $0x198] sm:$0x1]  ;;  %v1514_v59 = vld [vmem:[%s4114_s6 + $0x8] sm:$0xff] }
  0x38   : > { %2923 = vmatprep.subr.msk.bf16.mxu0 %vm3524_vm3, %v2921_v60  ;;  %2953 = vmatprep.subr.msk.bf16.mxu1 %vm3524_vm3, %v2951_v1  ;;  %v2981_v58 = vpack.c.bf16 %v968_v57, %v955_v55  ;;  %v1515_v60 = vld [vmem:[%s4114_s6 + $0x10] sm:$0xff] }
  0x39   : > { %1081 = vmatprep.mubr.f32.mxu0 %v3321_v0  ;;  %1294 = vmatprep.mubr.f32.mxu1 %v3321_v0 }
  0x3a   : > { %1534 = vperm.xlu0 %3043, %v1516_v13   ;;  %1524 = vperm.xlu1 %3044, %v1514_v59  }
  0x3b   : > { %2926 = vmatpush1.bf16.msk.msra.mxu0 %vm3524_vm3, %v2924_v10  ;;  %2956 = vmatpush1.bf16.msk.msra.mxu1 %vm3524_vm3, %v2954_v31 }
  0x3c   : > { %2938 = vmatprep.subr.bf16.mxu0 %v2937_v14  ;;  %2968 = vmatprep.subr.bf16.mxu1 %v2967_v19  ;;  %v3760_v14 = vld [vmem:[%s4113_s5 + $0x10] sm:$0xff] }
  0x3e   : > { %2718 = vmatmul.mubr.msk.f32.vlgmr.msra.gmra.mrb[0].mxu0 %vm973_vm5, %v3572_v56  ;;  %2727 = vmatmul.mubr.msk.f32.vlgmr.msra.gmra.mrb[2].mxu1 %vm973_vm5, %v3572_v56 }
  0x3f   : > { %2940 = vmatpush1.bf16.msra.mxu0 %v2939_v26  ;;  %2970 = vmatpush1.bf16.msra.mxu1 %v2969_v27 }
  0x40   : > { %2943 = vmatprep.subr.msk.bf16.mxu0 %vm3524_vm3, %v2941_v28  ;;  %2973 = vmatprep.subr.msk.bf16.mxu1 %vm3524_vm3, %v2971_v34 }
  0x41   : > { %1223 = vmatprep.mubr.f32.mxu0 %v3321_v0  ;;  %1436 = vmatprep.mubr.f32.mxu1 %v3321_v0 }
  0x42   : > { %1529 = vperm.xlu1 %3044, %v1515_v60  }
  0x43   : > { %2946 = vmatpush1.bf16.msk.msra.mxu0 %vm3524_vm3, %v2944_v39  ;;  %2976 = vmatpush1.bf16.msk.msra.mxu1 %vm3524_vm3, %v2974_v41 }
  0x44   : > { %2958 = vmatprep.subr.bf16.mxu0 %v2957_v42 }
  0x46   : > { %2724 = vmatmul.mubr.msk.f32.vlgmr.msra.gmra.mrb[2].mxu0 %vm973_vm5, %v3572_v56  ;;  %2733 = vmatmul.mubr.msk.f32.vlgmr.msra.gmra.mrb[4].mxu1 %vm973_vm5, %v3572_v56 }
  0x47   : > { %2960 = vmatpush1.bf16.msra.mxu0 %v2959_v47  ;;  %1365 = vmatprep.mubr.f32.mxu0 %v3321_v0 }
  0x48   : > { %2963 = vmatprep.subr.msk.bf16.mxu0 %vm3524_vm3, %v2961_v48  ;;  %1614 = vmatprep.mubr.f32.mxu1 %v3321_v0 }
  0x4b   : > { %2966 = vmatpush1.bf16.msk.msra.mxu0 %vm3524_vm3, %v2964_v51 }
  0x4c   : > { %2977 = vmatprep.subr.bf16.mxu0 %v3323_v29 }
  0x4e   : > { %2730 = vmatmul.mubr.msk.f32.vlgmr.msra.gmra.mrb[4].mxu0 %vm973_vm5, %v3572_v56 }
  0x4f   : > { %2979 = vmatpush3.bf16.msra.mxu0 %v2978_v54  ;;  %2852 = vmatprep.mubr.msk.f32.mxu0 %vm3325_vm4, %v3321_v0 }
  0x50   : > { %2980 = vmatprep.subr.bf16.mxu0 %v3323_v29 }
  0x53   : > { %2983 = vmatpush3.bf16.msk.msra.mxu0 %vm3524_vm3, %v2981_v58 }
  0x56   : > { %2853 = vmatmul.mubr.msk.f32.vlgmr.msra.gmra.mrb[6].mxu0 %vm973_vm5, %v3572_v56 }
  0x57   : > { %1703 = vmatprep.mubr.f32.mxu0 %v3321_v0 }
  0xa9   : > { %v3733_v61 = vpop.permute.xlu0 %413 }
  0xb1   : > { %v3837_v36 = vpop.permute.xlu0 %1519 }
 0x109   : > { %v1154_v29 = vpop.f32.mrb[0].mxu1 }
 0x10a   : > { %v2988_v40 = vadd.f32 %v1154_v29, %v3733_v61  ;;  %v1156_v62 = vpop.f32.mrb[1].mxu1 }
 0x10b   : > { %v2989_v56 = vadd.f32 %v1156_v62, %v3733_v61 }
 0x10d   : > { %1639 = vmatprep.subr.mxu0 %v2989_v56 }
 0x10e   : > { %1640 = vmatpush1.msra.mxu0 %v2988_v40 }
 0x10f   : > { %2740 = vmatmul.mubr.msk.f32.vlgmr.msra.gmra.mrb[8].mxu0 %vm1537_vm6, %v3740_v63 }
 0x110   : > { %1709 = vmatprep.mubr.f32.mxu0 %v3321_v0 }
 0x111   : > { %v1083_v1 = vpop.f32.mrb[0].mxu0  ;;  %v1296_v3 = vpop.f32.mrb[2].mxu1 }
 0x112   : > { %v1085_v5 = vpop.f32.mrb[1].mxu0  ;;  %v2992_v8 = vadd.f32 %v1296_v3, %v3733_v61  ;;  %v1298_v10 = vpop.f32.mrb[3].mxu1  ;;  %v2986_v13 = vadd.f32 %v1083_v1, %v3733_v61 }
 0x113   : > { %v2987_v9 = vadd.f32 %v1085_v5, %v3733_v61  ;;  %v2993_v31 = vadd.f32 %v1298_v10, %v3733_v61  ;;  %2741 = vmatmul.mubr.msk.f32.gmra.mrb[10].mxu0 %vm1537_vm6, %v3748_v2 }
 0x114   : > { %1715 = vmatprep.mubr.f32.mxu0 %v3321_v0 }
 0x115   : > { %1550 = vmatprep.subr.mxu1 %v2987_v9  ;;  %1817 = vmatprep.subr.mxu0 %v2993_v31 }
 0x116   : > { %1551 = vmatpush1.msra.mxu1 %v2986_v13  ;;  %1818 = vmatpush1.msra.mxu0 %v2992_v8 }
 0x117   : > { %2736 = vmatmul.mubr.msk.f32.vlgmr.msra.gmra.mrb[6].mxu1 %vm1537_vm6, %v3740_v63  ;;  %2984 = vmatprep.subr.mxu1 %v2989_v56 }
 0x118   : > { %2742 = vmatmul.mubr.msk.f32.gmra.mrb[12].mxu0 %vm1537_vm6, %v3760_v14  ;;  %2985 = vmatpush1.msra.mxu1 %v2988_v40 }
 0x119   : > { %v1225_v15 = vpop.f32.mrb[2].mxu0  ;;  %1620 = vmatprep.mubr.f32.mxu1 %v3321_v0  ;;  %v1438_v17 = vpop.f32.mrb[4].mxu1  ;;  %1881 = vmatprep.mubr.f32.mxu0 %v3321_v0 }
 0x11a   : > { %v1227_v18 = vpop.f32.mrb[3].mxu0  ;;  %v1440_v20 = vpop.f32.mrb[5].mxu1  ;;  %v2996_v23 = vadd.f32 %v1438_v17, %v3733_v61  ;;  %v2990_v27 = vadd.f32 %v1225_v15, %v3733_v61 }
 0x11b   : > { %v2991_v19 = vadd.f32 %v1227_v18, %v3733_v61  ;;  %2737 = vmatmul.mubr.msk.f32.gmra.mrb[8].mxu1 %vm1537_vm6, %v3748_v2  ;;  %v2997_v21 = vadd.f32 %v1440_v20, %v3733_v61 }
 0x11c   : > { %2748 = vmatmul.mubr.msk.f32.vlgmr.msra.gmra.mrb[14].mxu0 %vm1537_vm6, %v3740_v63  ;;  %1626 = vmatprep.mubr.f32.mxu1 %v3321_v0 }
 0x11d   : > { %1728 = vmatprep.subr.mxu1 %v2991_v19  ;;  %1887 = vmatprep.mubr.f32.mxu0 %v3321_v0 }
 0x11e   : > { %1995 = vmatprep.subr.mxu0 %v2997_v21 }
 0x11f   : > { %1996 = vmatpush1.msra.mxu0 %v2996_v23  ;;  %2738 = vmatmul.mubr.msk.f32.gmra.mrb[10].mxu1 %vm1537_vm6, %v3760_v14 }
 0x120   : > { %2749 = vmatmul.mubr.msk.f32.gmra.mrb[16].mxu0 %vm1537_vm6, %v3748_v2  ;;  %1632 = vmatprep.mubr.f32.mxu1 %v3321_v0 }
 0x121   : > { %v1367_v25 = vpop.f32.mrb[4].mxu0  ;;  %1893 = vmatprep.mubr.f32.mxu0 %v3321_v0 }
 0x122   : > { %v1369_v26 = vpop.f32.mrb[5].mxu0  ;;  %v2994_v32 = vadd.f32 %v1367_v25, %v3733_v61 }
 0x123   : > { %2739 = vmatmul.mubr.msk.f32.gmra.mrb[12].mxu1 %vm1537_vm6, %v972_v24  ;;  %v2995_v28 = vadd.f32 %v1369_v26, %v3733_v61 }
 0x124   : > { %2750 = vmatmul.mubr.msk.f32.gmra.mrb[18].mxu0 %vm1537_vm6, %v3760_v14  ;;  %1721 = vmatprep.mubr.f32.mxu1 %v3321_v0 }
 0x125   : > { %1899 = vmatprep.mubr.f32.mxu0 %v3321_v0 }
 0x127   : > { %2743 = vmatmul.mubr.msk.f32.vlgmr.msra.gmra.mrb[14].mxu1 %vm1537_vm6, %v972_v24 }
 0x128   : > { %1729 = vmatpush1.msra.mxu1 %v2990_v27  ;;  %2751 = vmatmul.mubr.msk.f32.gmra.mrb[20].mxu0 %vm1537_vm6, %v972_v24 }
 0x129   : > { %1906 = vmatprep.subr.mxu1 %v2995_v28  ;;  %v1509_v30 = vpop.f32.mrb[6].mxu0  ;;  %1792 = vmatprep.mubr.f32.mxu1 %v3321_v0 }
 0x12a   : > { %v2998_v33 = vadd.f32 %v1509_v30, %v3733_v61  ;;  %v2854_v34 = vpop.f32.mrb[7].mxu0  ;;  %2059 = vmatprep.mubr.f32.mxu0 %v3321_v0 }
 0x12b   : > { %2744 = vmatmul.mubr.msk.f32.vlgmr.msra.gmra.mrb[16].mxu1 %vm1537_vm6, %v3740_v63 }
 0x12c   : > { %1907 = vmatpush1.msra.mxu1 %v2994_v32  ;;  %2756 = vmatmul.mubr.msk.f32.vlgmr.msra.gmra.mrb[22].mxu0 %vm1537_vm6, %v3740_v63 }
 0x12d   : > { %2855 = vmatprep.subr.mxu1 %v2998_v33  ;;  %1798 = vmatprep.mubr.f32.mxu1 %v3321_v0 }
 0x12e   : > { %2065 = vmatprep.mubr.f32.mxu0 %v3321_v0 }
 0x12f   : > { %2745 = vmatmul.mubr.msk.f32.gmra.mrb[18].mxu1 %vm1537_vm6, %v3748_v2 }
 0x130   : > { %2757 = vmatmul.mubr.msk.f32.gmra.mrb[24].mxu0 %vm1537_vm6, %v3748_v2  ;;  %1804 = vmatprep.mubr.f32.mxu1 %v3321_v0 }
 0x131   : > { %2071 = vmatprep.mubr.f32.mxu0 %v3321_v0 }
 0x133   : > { %2746 = vmatmul.mubr.msk.f32.gmra.mrb[20].mxu1 %vm1537_vm6, %v3760_v14 }
 0x134   : > { %2758 = vmatmul.mubr.msk.f32.gmra.mrb[26].mxu0 %vm1537_vm6, %v3760_v14  ;;  %1810 = vmatprep.mubr.f32.mxu1 %v3321_v0 }
 0x135   : > { %2077 = vmatprep.mubr.f32.mxu0 %v3321_v0 }
 0x137   : > { %2747 = vmatmul.mubr.msk.f32.gmra.mrb[22].mxu1 %vm1537_vm6, %v972_v24 }
 0x138   : > { %2759 = vmatmul.mubr.msk.f32.gmra.mrb[28].mxu0 %vm1537_vm6, %v972_v24  ;;  %1970 = vmatprep.mubr.f32.mxu1 %v3321_v0 }
 0x13b   : > { %2752 = vmatmul.mubr.msk.f32.vlgmr.msra.gmra.mrb[24].mxu1 %vm1537_vm6, %v3740_v63 }
 0x13c   : > { %2856 = vmatpush3.msra.mxu1 %v2998_v33  ;;  %1976 = vmatprep.mubr.f32.mxu1 %v3321_v0 }
 0x13f   : > { %2753 = vmatmul.mubr.msk.f32.gmra.mrb[26].mxu1 %vm1537_vm6, %v3748_v2 }
 0x140   : > { %1982 = vmatprep.mubr.f32.mxu1 %v3321_v0 }
 0x143   : > { %2754 = vmatmul.mubr.msk.f32.gmra.mrb[28].mxu1 %vm1537_vm6, %v3760_v14 }
 0x144   : > { %1988 = vmatprep.mubr.f32.mxu1 %v3321_v0  ;;  %v3840_v0 = vpop.permute.xlu1 %1524 }
 0x147   : > { %2755 = vmatmul.mubr.msk.f32.gmra.mrb[30].mxu1 %vm1537_vm6, %v972_v24 }
 0x148   : > { %2857 = vmatprep.mubr.msk.f32.mxu1 %vm1537_vm6, %v3740_v63  ;;  %v3845_v50 = vpop.permute.xlu1 %1529 }
 0x14b   : > { %2858 = vmatmul.mubr.msk.f32.vlgmr.msra.gmra.mrb[32].mxu1 %vm1537_vm6, %v3748_v2 }
 0x14c   : > { %2860 = vmatprep.mubr.msk.f32.mxu1 %vm1537_vm6, %v3760_v14 }
 0x14f   : > { %2861 = vmatmul.mubr.msk.f32.gmra.mrb[34].mxu1 %vm1537_vm6, %v972_v24 }
 0x1e2   : > { %v1705_v37 = vpop.f32.mrb[8].mxu0 }
 0x1e3   : > { %v1706_v38 = vadd.f32 %v1705_v37, %v3837_v36  ;;  %v1707_v39 = vpop.f32.mrb[9].mxu0 }
 0x1e4   : > { %v1708_v41 = vadd.f32 %v1707_v39, %v3837_v36 }
 0x1e5   : > { %v2766_v42 = vmul.f32 -1.442695, %v1706_v38 }
 0x1e6   : > { %v2767_v43 = vmul.f32 -1.442695, %v1708_v41  ;;  %v1711_v44 = vpop.f32.mrb[10].mxu0  ;;  %v3856_v41 = vpop.permute.xlu0 %1534 }
 0x1e7   : > { %3045 = vpow2.f32 %v2766_v42  ;;  %v1713_v45 = vpop.f32.mrb[11].mxu0  ;;  %v1712_v46 = vadd.f32 %v1711_v44, %v3840_v0 }
 0x1e8   : > { %3047 = vpow2.f32 %v2767_v43  ;;  %v1714_v47 = vadd.f32 %v1713_v45, %v3840_v0 }
 0x1e9   : > { %v2779_v49 = vmul.f32 -1.442695, %v1712_v46 }
 0x1ea   : > { %v1616_v48 = vpop.f32.mrb[6].mxu1  ;;  %v2780_v54 = vmul.f32 -1.442695, %v1714_v47 }
 0x1eb   : > { %v1617_v51 = vadd.f32 %v1616_v48, %v3837_v36  ;;  %v1618_v52 = vpop.f32.mrb[7].mxu1  ;;  %v1717_v53 = vpop.f32.mrb[12].mxu0  ;;  %3049 = vpow2.f32 %v2779_v49 }
 0x1ec   : > { %v1619_v55 = vadd.f32 %v1618_v52, %v3837_v36  ;;  %v1719_v57 = vpop.f32.mrb[13].mxu0  ;;  %v1718_v58 = vadd.f32 %v1717_v53, %v3845_v50  ;;  %3051 = vpow2.f32 %v2780_v54 }
 0x1ed   : > { %v2764_v59 = vmul.f32 -1.442695, %v1617_v51  ;;  %v1720_v60 = vadd.f32 %v1719_v57, %v3845_v50 }
 0x1ee   : > { %v2765_v61 = vmul.f32 -1.442695, %v1619_v55  ;;  %v1622_v29 = vpop.f32.mrb[8].mxu1  ;;  %v2792_v40 = vmul.f32 -1.442695, %v1718_v58 }
 0x1ef   : > { %3053 = vpow2.f32 %v2764_v59  ;;  %v1883_v62 = vpop.f32.mrb[14].mxu0  ;;  %v1623_v56 = vadd.f32 %v1622_v29, %v3840_v0  ;;  %v1624_v63 = vpop.f32.mrb[9].mxu1  ;;  %v2793_v1 = vmul.f32 -1.442695, %v1720_v60 }
 0x1f0   : > { %3055 = vpow2.f32 %v2765_v61  ;;  %v1884_v2 = vadd.f32 %v1883_v62, %v3837_v36  ;;  %v1885_v3 = vpop.f32.mrb[15].mxu0  ;;  %v1625_v5 = vadd.f32 %v1624_v63, %v3840_v0 }
 0x1f1   : > { %v1886_v8 = vadd.f32 %v1885_v3, %v3837_v36  ;;  %v2777_v9 = vmul.f32 -1.442695, %v1623_v56  ;;  %3057 = vpow2.f32 %v2792_v40  ;;  %v3046_v10 = vpop.eup %3045 }
 0x1f2   : > { %v2770_v13 = vmul.f32 -1.442695, %v1884_v2  ;;  %v1628_v31 = vpop.f32.mrb[10].mxu1  ;;  %3059 = vpow2.f32 %v2793_v1  ;;  %v3048_v14 = vpop.eup %3047  ;;  %v2327_v15 = vadd.f32 1.0, %v3046_v10  ;;  %v2778_v23 = vmul.f32 -1.442695, %v1625_v5 }
 0x1f3   : > { %v2771_v17 = vmul.f32 -1.442695, %v1886_v8  ;;  %3061 = vpow2.f32 %v2777_v9  ;;  %v1629_v18 = vadd.f32 %v1628_v31, %v3845_v50  ;;  %v1630_v19 = vpop.f32.mrb[11].mxu1  ;;  %v1889_v20 = vpop.f32.mrb[16].mxu0  ;;  %v2328_v21 = vadd.f32 1.0, %v3048_v14 }
 0x1f4   : > { %3063 = vpow2.f32 %v2770_v13  ;;  %v1891_v24 = vpop.f32.mrb[17].mxu0  ;;  %v1631_v43 = vadd.f32 %v1630_v19, %v3845_v50  ;;  %v1890_v60 = vadd.f32 %v1889_v20, %v3840_v0 }
 0x1f5   : > { %3065 = vrcp.f32 %v2327_v15  ;;  %v3050_v25 = vpop.eup %3049  ;;  %v2790_v30 = vmul.f32 -1.442695, %v1629_v18  ;;  %v1892_v10 = vadd.f32 %v1891_v24, %v3840_v0 }
 0x1f6   : > { %3067 = vrcp.f32 %v2328_v21  ;;  %v1634_v26 = vpop.f32.mrb[12].mxu1  ;;  %v3052_v27 = vpop.eup %3051  ;;  %v2340_v28 = vadd.f32 1.0, %v3050_v25  ;;  %v2791_v59 = vmul.f32 -1.442695, %v1631_v43  ;;  %v2783_v14 = vmul.f32 -1.442695, %v1890_v60 }
 0x1f7   : > { %3069 = vpow2.f32 %v2771_v17  ;;  %v1636_v32 = vpop.f32.mrb[13].mxu1  ;;  %v1895_v33 = vpop.f32.mrb[18].mxu0  ;;  %v2341_v34 = vadd.f32 1.0, %v3052_v27  ;;  %v1635_v47 = vadd.f32 %v1634_v26, %v3856_v41 }
 0x1f8   : > { %3071 = vpow2.f32 %v2778_v23  ;;  %v1897_v37 = vpop.f32.mrb[19].mxu0  ;;  %v1637_v56 = vadd.f32 %v1636_v32, %v3856_v41  ;;  %v1896_v15 = vadd.f32 %v1895_v33, %v3845_v50 }
 0x1f9   : > { %v3054_v38 = vpop.eup %3053  ;;  %3073 = vrcp.f32 %v2340_v28  ;;  %v2803_v62 = vmul.f32 -1.442695, %v1635_v47 }
 0x1fa   : > { %v3056_v39 = vpop.eup %3055  ;;  %v2325_v42 = vadd.f32 1.0, %v3054_v38  ;;  %3075 = vrcp.f32 %v2341_v34  ;;  %v1723_v44 = vpop.f32.mrb[14].mxu1  ;;  %v2804_v19 = vmul.f32 -1.442695, %v1637_v56 }
 0x1fb   : > { %v3058_v45 = vpop.eup %3057  ;;  %v2326_v46 = vadd.f32 1.0, %v3056_v39  ;;  %3077 = vpow2.f32 %v2790_v30  ;;  %v1901_v48 = vpop.f32.mrb[20].mxu0  ;;  %v1724_v25 = vadd.f32 %v1723_v44, %v3856_v41  ;;  %v2784_v30 = vmul.f32 -1.442695, %v1892_v10 }
 0x1fc   : > { %v1725_v49 = vpop.f32.mrb[15].mxu1  ;;  %v3060_v51 = vpop.eup %3059  ;;  %3079 = vrcp.f32 %v2325_v42  ;;  %v2353_v52 = vadd.f32 1.0, %v3058_v45  ;;  %v1902_v32 = vadd.f32 %v1901_v48, %v3856_v41 }
 0x1fd   : > { %v3860_v53 = vpop.f32.mrb[21].mxu0  ;;  %v3062_v54 = vpop.eup %3061  ;;  %3081 = vrcp.f32 %v2326_v46  ;;  %v2354_v55 = vadd.f32 1.0, %v3060_v51  ;;  %v3253_v46 = vld [vmem:[%s3394_s8 + $0x8] sm:$0xff]  ;;  %v2805_v48 = vmul.f32 -1.442695, %v1724_v25 }
 0x1fe   : > { %v3064_v57 = vpop.eup %3063  ;;  %v2338_v58 = vadd.f32 1.0, %v3062_v54  ;;  %3083 = vrcp.f32 %v2353_v52  ;;  %v3863_v61 = vpop.f32.mrb[16].mxu1  ;;  %v2809_v52 = vmul.f32 -1.442695, %v1902_v32  ;;  %v1904_v54 = vadd.f32 %v3860_v53, %v3856_v41 }
 0x1ff   : > { %v3066_v29 = vpop.eup %3065  ;;  %v2331_v40 = vadd.f32 1.0, %v3064_v57  ;;  %3085 = vrcp.f32 %v2354_v55  ;;  %v3873_v63 = vpop.f32.mrb[22].mxu0 }
 0x200   : > { %v3875_v1 = vpop.f32.mrb[17].mxu1  ;;  %v3068_v2 = vpop.eup %3067  ;;  %v2483_v3 = vmul.f32 %v3066_v29, %v3412_v11  ;;  %3087 = vrcp.f32 %v2338_v58 }
 0x201   : > { %v3878_v5 = vpop.f32.mrb[23].mxu0  ;;  %v3070_v8 = vpop.eup %3069  ;;  %v2484_v9 = vmul.f32 %v3068_v2, %v3399_v4  ;;  %3089 = vrcp.f32 %v2331_v40  ;;  %v1898_v4 = vadd.f32 %v1897_v37, %v3845_v50  ;;  %v2796_v37 = vmul.f32 -1.442695, %v1896_v15  ;;  %v3255_v15 = vld [vmem:[%s3394_s8 + $0x38] sm:$0xff] }
 0x202   : > { %v3072_v13 = vpop.eup %3071  ;;  %2535 = vst [vmem:[%s3870_s20 + $0x10] sm:$0xff] %v2483_v3  ;;  %v2332_v31 = vadd.f32 1.0, %v3070_v8  ;;  %3091 = vpow2.f32 %v2791_v59  ;;  %v3884_v17 = vpop.f32.mrb[18].mxu1  ;;  %v1795_v59 = vadd.f32 %v3863_v61, %v3837_v36  ;;  %v2810_v8 = vmul.f32 -1.442695, %v1904_v54 }
 0x203   : > { %v3074_v18 = vpop.eup %3073  ;;  %2536 = vst [vmem:[%s3870_s20 + $0x18] sm:$0xff] %v2484_v9  ;;  %v2339_v11 = vadd.f32 1.0, %v3072_v13  ;;  %3093 = vpow2.f32 %v2803_v62  ;;  %v3888_v20 = vpop.f32.mrb[19].mxu1  ;;  %v2062_v9 = vadd.f32 %v3873_v63, %v3837_v36  ;;  %v1801_v54 = vadd.f32 %v3884_v17, %v3840_v0 }
 0x204   : > { %v3890_v21 = vpop.f32.mrb[24].mxu0  ;;  %v3076_v23 = vpop.eup %3075  ;;  %3095 = vrcp.f32 %v2332_v31  ;;  %v2496_v24 = vmul.f32 %v3074_v18, %v3415_v12  ;;  %v1726_v12 = vadd.f32 %v1725_v49, %v3856_v41 }
 0x205   : > { %v3894_v26 = vpop.f32.mrb[25].mxu0  ;;  %v3078_v27 = vpop.eup %3077  ;;  %v2497_v28 = vmul.f32 %v3076_v23, %v3402_v6  ;;  %3097 = vrcp.f32 %v2339_v11  ;;  %v2797_v6 = vmul.f32 -1.442695, %v1898_v4  ;;  %v3256_v4 = vld [vmem:[%s3394_s8 + $0x70] sm:$0xff]  ;;  %v2774_v25 = vmul.f32 -1.442695, %v2062_v9 }
 0x206   : > { %v3080_v33 = vpop.eup %3079  ;;  %2549 = vst [vmem:[%s3870_s20 + $0x78] sm:$0xff] %v2496_v24  ;;  %v2351_v34 = vadd.f32 1.0, %v3078_v27  ;;  %3099 = vpow2.f32 %v2783_v14  ;;  %v3900_v38 = vpop.f32.mrb[20].mxu1  ;;  %v2806_v58 = vmul.f32 -1.442695, %v1726_v12  ;;  %v3259_v9 = vld [vmem:[%s3394_s8 + $0x138] sm:$0xff] }
 0x207   : > { %v3082_v39 = vpop.eup %3081  ;;  %v2481_v42 = vmul.f32 %v3080_v33, %v3405_v7  ;;  %2550 = vst [vmem:[%s3870_s20 + $0x80] sm:$0xff] %v2497_v28  ;;  %3101 = vpow2.f32 %v2804_v19  ;;  %v3904_v43 = vpop.f32.mrb[26].mxu0 }
 0x208   : > { %v3906_v44 = vpop.f32.mrb[21].mxu1  ;;  %v3084_v45 = vpop.eup %3083  ;;  %v2482_v47 = vmul.f32 %v3253_v46, %v3082_v39  ;;  %3103 = vrcp.f32 %v2351_v34  ;;  %v3257_v34 = vld [vmem:[%s3394_s8 + $0xd0] sm:$0xff]  ;;  %v2064_v46 = vadd.f32 %v3878_v5, %v3837_v36 }
 0x209   : > { %v3909_v49 = vpop.f32.mrb[27].mxu0  ;;  %v3086_v51 = vpop.eup %3085  ;;  %2533 = vst [vmem:[%s3870_s20] sm:$0xff] %v2481_v42  ;;  %v2509_v7 = vmul.f32 %v3084_v45, %v3429_v22  ;;  %3105 = vpow2.f32 %v2784_v30  ;;  %v3254_v22 = vld [vmem:[%s3394_s8 + $0x68] sm:$0xff]  ;;  %v1797_v30 = vadd.f32 %v3875_v1, %v3837_v36 }
 0x20a   : > { %v3088_v55 = vpop.eup %3087  ;;  %2534 = vst [vmem:[%s3870_s20 + $0x8] sm:$0xff] %v2482_v47  ;;  %v2510_v57 = vmul.f32 %v3086_v51, %v3422_v16  ;;  %3107 = vpow2.f32 %v2796_v37  ;;  %v3919_v60 = vpop.f32.mrb[22].mxu1 }
 0x20b   : > { %v3090_v29 = vpop.eup %3089  ;;  %v2494_v40 = vmul.f32 %v3254_v22, %v3088_v55  ;;  %2562 = vst [vmem:[%s3870_s20 + $0xe0] sm:$0xff] %v2509_v7  ;;  %3109 = vpow2.f32 %v2797_v6  ;;  %v3923_v53 = vpop.f32.mrb[28].mxu0 }
 0x20c   : > { %v3925_v62 = vpop.f32.mrb[23].mxu1  ;;  %v3092_v56 = vpop.eup %3091  ;;  %v2487_v16 = vmul.f32 %v3090_v29, %v3445_v35  ;;  %2563 = vst [vmem:[%s3870_s20 + $0xe8] sm:$0xff] %v2510_v57  ;;  %3111 = vpow2.f32 %v2805_v48  ;;  %v2768_v35 = vmul.f32 -1.442695, %v1795_v59  ;;  %v2769_v48 = vmul.f32 -1.442695, %v1797_v30 }
 0x20d   : > { %v3929_v2 = vpop.f32.mrb[29].mxu0  ;;  %v3094_v61 = vpop.eup %3093  ;;  %2547 = vst [vmem:[%s3870_s20 + $0x68] sm:$0xff] %v2494_v40  ;;  %v2352_v3 = vadd.f32 1.0, %v3092_v56  ;;  %3113 = vpow2.f32 %v2809_v52  ;;  %v1803_v59 = vadd.f32 %v3888_v20, %v3840_v0  ;;  %v2775_v56 = vmul.f32 -1.442695, %v2064_v46 }
 0x20e   : > { %v3096_v10 = vpop.eup %3095  ;;  %2539 = vst [vmem:[%s3870_s20 + $0x30] sm:$0xff] %v2487_v16  ;;  %v2364_v13 = vadd.f32 1.0, %v3094_v61  ;;  %3115 = vpow2.f32 %v2806_v58  ;;  %v3935_v31 = vpop.f32.mrb[24].mxu1  ;;  %v3258_v16 = vld [vmem:[%s3394_s8 + $0xd8] sm:$0xff]  ;;  %v2781_v20 = vmul.f32 -1.442695, %v1801_v54 }
 0x20f   : > { %v3098_v14 = vpop.eup %3097  ;;  %v2488_v18 = vmul.f32 %v3255_v15, %v3096_v10  ;;  %3117 = vrcp.f32 %v2352_v3  ;;  %v3938_v11 = vpop.f32.mrb[25].mxu1 }
 0x210   : > { %v3100_v19 = vpop.eup %3099  ;;  %v2495_v23 = vmul.f32 %v3256_v4, %v3098_v14  ;;  %3119 = vrcp.f32 %v2364_v13  ;;  %v2068_v13 = vadd.f32 %v3890_v21, %v3840_v0  ;;  %v2074_v21 = vadd.f32 %v3904_v43, %v3845_v50 }
 0x211   : > { %v3102_v63 = vpop.eup %3101  ;;  %2540 = vst [vmem:[%s3870_s20 + $0x38] sm:$0xff] %v2488_v18  ;;  %v2344_v24 = vadd.f32 1.0, %v3100_v19  ;;  %3121 = vpow2.f32 %v2810_v8  ;;  %v2782_v18 = vmul.f32 -1.442695, %v1803_v59  ;;  %v2070_v19 = vadd.f32 %v3894_v26, %v3840_v0 }
 0x212   : > { %v3104_v27 = vpop.eup %3103  ;;  %2548 = vst [vmem:[%s3870_s20 + $0x70] sm:$0xff] %v2495_v23  ;;  %v2365_v28 = vadd.f32 1.0, %v3102_v63  ;;  %3123 = vpow2.f32 %v2768_v35  ;;  %v3945_v32 = vpop.f32.mrb[26].mxu1  ;;  %v1807_v63 = vadd.f32 %v3900_v38, %v3845_v50  ;;  %v2076_v26 = vadd.f32 %v3909_v49, %v3845_v50  ;;  %v3261_v38 = vld [vmem:[%s3394_s8 + $0x140] sm:$0xff] }
 0x213   : > { %v3106_v33 = vpop.eup %3105  ;;  %v2507_v37 = vmul.f32 %v3257_v34, %v3104_v27  ;;  %3125 = vrcp.f32 %v2344_v24  ;;  %v3948_v12 = vpop.f32.mrb[27].mxu1  ;;  %v2787_v43 = vmul.f32 -1.442695, %v2068_v13  ;;  %v3262_v49 = vld [vmem:[%s3394_s8 + $0xa0] sm:$0xff]  ;;  %v1813_v59 = vadd.f32 %v3919_v60, %v3856_v41  ;;  %v3266_v60 = vld [vmem:[%s3394_s8 + $0x168] sm:$0xff]  ;;  %v3267_v13 = vld [vmem:[%s3394_s8 + $0x150] sm:$0xff] }
 0x214   : > { %v3108_v39 = vpop.eup %3107  ;;  %3127 = vrcp.f32 %v2365_v28  ;;  %v2345_v42 = vadd.f32 1.0, %v3106_v33  ;;  %v1809_v28 = vadd.f32 %v3906_v44, %v3845_v50  ;;  %v2794_v46 = vmul.f32 -1.442695, %v1807_v63 }
 0x215   : > { %v3110_v6 = vpop.eup %3109  ;;  %2560 = vst [vmem:[%s3870_s20 + $0xd0] sm:$0xff] %v2507_v37  ;;  %v2357_v45 = vadd.f32 1.0, %v3108_v39  ;;  %3129 = vpow2.f32 %v2774_v25  ;;  %v3260_v25 = vld [vmem:[%s3394_s8 + $0x98] sm:$0xff] }
 0x216   : > { %v3112_v47 = vpop.eup %3111  ;;  %3131 = vrcp.f32 %v2345_v42  ;;  %v2358_v1 = vadd.f32 1.0, %v3110_v6  ;;  %v1984_v51 = vpop.f32.mrb[28].mxu1  ;;  %v2788_v6 = vmul.f32 -1.442695, %v2070_v19 }
 0x217   : > { %v3114_v7 = vpop.eup %3113  ;;  %3133 = vrcp.f32 %v2357_v45  ;;  %v2366_v52 = vadd.f32 1.0, %v3112_v47  ;;  %v3956_v55 = vadd.f32 %v1984_v51, %v3845_v50  ;;  %v1986_v57 = vpop.f32.mrb[29].mxu1  ;;  %v2800_v47 = vmul.f32 -1.442695, %v2074_v21  ;;  %v3268_v21 = vld [vmem:[%s3394_s8 + $0x170] sm:$0xff] }
 0x218   : > { %v3116_v58 = vpop.eup %3115  ;;  %3135 = vrcp.f32 %v2358_v1  ;;  %v2370_v5 = vadd.f32 1.0, %v3114_v7  ;;  %v3961_v29 = vadd.f32 %v1986_v57, %v3845_v50  ;;  %v2795_v7 = vmul.f32 -1.442695, %v1809_v28 }
 0x219   : > { %v3118_v22 = vpop.eup %3117  ;;  %3137 = vrcp.f32 %v2366_v52  ;;  %v2367_v40 = vadd.f32 1.0, %v3116_v58  ;;  %v2801_v52 = vmul.f32 -1.442695, %v2076_v26  ;;  %v3264_v58 = vld [vmem:[%s3394_s8 + $0x108] sm:$0xff] }
 0x21a   : > { %v3120_v17 = vpop.eup %3119  ;;  %v2508_v61 = vmul.f32 %v3258_v16, %v3118_v22  ;;  %3139 = vrcp.f32 %v2370_v5  ;;  %v3964_v3 = vpop.f32.mrb[30].mxu1 }
 0x21b   : > { %v3122_v8 = vpop.eup %3121  ;;  %v2520_v10 = vmul.f32 %v3259_v9, %v3120_v17  ;;  %3141 = vrcp.f32 %v2367_v40  ;;  %v3969_v35 = vpop.f32.mrb[31].mxu1  ;;  %v3265_v17 = vld [vmem:[%s3394_s8 + $0x148] sm:$0xff] }
 0x21c   : > { %v3124_v14 = vpop.eup %3123  ;;  %2561 = vst [vmem:[%s3870_s20 + $0xd8] sm:$0xff] %v2508_v61  ;;  %v2371_v15 = vadd.f32 1.0, %v3122_v8  ;;  %3143 = vpow2.f32 %v2769_v48  ;;  %v3263_v48 = vld [vmem:[%s3394_s8 + $0x100] sm:$0xff]  ;;  %v2080_v61 = vadd.f32 %v3923_v53, %v3856_v41  ;;  %v2807_v53 = vmul.f32 -1.442695, %v1813_v59 }
 0x21d   : > { %v3126_v4 = vpop.eup %3125  ;;  %2573 = vst [vmem:[%s3870_s20 + $0x138] sm:$0xff] %v2520_v10  ;;  %v2329_v23 = vadd.f32 1.0, %v3124_v14  ;;  %3145 = vpow2.f32 %v2775_v56  ;;  %v1979_v59 = vadd.f32 %v3945_v32, %v3840_v0 }
 0x21e   : > { %v3128_v24 = vpop.eup %3127  ;;  %v2500_v27 = vmul.f32 %v3260_v25, %v3126_v4  ;;  %3147 = vrcp.f32 %v2371_v15  ;;  %v3984_v30 = vpop.f32.mrb[32].mxu1 }
 0x21f   : > { %v3130_v33 = vpop.eup %3129  ;;  %v2521_v34 = vmul.f32 %v3261_v38, %v3128_v24  ;;  %3149 = vrcp.f32 %v2329_v23  ;;  %v3987_v37 = vpop.f32.mrb[33].mxu1  ;;  %v2813_v23 = vmul.f32 -1.442695, %v2080_v61  ;;  %v3272_v61 = vld [vmem:[%s3394_s8 + $0x58] sm:$0xff] }
 0x220   : > { %v3132_v39 = vpop.eup %3131  ;;  %2553 = vst [vmem:[%s3870_s20 + $0x98] sm:$0xff] %v2500_v27  ;;  %v2335_v42 = vadd.f32 1.0, %v3130_v33  ;;  %3151 = vpow2.f32 %v2781_v20  ;;  %v3269_v27 = vld [vmem:[%s3394_s8 + $0x20] sm:$0xff] }
 0x221   : > { %v3134_v44 = vpop.eup %3133  ;;  %2574 = vst [vmem:[%s3870_s20 + $0x140] sm:$0xff] %v2521_v34  ;;  %v2501_v45 = vmul.f32 %v3262_v49, %v3132_v39  ;;  %3153 = vpow2.f32 %v2782_v18  ;;  %v3270_v39 = vld [vmem:[%s3394_s8 + $0x50] sm:$0xff]  ;;  %v2082_v49 = vadd.f32 %v3929_v2, %v3856_v41  ;;  %v1975_v2 = vadd.f32 %v3938_v11, %v3837_v36 }
 0x222   : > { %v3136_v1 = vpop.eup %3135  ;;  %v2513_v51 = vmul.f32 %v3263_v48, %v3134_v44  ;;  %3155 = vrcp.f32 %v2335_v42  ;;  %v2862_v54 = vpop.f32.mrb[34].mxu1  ;;  %v1981_v11 = vadd.f32 %v3948_v12, %v3840_v0  ;;  %v1991_v12 = vadd.f32 %v3964_v3, %v3856_v41 }
 0x223   : > { %v3138_v57 = vpop.eup %3137  ;;  %2554 = vst [vmem:[%s3870_s20 + $0xa0] sm:$0xff] %v2501_v45  ;;  %v2514_v5 = vmul.f32 %v3264_v58, %v3136_v1  ;;  %3157 = vpow2.f32 %v2787_v43  ;;  %v3998_v22 = vadd.f32 %v2862_v54, %v3856_v41  ;;  %v2160_v40 = vpop.f32.mrb[35].mxu1  ;;  %v2156_v3 = vadd.f32 %v3984_v30, %v3840_v0 }
 0x224   : > { %v3140_v56 = vpop.eup %3139  ;;  %2566 = vst [vmem:[%s3870_s20 + $0x100] sm:$0xff] %v2513_v51  ;;  %v2522_v16 = vmul.f32 %v3265_v17, %v3138_v57  ;;  %3159 = vpow2.f32 %v2788_v6  ;;  %v4005_v8 = vadd.f32 %v2160_v40, %v3845_v50  ;;  %v1815_v50 = vadd.f32 %v3925_v62, %v3856_v41 }
 0x225   : > { %v3142_v9 = vpop.eup %3141  ;;  %2567 = vst [vmem:[%s3870_s20 + $0x108] sm:$0xff] %v2514_v5  ;;  %v2526_v10 = vmul.f32 %v3266_v60, %v3140_v56  ;;  %3161 = vpow2.f32 %v2794_v46  ;;  %v2814_v57 = vmul.f32 -1.442695, %v2082_v49  ;;  %v3271_v56 = vld [vmem:[%s3394_s8 + $0x28] sm:$0xff]  ;;  %v3279_v49 = vld [vmem:[%s3394_s8 + $0xf8] sm:$0xff] }
 0x226   : > { %v3144_v20 = vpop.eup %3143  ;;  %2575 = vst [vmem:[%s3870_s20 + $0x148] sm:$0xff] %v2522_v16  ;;  %v2523_v14 = vmul.f32 %v3267_v13, %v3142_v9  ;;  %3163 = vpow2.f32 %v2800_v47  ;;  %v2808_v62 = vmul.f32 -1.442695, %v1815_v50  ;;  %v1973_v47 = vadd.f32 %v3935_v31, %v3837_v36 }
 0x227   : > { %v3146_v15 = vpop.eup %3145  ;;  %2579 = vst [vmem:[%s3870_s20 + $0x168] sm:$0xff] %v2526_v10  ;;  %v2330_v18 = vadd.f32 1.0, %v3144_v20  ;;  %3165 = vpow2.f32 %v2795_v7  ;;  %v2773_v20 = vmul.f32 -1.442695, %v1975_v2 }
 0x228   : > { %v3148_v19 = vpop.eup %3147  ;;  %2576 = vst [vmem:[%s3870_s20 + $0x150] sm:$0xff] %v2523_v14  ;;  %v2336_v4 = vadd.f32 1.0, %v3146_v15  ;;  %3167 = vpow2.f32 %v2801_v52  ;;  %v2772_v31 = vmul.f32 -1.442695, %v1973_v47  ;;  %v2785_v14 = vmul.f32 -1.442695, %v1979_v59 }
 0x229   : > { %v3150_v63 = vpop.eup %3149  ;;  %v2527_v24 = vmul.f32 %v3268_v21, %v3148_v19  ;;  %3169 = vrcp.f32 %v2330_v18  ;;  %v3273_v18 = vld [vmem:[%s3394_s8 + $0x88] sm:$0xff]  ;;  %v3274_v19 = vld [vmem:[%s3394_s8 + $0x90] sm:$0xff] }
 0x22a   : > { %v3152_v25 = vpop.eup %3151  ;;  %v2485_v28 = vmul.f32 %v3269_v27, %v3150_v63  ;;  %3171 = vrcp.f32 %v2336_v4  ;;  %v1993_v63 = vadd.f32 %v3969_v35, %v3856_v41  ;;  %v2799_v41 = vmul.f32 -1.442695, %v3961_v29  ;;  %v3278_v29 = vld [vmem:[%s3394_s8 + $0x120] sm:$0xff]  ;;  %v3280_v47 = vld [vmem:[%s3394_s8 + $0x128] sm:$0xff] }
 0x22b   : > { %v3154_v26 = vpop.eup %3153  ;;  %2580 = vst [vmem:[%s3870_s20 + $0x170] sm:$0xff] %v2527_v24  ;;  %v2342_v33 = vadd.f32 1.0, %v3152_v25  ;;  %3173 = vpow2.f32 %v2807_v53  ;;  %v2798_v25 = vmul.f32 -1.442695, %v3956_v55 }
 0x22c   : > { %v3156_v38 = vpop.eup %3155  ;;  %2537 = vst [vmem:[%s3870_s20 + $0x20] sm:$0xff] %v2485_v28  ;;  %v2343_v34 = vadd.f32 1.0, %v3154_v26  ;;  %3175 = vpow2.f32 %v2813_v23  ;;  %v2786_v23 = vmul.f32 -1.442695, %v1981_v11  ;;  %v3275_v28 = vld [vmem:[%s3394_s8 + $0xb8] sm:$0xff] }
 0x22d   : > { %v3158_v43 = vpop.eup %3157  ;;  %v2491_v42 = vmul.f32 %v3270_v39, %v3156_v38  ;;  %3177 = vrcp.f32 %v2342_v33  ;;  %v3276_v33 = vld [vmem:[%s3394_s8 + $0xc0] sm:$0xff]  ;;  %v2811_v38 = vmul.f32 -1.442695, %v1991_v12  ;;  %v2812_v30 = vmul.f32 -1.442695, %v1993_v63 }
 0x22e   : > { %v3160_v6 = vpop.eup %3159  ;;  %3179 = vrcp.f32 %v2343_v34  ;;  %v2348_v44 = vadd.f32 1.0, %v3158_v43  ;;  %v3277_v34 = vld [vmem:[%s3394_s8 + $0xf0] sm:$0xff]  ;;  %v2151_v43 = vadd.f32 %v3987_v37, %v3837_v36  ;;  %v3285_v63 = vld [vmem:[%s3394_s8 + $0x40] sm:$0xff] }
 0x22f   : > { %v3162_v45 = vpop.eup %3161  ;;  %2543 = vst [vmem:[%s3870_s20 + $0x50] sm:$0xff] %v2491_v42  ;;  %v2349_v46 = vadd.f32 1.0, %v3160_v6  ;;  %3181 = vpow2.f32 %v2808_v62  ;;  %v2789_v6 = vmul.f32 -1.442695, %v2156_v3 }
 0x230   : > { %v3164_v1 = vpop.eup %3163  ;;  %3183 = vrcp.f32 %v2348_v44  ;;  %v2355_v48 = vadd.f32 1.0, %v3162_v45 }
 0x231   : > { %v3166_v51 = vpop.eup %3165  ;;  %3185 = vrcp.f32 %v2349_v46  ;;  %v2361_v7 = vadd.f32 1.0, %v3164_v1 }
 0x232   : > { %v3168_v52 = vpop.eup %3167  ;;  %3187 = vrcp.f32 %v2355_v48  ;;  %v2356_v54 = vadd.f32 1.0, %v3166_v51  ;;  %v2776_v48 = vmul.f32 -1.442695, %v2151_v43 }
 0x233   : > { %v3170_v58 = vpop.eup %3169  ;;  %3189 = vrcp.f32 %v2361_v7  ;;  %v2362_v5 = vadd.f32 1.0, %v3168_v52  ;;  %v2815_v52 = vmul.f32 -1.442695, %v3998_v22 }
 0x234   : > { %v3172_v40 = vpop.eup %3171  ;;  %v2486_v17 = vmul.f32 %v3271_v56, %v3170_v58  ;;  %3191 = vrcp.f32 %v2356_v54  ;;  %v2802_v56 = vmul.f32 -1.442695, %v4005_v8 }
 0x235   : > { %v3174_v16 = vpop.eup %3173  ;;  %v2492_v9 = vmul.f32 %v3272_v61, %v3172_v40  ;;  %3193 = vrcp.f32 %v2362_v5  ;;  %v3282_v5 = vld [vmem:[%s3394_s8 + $0x188] sm:$0xff]  ;;  %v3283_v61 = vld [vmem:[%s3394_s8 + $0x160] sm:$0xff] }
 0x236   : > { %v3176_v60 = vpop.eup %3175  ;;  %2538 = vst [vmem:[%s3870_s20 + $0x28] sm:$0xff] %v2486_v17  ;;  %v2368_v10 = vadd.f32 1.0, %v3174_v16  ;;  %3195 = vpow2.f32 %v2814_v57  ;;  %v3281_v57 = vld [vmem:[%s3394_s8 + $0x158] sm:$0xff] }
 0x237   : > { %v3178_v32 = vpop.eup %3177  ;;  %2544 = vst [vmem:[%s3870_s20 + $0x58] sm:$0xff] %v2492_v9  ;;  %v2374_v13 = vadd.f32 1.0, %v3176_v60  ;;  %3197 = vpow2.f32 %v2772_v31 }
 0x238   : > { %v3180_v15 = vpop.eup %3179  ;;  %v2498_v53 = vmul.f32 %v3273_v18, %v3178_v32  ;;  %3199 = vrcp.f32 %v2368_v10 }
 0x239   : > { %v3182_v50 = vpop.eup %3181  ;;  %v2499_v4 = vmul.f32 %v3274_v19, %v3180_v15  ;;  %3201 = vrcp.f32 %v2374_v13  ;;  %v3284_v19 = vld [vmem:[%s3394_s8 + $0x190] sm:$0xff] }
 0x23a   : > { %v3184_v21 = vpop.eup %3183  ;;  %2551 = vst [vmem:[%s3870_s20 + $0x88] sm:$0xff] %v2498_v53  ;;  %v2369_v24 = vadd.f32 1.0, %v3182_v50  ;;  %3203 = vpow2.f32 %v2773_v20 }
 0x23b   : > { %v3186_v27 = vpop.eup %3185  ;;  %2552 = vst [vmem:[%s3870_s20 + $0x90] sm:$0xff] %v2499_v4  ;;  %v2504_v26 = vmul.f32 %v3275_v28, %v3184_v21  ;;  %3205 = vpow2.f32 %v2785_v14 }
 0x23c   : > { %v3188_v35 = vpop.eup %3187  ;;  %v2505_v62 = vmul.f32 %v3276_v33, %v3186_v27  ;;  %3207 = vrcp.f32 %v2369_v24  ;;  %v3287_v33 = vld [vmem:[%s3394_s8 + $0xa8] sm:$0xff] }
 0x23d   : > { %v3190_v55 = vpop.eup %3189  ;;  %2557 = vst [vmem:[%s3870_s20 + $0xb8] sm:$0xff] %v2504_v26  ;;  %v2511_v0 = vmul.f32 %v3277_v34, %v3188_v35  ;;  %3209 = vpow2.f32 %v2786_v23  ;;  %v3286_v26 = vld [vmem:[%s3394_s8 + $0x48] sm:$0xff] }
 0x23e   : > { %v3192_v39 = vpop.eup %3191  ;;  %2558 = vst [vmem:[%s3870_s20 + $0xc0] sm:$0xff] %v2505_v62  ;;  %v2517_v42 = vmul.f32 %v3278_v29, %v3190_v55  ;;  %3211 = vpow2.f32 %v2798_v25 }
 0x23f   : > { %v3194_v44 = vpop.eup %3193  ;;  %2564 = vst [vmem:[%s3870_s20 + $0xf0] sm:$0xff] %v2511_v0  ;;  %v2512_v45 = vmul.f32 %v3279_v49, %v3192_v39  ;;  %3213 = vpow2.f32 %v2799_v41  ;;  %v3288_v0 = vld [vmem:[%s3394_s8 + $0xb0] sm:$0xff] }
 0x240   : > { %v3196_v46 = vpop.eup %3195  ;;  %2570 = vst [vmem:[%s3870_s20 + $0x120] sm:$0xff] %v2517_v42  ;;  %v2518_v1 = vmul.f32 %v3280_v47, %v3194_v44  ;;  %3215 = vpow2.f32 %v2811_v38  ;;  %v3289_v39 = vld [vmem:[%s3394_s8 + $0x110] sm:$0xff] }
 0x241   : > { %v3198_v36 = vpop.eup %3197  ;;  %2565 = vst [vmem:[%s3870_s20 + $0xf8] sm:$0xff] %v2512_v45  ;;  %v2375_v37 = vadd.f32 1.0, %v3196_v46  ;;  %3217 = vpow2.f32 %v2812_v30  ;;  %v3291_v45 = vld [vmem:[%s3394_s8 + $0x178] sm:$0xff] }
 0x242   : > { %v3200_v51 = vpop.eup %3199  ;;  %2571 = vst [vmem:[%s3870_s20 + $0x128] sm:$0xff] %v2518_v1  ;;  %v2333_v7 = vadd.f32 1.0, %v3198_v36  ;;  %3219 = vpow2.f32 %v2789_v6  ;;  %v3290_v6 = vld [vmem:[%s3394_s8 + $0x118] sm:$0xff]  ;;  %v3292_v1 = vld [vmem:[%s3394_s8 + $0x180] sm:$0xff] }
 0x243   : > { %v3202_v54 = vpop.eup %3201  ;;  %v2524_v2 = vmul.f32 %v3281_v57, %v3200_v51  ;;  %3221 = vrcp.f32 %v2375_v37  ;;  %v3293_v37 = vld [vmem:[%s3394_s8 + $0xc8] sm:$0xff]  ;;  %v3295_v57 = vld [vmem:[%s3394_s8 + $0x198] sm:$0xff] }
 0x244   : > { %v3204_v58 = vpop.eup %3203  ;;  %v2530_v31 = vmul.f32 %v3282_v5, %v3202_v54  ;;  %3223 = vrcp.f32 %v2333_v7  ;;  %v3296_v5 = vld [vmem:[%s3394_s8 + $0x130] sm:$0xff] }
 0x245   : > { %v3206_v59 = vpop.eup %3205  ;;  %2577 = vst [vmem:[%s3870_s20 + $0x158] sm:$0xff] %v2524_v2  ;;  %v2334_v40 = vadd.f32 1.0, %v3204_v58  ;;  %3225 = vpow2.f32 %v2776_v48 }
 0x246   : > { %v3208_v17 = vpop.eup %3207  ;;  %2583 = vst [vmem:[%s3870_s20 + $0x188] sm:$0xff] %v2530_v31  ;;  %v2346_v16 = vadd.f32 1.0, %v3206_v59  ;;  %3227 = vpow2.f32 %v2815_v52  ;;  %v3294_v52 = vld [vmem:[%s3394_s8 + $0x60] sm:$0xff] }
 0x247   : > { %v3210_v22 = vpop.eup %3209  ;;  %v2525_v9 = vmul.f32 %v3283_v61, %v3208_v17  ;;  %3229 = vrcp.f32 %v2334_v40 }
 0x248   : > { %v3212_v11 = vpop.eup %3211  ;;  %3231 = vrcp.f32 %v2346_v16  ;;  %v2347_v60 = vadd.f32 1.0, %v3210_v22 }
 0x249   : > { %v3214_v10 = vpop.eup %3213  ;;  %2578 = vst [vmem:[%s3870_s20 + $0x160] sm:$0xff] %v2525_v9  ;;  %v2359_v20 = vadd.f32 1.0, %v3212_v11  ;;  %3233 = vpow2.f32 %v2802_v56 }
 0x24a   : > { %v3216_v32 = vpop.eup %3215  ;;  %3235 = vrcp.f32 %v2347_v60  ;;  %v2360_v8 = vadd.f32 1.0, %v3214_v10 }
 0x24b   : > { %v3218_v13 = vpop.eup %3217  ;;  %3237 = vrcp.f32 %v2359_v20  ;;  %v2372_v14 = vadd.f32 1.0, %v3216_v32 }
 0x24c   : > { %v3220_v15 = vpop.eup %3219  ;;  %3239 = vrcp.f32 %v2360_v8  ;;  %v2373_v18 = vadd.f32 1.0, %v3218_v13 }
 0x24d   : > { %v3222_v53 = vpop.eup %3221  ;;  %3241 = vrcp.f32 %v2372_v14  ;;  %v2350_v12 = vadd.f32 1.0, %v3220_v15 }
 0x24e   : > { %v3224_v50 = vpop.eup %3223  ;;  %v2531_v4 = vmul.f32 %v3284_v19, %v3222_v53  ;;  %3243 = vrcp.f32 %v2373_v18 }
 0x24f   : > { %v3226_v23 = vpop.eup %3225  ;;  %v2489_v21 = vmul.f32 %v3285_v63, %v3224_v50  ;;  %3245 = vrcp.f32 %v2350_v12 }
 0x250   : > { %v3228_v24 = vpop.eup %3227  ;;  %2584 = vst [vmem:[%s3870_s20 + $0x190] sm:$0xff] %v2531_v4  ;;  %v2337_v25 = vadd.f32 1.0, %v3226_v23 }
 0x251   : > { %v3230_v3 = vpop.eup %3229  ;;  %2541 = vst [vmem:[%s3870_s20 + $0x40] sm:$0xff] %v2489_v21  ;;  %v2376_v27 = vadd.f32 1.0, %v3228_v24 }
 0x252   : > { %v3232_v28 = vpop.eup %3231  ;;  %v2490_v41 = vmul.f32 %v3286_v26, %v3230_v3  ;;  %3247 = vrcp.f32 %v2337_v25 }
 0x253   : > { %v3234_v35 = vpop.eup %3233  ;;  %v2502_v62 = vmul.f32 %v3287_v33, %v3232_v28  ;;  %3249 = vrcp.f32 %v2376_v27 }
 0x254   : > { %v3236_v38 = vpop.eup %3235  ;;  %2542 = vst [vmem:[%s3870_s20 + $0x48] sm:$0xff] %v2490_v41  ;;  %v2363_v55 = vadd.f32 1.0, %v3234_v35 }
 0x255   : > { %v3238_v34 = vpop.eup %3237  ;;  %2555 = vst [vmem:[%s3870_s20 + $0xa8] sm:$0xff] %v2502_v62  ;;  %v2503_v30 = vmul.f32 %v3288_v0, %v3236_v38 }
 0x256   : > { %v3240_v43 = vpop.eup %3239  ;;  %v2515_v29 = vmul.f32 %v3289_v39, %v3238_v34  ;;  %3251 = vrcp.f32 %v2363_v55 }
 0x257   : > { %v3242_v42 = vpop.eup %3241  ;;  %2556 = vst [vmem:[%s3870_s20 + $0xb0] sm:$0xff] %v2503_v30  ;;  %v2516_v44 = vmul.f32 %v3290_v6, %v3240_v43 }
 0x258   : > { %v3244_v49 = vpop.eup %3243  ;;  %2568 = vst [vmem:[%s3870_s20 + $0x110] sm:$0xff] %v2515_v29  ;;  %v2528_v46 = vmul.f32 %v3291_v45, %v3242_v42 }
 0x259   : > { %v3246_v47 = vpop.eup %3245  ;;  %2569 = vst [vmem:[%s3870_s20 + $0x118] sm:$0xff] %v2516_v44  ;;  %v2529_v36 = vmul.f32 %v3292_v1, %v3244_v49 }
 0x25a   : > { %2581 = vst [vmem:[%s3870_s20 + $0x178] sm:$0xff] %v2528_v46  ;;  %v2506_v48 = vmul.f32 %v3293_v37, %v3246_v47 }
 0x25b   : > { %2582 = vst [vmem:[%s3870_s20 + $0x180] sm:$0xff] %v2529_v36 }
 0x25c   : > { %v3248_v51 = vpop.eup %3247  ;;  %2559 = vst.msk [vmem:[%s3870_s20 + $0xc8] sm:$0xff] %vm2545_vm7, %v2506_v48 }
 0x25d   : > { %v3250_v7 = vpop.eup %3249  ;;  %v2493_v54 = vmul.f32 %v3294_v52, %v3248_v51 }
 0x25e   : > { %v2532_v2 = vmul.f32 %v3295_v57, %v3250_v7 }
 0x25f   : > { %2546 = vst.msk [vmem:[%s3870_s20 + $0x60] sm:$0xff] %vm2545_vm7, %v2493_v54 }
 0x260   : > { %v3252_v58 = vpop.eup %3251  ;;  %2585 = vst.msk [vmem:[%s3870_s20 + $0x198] sm:$0xff] %vm2545_vm7, %v2532_v2 }
 0x261   : > { %v2519_v31 = vmul.f32 %v3296_v5, %v3252_v58 }
 0x263   : > { %2572 = vst.msk [vmem:[%s3870_s20 + $0x130] sm:$0xff] %vm2545_vm7, %v2519_v31 }
 0x264 PF: > { %s17_s26 = sadd.s32 1, %s3319_s26   ;;  %s4118_s24 = smov %s3315_s25 }
 0x265   : > { %p14_p5 = scmp.ge.s32.totalorder %s17_s26, 4   ;;  %s4119_s25 = smov %s4121_s27 }
 0x267   :  { %16 = sbr.rel (!%p14_p5) target bundleno = 2 (0x2), region = 84 }

// kernel: esa_forward_pallas.2
= control target key start
LH: loop header
LB: loop body
LE: loop exit
PB: predicated region body
PF: predicated region fallthrough
CT: control target
= control target key end

     0   :  { %s16008_s0 = inlined_call_operand.hbm [shape: f32[2,1280,40], index: 0, kind: input, shape index: {}]   ;;  %s16009_s1 = inlined_call_operand.hbm [shape: f32[3,152,1280], index: 1, kind: input, shape index: {}]   ;;  %s16010_s2 = inlined_call_operand.vmem [shape: f32[152,1], index: 2, kind: input, shape index: {}]   ;;  %s16011_s3 = inlined_call_operand.hbm [shape: f32[3,40,40], index: 3, kind: input, shape index: {}]   ;;  %s16012_s4 = inlined_call_operand.vmem [shape: f32[40,1], index: 4, kind: input, shape index: {}]   ;;  %s16013_s5 = inlined_call_operand.hbm [shape: f32[3,40,40], index: 5, kind: input, shape index: {}]   ;;  %s16014_s6 = inlined_call_operand.vmem [shape: f32[40,1], index: 6, kind: input, shape index: {}]   ;;  %s16015_s7 = inlined_call_operand.hbm [shape: f32[3,40,40], index: 7, kind: input, shape index: {}]   ;;  %s16016_s8 = inlined_call_operand.vmem [shape: f32[40,1], index: 8, kind: input, shape index: {}]   ;;  %s16017_s9 = inlined_call_operand.vmem [shape: f32[2,40,5], index: 9, kind: output, shape index: {}]  }
   0x1   :  { %16070 = sst [smem:[#allocation51_spill]] %s16016_s8 }
   0x2   :  { %16071 = sst [smem:[#allocation52_spill]] %s16017_s9 }
   0x3   :  { %14 = vsyncpa [#allocation3], 0 }
   0x4   :  { %16 = vsyncpa [#allocation3 + $0x1], 0 }
   0x5   :  { %17 = vsyncpa [#allocation5], 0 }
   0x6   :  { %18 = vsyncpa [#allocation8], 0  ;;  %s13197_s30 = smov 0   ;;  %s13199_s10 = smov 0  }
   0x7   :  { %s13201_s11 = smov 0   ;;  %s13203_s12 = smov 0  }
   0x8 LB: > { %s13216_s13 = sadd.s32 4294967295, %s13129_s12   ;;  %p44_p0 = scmp.ne.s32.totalorder %s13121_s10, %s13117_s30  ;;  %s13129_s12 = sphi %s13203_s12, %s16194_s12   ;;  %s13125_s11 = sphi %s13201_s11, %s16193_s11   ;;  %s13121_s10 = sphi %s13199_s10, %s16192_s10   ;;  %s13117_s30 = sphi %s13197_s30, %s16191_s30  }
   0x9   : > { %p16018_p1 = scmp.eq.s32.totalorder %s13216_s13, 0  ;;  %p10565_p2 = scmp.ge.s32.totalorder %s13129_s12, 1 }
   0xa   : > { %p249_p3 = scmp.lt.s32.totalorder %s13129_s12, 3  ;;  %s13131_s16 = smov [#allocation4]  }
   0xb   : > { %p13224_p4 = por %p16018_p1, %p44_p0  ;;  %s261_s17 = sshll.u32 %s13131_s16, 4  ;;  %s262_s17 = int_to_ptr.vmem [resolvable:$true] %s261_s17 }
   0xc   : > { %p13228_p5 = pnand %p10565_p2, %p249_p3  ;;  %s13132_s19 = smov [#allocation7]  }
   0xd   : > { %s16072_s14 = scalar_select %p13224_p4, 1, 0 }
   0xe   : > { %s16073_s15 = scalar_select %p13228_p5, 1, 0 }
   0xf   : > { %p12870_p6 = pneg %p13228_p5  ;;  %s293_s20 = sshll.u32 %s13132_s19, 4  ;;  %s294_s20 = int_to_ptr.vmem [resolvable:$true] %s293_s20 }
  0x10   : > { %s12945_s23 = scalar_lea.hbm %s16009_s1, 72960 }
  0x11   : > { %p13236_p7 = pnand %p12870_p6, %p16018_p1  ;;  %p12946_p8 = scmp.ne.s32.totalorder %s16009_s1, %s12945_s23 }
  0x12   : > { %p12952_p12 = scmp.lt.u32.totalorder %s12945_s23, %s16009_s1 }
  0x13   : > { %p13248_p9 = pneg %p13236_p7 }
  0x15   : > { %p12948_p10 = pnand %p13248_p9, %p12946_p8 }
  0x17   : > { %p12949_p11 = pneg %p12948_p10 }
  0x19   : > { %p12954_p13 = pnand %p12952_p12, %p12949_p11 }
  0x1b   : > { %12957 = shalt.err (!%p12954_p13)
}
  0x1c   : > { %s12958_s29 = scalar_lea.vmem %s262_s17, 72960  ;;  %p12966_p6 = scmp.lt.s32.totalorder %s262_s17, %s262_s17 }
  0x1d   : > { %p12959_p0 = scmp.ne.s32.totalorder %s262_s17, %s12958_s29  ;;  %p12967_p1 = scmp.lt.s32.totalorder %s12958_s29, %s12958_s29 }
  0x1f   : > { %p12961_p2 = pnand %p12959_p0, %p13248_p9  ;;  %p12968_p4 = por %p12967_p1, %p12966_p6 }
  0x21   : > { %p12962_p3 = pneg %p12961_p2 }
  0x23   : > { %p12969_p5 = pnand %p12968_p4, %p12962_p3 }
  0x25   : > { %12972 = shalt.err (!%p12969_p5)
}
  0x26   : > { %s13133_s30 = smov 1280   ;;  %s13134_s16 = smov 80  }
  0x27   : > { %12873 = dma.hbm_to_vmem [thread:$0]  (!%p13236_p7), %s16009_s1, 72960, %s262_s17, [#allocation5], %s13133_s30, %s13133_s30, %s13134_s16  }
  0x28   : > { %s13135_s22 = smov [#allocation6]   ;;  %s12973_s27 = scalar_lea.hbm %s16013_s5, 1920 }
  0x29   : > { %s277_s23 = sshll.u32 %s13135_s22, 4  ;;  %p12974_p1 = scmp.ne.s32.totalorder %s16013_s5, %s12973_s27  ;;  %s278_s23 = int_to_ptr.vmem [resolvable:$true] %s277_s23 }
  0x2a   : > { %p12980_p8 = scmp.lt.u32.totalorder %s12973_s27, %s16013_s5 }
  0x2b   : > { %p12976_p4 = pnand %p12974_p1, %p13248_p9 }
  0x2d   : > { %p12977_p5 = pneg %p12976_p4 }
  0x2f   : > { %p12982_p10 = pnand %p12980_p8, %p12977_p5 }
  0x31   : > { %12985 = shalt.err (!%p12982_p10)
}
  0x32   : > { %s12986_s17 = scalar_lea.vmem %s294_s20, 1920  ;;  %p12994_p0 = scmp.lt.s32.totalorder %s294_s20, %s294_s20 }
  0x33   : > { %p12987_p11 = scmp.ne.s32.totalorder %s294_s20, %s12986_s17  ;;  %p12995_p2 = scmp.lt.s32.totalorder %s12986_s17, %s12986_s17 }
  0x35   : > { %p12989_p12 = pnand %p12987_p11, %p13248_p9  ;;  %p12996_p3 = por %p12995_p2, %p12994_p0 }
  0x37   : > { %p12990_p13 = pneg %p12989_p12 }
  0x39   : > { %p12997_p6 = pnand %p12996_p3, %p12990_p13 }
  0x3b   : > { %13000 = shalt.err (!%p12997_p6)
}
  0x3c   : > { %s13136_s30 = smov 128   ;;  %s13137_s16 = smov 8  }
  0x3d   : > { %12879 = dma.hbm_to_vmem [thread:$0]  (!%p13236_p7), %s16013_s5, 1920, %s294_s20, [#allocation8], %s13136_s30, %s13136_s30, %s13137_s16  }
  0x3e   : > { %s13001_s22 = scalar_lea.hbm %s16011_s3, 1920 }
  0x3f   : > { %p13002_p1 = scmp.ne.s32.totalorder %s16011_s3, %s13001_s22  ;;  %p13008_p8 = scmp.lt.u32.totalorder %s13001_s22, %s16011_s3 }
  0x41   : > { %p13004_p4 = pnand %p13002_p1, %p13248_p9 }
  0x43   : > { %p13005_p5 = pneg %p13004_p4 }
  0x45   : > { %p13010_p10 = pnand %p13008_p8, %p13005_p5 }
  0x47   : > { %13013 = shalt.err (!%p13010_p10)
}
  0x48   : > { %s13014_s29 = scalar_lea.vmem %s278_s23, 1920  ;;  %p13022_p0 = scmp.lt.s32.totalorder %s278_s23, %s278_s23 }
  0x49   : > { %p13015_p11 = scmp.ne.s32.totalorder %s278_s23, %s13014_s29  ;;  %p13023_p2 = scmp.lt.s32.totalorder %s13014_s29, %s13014_s29 }
  0x4b   : > { %p13017_p12 = pnand %p13015_p11, %p13248_p9  ;;  %p13024_p3 = por %p13023_p2, %p13022_p0 }
  0x4d   : > { %p13018_p13 = pneg %p13017_p12 }
  0x4f   : > { %p13025_p6 = pnand %p13024_p3, %p13018_p13 }
  0x51   : > { %13028 = shalt.err (!%p13025_p6)
}
  0x52   : > { %12876 = dma.hbm_to_vmem [thread:$0]  (!%p13236_p7), %s16011_s3, 1920, %s278_s23, [#allocation5], %s13136_s30, %s13136_s30, %s13137_s16  }
  0x53   : > { %s13138_s8 = smov [#allocation9]   ;;  %s13029_s22 = scalar_lea.hbm %s16015_s7, 1920 }
  0x54   : > { %s309_s9 = sshll.u32 %s13138_s8, 4  ;;  %p13030_p1 = scmp.ne.s32.totalorder %s16015_s7, %s13029_s22  ;;  %s310_s9 = int_to_ptr.vmem [resolvable:$true] %s309_s9 }
  0x55   : > { %p13036_p8 = scmp.lt.u32.totalorder %s13029_s22, %s16015_s7 }
  0x56   : > { %p13032_p4 = pnand %p13030_p1, %p13248_p9 }
  0x58   : > { %p13033_p5 = pneg %p13032_p4 }
  0x5a   : > { %p13038_p10 = pnand %p13036_p8, %p13033_p5 }
  0x5c   : > { %13041 = shalt.err (!%p13038_p10)
}
  0x5d   : > { %s13042_s23 = scalar_lea.vmem %s310_s9, 1920  ;;  %p13050_p0 = scmp.lt.s32.totalorder %s310_s9, %s310_s9 }
  0x5e   : > { %p13043_p11 = scmp.ne.s32.totalorder %s310_s9, %s13042_s23  ;;  %p13051_p2 = scmp.lt.s32.totalorder %s13042_s23, %s13042_s23 }
  0x60   : > { %p13045_p12 = pnand %p13043_p11, %p13248_p9  ;;  %p13052_p3 = por %p13051_p2, %p13050_p0 }
  0x62   : > { %p13046_p13 = pneg %p13045_p12 }
  0x64   : > { %p13053_p6 = pnand %p13052_p3, %p13046_p13 }
  0x66   : > { %13056 = shalt.err (!%p13053_p6)
}
  0x67   : > { %12882 = dma.hbm_to_vmem [thread:$0]  (!%p13236_p7), %s16015_s7, 1920, %s310_s9, [#allocation8], %s13136_s30, %s13136_s30, %s13137_s16  }
  0x68   : > { %s13328_s26 = sadd.s32 1, %s13129_s12   ;;  %s31_s18 = sadd.s32 1, %s13125_s11 }
  0x69   : > { %s28_s17 = ssub.s32 %s13129_s12, %s13328_s26  ;;  %p38_p9 = scmp.ne.s32.totalorder %s13125_s11, %s13121_s10 }
  0x6a   : > { %p29_p1 = scmp.eq.s32.totalorder %s28_s17, 0  ;;  %p39_p4 = scmp.eq.s32.totalorder %s13129_s12, 0 }
  0x6b   : > { %p12891_p5 = scmp.lt.s32.totalorder %s13129_s12, 2  ;;  %s326_s8 = sand.u32 1, %s13125_s11  }
  0x6c   : > { %s13339_s19 = scalar_select %p29_p1, %s13125_s11, %s31_s18  }
  0x6d   : > { %p40_p8 = por %p39_p4, %p38_p9  ;;  %s12848_s21 = smul.u32 1280, %s326_s8 }
  0x6e   : > { %s12849_s22 = smul.u32 20480, %s13129_s12  ;;  %s13353_s12 = scalar_lea.sflag [#allocation3], %s326_s8 }
  0x6f   : > { %p13342_p10 = pnand %p12891_p5, %p40_p8  ;;  %s330_s28 = scalar_lea.vmem [#allocation2], %s12848_s21 }
  0x70   : > { %s13349_s27 = scalar_lea.hbm %s16008_s0, %s12849_s22  ;;  %s337_s23 = sshll.u32 %s330_s28, 4  ;;  %s13351_s23 = int_to_ptr.vmem [resolvable:$true] %s337_s23 }
  0x71   : > { %s13057_s29 = scalar_lea.hbm %s13349_s27, 20480  ;;  %p13059_p11 = pneg %p13342_p10 }
  0x72   : > { %p13058_p7 = scmp.ne.s32.totalorder %s13349_s27, %s13057_s29  ;;  %s13062_s17 = scalar_lea.hbm %s16008_s0, 40960 }
  0x73   : > { %p13063_p0 = scmp.lt.u32.totalorder %s13349_s27, %s16008_s0  ;;  %p13064_p2 = scmp.lt.u32.totalorder %s13062_s17, %s13057_s29 }
  0x74   : > { %p13060_p12 = pnand %p13059_p11, %p13058_p7  ;;  %p13066_p6 = scmp.lt.u32.totalorder %s13057_s29, %s13349_s27 }
  0x75   : > { %p13065_p3 = por %p13064_p2, %p13063_p0 }
  0x76   : > { %p13061_p13 = pneg %p13060_p12 }
  0x77   : > { %p13067_p9 = por %p13066_p6, %p13065_p3 }
  0x79   : > { %p13068_p1 = pnand %p13067_p9, %p13061_p13 }
  0x7b   : > { %13071 = shalt.err (!%p13068_p1)
}
  0x7c   : > { %s13072_s8 = scalar_lea.vmem %s13351_s23, 20480  ;;  %s13139_s21 = smov [#allocation2]  }
  0x7d   : > { %p13073_p4 = scmp.ne.s32.totalorder %s13351_s23, %s13072_s8  ;;  %s13077_s25 = sshll.u32 %s13139_s21, 4  ;;  %s13078_s25 = int_to_ptr.vmem [resolvable:$false] %s13077_s25 }
  0x7e   : > { %s13079_s28 = scalar_lea.vmem %s13078_s25, 40960  ;;  %p13080_p7 = scmp.lt.s32.totalorder %s13351_s23, %s13078_s25 }
  0x7f   : > { %p13075_p5 = pnand %p13073_p4, %p13059_p11  ;;  %p13081_p12 = scmp.lt.s32.totalorder %s13079_s28, %s13072_s8 }
  0x81   : > { %p13076_p8 = pneg %p13075_p5  ;;  %p13082_p0 = por %p13081_p12, %p13080_p7 }
  0x83   : > { %p13083_p2 = pnand %p13082_p0, %p13076_p8 }
  0x85   : > { %13086 = shalt.err (!%p13083_p2)
}
  0x86   : > { %12886 = dma.hbm_to_vmem [thread:$0]  (!%p13342_p10), %s13349_s27, 20480, %s13351_s23, %s13353_s12, %s13136_s30, %s13136_s30, %s13137_s16  }
  0x87   : > { %p16077_p11 = scmp.ne.s32.totalorder %s16073_s15, 0 }
  0x89   : > { %349 = sbr.rel (%p16077_p11) target bundleno = 3955 (0xf73), region = 56 }
  0x90   : > { %s351_s29 = sand.u32 1, %s13121_s10   ;;  %p16078_p13 = scmp.ne.s32.totalorder %s16072_s14, 0 }
  0x91   : > { %s12850_s20 = smul.u32 1280, %s351_s29  ;;  %s352_s18 = scalar_lea.sflag [#allocation3], %s351_s29 }
  0x93   : > { %s13387_s17 = scalar_lea.vmem [#allocation2], %s12850_s20 }
  0x94   : > { %13104 = dma.done.wait (%p16078_p13), %s352_s18, 20480  }
  0x95   : > { %13106 = vsyncadd (%p16078_p13), %s352_s18, 4294946816  ;;  %p16079_p3 = scmp.eq.s32.totalorder %s13216_s13, 0 }
  0x97   : > { %13108 = dma.done.wait (%p16079_p3), [#allocation5], 74880   ;;  %p16080_p10 = pmov %p16079_p3 }
  0x98   : > { %p16081_p6 = pmov %p16079_p3 }
  0x99   : > { %13110 = vsyncadd (%p16080_p10), [#allocation5], 4294892416 }
  0x9a   : > { %13112 = dma.done.wait (%p16081_p6), [#allocation8], 3840   ;;  %p16082_p9 = pmov %p16079_p3 }
  0x9b   : > { %v16034_v0 = vmov 0.0|0.0   ;;  %v411_v1 = vld [vmem:[%s13387_s17] sm:$0xff]  ;;  %v412_v2 = vld [vmem:[%s13387_s17 + $0x8] sm:$0xff]  ;;  %v413_v3 = vld [vmem:[%s13387_s17 + $0x10] sm:$0xff]  ;;  %vm13144_vm14 = vmmov 0   ;;  %vm2592_vm15 = vcmask 326656  }
  0x9c   : > { %13114 = vsyncadd (%p16082_p9), [#allocation8], 4294963456  ;;  %11598 = vmatprep.subr.bf16.mxu0 %v16034_v0  ;;  %11838 = vmatprep.subr.bf16.mxu1 %v16034_v0  ;;  %v13406_v4 = vpack.c.bf16 %v412_v2, %v411_v1  ;;  %v414_v5 = vld [vmem:[%s13387_s17 + $0x18] sm:$0xff]  ;;  %v415_v7 = vld [vmem:[%s13387_s17 + $0x20] sm:$0xff]  ;;  %s16185_s18 = sld [smem:[#allocation51_spill]]  ;;  %p406_p1 = scmp.lt.s32.totalorder %s13216_s13, 1 }
  0x9d   : > { %v13411_v6 = vpack.c.bf16 %v414_v5, %v413_v3  ;;  %v416_v8 = vld [vmem:[%s13387_s17 + $0x28] sm:$0xff]  ;;  %v417_v10 = vld [vmem:[%s13387_s17 + $0x30] sm:$0xff]  ;;  %v418_v11 = vld [vmem:[%s13387_s17 + $0x38] sm:$0xff]  ;;  %s16190_s15 = sld [smem:[#allocation52_spill]] }
  0x9e   : > { %11600 = vmatpush1.bf16.msra.mxu0 %v13406_v4  ;;  %11840 = vmatpush1.bf16.msra.mxu1 %v13406_v4  ;;  %v13419_v9 = vpack.c.bf16 %v416_v8, %v415_v7  ;;  %v572_v12 = vld [vmem:[#allocation4 + $0x8] sm:$0xff]  ;;  %v13427_v13 = vpack.c.bf16 %v418_v11, %v417_v10  ;;  %v1587_v14 = vld [vmem:[#allocation4 + $0x5f8] sm:$0xff]  ;;  %v419_v15 = vld [vmem:[%s13387_s17 + $0x40] sm:$0xff]  ;;  %s16196_s13 = smov (!%p406_p1, %s13216_s13), 1 }
  0x9f   : > { %11601 = vmatprep.subr.bf16.mxu0 %v16034_v0  ;;  %11841 = vmatprep.subr.bf16.mxu1 %v16034_v0  ;;  %v420_v16 = vld [vmem:[%s13387_s17 + $0x48] sm:$0xff]  ;;  %v421_v18 = vld [vmem:[%s13387_s17 + $0x50] sm:$0xff]  ;;  %v422_v19 = vld [vmem:[%s13387_s17 + $0x58] sm:$0xff]  ;;  %s12851_s20 = smul.u32 40, %s16196_s13 }
  0xa0   : > { %825 = vmatprep.mubr.f32.mxu0 %v572_v12  ;;  %1840 = vmatprep.mubr.f32.mxu1 %v1587_v14  ;;  %v13435_v17 = vpack.c.bf16 %v420_v16, %v419_v15  ;;  %v13443_v20 = vpack.c.bf16 %v422_v19, %v421_v18  ;;  %v423_v21 = vld [vmem:[%s13387_s17 + $0x60] sm:$0xff]  ;;  %v424_v22 = vld [vmem:[%s13387_s17 + $0x68] sm:$0xff]  ;;  %v425_v24 = vld [vmem:[%s13387_s17 + $0x70] sm:$0xff] }
  0xa1   : > { %v13451_v23 = vpack.c.bf16 %v424_v22, %v423_v21  ;;  %v426_v25 = vld [vmem:[%s13387_s17 + $0x78] sm:$0xff]  ;;  %v427_v27 = vld [vmem:[%s13387_s17 + $0x80] sm:$0xff]  ;;  %v428_v28 = vld [vmem:[%s13387_s17 + $0x88] sm:$0xff] }
  0xa2   : > { %11603 = vmatpush1.bf16.msra.mxu0 %v13411_v6  ;;  %11843 = vmatpush1.bf16.msra.mxu1 %v13411_v6  ;;  %v13459_v26 = vpack.c.bf16 %v426_v25, %v425_v24  ;;  %v13467_v29 = vpack.c.bf16 %v428_v28, %v427_v27  ;;  %v429_v30 = vld [vmem:[%s13387_s17 + $0x90] sm:$0xff]  ;;  %v430_v31 = vld [vmem:[%s13387_s17 + $0x98] sm:$0xff]  ;;  %v431_v33 = vld [vmem:[%s13387_s17 + $0xa0] sm:$0xff] }
  0xa3   : > { %11604 = vmatprep.subr.bf16.mxu0 %v16034_v0  ;;  %11844 = vmatprep.subr.bf16.mxu1 %v16034_v0  ;;  %v13475_v32 = vpack.c.bf16 %v430_v31, %v429_v30  ;;  %v432_v34 = vld [vmem:[%s13387_s17 + $0xa8] sm:$0xff]  ;;  %v433_v36 = vld [vmem:[%s13387_s17 + $0xb0] sm:$0xff]  ;;  %v434_v37 = vld [vmem:[%s13387_s17 + $0xb8] sm:$0xff]  ;;  %s15983_s30 = scalar_lea.vmem %s16190_s15, %s12851_s20 }
  0xa4   : > { %v13483_v35 = vpack.c.bf16 %v432_v34, %v431_v33  ;;  %v13491_v38 = vpack.c.bf16 %v434_v37, %v433_v36  ;;  %v435_v39 = vld [vmem:[%s13387_s17 + $0xc0] sm:$0xff]  ;;  %v436_v40 = vld [vmem:[%s13387_s17 + $0xc8] sm:$0xff]  ;;  %v437_v42 = vld [vmem:[%s13387_s17 + $0xd0] sm:$0xff] }
  0xa5   : > { %v13499_v41 = vpack.c.bf16 %v436_v40, %v435_v39  ;;  %v438_v43 = vld [vmem:[%s13387_s17 + $0xd8] sm:$0xff]  ;;  %v439_v45 = vld [vmem:[%s13387_s17 + $0xe0] sm:$0xff]  ;;  %v440_v46 = vld [vmem:[%s13387_s17 + $0xe8] sm:$0xff] }
  0xa6   : > { %11606 = vmatpush1.bf16.msra.mxu0 %v13419_v9  ;;  %11846 = vmatpush1.bf16.msra.mxu1 %v13419_v9  ;;  %v13507_v44 = vpack.c.bf16 %v438_v43, %v437_v42  ;;  %v13515_v47 = vpack.c.bf16 %v440_v46, %v439_v45  ;;  %v441_v48 = vld [vmem:[%s13387_s17 + $0xf0] sm:$0xff]  ;;  %v442_v49 = vld [vmem:[%s13387_s17 + $0xf8] sm:$0xff]  ;;  %v443_v51 = vld [vmem:[%s13387_s17 + $0x100] sm:$0xff] }
  0xa7   : > { %11607 = vmatprep.subr.bf16.mxu0 %v16034_v0  ;;  %11847 = vmatprep.subr.bf16.mxu1 %v16034_v0  ;;  %v13523_v50 = vpack.c.bf16 %v442_v49, %v441_v48  ;;  %v444_v52 = vld [vmem:[%s13387_s17 + $0x108] sm:$0xff]  ;;  %v571_v53 = vld [vmem:[#allocation4] sm:$0xff]  ;;  %v1586_v54 = vld [vmem:[#allocation4 + $0x5f0] sm:$0xff] }
  0xa8   : > { %v582_v55 = vld [vmem:[#allocation4 + $0x58] sm:$0xff]  ;;  %v1597_v56 = vld [vmem:[#allocation4 + $0x648] sm:$0xff]  ;;  %v13533_v57 = vpack.c.bf16 %v444_v52, %v443_v51  ;;  %v445_v58 = vld [vmem:[%s13387_s17 + $0x110] sm:$0xff] }
  0xa9   : > { %v446_v59 = vld [vmem:[%s13387_s17 + $0x118] sm:$0xff]  ;;  %v581_v60 = vld [vmem:[#allocation4 + $0x50] sm:$0xff]  ;;  %v1596_v61 = vld [vmem:[#allocation4 + $0x640] sm:$0xff] }
  0xaa   : > { %11609 = vmatpush1.bf16.msra.mxu0 %v13427_v13  ;;  %11849 = vmatpush1.bf16.msra.mxu1 %v13427_v13  ;;  %v592_v62 = vld [vmem:[#allocation4 + $0xa8] sm:$0xff]  ;;  %v1607_v63 = vld [vmem:[#allocation4 + $0x698] sm:$0xff]  ;;  %v13539_v1 = vpack.c.bf16 %v446_v59, %v445_v58  ;;  %v447_v2 = vld [vmem:[%s13387_s17 + $0x120] sm:$0xff] }
  0xab   : > { %11610 = vmatprep.subr.bf16.mxu0 %v16034_v0  ;;  %11850 = vmatprep.subr.bf16.mxu1 %v16034_v0  ;;  %v448_v3 = vld [vmem:[%s13387_s17 + $0x128] sm:$0xff]  ;;  %v591_v5 = vld [vmem:[#allocation4 + $0xa0] sm:$0xff]  ;;  %v1606_v7 = vld [vmem:[#allocation4 + $0x690] sm:$0xff] }
  0xac   : > { %v602_v8 = vld [vmem:[#allocation4 + $0xf8] sm:$0xff]  ;;  %v1617_v10 = vld [vmem:[#allocation4 + $0x6e8] sm:$0xff]  ;;  %v13547_v11 = vpack.c.bf16 %v448_v3, %v447_v2  ;;  %v449_v12 = vld [vmem:[%s13387_s17 + $0x130] sm:$0xff] }
  0xad   : > { %v450_v14 = vld [vmem:[%s13387_s17 + $0x138] sm:$0xff]  ;;  %v601_v15 = vld [vmem:[#allocation4 + $0xf0] sm:$0xff]  ;;  %v1616_v16 = vld [vmem:[#allocation4 + $0x6e0] sm:$0xff] }
  0xae   : > { %11612 = vmatpush1.bf16.msra.mxu0 %v13435_v17  ;;  %11852 = vmatpush1.bf16.msra.mxu1 %v13435_v17  ;;  %v612_v18 = vld [vmem:[#allocation4 + $0x148] sm:$0xff]  ;;  %v1627_v19 = vld [vmem:[#allocation4 + $0x738] sm:$0xff]  ;;  %v13555_v21 = vpack.c.bf16 %v450_v14, %v449_v12  ;;  %v451_v22 = vld [vmem:[%s13387_s17 + $0x140] sm:$0xff] }
  0xaf   : > { %11613 = vmatprep.subr.bf16.mxu0 %v16034_v0  ;;  %11853 = vmatprep.subr.bf16.mxu1 %v16034_v0  ;;  %v452_v24 = vld [vmem:[%s13387_s17 + $0x148] sm:$0xff]  ;;  %v611_v25 = vld [vmem:[#allocation4 + $0x140] sm:$0xff]  ;;  %v1626_v27 = vld [vmem:[#allocation4 + $0x730] sm:$0xff] }
  0xb0   : > { %v622_v28 = vld [vmem:[#allocation4 + $0x198] sm:$0xff]  ;;  %v1637_v30 = vld [vmem:[#allocation4 + $0x788] sm:$0xff]  ;;  %v13563_v31 = vpack.c.bf16 %v452_v24, %v451_v22  ;;  %v453_v33 = vld [vmem:[%s13387_s17 + $0x150] sm:$0xff] }
  0xb1   : > { %v454_v34 = vld [vmem:[%s13387_s17 + $0x158] sm:$0xff]  ;;  %v621_v36 = vld [vmem:[#allocation4 + $0x190] sm:$0xff]  ;;  %v1636_v37 = vld [vmem:[#allocation4 + $0x780] sm:$0xff] }
  0xb2   : > { %11615 = vmatpush1.bf16.msra.mxu0 %v13443_v20  ;;  %11855 = vmatpush1.bf16.msra.mxu1 %v13443_v20  ;;  %v632_v39 = vld [vmem:[#allocation4 + $0x1e8] sm:$0xff]  ;;  %v1647_v40 = vld [vmem:[#allocation4 + $0x7d8] sm:$0xff]  ;;  %v13571_v42 = vpack.c.bf16 %v454_v34, %v453_v33  ;;  %v455_v43 = vld [vmem:[%s13387_s17 + $0x160] sm:$0xff] }
  0xb3   : > { %11616 = vmatprep.subr.bf16.mxu0 %v16034_v0  ;;  %11856 = vmatprep.subr.bf16.mxu1 %v16034_v0  ;;  %v456_v45 = vld [vmem:[%s13387_s17 + $0x168] sm:$0xff]  ;;  %v631_v46 = vld [vmem:[#allocation4 + $0x1e0] sm:$0xff]  ;;  %v1646_v48 = vld [vmem:[#allocation4 + $0x7d0] sm:$0xff] }
  0xb4   : > { %v642_v49 = vld [vmem:[#allocation4 + $0x238] sm:$0xff]  ;;  %v1657_v51 = vld [vmem:[#allocation4 + $0x828] sm:$0xff]  ;;  %v13579_v52 = vpack.c.bf16 %v456_v45, %v455_v43  ;;  %v1666_v2 = vld [vmem:[#allocation4 + $0x870] sm:$0xff] }
  0xb5   : > { %v652_v58 = vld [vmem:[#allocation4 + $0x288] sm:$0xff]  ;;  %v1667_v59 = vld [vmem:[#allocation4 + $0x878] sm:$0xff]  ;;  %v661_v12 = vld [vmem:[#allocation4 + $0x2d0] sm:$0xff] }
  0xb6   : > { %11618 = vmatpush1.bf16.msra.mxu0 %v13451_v23  ;;  %11858 = vmatpush1.bf16.msra.mxu1 %v13451_v23  ;;  %v662_v3 = vld [vmem:[#allocation4 + $0x2d8] sm:$0xff]  ;;  %v1676_v14 = vld [vmem:[#allocation4 + $0x8c0] sm:$0xff]  ;;  %v464_v22 = vld [vmem:[%s13387_s17 + $0x1a8] sm:$0xff] }
  0xb7   : > { %11619 = vmatprep.subr.bf16.mxu0 %v16034_v0  ;;  %11859 = vmatprep.subr.bf16.mxu1 %v16034_v0  ;;  %v671_v24 = vld [vmem:[#allocation4 + $0x320] sm:$0xff]  ;;  %v465_v33 = vld [vmem:[%s13387_s17 + $0x1b0] sm:$0xff]  ;;  %v466_v34 = vld [vmem:[%s13387_s17 + $0x1b8] sm:$0xff] }
  0xb8   : > { %v13619_v43 = vpack.c.bf16 %v466_v34, %v465_v33  ;;  %v467_v45 = vld [vmem:[%s13387_s17 + $0x1c0] sm:$0xff]  ;;  %v1746_v33 = vld [vmem:[#allocation4 + $0xaf0] sm:$0xff]  ;;  %v742_v34 = vld [vmem:[#allocation4 + $0x558] sm:$0xff] }
  0xba   : > { %11621 = vmatpush1.bf16.msra.mxu0 %v13459_v26  ;;  %11861 = vmatpush1.bf16.msra.mxu1 %v13459_v26 }
  0xbb   : > { %11622 = vmatprep.subr.bf16.mxu0 %v16034_v0  ;;  %11862 = vmatprep.subr.bf16.mxu1 %v16034_v0 }
  0xbe   : > { %11624 = vmatpush1.bf16.msra.mxu0 %v13467_v29  ;;  %11864 = vmatpush1.bf16.msra.mxu1 %v13467_v29 }
  0xbf   : > { %11625 = vmatprep.subr.bf16.mxu0 %v16034_v0  ;;  %11865 = vmatprep.subr.bf16.mxu1 %v16034_v0 }
  0xc2   : > { %11627 = vmatpush1.bf16.msra.mxu0 %v13475_v32  ;;  %11867 = vmatpush1.bf16.msra.mxu1 %v13475_v32 }
  0xc3   : > { %11628 = vmatprep.subr.bf16.mxu0 %v16034_v0  ;;  %11868 = vmatprep.subr.bf16.mxu1 %v16034_v0 }
  0xc6   : > { %11630 = vmatpush1.bf16.msra.mxu0 %v13483_v35  ;;  %11870 = vmatpush1.bf16.msra.mxu1 %v13483_v35 }
  0xc7   : > { %11631 = vmatprep.subr.bf16.mxu0 %v16034_v0  ;;  %11871 = vmatprep.subr.bf16.mxu1 %v16034_v0 }
  0xca   : > { %11633 = vmatpush1.bf16.msra.mxu0 %v13491_v38  ;;  %11873 = vmatpush1.bf16.msra.mxu1 %v13491_v38 }
  0xcb   : > { %11634 = vmatprep.subr.bf16.mxu0 %v16034_v0  ;;  %11874 = vmatprep.subr.bf16.mxu1 %v16034_v0 }
  0xce   : > { %11636 = vmatpush1.bf16.msra.mxu0 %v13499_v41  ;;  %11876 = vmatpush1.bf16.msra.mxu1 %v13499_v41 }
  0xcf   : > { %11637 = vmatprep.subr.bf16.mxu0 %v16034_v0  ;;  %11877 = vmatprep.subr.bf16.mxu1 %v16034_v0 }
  0xd2   : > { %11639 = vmatpush1.bf16.msra.mxu0 %v13507_v44  ;;  %11879 = vmatpush1.bf16.msra.mxu1 %v13507_v44 }
  0xd3   : > { %11640 = vmatprep.subr.bf16.mxu0 %v16034_v0  ;;  %11880 = vmatprep.subr.bf16.mxu1 %v16034_v0 }
  0xd6   : > { %11642 = vmatpush1.bf16.msra.mxu0 %v13515_v47  ;;  %11882 = vmatpush1.bf16.msra.mxu1 %v13515_v47 }
  0xd7   : > { %11643 = vmatprep.subr.bf16.mxu0 %v16034_v0  ;;  %11883 = vmatprep.subr.bf16.mxu1 %v16034_v0 }
  0xda   : > { %11645 = vmatpush1.bf16.msra.mxu0 %v13523_v50  ;;  %11885 = vmatpush1.bf16.msra.mxu1 %v13523_v50 }
  0xdb   : > { %11646 = vmatprep.subr.bf16.mxu0 %v16034_v0  ;;  %11886 = vmatprep.subr.bf16.mxu1 %v16034_v0 }
  0xdd   : > { %826 = vmatmul.mubr.f32.vlgmr.msra.gmra.mrb[0].mxu0 %v571_v53  ;;  %1841 = vmatmul.mubr.f32.vlgmr.msra.gmra.mrb[0].mxu1 %v1586_v54  ;;  %v457_v53 = vld [vmem:[%s13387_s17 + $0x170] sm:$0xff]  ;;  %v458_v54 = vld [vmem:[%s13387_s17 + $0x178] sm:$0xff] }
  0xde   : > { %830 = vmatprep.mubr.f32.mxu0 %v582_v55  ;;  %1845 = vmatprep.mubr.f32.mxu1 %v1597_v56  ;;  %v641_v55 = vld [vmem:[#allocation4 + $0x230] sm:$0xff]  ;;  %v1656_v56 = vld [vmem:[#allocation4 + $0x820] sm:$0xff] }
  0xdf   : > { %11648 = vmatpush1.bf16.msra.mxu0 %v13533_v57  ;;  %11888 = vmatpush1.bf16.msra.mxu1 %v13533_v57 }
  0xe0   : > { %11649 = vmatprep.subr.bf16.mxu0 %v16034_v0  ;;  %11889 = vmatprep.subr.bf16.mxu1 %v16034_v0 }
  0xe1   : > { %831 = vmatmul.mubr.f32.gmra.mrb[2].mxu0 %v581_v60  ;;  %1846 = vmatmul.mubr.f32.gmra.mrb[2].mxu1 %v1596_v61  ;;  %v13587_v60 = vpack.c.bf16 %v458_v54, %v457_v53  ;;  %v459_v61 = vld [vmem:[%s13387_s17 + $0x180] sm:$0xff]  ;;  %v1717_v53 = vld [vmem:[#allocation4 + $0xa08] sm:$0xff] }
  0xe2   : > { %835 = vmatprep.mubr.f32.mxu0 %v592_v62  ;;  %1850 = vmatprep.mubr.f32.mxu1 %v1607_v63  ;;  %v460_v62 = vld [vmem:[%s13387_s17 + $0x188] sm:$0xff]  ;;  %v651_v63 = vld [vmem:[#allocation4 + $0x280] sm:$0xff] }
  0xe3   : > { %11651 = vmatpush1.bf16.msra.mxu0 %v13539_v1  ;;  %11891 = vmatpush1.bf16.msra.mxu1 %v13539_v1 }
  0xe4   : > { %11652 = vmatprep.subr.bf16.mxu0 %v16034_v0  ;;  %11892 = vmatprep.subr.bf16.mxu1 %v16034_v0 }
  0xe5   : > { %836 = vmatmul.mubr.f32.gmra.mrb[4].mxu0 %v591_v5  ;;  %1851 = vmatmul.mubr.f32.gmra.mrb[4].mxu1 %v1606_v7  ;;  %v1677_v5 = vld [vmem:[#allocation4 + $0x8c8] sm:$0xff]  ;;  %v13595_v7 = vpack.c.bf16 %v460_v62, %v459_v61  ;;  %v1727_v62 = vld [vmem:[#allocation4 + $0xa58] sm:$0xff] }
  0xe6   : > { %840 = vmatprep.mubr.f32.mxu0 %v602_v8  ;;  %1855 = vmatprep.mubr.f32.mxu1 %v1617_v10  ;;  %v461_v8 = vld [vmem:[%s13387_s17 + $0x190] sm:$0xff]  ;;  %v462_v10 = vld [vmem:[%s13387_s17 + $0x198] sm:$0xff]  ;;  %v712_v61 = vld [vmem:[#allocation4 + $0x468] sm:$0xff] }
  0xe7   : > { %11654 = vmatpush1.bf16.msra.mxu0 %v13547_v11  ;;  %11894 = vmatpush1.bf16.msra.mxu1 %v13547_v11 }
  0xe8   : > { %11655 = vmatprep.subr.bf16.mxu0 %v16034_v0  ;;  %11895 = vmatprep.subr.bf16.mxu1 %v16034_v0 }
  0xe9   : > { %841 = vmatmul.mubr.f32.gmra.mrb[6].mxu0 %v601_v15  ;;  %1856 = vmatmul.mubr.f32.gmra.mrb[6].mxu1 %v1616_v16  ;;  %v672_v15 = vld [vmem:[#allocation4 + $0x328] sm:$0xff]  ;;  %v1687_v16 = vld [vmem:[#allocation4 + $0x918] sm:$0xff] }
  0xea   : > { %845 = vmatprep.mubr.f32.mxu0 %v612_v18  ;;  %1860 = vmatprep.mubr.f32.mxu1 %v1627_v19  ;;  %v13603_v18 = vpack.c.bf16 %v462_v10, %v461_v8  ;;  %v463_v19 = vld [vmem:[%s13387_s17 + $0x1a0] sm:$0xff]  ;;  %v1726_v8 = vld [vmem:[#allocation4 + $0xa50] sm:$0xff]  ;;  %v722_v10 = vld [vmem:[#allocation4 + $0x4b8] sm:$0xff] }
  0xeb   : > { %11657 = vmatpush1.bf16.msra.mxu0 %v13555_v21  ;;  %11897 = vmatpush1.bf16.msra.mxu1 %v13555_v21 }
  0xec   : > { %11658 = vmatprep.subr.bf16.mxu0 %v16034_v0  ;;  %11898 = vmatprep.subr.bf16.mxu1 %v16034_v0 }
  0xed   : > { %846 = vmatmul.mubr.f32.gmra.mrb[8].mxu0 %v611_v25  ;;  %1861 = vmatmul.mubr.f32.gmra.mrb[8].mxu1 %v1626_v27  ;;  %v1686_v25 = vld [vmem:[#allocation4 + $0x910] sm:$0xff]  ;;  %v682_v27 = vld [vmem:[#allocation4 + $0x378] sm:$0xff] }
  0xee   : > { %850 = vmatprep.mubr.f32.mxu0 %v622_v28  ;;  %1865 = vmatprep.mubr.f32.mxu1 %v1637_v30  ;;  %v1697_v28 = vld [vmem:[#allocation4 + $0x968] sm:$0xff]  ;;  %v13611_v30 = vpack.c.bf16 %v464_v22, %v463_v19  ;;  %v721_v19 = vld [vmem:[#allocation4 + $0x4b0] sm:$0xff]  ;;  %v1736_v22 = vld [vmem:[#allocation4 + $0xaa0] sm:$0xff] }
  0xef   : > { %11660 = vmatpush1.bf16.msra.mxu0 %v13563_v31  ;;  %11900 = vmatpush1.bf16.msra.mxu1 %v13563_v31 }
  0xf0   : > { %11661 = vmatprep.subr.bf16.mxu0 %v16034_v0  ;;  %11901 = vmatprep.subr.bf16.mxu1 %v16034_v0 }
  0xf1   : > { %851 = vmatmul.mubr.f32.gmra.mrb[10].mxu0 %v621_v36  ;;  %1866 = vmatmul.mubr.f32.gmra.mrb[10].mxu1 %v1636_v37  ;;  %v681_v36 = vld [vmem:[#allocation4 + $0x370] sm:$0xff]  ;;  %v1696_v37 = vld [vmem:[#allocation4 + $0x960] sm:$0xff] }
  0xf2   : > { %855 = vmatprep.mubr.f32.mxu0 %v632_v39  ;;  %1870 = vmatprep.mubr.f32.mxu1 %v1647_v40  ;;  %v692_v39 = vld [vmem:[#allocation4 + $0x3c8] sm:$0xff]  ;;  %v1707_v40 = vld [vmem:[#allocation4 + $0x9b8] sm:$0xff] }
  0xf3   : > { %11663 = vmatpush1.bf16.msra.mxu0 %v13571_v42  ;;  %11903 = vmatpush1.bf16.msra.mxu1 %v13571_v42 }
  0xf4   : > { %11664 = vmatprep.subr.bf16.mxu0 %v16034_v0  ;;  %11904 = vmatprep.subr.bf16.mxu1 %v16034_v0 }
  0xf5   : > { %856 = vmatmul.mubr.f32.gmra.mrb[12].mxu0 %v631_v46  ;;  %1871 = vmatmul.mubr.f32.gmra.mrb[12].mxu1 %v1646_v48  ;;  %v468_v46 = vld [vmem:[%s13387_s17 + $0x1c8] sm:$0xff]  ;;  %v691_v48 = vld [vmem:[#allocation4 + $0x3c0] sm:$0xff] }
  0xf6   : > { %860 = vmatprep.mubr.f32.mxu0 %v642_v49  ;;  %1875 = vmatprep.mubr.f32.mxu1 %v1657_v51  ;;  %v1706_v49 = vld [vmem:[#allocation4 + $0x9b0] sm:$0xff]  ;;  %v702_v51 = vld [vmem:[#allocation4 + $0x418] sm:$0xff]  ;;  %v13627_v54 = vpack.c.bf16 %v468_v46, %v467_v45  ;;  %v751_v46 = vld [vmem:[#allocation4 + $0x5a0] sm:$0xff] }
  0xf7   : > { %11666 = vmatpush1.bf16.msra.mxu0 %v13579_v52  ;;  %11906 = vmatpush1.bf16.msra.mxu1 %v13579_v52  ;;  %v1767_v45 = vld [vmem:[#allocation4 + $0xb98] sm:$0xff] }
  0xf8   : > { %11667 = vmatprep.subr.bf16.mxu0 %v16034_v0  ;;  %11907 = vmatprep.subr.bf16.mxu1 %v16034_v0 }
  0xf9   : > { %861 = vmatmul.mubr.f32.gmra.mrb[14].mxu0 %v641_v55  ;;  %1876 = vmatmul.mubr.f32.gmra.mrb[14].mxu1 %v1656_v56  ;;  %v469_v55 = vld [vmem:[%s13387_s17 + $0x1d0] sm:$0xff]  ;;  %v470_v56 = vld [vmem:[%s13387_s17 + $0x1d8] sm:$0xff] }
  0xfa   : > { %865 = vmatprep.mubr.f32.mxu0 %v652_v58  ;;  %1880 = vmatprep.mubr.f32.mxu1 %v1667_v59  ;;  %v701_v58 = vld [vmem:[#allocation4 + $0x410] sm:$0xff]  ;;  %v1716_v59 = vld [vmem:[#allocation4 + $0xa00] sm:$0xff] }
  0xfb   : > { %11669 = vmatpush1.bf16.msra.mxu0 %v13587_v60  ;;  %11909 = vmatpush1.bf16.msra.mxu1 %v13587_v60 }
  0xfc   : > { %11670 = vmatprep.subr.bf16.mxu0 %v16034_v0  ;;  %11910 = vmatprep.subr.bf16.mxu1 %v16034_v0 }
  0xfd   : > { %866 = vmatmul.mubr.f32.gmra.mrb[16].mxu0 %v651_v63  ;;  %1881 = vmatmul.mubr.f32.gmra.mrb[16].mxu1 %v1666_v2  ;;  %v13635_v63 = vpack.c.bf16 %v470_v56, %v469_v55  ;;  %v471_v2 = vld [vmem:[%s13387_s17 + $0x1e0] sm:$0xff]  ;;  %v476_v55 = vld [vmem:[%s13387_s17 + $0x208] sm:$0xff]  ;;  %v573_v56 = vld [vmem:[#allocation4 + $0x10] sm:$0xff] }
  0xfe   : > { %870 = vmatprep.mubr.f32.mxu0 %v662_v3  ;;  %1885 = vmatprep.mubr.f32.mxu1 %v1677_v5  ;;  %v472_v3 = vld [vmem:[%s13387_s17 + $0x1e8] sm:$0xff]  ;;  %v711_v5 = vld [vmem:[#allocation4 + $0x460] sm:$0xff] }
  0xff   : > { %11672 = vmatpush1.bf16.msra.mxu0 %v13595_v7  ;;  %11912 = vmatpush1.bf16.msra.mxu1 %v13595_v7 }
 0x100   : > { %11673 = vmatprep.subr.bf16.mxu0 %v16034_v0  ;;  %11913 = vmatprep.subr.bf16.mxu1 %v16034_v0 }
 0x101   : > { %871 = vmatmul.mubr.f32.gmra.mrb[18].mxu0 %v661_v12  ;;  %1886 = vmatmul.mubr.f32.gmra.mrb[18].mxu1 %v1676_v14  ;;  %v1737_v12 = vld [vmem:[#allocation4 + $0xaa8] sm:$0xff]  ;;  %v13643_v14 = vpack.c.bf16 %v472_v3, %v471_v2  ;;  %v477_v2 = vld [vmem:[%s13387_s17 + $0x210] sm:$0xff]  ;;  %v478_v3 = vld [vmem:[%s13387_s17 + $0x218] sm:$0xff] }
 0x102   : > { %875 = vmatprep.mubr.f32.mxu0 %v672_v15  ;;  %1890 = vmatprep.mubr.f32.mxu1 %v1687_v16  ;;  %v473_v15 = vld [vmem:[%s13387_s17 + $0x1f0] sm:$0xff]  ;;  %v474_v16 = vld [vmem:[%s13387_s17 + $0x1f8] sm:$0xff] }
 0x103   : > { %11675 = vmatpush1.bf16.msra.mxu0 %v13603_v18  ;;  %11915 = vmatpush1.bf16.msra.mxu1 %v13603_v18 }
 0x104   : > { %11676 = vmatprep.subr.bf16.mxu0 %v16034_v0  ;;  %11916 = vmatprep.subr.bf16.mxu1 %v16034_v0 }
 0x105   : > { %876 = vmatmul.mubr.f32.gmra.mrb[20].mxu0 %v671_v24  ;;  %1891 = vmatmul.mubr.f32.gmra.mrb[20].mxu1 %v1686_v25  ;;  %v732_v24 = vld [vmem:[#allocation4 + $0x508] sm:$0xff]  ;;  %v1747_v25 = vld [vmem:[#allocation4 + $0xaf8] sm:$0xff] }
 0x106   : > { %880 = vmatprep.mubr.f32.mxu0 %v682_v27  ;;  %1895 = vmatprep.mubr.f32.mxu1 %v1697_v28  ;;  %v13651_v27 = vpack.c.bf16 %v474_v16, %v473_v15  ;;  %v731_v28 = vld [vmem:[#allocation4 + $0x500] sm:$0xff]  ;;  %v13667_v15 = vpack.c.bf16 %v478_v3, %v477_v2  ;;  %v1638_v3 = vld [vmem:[#allocation4 + $0x790] sm:$0xff] }
 0x107   : > { %11678 = vmatpush1.bf16.msra.mxu0 %v13611_v30  ;;  %11918 = vmatpush1.bf16.msra.mxu1 %v13611_v30  ;;  %v479_v16 = vld [vmem:[%s13387_s17 + $0x220] sm:$0xff] }
 0x108   : > { %11679 = vmatprep.subr.bf16.mxu0 %v16034_v0  ;;  %11919 = vmatprep.subr.bf16.mxu1 %v16034_v0  ;;  %v623_v2 = vld [vmem:[#allocation4 + $0x1a0] sm:$0xff] }
 0x109   : > { %881 = vmatmul.mubr.f32.gmra.mrb[22].mxu0 %v681_v36  ;;  %1896 = vmatmul.mubr.f32.gmra.mrb[22].mxu1 %v1696_v37  ;;  %v1757_v36 = vld [vmem:[#allocation4 + $0xb48] sm:$0xff]  ;;  %v741_v37 = vld [vmem:[#allocation4 + $0x550] sm:$0xff] }
 0x10a   : > { %885 = vmatprep.mubr.f32.mxu0 %v692_v39  ;;  %1900 = vmatprep.mubr.f32.mxu1 %v1707_v40  ;;  %v1756_v39 = vld [vmem:[#allocation4 + $0xb40] sm:$0xff]  ;;  %v752_v40 = vld [vmem:[#allocation4 + $0x5a8] sm:$0xff] }
 0x10b   : > { %11681 = vmatpush1.bf16.msra.mxu0 %v13619_v43  ;;  %11921 = vmatpush1.bf16.msra.mxu1 %v13619_v43 }
 0x10c   : > { %11682 = vmatprep.subr.bf16.mxu0 %v16034_v0  ;;  %11922 = vmatprep.subr.bf16.mxu1 %v16034_v0 }
 0x10d   : > { %886 = vmatmul.mubr.f32.gmra.mrb[24].mxu0 %v691_v48  ;;  %1901 = vmatmul.mubr.f32.gmra.mrb[24].mxu1 %v1706_v49  ;;  %v1766_v48 = vld [vmem:[#allocation4 + $0xb90] sm:$0xff]  ;;  %v574_v49 = vld [vmem:[#allocation4 + $0x18] sm:$0xff] }
 0x10e   : > { %890 = vmatprep.mubr.f32.mxu0 %v702_v51  ;;  %1905 = vmatprep.mubr.f32.mxu1 %v1717_v53  ;;  %v1589_v51 = vld [vmem:[#allocation4 + $0x608] sm:$0xff]  ;;  %v475_v53 = vld [vmem:[%s13387_s17 + $0x200] sm:$0xff] }
 0x10f   : > { %11684 = vmatpush1.bf16.msra.mxu0 %v13627_v54  ;;  %11924 = vmatpush1.bf16.msra.mxu1 %v13627_v54 }
 0x110   : > { %11685 = vmatprep.subr.bf16.mxu0 %v16034_v0  ;;  %11925 = vmatprep.subr.bf16.mxu1 %v16034_v0 }
 0x111   : > { %891 = vmatmul.mubr.f32.gmra.mrb[26].mxu0 %v701_v58  ;;  %1906 = vmatmul.mubr.f32.gmra.mrb[26].mxu1 %v1716_v59  ;;  %v1588_v58 = vld [vmem:[#allocation4 + $0x600] sm:$0xff]  ;;  %v584_v59 = vld [vmem:[#allocation4 + $0x68] sm:$0xff] }
 0x112   : > { %895 = vmatprep.mubr.f32.mxu0 %v712_v61  ;;  %1910 = vmatprep.mubr.f32.mxu1 %v1727_v62  ;;  %v1599_v61 = vld [vmem:[#allocation4 + $0x658] sm:$0xff]  ;;  %v13661_v62 = vpack.c.bf16 %v476_v55, %v475_v53  ;;  %v1628_v53 = vld [vmem:[#allocation4 + $0x740] sm:$0xff]  ;;  %v624_v55 = vld [vmem:[#allocation4 + $0x1a8] sm:$0xff] }
 0x113   : > { %11687 = vmatpush1.bf16.msra.mxu0 %v13635_v63  ;;  %11927 = vmatpush1.bf16.msra.mxu1 %v13635_v63 }
 0x114   : > { %11688 = vmatprep.subr.bf16.mxu0 %v16034_v0  ;;  %11928 = vmatprep.subr.bf16.mxu1 %v16034_v0 }
 0x115   : > { %896 = vmatmul.mubr.f32.gmra.mrb[28].mxu0 %v711_v5  ;;  %1911 = vmatmul.mubr.f32.gmra.mrb[28].mxu1 %v1726_v8  ;;  %v583_v5 = vld [vmem:[#allocation4 + $0x60] sm:$0xff]  ;;  %v1598_v8 = vld [vmem:[#allocation4 + $0x650] sm:$0xff] }
 0x116   : > { %900 = vmatprep.mubr.f32.mxu0 %v722_v10  ;;  %1915 = vmatprep.mubr.f32.mxu1 %v1737_v12  ;;  %v594_v10 = vld [vmem:[#allocation4 + $0xb8] sm:$0xff]  ;;  %v1609_v12 = vld [vmem:[#allocation4 + $0x6a8] sm:$0xff] }
 0x117   : > { %11690 = vmatpush1.bf16.msra.mxu0 %v13643_v14  ;;  %11930 = vmatpush1.bf16.msra.mxu1 %v13643_v14 }
 0x118   : > { %11691 = vmatprep.subr.bf16.mxu0 %v16034_v0  ;;  %11931 = vmatprep.subr.bf16.mxu1 %v16034_v0 }
 0x119   : > { %901 = vmatmul.mubr.f32.gmra.mrb[30].mxu0 %v721_v19  ;;  %1916 = vmatmul.mubr.f32.gmra.mrb[30].mxu1 %v1736_v22  ;;  %v480_v19 = vld [vmem:[%s13387_s17 + $0x228] sm:$0xff]  ;;  %v593_v22 = vld [vmem:[#allocation4 + $0xb0] sm:$0xff] }
 0x11a   : > { %905 = vmatprep.mubr.f32.mxu0 %v732_v24  ;;  %1920 = vmatprep.mubr.f32.mxu1 %v1747_v25  ;;  %v1608_v24 = vld [vmem:[#allocation4 + $0x6a0] sm:$0xff]  ;;  %v604_v25 = vld [vmem:[#allocation4 + $0x108] sm:$0xff] }
 0x11b   : > { %11693 = vmatpush1.bf16.msra.mxu0 %v13651_v27  ;;  %11933 = vmatpush1.bf16.msra.mxu1 %v13651_v27 }
 0x11c   : > { %11694 = vmatprep.subr.bf16.mxu0 %v16034_v0  ;;  %11934 = vmatprep.subr.bf16.mxu1 %v16034_v0 }
 0x11d   : > { %906 = vmatmul.mubr.f32.gmra.mrb[32].mxu0 %v731_v28  ;;  %1921 = vmatmul.mubr.f32.gmra.mrb[32].mxu1 %v1746_v33  ;;  %v1619_v28 = vld [vmem:[#allocation4 + $0x6f8] sm:$0xff]  ;;  %v13675_v33 = vpack.c.bf16 %v480_v19, %v479_v16  ;;  %v488_v16 = vld [vmem:[%s13387_s17 + $0x268] sm:$0xff]  ;;  %v633_v19 = vld [vmem:[#allocation4 + $0x1f0] sm:$0xff] }
 0x11e   : > { %910 = vmatprep.mubr.f32.mxu0 %v742_v34  ;;  %1925 = vmatprep.mubr.f32.mxu1 %v1757_v36  ;;  %v481_v34 = vld [vmem:[%s13387_s17 + $0x230] sm:$0xff]  ;;  %v482_v36 = vld [vmem:[%s13387_s17 + $0x238] sm:$0xff] }
 0x121   : > { %911 = vmatmul.mubr.f32.gmra.mrb[34].mxu0 %v741_v37  ;;  %1926 = vmatmul.mubr.f32.gmra.mrb[34].mxu1 %v1756_v39  ;;  %v603_v37 = vld [vmem:[#allocation4 + $0x100] sm:$0xff]  ;;  %v1618_v39 = vld [vmem:[#allocation4 + $0x6f0] sm:$0xff] }
 0x122   : > { %915 = vmatprep.mubr.f32.mxu0 %v752_v40  ;;  %1930 = vmatprep.mubr.f32.mxu1 %v1767_v45  ;;  %v614_v40 = vld [vmem:[#allocation4 + $0x158] sm:$0xff]  ;;  %v1629_v45 = vld [vmem:[#allocation4 + $0x748] sm:$0xff] }
 0x125   : > { %916 = vmatmul.mubr.f32.gmra.mrb[36].mxu0 %v751_v46  ;;  %1931 = vmatmul.mubr.f32.gmra.mrb[36].mxu1 %v1766_v48  ;;  %v13683_v46 = vpack.c.bf16 %v482_v36, %v481_v34  ;;  %v483_v48 = vld [vmem:[%s13387_s17 + $0x240] sm:$0xff]  ;;  %v489_v34 = vld [vmem:[%s13387_s17 + $0x270] sm:$0xff]  ;;  %v490_v36 = vld [vmem:[%s13387_s17 + $0x278] sm:$0xff] }
 0x126   : > { %985 = vmatprep.mubr.f32.mxu0 %v574_v49  ;;  %2000 = vmatprep.mubr.f32.mxu1 %v1589_v51  ;;  %v484_v49 = vld [vmem:[%s13387_s17 + $0x248] sm:$0xff]  ;;  %v613_v51 = vld [vmem:[#allocation4 + $0x150] sm:$0xff] }
 0x129   : > { %986 = vmatmul.mubr.f32.vlgmr.msra.gmra.mrb[0].mxu0 %v573_v56  ;;  %2001 = vmatmul.mubr.f32.vlgmr.msra.gmra.mrb[0].mxu1 %v1588_v58  ;;  %v1639_v56 = vld [vmem:[#allocation4 + $0x798] sm:$0xff]  ;;  %v13691_v58 = vpack.c.bf16 %v484_v49, %v483_v48  ;;  %v13715_v48 = vpack.c.bf16 %v490_v36, %v489_v34  ;;  %v491_v49 = vld [vmem:[%s13387_s17 + $0x280] sm:$0xff]  ;;  %v684_v36 = vld [vmem:[#allocation4 + $0x388] sm:$0xff] }
 0x12a   : > { %990 = vmatprep.mubr.f32.mxu0 %v584_v59  ;;  %2005 = vmatprep.mubr.f32.mxu1 %v1599_v61  ;;  %v485_v59 = vld [vmem:[%s13387_s17 + $0x250] sm:$0xff]  ;;  %v486_v61 = vld [vmem:[%s13387_s17 + $0x258] sm:$0xff]  ;;  %v1688_v34 = vld [vmem:[#allocation4 + $0x920] sm:$0xff] }
 0x12b   : > { %11696 = vmatpush1.bf16.msra.mxu0 %v13661_v62  ;;  %11936 = vmatpush1.bf16.msra.mxu1 %v13661_v62 }
 0x12c   : > { %11697 = vmatprep.subr.bf16.mxu0 %v16034_v0  ;;  %11937 = vmatprep.subr.bf16.mxu1 %v16034_v0 }
 0x12d   : > { %991 = vmatmul.mubr.f32.gmra.mrb[2].mxu0 %v583_v5  ;;  %2006 = vmatmul.mubr.f32.gmra.mrb[2].mxu1 %v1598_v8  ;;  %v634_v5 = vld [vmem:[#allocation4 + $0x1f8] sm:$0xff]  ;;  %v1649_v8 = vld [vmem:[#allocation4 + $0x7e8] sm:$0xff] }
 0x12e   : > { %995 = vmatprep.mubr.f32.mxu0 %v594_v10  ;;  %2010 = vmatprep.mubr.f32.mxu1 %v1609_v12  ;;  %v13699_v10 = vpack.c.bf16 %v486_v61, %v485_v59  ;;  %v487_v12 = vld [vmem:[%s13387_s17 + $0x260] sm:$0xff]  ;;  %v1679_v59 = vld [vmem:[#allocation4 + $0x8d8] sm:$0xff] }
 0x12f   : > { %11699 = vmatpush1.bf16.msra.mxu0 %v13667_v15  ;;  %11939 = vmatpush1.bf16.msra.mxu1 %v13667_v15 }
 0x130   : > { %11700 = vmatprep.subr.bf16.mxu0 %v16034_v0  ;;  %11940 = vmatprep.subr.bf16.mxu1 %v16034_v0 }
 0x131   : > { %996 = vmatmul.mubr.f32.gmra.mrb[4].mxu0 %v593_v22  ;;  %2011 = vmatmul.mubr.f32.gmra.mrb[4].mxu1 %v1608_v24  ;;  %v1648_v22 = vld [vmem:[#allocation4 + $0x7e0] sm:$0xff]  ;;  %v644_v24 = vld [vmem:[#allocation4 + $0x248] sm:$0xff] }
 0x132   : > { %1000 = vmatprep.mubr.f32.mxu0 %v604_v25  ;;  %2015 = vmatprep.mubr.f32.mxu1 %v1619_v28  ;;  %v1659_v25 = vld [vmem:[#allocation4 + $0x838] sm:$0xff]  ;;  %v13707_v28 = vpack.c.bf16 %v488_v16, %v487_v12  ;;  %v1689_v16 = vld [vmem:[#allocation4 + $0x928] sm:$0xff] }
 0x133   : > { %11702 = vmatpush1.bf16.msra.mxu0 %v13675_v33  ;;  %11942 = vmatpush1.bf16.msra.mxu1 %v13675_v33  ;;  %v674_v12 = vld [vmem:[#allocation4 + $0x338] sm:$0xff] }
 0x134   : > { %11703 = vmatprep.subr.bf16.mxu0 %v16034_v0  ;;  %11943 = vmatprep.subr.bf16.mxu1 %v16034_v0 }
 0x135   : > { %1001 = vmatmul.mubr.f32.gmra.mrb[6].mxu0 %v603_v37  ;;  %2016 = vmatmul.mubr.f32.gmra.mrb[6].mxu1 %v1618_v39  ;;  %v643_v37 = vld [vmem:[#allocation4 + $0x240] sm:$0xff]  ;;  %v1658_v39 = vld [vmem:[#allocation4 + $0x830] sm:$0xff] }
 0x136   : > { %1005 = vmatprep.mubr.f32.mxu0 %v614_v40  ;;  %2020 = vmatprep.mubr.f32.mxu1 %v1629_v45  ;;  %v654_v40 = vld [vmem:[#allocation4 + $0x298] sm:$0xff]  ;;  %v1669_v45 = vld [vmem:[#allocation4 + $0x888] sm:$0xff] }
 0x137   : > { %11705 = vmatpush1.bf16.msra.mxu0 %v13683_v46  ;;  %11945 = vmatpush1.bf16.msra.mxu1 %v13683_v46 }
 0x138   : > { %11706 = vmatprep.subr.bf16.mxu0 %v16034_v0  ;;  %11946 = vmatprep.subr.bf16.mxu1 %v16034_v0 }
 0x139   : > { %1006 = vmatmul.mubr.f32.gmra.mrb[8].mxu0 %v613_v51  ;;  %2021 = vmatmul.mubr.f32.gmra.mrb[8].mxu1 %v1628_v53  ;;  %v492_v51 = vld [vmem:[%s13387_s17 + $0x288] sm:$0xff]  ;;  %v653_v53 = vld [vmem:[#allocation4 + $0x290] sm:$0xff] }
 0x13a   : > { %1010 = vmatprep.mubr.f32.mxu0 %v624_v55  ;;  %2025 = vmatprep.mubr.f32.mxu1 %v1639_v56  ;;  %v1668_v55 = vld [vmem:[#allocation4 + $0x880] sm:$0xff]  ;;  %v664_v56 = vld [vmem:[#allocation4 + $0x2e8] sm:$0xff]  ;;  %v13723_v61 = vpack.c.bf16 %v492_v51, %v491_v49  ;;  %v1698_v51 = vld [vmem:[#allocation4 + $0x970] sm:$0xff] }
 0x13b   : > { %11708 = vmatpush1.bf16.msra.mxu0 %v13691_v58  ;;  %11948 = vmatpush1.bf16.msra.mxu1 %v13691_v58  ;;  %v683_v49 = vld [vmem:[#allocation4 + $0x380] sm:$0xff] }
 0x13c   : > { %11709 = vmatprep.subr.bf16.mxu0 %v16034_v0  ;;  %11949 = vmatprep.subr.bf16.mxu1 %v16034_v0 }
 0x13d   : > { %1011 = vmatmul.mubr.f32.gmra.mrb[10].mxu0 %v623_v2  ;;  %2026 = vmatmul.mubr.f32.gmra.mrb[10].mxu1 %v1638_v3  ;;  %v493_v2 = vld [vmem:[%s13387_s17 + $0x290] sm:$0xff]  ;;  %v494_v3 = vld [vmem:[%s13387_s17 + $0x298] sm:$0xff] }
 0x13e   : > { %1015 = vmatprep.mubr.f32.mxu0 %v634_v5  ;;  %2030 = vmatprep.mubr.f32.mxu1 %v1649_v8  ;;  %v663_v5 = vld [vmem:[#allocation4 + $0x2e0] sm:$0xff]  ;;  %v1678_v8 = vld [vmem:[#allocation4 + $0x8d0] sm:$0xff] }
 0x13f   : > { %11711 = vmatpush1.bf16.msra.mxu0 %v13699_v10  ;;  %11951 = vmatpush1.bf16.msra.mxu1 %v13699_v10 }
 0x140   : > { %11712 = vmatprep.subr.bf16.mxu0 %v16034_v0  ;;  %11952 = vmatprep.subr.bf16.mxu1 %v16034_v0 }
 0x141   : > { %1016 = vmatmul.mubr.f32.gmra.mrb[12].mxu0 %v633_v19  ;;  %2031 = vmatmul.mubr.f32.gmra.mrb[12].mxu1 %v1648_v22  ;;  %v13731_v19 = vpack.c.bf16 %v494_v3, %v493_v2  ;;  %v495_v22 = vld [vmem:[%s13387_s17 + $0x2a0] sm:$0xff]  ;;  %v500_v2 = vld [vmem:[%s13387_s17 + $0x2c8] sm:$0xff]  ;;  %v693_v3 = vld [vmem:[#allocation4 + $0x3d0] sm:$0xff] }
 0x142   : > { %1020 = vmatprep.mubr.f32.mxu0 %v644_v24  ;;  %2035 = vmatprep.mubr.f32.mxu1 %v1659_v25  ;;  %v496_v24 = vld [vmem:[%s13387_s17 + $0x2a8] sm:$0xff]  ;;  %v673_v25 = vld [vmem:[#allocation4 + $0x330] sm:$0xff] }
 0x143   : > { %11714 = vmatpush1.bf16.msra.mxu0 %v13707_v28  ;;  %11954 = vmatpush1.bf16.msra.mxu1 %v13707_v28 }
 0x144   : > { %11715 = vmatprep.subr.bf16.mxu0 %v16034_v0  ;;  %11955 = vmatprep.subr.bf16.mxu1 %v16034_v0 }
 0x145   : > { %1021 = vmatmul.mubr.f32.gmra.mrb[14].mxu0 %v643_v37  ;;  %2036 = vmatmul.mubr.f32.gmra.mrb[14].mxu1 %v1658_v39  ;;  %v1699_v37 = vld [vmem:[#allocation4 + $0x978] sm:$0xff]  ;;  %v13739_v39 = vpack.c.bf16 %v496_v24, %v495_v22  ;;  %v501_v22 = vld [vmem:[%s13387_s17 + $0x2d0] sm:$0xff] }
 0x146   : > { %1025 = vmatprep.mubr.f32.mxu0 %v654_v40  ;;  %2040 = vmatprep.mubr.f32.mxu1 %v1669_v45  ;;  %v497_v40 = vld [vmem:[%s13387_s17 + $0x2b0] sm:$0xff]  ;;  %v498_v45 = vld [vmem:[%s13387_s17 + $0x2b8] sm:$0xff] }
 0x147   : > { %11717 = vmatpush1.bf16.msra.mxu0 %v13715_v48  ;;  %11957 = vmatpush1.bf16.msra.mxu1 %v13715_v48  ;;  %v502_v24 = vld [vmem:[%s13387_s17 + $0x2d8] sm:$0xff] }
 0x148   : > { %11718 = vmatprep.subr.bf16.mxu0 %v16034_v0  ;;  %11958 = vmatprep.subr.bf16.mxu1 %v16034_v0 }
 0x149   : > { %1026 = vmatmul.mubr.f32.gmra.mrb[16].mxu0 %v653_v53  ;;  %2041 = vmatmul.mubr.f32.gmra.mrb[16].mxu1 %v1668_v55  ;;  %v694_v53 = vld [vmem:[#allocation4 + $0x3d8] sm:$0xff]  ;;  %v1709_v55 = vld [vmem:[#allocation4 + $0x9c8] sm:$0xff] }
 0x14a   : > { %1030 = vmatprep.mubr.f32.mxu0 %v664_v56  ;;  %2045 = vmatprep.mubr.f32.mxu1 %v1679_v59  ;;  %v13747_v56 = vpack.c.bf16 %v498_v45, %v497_v40  ;;  %v499_v59 = vld [vmem:[%s13387_s17 + $0x2c0] sm:$0xff]  ;;  %v13763_v40 = vpack.c.bf16 %v502_v24, %v501_v22  ;;  %v734_v22 = vld [vmem:[#allocation4 + $0x518] sm:$0xff]  ;;  %v1749_v24 = vld [vmem:[#allocation4 + $0xb08] sm:$0xff] }
 0x14b   : > { %11720 = vmatpush1.bf16.msra.mxu0 %v13723_v61  ;;  %11960 = vmatpush1.bf16.msra.mxu1 %v13723_v61  ;;  %v503_v45 = vld [vmem:[%s13387_s17 + $0x2e0] sm:$0xff] }
 0x14c   : > { %11721 = vmatprep.subr.bf16.mxu0 %v16034_v0  ;;  %11961 = vmatprep.subr.bf16.mxu1 %v16034_v0 }
 0x14d   : > { %1031 = vmatmul.mubr.f32.gmra.mrb[18].mxu0 %v663_v5  ;;  %2046 = vmatmul.mubr.f32.gmra.mrb[18].mxu1 %v1678_v8  ;;  %v1708_v5 = vld [vmem:[#allocation4 + $0x9c0] sm:$0xff]  ;;  %v704_v8 = vld [vmem:[#allocation4 + $0x428] sm:$0xff] }
 0x14e   : > { %1035 = vmatprep.mubr.f32.mxu0 %v674_v12  ;;  %2050 = vmatprep.mubr.f32.mxu1 %v1689_v16  ;;  %v1719_v12 = vld [vmem:[#allocation4 + $0xa18] sm:$0xff]  ;;  %v13755_v16 = vpack.c.bf16 %v500_v2, %v499_v59 }
 0x14f   : > { %11723 = vmatpush1.bf16.msra.mxu0 %v13731_v19  ;;  %11963 = vmatpush1.bf16.msra.mxu1 %v13731_v19  ;;  %v1739_v59 = vld [vmem:[#allocation4 + $0xab8] sm:$0xff] }
 0x150   : > { %11724 = vmatprep.subr.bf16.mxu0 %v16034_v0  ;;  %11964 = vmatprep.subr.bf16.mxu1 %v16034_v0 }
 0x151   : > { %1036 = vmatmul.mubr.f32.gmra.mrb[20].mxu0 %v673_v25  ;;  %2051 = vmatmul.mubr.f32.gmra.mrb[20].mxu1 %v1688_v34  ;;  %v703_v25 = vld [vmem:[#allocation4 + $0x420] sm:$0xff]  ;;  %v1718_v34 = vld [vmem:[#allocation4 + $0xa10] sm:$0xff] }
 0x152   : > { %1040 = vmatprep.mubr.f32.mxu0 %v684_v36  ;;  %2055 = vmatprep.mubr.f32.mxu1 %v1699_v37  ;;  %v714_v36 = vld [vmem:[#allocation4 + $0x478] sm:$0xff]  ;;  %v1729_v37 = vld [vmem:[#allocation4 + $0xa68] sm:$0xff] }
 0x153   : > { %11726 = vmatpush1.bf16.msra.mxu0 %v13739_v39  ;;  %11966 = vmatpush1.bf16.msra.mxu1 %v13739_v39 }
 0x154   : > { %11727 = vmatprep.subr.bf16.mxu0 %v16034_v0  ;;  %11967 = vmatprep.subr.bf16.mxu1 %v16034_v0 }
 0x155   : > { %1041 = vmatmul.mubr.f32.gmra.mrb[22].mxu0 %v683_v49  ;;  %2056 = vmatmul.mubr.f32.gmra.mrb[22].mxu1 %v1698_v51  ;;  %v504_v49 = vld [vmem:[%s13387_s17 + $0x2e8] sm:$0xff]  ;;  %v713_v51 = vld [vmem:[#allocation4 + $0x470] sm:$0xff] }
 0x156   : > { %1045 = vmatprep.mubr.f32.mxu0 %v694_v53  ;;  %2060 = vmatprep.mubr.f32.mxu1 %v1709_v55  ;;  %v1728_v53 = vld [vmem:[#allocation4 + $0xa60] sm:$0xff]  ;;  %v724_v55 = vld [vmem:[#allocation4 + $0x4c8] sm:$0xff]  ;;  %v13771_v2 = vpack.c.bf16 %v504_v49, %v503_v45  ;;  %v1759_v45 = vld [vmem:[#allocation4 + $0xb58] sm:$0xff] }
 0x157   : > { %11729 = vmatpush1.bf16.msra.mxu0 %v13747_v56  ;;  %11969 = vmatpush1.bf16.msra.mxu1 %v13747_v56  ;;  %v743_v49 = vld [vmem:[#allocation4 + $0x560] sm:$0xff] }
 0x158   : > { %11730 = vmatprep.subr.bf16.mxu0 %v16034_v0  ;;  %11970 = vmatprep.subr.bf16.mxu1 %v16034_v0 }
 0x159   : > { %1046 = vmatmul.mubr.f32.gmra.mrb[24].mxu0 %v693_v3  ;;  %2061 = vmatmul.mubr.f32.gmra.mrb[24].mxu1 %v1708_v5  ;;  %v505_v3 = vld [vmem:[%s13387_s17 + $0x2f0] sm:$0xff]  ;;  %v506_v5 = vld [vmem:[%s13387_s17 + $0x2f8] sm:$0xff] }
 0x15a   : > { %1050 = vmatprep.mubr.f32.mxu0 %v704_v8  ;;  %2065 = vmatprep.mubr.f32.mxu1 %v1719_v12  ;;  %v723_v8 = vld [vmem:[#allocation4 + $0x4c0] sm:$0xff]  ;;  %v1738_v12 = vld [vmem:[#allocation4 + $0xab0] sm:$0xff] }
 0x15b   : > { %11732 = vmatpush1.bf16.msra.mxu0 %v13755_v16  ;;  %11972 = vmatpush1.bf16.msra.mxu1 %v13755_v16 }
 0x15c   : > { %11733 = vmatprep.subr.bf16.mxu0 %v16034_v0  ;;  %11973 = vmatprep.subr.bf16.mxu1 %v16034_v0 }
 0x15d   : > { %1051 = vmatmul.mubr.f32.gmra.mrb[26].mxu0 %v703_v25  ;;  %2066 = vmatmul.mubr.f32.gmra.mrb[26].mxu1 %v1718_v34  ;;  %v13779_v25 = vpack.c.bf16 %v506_v5, %v505_v3  ;;  %v733_v34 = vld [vmem:[#allocation4 + $0x510] sm:$0xff]  ;;  %v1768_v3 = vld [vmem:[#allocation4 + $0xba0] sm:$0xff]  ;;  %v576_v5 = vld [vmem:[#allocation4 + $0x28] sm:$0xff] }
 0x15e   : > { %1055 = vmatprep.mubr.f32.mxu0 %v714_v36  ;;  %2070 = vmatprep.mubr.f32.mxu1 %v1729_v37  ;;  %v1748_v36 = vld [vmem:[#allocation4 + $0xb00] sm:$0xff]  ;;  %v744_v37 = vld [vmem:[#allocation4 + $0x568] sm:$0xff] }
 0x15f   : > { %11735 = vmatpush1.bf16.msra.mxu0 %v13763_v40  ;;  %11975 = vmatpush1.bf16.msra.mxu1 %v13763_v40  ;;  %16083 = vst [vmem:[#allocation13_spill] sm:$0xff] %v13779_v25 }
 0x160   : > { %11736 = vmatprep.subr.bf16.mxu0 %v16034_v0  ;;  %11976 = vmatprep.subr.bf16.mxu1 %v16034_v0 }
 0x161   : > { %1056 = vmatmul.mubr.f32.gmra.mrb[28].mxu0 %v713_v51  ;;  %2071 = vmatmul.mubr.f32.gmra.mrb[28].mxu1 %v1728_v53  ;;  %v1758_v51 = vld [vmem:[#allocation4 + $0xb50] sm:$0xff]  ;;  %v754_v53 = vld [vmem:[#allocation4 + $0x5b8] sm:$0xff] }
 0x162   : > { %1060 = vmatprep.mubr.f32.mxu0 %v724_v55  ;;  %2075 = vmatprep.mubr.f32.mxu1 %v1739_v59  ;;  %v1769_v55 = vld [vmem:[#allocation4 + $0xba8] sm:$0xff]  ;;  %v753_v59 = vld [vmem:[#allocation4 + $0x5b0] sm:$0xff] }
 0x163   : > { %11738 = vmatpush1.bf16.msra.mxu0 %v13771_v2  ;;  %11978 = vmatpush1.bf16.msra.mxu1 %v13771_v2 }
 0x164   : > { %11739 = vmatprep.subr.bf16.mxu0 %v16034_v0  ;;  %11979 = vmatprep.subr.bf16.mxu1 %v16034_v0 }
 0x165   : > { %1061 = vmatmul.mubr.f32.gmra.mrb[30].mxu0 %v723_v8  ;;  %2076 = vmatmul.mubr.f32.gmra.mrb[30].mxu1 %v1738_v12  ;;  %v1591_v8 = vld [vmem:[#allocation4 + $0x618] sm:$0xff]  ;;  %v507_v12 = vld [vmem:[%s13387_s17 + $0x300] sm:$0xff] }
 0x166   : > { %1065 = vmatprep.mubr.f32.mxu0 %v734_v22  ;;  %2080 = vmatprep.mubr.f32.mxu1 %v1749_v24  ;;  %v508_v22 = vld [vmem:[%s13387_s17 + $0x308] sm:$0xff]  ;;  %v575_v24 = vld [vmem:[#allocation4 + $0x20] sm:$0xff] }
 0x167   : > { %11741 = vmatpush1.bf16.msra.mxu0 %v13779_v25  ;;  %11981 = vmatpush1.bf16.msra.mxu1 %v13779_v25  ;;  %v1645_v25 = vld [vmem:[#allocation4 + $0x7c8] sm:$0xff] }
 0x168   : > { %11742 = vmatprep.subr.bf16.mxu0 %v16034_v0  ;;  %11982 = vmatprep.subr.bf16.mxu1 %v16034_v0 }
 0x169   : > { %1066 = vmatmul.mubr.f32.gmra.mrb[32].mxu0 %v733_v34  ;;  %2081 = vmatmul.mubr.f32.gmra.mrb[32].mxu1 %v1748_v36  ;;  %v1590_v34 = vld [vmem:[#allocation4 + $0x610] sm:$0xff]  ;;  %v586_v36 = vld [vmem:[#allocation4 + $0x78] sm:$0xff] }
 0x16a   : > { %1070 = vmatprep.mubr.f32.mxu0 %v744_v37  ;;  %2085 = vmatprep.mubr.f32.mxu1 %v1759_v45  ;;  %v1601_v37 = vld [vmem:[#allocation4 + $0x668] sm:$0xff]  ;;  %v13789_v45 = vpack.c.bf16 %v508_v22, %v507_v12  ;;  %v595_v22 = vld [vmem:[#allocation4 + $0xc0] sm:$0xff] }
 0x16b   : > { %v512_v12 = vld [vmem:[%s13387_s17 + $0x328] sm:$0xff] }
 0x16c   : > { %16084 = vst [vmem:[#allocation14_spill] sm:$0xff] %v13789_v45 }
 0x16d   : > { %1071 = vmatmul.mubr.f32.gmra.mrb[34].mxu0 %v743_v49  ;;  %2086 = vmatmul.mubr.f32.gmra.mrb[34].mxu1 %v1758_v51  ;;  %v509_v49 = vld [vmem:[%s13387_s17 + $0x310] sm:$0xff]  ;;  %v510_v51 = vld [vmem:[%s13387_s17 + $0x318] sm:$0xff] }
 0x16e   : > { %1075 = vmatprep.mubr.f32.mxu0 %v754_v53  ;;  %2090 = vmatprep.mubr.f32.mxu1 %v1769_v55  ;;  %v585_v53 = vld [vmem:[#allocation4 + $0x70] sm:$0xff]  ;;  %v1600_v55 = vld [vmem:[#allocation4 + $0x660] sm:$0xff] }
 0x171   : > { %1076 = vmatmul.mubr.f32.gmra.mrb[36].mxu0 %v753_v59  ;;  %2091 = vmatmul.mubr.f32.gmra.mrb[36].mxu1 %v1768_v3  ;;  %v596_v59 = vld [vmem:[#allocation4 + $0xc8] sm:$0xff]  ;;  %v1611_v3 = vld [vmem:[#allocation4 + $0x6b8] sm:$0xff] }
 0x172   : > { %1145 = vmatprep.mubr.f32.mxu0 %v576_v5  ;;  %2160 = vmatprep.mubr.f32.mxu1 %v1591_v8  ;;  %v13795_v5 = vpack.c.bf16 %v510_v51, %v509_v49  ;;  %v511_v8 = vld [vmem:[%s13387_s17 + $0x320] sm:$0xff]  ;;  %v513_v49 = vld [vmem:[%s13387_s17 + $0x330] sm:$0xff]  ;;  %v514_v51 = vld [vmem:[%s13387_s17 + $0x338] sm:$0xff] }
 0x174   : > { %16085 = vst [vmem:[#allocation15_spill] sm:$0xff] %v13795_v5 }
 0x175   : > { %1146 = vmatmul.mubr.f32.vlgmr.msra.gmra.mrb[0].mxu0 %v575_v24  ;;  %2161 = vmatmul.mubr.f32.vlgmr.msra.gmra.mrb[0].mxu1 %v1590_v34  ;;  %v1610_v24 = vld [vmem:[#allocation4 + $0x6b0] sm:$0xff]  ;;  %v606_v34 = vld [vmem:[#allocation4 + $0x118] sm:$0xff] }
 0x176   : > { %1150 = vmatprep.mubr.f32.mxu0 %v586_v36  ;;  %2165 = vmatprep.mubr.f32.mxu1 %v1601_v37  ;;  %v1621_v36 = vld [vmem:[#allocation4 + $0x708] sm:$0xff]  ;;  %v13803_v37 = vpack.c.bf16 %v512_v12, %v511_v8  ;;  %v13811_v8 = vpack.c.bf16 %v514_v51, %v513_v49  ;;  %v515_v12 = vld [vmem:[%s13387_s17 + $0x340] sm:$0xff]  ;;  %v517_v51 = vld [vmem:[%s13387_s17 + $0x350] sm:$0xff] }
 0x177   : > { %11744 = vmatpush1.bf16.msra.mxu0 %v13789_v45  ;;  %11984 = vmatpush1.bf16.msra.mxu1 %v13789_v45  ;;  %v1753_v45 = vld [vmem:[#allocation4 + $0xb28] sm:$0xff] }
 0x178   : > { %11745 = vmatprep.subr.bf16.mxu0 %v16034_v0  ;;  %11985 = vmatprep.subr.bf16.mxu1 %v16034_v0  ;;  %16086 = vst [vmem:[#allocation16_spill] sm:$0xff] %v13803_v37  ;;  %16087 = vst [vmem:[#allocation17_spill] sm:$0xff] %v13811_v8 }
 0x179   : > { %1151 = vmatmul.mubr.f32.gmra.mrb[2].mxu0 %v585_v53  ;;  %2166 = vmatmul.mubr.f32.gmra.mrb[2].mxu1 %v1600_v55  ;;  %v605_v53 = vld [vmem:[#allocation4 + $0x110] sm:$0xff]  ;;  %v1620_v55 = vld [vmem:[#allocation4 + $0x700] sm:$0xff] }
 0x17a   : > { %1155 = vmatprep.mubr.f32.mxu0 %v596_v59  ;;  %2170 = vmatprep.mubr.f32.mxu1 %v1611_v3  ;;  %v616_v59 = vld [vmem:[#allocation4 + $0x168] sm:$0xff]  ;;  %v1631_v3 = vld [vmem:[#allocation4 + $0x758] sm:$0xff] }
 0x17b   : > { %11747 = vmatpush1.bf16.msra.mxu0 %v13795_v5  ;;  %11987 = vmatpush1.bf16.msra.mxu1 %v13795_v5  ;;  %v1641_v5 = vld [vmem:[#allocation4 + $0x7a8] sm:$0xff] }
 0x17c   : > { %11748 = vmatprep.subr.bf16.mxu0 %v16034_v0  ;;  %11988 = vmatprep.subr.bf16.mxu1 %v16034_v0 }
 0x17d   : > { %1156 = vmatmul.mubr.f32.gmra.mrb[4].mxu0 %v595_v22  ;;  %2171 = vmatmul.mubr.f32.gmra.mrb[4].mxu1 %v1610_v24  ;;  %v516_v22 = vld [vmem:[%s13387_s17 + $0x348] sm:$0xff]  ;;  %v615_v24 = vld [vmem:[#allocation4 + $0x160] sm:$0xff] }
 0x17e   : > { %1160 = vmatprep.mubr.f32.mxu0 %v606_v34  ;;  %2175 = vmatprep.mubr.f32.mxu1 %v1621_v36  ;;  %v1630_v34 = vld [vmem:[#allocation4 + $0x750] sm:$0xff]  ;;  %v626_v36 = vld [vmem:[#allocation4 + $0x1b8] sm:$0xff]  ;;  %v13819_v49 = vpack.c.bf16 %v516_v22, %v515_v12  ;;  %v519_v22 = vld [vmem:[%s13387_s17 + $0x360] sm:$0xff] }
 0x17f   : > { %11750 = vmatpush1.bf16.msra.mxu0 %v13803_v37  ;;  %11990 = vmatpush1.bf16.msra.mxu1 %v13803_v37  ;;  %v1651_v37 = vld [vmem:[#allocation4 + $0x7f8] sm:$0xff] }
 0x180   : > { %11751 = vmatprep.subr.bf16.mxu0 %v16034_v0  ;;  %11991 = vmatprep.subr.bf16.mxu1 %v16034_v0  ;;  %16088 = vst [vmem:[#allocation18_spill] sm:$0xff] %v13819_v49 }
 0x181   : > { %1161 = vmatmul.mubr.f32.gmra.mrb[6].mxu0 %v605_v53  ;;  %2176 = vmatmul.mubr.f32.gmra.mrb[6].mxu1 %v1620_v55  ;;  %v518_v53 = vld [vmem:[%s13387_s17 + $0x358] sm:$0xff]  ;;  %v625_v55 = vld [vmem:[#allocation4 + $0x1b0] sm:$0xff] }
 0x182   : > { %1165 = vmatprep.mubr.f32.mxu0 %v616_v59  ;;  %2180 = vmatprep.mubr.f32.mxu1 %v1631_v3  ;;  %v1640_v59 = vld [vmem:[#allocation4 + $0x7a0] sm:$0xff]  ;;  %v636_v3 = vld [vmem:[#allocation4 + $0x208] sm:$0xff]  ;;  %v13827_v12 = vpack.c.bf16 %v518_v53, %v517_v51  ;;  %v521_v53 = vld [vmem:[%s13387_s17 + $0x370] sm:$0xff] }
 0x183   : > { %11753 = vmatpush1.bf16.msra.mxu0 %v13811_v8  ;;  %11993 = vmatpush1.bf16.msra.mxu1 %v13811_v8  ;;  %v1661_v8 = vld [vmem:[#allocation4 + $0x848] sm:$0xff] }
 0x184   : > { %11754 = vmatprep.subr.bf16.mxu0 %v16034_v0  ;;  %11994 = vmatprep.subr.bf16.mxu1 %v16034_v0  ;;  %16089 = vst [vmem:[#allocation19_spill] sm:$0xff] %v13827_v12 }
 0x185   : > { %1166 = vmatmul.mubr.f32.gmra.mrb[8].mxu0 %v615_v24  ;;  %2181 = vmatmul.mubr.f32.gmra.mrb[8].mxu1 %v1630_v34  ;;  %v520_v24 = vld [vmem:[%s13387_s17 + $0x368] sm:$0xff]  ;;  %v1650_v34 = vld [vmem:[#allocation4 + $0x7f0] sm:$0xff] }
 0x186   : > { %1170 = vmatprep.mubr.f32.mxu0 %v626_v36  ;;  %2185 = vmatprep.mubr.f32.mxu1 %v1641_v5  ;;  %v635_v5 = vld [vmem:[#allocation4 + $0x200] sm:$0xff]  ;;  %v646_v36 = vld [vmem:[#allocation4 + $0x258] sm:$0xff]  ;;  %v13835_v51 = vpack.c.bf16 %v520_v24, %v519_v22 }
 0x187   : > { %11756 = vmatpush1.bf16.msra.mxu0 %v13819_v49  ;;  %11996 = vmatpush1.bf16.msra.mxu1 %v13819_v49  ;;  %v1671_v49 = vld [vmem:[#allocation4 + $0x898] sm:$0xff]  ;;  %v523_v24 = vld [vmem:[%s13387_s17 + $0x380] sm:$0xff] }
 0x188   : > { %11757 = vmatprep.subr.bf16.mxu0 %v16034_v0  ;;  %11997 = vmatprep.subr.bf16.mxu1 %v16034_v0  ;;  %16090 = vst [vmem:[#allocation20_spill] sm:$0xff] %v13835_v51 }
 0x189   : > { %1171 = vmatmul.mubr.f32.gmra.mrb[10].mxu0 %v625_v55  ;;  %2186 = vmatmul.mubr.f32.gmra.mrb[10].mxu1 %v1640_v59  ;;  %v522_v55 = vld [vmem:[%s13387_s17 + $0x378] sm:$0xff]  ;;  %v1660_v59 = vld [vmem:[#allocation4 + $0x840] sm:$0xff] }
 0x18a   : > { %1175 = vmatprep.mubr.f32.mxu0 %v636_v3  ;;  %2190 = vmatprep.mubr.f32.mxu1 %v1651_v37  ;;  %v645_v37 = vld [vmem:[#allocation4 + $0x250] sm:$0xff]  ;;  %v656_v3 = vld [vmem:[#allocation4 + $0x2a8] sm:$0xff]  ;;  %v13843_v22 = vpack.c.bf16 %v522_v55, %v521_v53 }
 0x18b   : > { %11759 = vmatpush1.bf16.msra.mxu0 %v13827_v12  ;;  %11999 = vmatpush1.bf16.msra.mxu1 %v13827_v12  ;;  %v1681_v12 = vld [vmem:[#allocation4 + $0x8e8] sm:$0xff]  ;;  %v525_v55 = vld [vmem:[%s13387_s17 + $0x390] sm:$0xff] }
 0x18c   : > { %11760 = vmatprep.subr.bf16.mxu0 %v16034_v0  ;;  %12000 = vmatprep.subr.bf16.mxu1 %v16034_v0  ;;  %16091 = vst [vmem:[#allocation21_spill] sm:$0xff] %v13843_v22 }
 0x18d   : > { %1176 = vmatmul.mubr.f32.gmra.mrb[12].mxu0 %v635_v5  ;;  %2191 = vmatmul.mubr.f32.gmra.mrb[12].mxu1 %v1650_v34  ;;  %v524_v5 = vld [vmem:[%s13387_s17 + $0x388] sm:$0xff]  ;;  %v1670_v34 = vld [vmem:[#allocation4 + $0x890] sm:$0xff] }
 0x18e   : > { %1180 = vmatprep.mubr.f32.mxu0 %v646_v36  ;;  %2195 = vmatprep.mubr.f32.mxu1 %v1661_v8  ;;  %v655_v8 = vld [vmem:[#allocation4 + $0x2a0] sm:$0xff]  ;;  %v666_v36 = vld [vmem:[#allocation4 + $0x2f8] sm:$0xff]  ;;  %v13851_v53 = vpack.c.bf16 %v524_v5, %v523_v24 }
 0x18f   : > { %11762 = vmatpush1.bf16.msra.mxu0 %v13835_v51  ;;  %12002 = vmatpush1.bf16.msra.mxu1 %v13835_v51  ;;  %v1691_v51 = vld [vmem:[#allocation4 + $0x938] sm:$0xff]  ;;  %v527_v5 = vld [vmem:[%s13387_s17 + $0x3a0] sm:$0xff] }
 0x190   : > { %11763 = vmatprep.subr.bf16.mxu0 %v16034_v0  ;;  %12003 = vmatprep.subr.bf16.mxu1 %v16034_v0  ;;  %16092 = vst [vmem:[#allocation22_spill] sm:$0xff] %v13851_v53 }
 0x191   : > { %1181 = vmatmul.mubr.f32.gmra.mrb[14].mxu0 %v645_v37  ;;  %2196 = vmatmul.mubr.f32.gmra.mrb[14].mxu1 %v1660_v59  ;;  %v526_v37 = vld [vmem:[%s13387_s17 + $0x398] sm:$0xff]  ;;  %v1680_v59 = vld [vmem:[#allocation4 + $0x8e0] sm:$0xff] }
 0x192   : > { %1185 = vmatprep.mubr.f32.mxu0 %v656_v3  ;;  %2200 = vmatprep.mubr.f32.mxu1 %v1671_v49  ;;  %v665_v49 = vld [vmem:[#allocation4 + $0x2f0] sm:$0xff]  ;;  %v676_v3 = vld [vmem:[#allocation4 + $0x348] sm:$0xff]  ;;  %v13859_v24 = vpack.c.bf16 %v526_v37, %v525_v55 }
 0x193   : > { %11765 = vmatpush1.bf16.msra.mxu0 %v13843_v22  ;;  %12005 = vmatpush1.bf16.msra.mxu1 %v13843_v22  ;;  %v1701_v22 = vld [vmem:[#allocation4 + $0x988] sm:$0xff]  ;;  %v529_v37 = vld [vmem:[%s13387_s17 + $0x3b0] sm:$0xff] }
 0x194   : > { %11766 = vmatprep.subr.bf16.mxu0 %v16034_v0  ;;  %12006 = vmatprep.subr.bf16.mxu1 %v16034_v0  ;;  %16093 = vst [vmem:[#allocation23_spill] sm:$0xff] %v13859_v24 }
 0x195   : > { %1186 = vmatmul.mubr.f32.gmra.mrb[16].mxu0 %v655_v8  ;;  %2201 = vmatmul.mubr.f32.gmra.mrb[16].mxu1 %v1670_v34  ;;  %v528_v8 = vld [vmem:[%s13387_s17 + $0x3a8] sm:$0xff]  ;;  %v1690_v34 = vld [vmem:[#allocation4 + $0x930] sm:$0xff] }
 0x196   : > { %1190 = vmatprep.mubr.f32.mxu0 %v666_v36  ;;  %2205 = vmatprep.mubr.f32.mxu1 %v1681_v12  ;;  %v675_v12 = vld [vmem:[#allocation4 + $0x340] sm:$0xff]  ;;  %v686_v36 = vld [vmem:[#allocation4 + $0x398] sm:$0xff]  ;;  %v13867_v55 = vpack.c.bf16 %v528_v8, %v527_v5 }
 0x197   : > { %11768 = vmatpush1.bf16.msra.mxu0 %v13851_v53  ;;  %12008 = vmatpush1.bf16.msra.mxu1 %v13851_v53  ;;  %v1711_v53 = vld [vmem:[#allocation4 + $0x9d8] sm:$0xff]  ;;  %v531_v8 = vld [vmem:[%s13387_s17 + $0x3c0] sm:$0xff] }
 0x198   : > { %11769 = vmatprep.subr.bf16.mxu0 %v16034_v0  ;;  %12009 = vmatprep.subr.bf16.mxu1 %v16034_v0  ;;  %16094 = vst [vmem:[#allocation24_spill] sm:$0xff] %v13867_v55 }
 0x199   : > { %1191 = vmatmul.mubr.f32.gmra.mrb[18].mxu0 %v665_v49  ;;  %2206 = vmatmul.mubr.f32.gmra.mrb[18].mxu1 %v1680_v59  ;;  %v530_v49 = vld [vmem:[%s13387_s17 + $0x3b8] sm:$0xff]  ;;  %v1700_v59 = vld [vmem:[#allocation4 + $0x980] sm:$0xff] }
 0x19a   : > { %1195 = vmatprep.mubr.f32.mxu0 %v676_v3  ;;  %2210 = vmatprep.mubr.f32.mxu1 %v1691_v51  ;;  %v685_v51 = vld [vmem:[#allocation4 + $0x390] sm:$0xff]  ;;  %v696_v3 = vld [vmem:[#allocation4 + $0x3e8] sm:$0xff]  ;;  %v13875_v5 = vpack.c.bf16 %v530_v49, %v529_v37 }
 0x19b   : > { %11771 = vmatpush1.bf16.msra.mxu0 %v13859_v24  ;;  %12011 = vmatpush1.bf16.msra.mxu1 %v13859_v24  ;;  %v1721_v24 = vld [vmem:[#allocation4 + $0xa28] sm:$0xff]  ;;  %v533_v49 = vld [vmem:[%s13387_s17 + $0x3d0] sm:$0xff] }
 0x19c   : > { %11772 = vmatprep.subr.bf16.mxu0 %v16034_v0  ;;  %12012 = vmatprep.subr.bf16.mxu1 %v16034_v0  ;;  %16095 = vst [vmem:[#allocation25_spill] sm:$0xff] %v13875_v5 }
 0x19d   : > { %1196 = vmatmul.mubr.f32.gmra.mrb[20].mxu0 %v675_v12  ;;  %2211 = vmatmul.mubr.f32.gmra.mrb[20].mxu1 %v1690_v34  ;;  %v532_v12 = vld [vmem:[%s13387_s17 + $0x3c8] sm:$0xff]  ;;  %v1710_v34 = vld [vmem:[#allocation4 + $0x9d0] sm:$0xff] }
 0x19e   : > { %1200 = vmatprep.mubr.f32.mxu0 %v686_v36  ;;  %2215 = vmatprep.mubr.f32.mxu1 %v1701_v22  ;;  %v695_v22 = vld [vmem:[#allocation4 + $0x3e0] sm:$0xff]  ;;  %v706_v36 = vld [vmem:[#allocation4 + $0x438] sm:$0xff]  ;;  %v13883_v37 = vpack.c.bf16 %v532_v12, %v531_v8 }
 0x19f   : > { %11774 = vmatpush1.bf16.msra.mxu0 %v13867_v55  ;;  %12014 = vmatpush1.bf16.msra.mxu1 %v13867_v55  ;;  %v1731_v55 = vld [vmem:[#allocation4 + $0xa78] sm:$0xff]  ;;  %v535_v12 = vld [vmem:[%s13387_s17 + $0x3e0] sm:$0xff] }
 0x1a0   : > { %11775 = vmatprep.subr.bf16.mxu0 %v16034_v0  ;;  %12015 = vmatprep.subr.bf16.mxu1 %v16034_v0  ;;  %16096 = vst [vmem:[#allocation26_spill] sm:$0xff] %v13883_v37 }
 0x1a1   : > { %1201 = vmatmul.mubr.f32.gmra.mrb[22].mxu0 %v685_v51  ;;  %2216 = vmatmul.mubr.f32.gmra.mrb[22].mxu1 %v1700_v59  ;;  %v534_v51 = vld [vmem:[%s13387_s17 + $0x3d8] sm:$0xff]  ;;  %v1720_v59 = vld [vmem:[#allocation4 + $0xa20] sm:$0xff] }
 0x1a2   : > { %1205 = vmatprep.mubr.f32.mxu0 %v696_v3  ;;  %2220 = vmatprep.mubr.f32.mxu1 %v1711_v53  ;;  %v705_v53 = vld [vmem:[#allocation4 + $0x430] sm:$0xff]  ;;  %v716_v3 = vld [vmem:[#allocation4 + $0x488] sm:$0xff]  ;;  %v13891_v8 = vpack.c.bf16 %v534_v51, %v533_v49 }
 0x1a3   : > { %11777 = vmatpush1.bf16.msra.mxu0 %v13875_v5  ;;  %12017 = vmatpush1.bf16.msra.mxu1 %v13875_v5  ;;  %v1741_v5 = vld [vmem:[#allocation4 + $0xac8] sm:$0xff]  ;;  %v537_v51 = vld [vmem:[%s13387_s17 + $0x3f0] sm:$0xff] }
 0x1a4   : > { %11778 = vmatprep.subr.bf16.mxu0 %v16034_v0  ;;  %12018 = vmatprep.subr.bf16.mxu1 %v16034_v0  ;;  %16097 = vst [vmem:[#allocation27_spill] sm:$0xff] %v13891_v8 }
 0x1a5   : > { %1206 = vmatmul.mubr.f32.gmra.mrb[24].mxu0 %v695_v22  ;;  %2221 = vmatmul.mubr.f32.gmra.mrb[24].mxu1 %v1710_v34  ;;  %v536_v22 = vld [vmem:[%s13387_s17 + $0x3e8] sm:$0xff]  ;;  %v1730_v34 = vld [vmem:[#allocation4 + $0xa70] sm:$0xff] }
 0x1a6   : > { %1210 = vmatprep.mubr.f32.mxu0 %v706_v36  ;;  %2225 = vmatprep.mubr.f32.mxu1 %v1721_v24  ;;  %v715_v24 = vld [vmem:[#allocation4 + $0x480] sm:$0xff]  ;;  %v726_v36 = vld [vmem:[#allocation4 + $0x4d8] sm:$0xff]  ;;  %v13899_v49 = vpack.c.bf16 %v536_v22, %v535_v12 }
 0x1a7   : > { %11780 = vmatpush1.bf16.msra.mxu0 %v13883_v37  ;;  %12020 = vmatpush1.bf16.msra.mxu1 %v13883_v37  ;;  %v538_v37 = vld [vmem:[%s13387_s17 + $0x3f8] sm:$0xff]  ;;  %v735_v22 = vld [vmem:[#allocation4 + $0x520] sm:$0xff] }
 0x1a8   : > { %11781 = vmatprep.subr.bf16.mxu0 %v16034_v0  ;;  %12021 = vmatprep.subr.bf16.mxu1 %v16034_v0  ;;  %16098 = vst [vmem:[#allocation28_spill] sm:$0xff] %v13899_v49  ;;  %v13907_v12 = vpack.c.bf16 %v538_v37, %v537_v51  ;;  %v745_v37 = vld [vmem:[#allocation4 + $0x570] sm:$0xff]  ;;  %v756_v51 = vld [vmem:[#allocation4 + $0x5c8] sm:$0xff] }
 0x1a9   : > { %1211 = vmatmul.mubr.f32.gmra.mrb[26].mxu0 %v705_v53  ;;  %2226 = vmatmul.mubr.f32.gmra.mrb[26].mxu1 %v1720_v59  ;;  %v1740_v53 = vld [vmem:[#allocation4 + $0xac0] sm:$0xff]  ;;  %v736_v59 = vld [vmem:[#allocation4 + $0x528] sm:$0xff] }
 0x1aa   : > { %1215 = vmatprep.mubr.f32.mxu0 %v716_v3  ;;  %2230 = vmatprep.mubr.f32.mxu1 %v1731_v55  ;;  %v725_v55 = vld [vmem:[#allocation4 + $0x4d0] sm:$0xff]  ;;  %v1751_v3 = vld [vmem:[#allocation4 + $0xb18] sm:$0xff]  ;;  %16099 = vst [vmem:[#allocation29_spill] sm:$0xff] %v13907_v12 }
 0x1ab   : > { %11783 = vmatpush1.bf16.msra.mxu0 %v13891_v8  ;;  %12023 = vmatpush1.bf16.msra.mxu1 %v13891_v8  ;;  %v1602_v8 = vld [vmem:[#allocation4 + $0x670] sm:$0xff] }
 0x1ac   : > { %11784 = vmatprep.subr.bf16.mxu0 %v16034_v0  ;;  %12024 = vmatprep.subr.bf16.mxu1 %v16034_v0 }
 0x1ad   : > { %1216 = vmatmul.mubr.f32.gmra.mrb[28].mxu0 %v715_v24  ;;  %2231 = vmatmul.mubr.f32.gmra.mrb[28].mxu1 %v1730_v34  ;;  %v746_v24 = vld [vmem:[#allocation4 + $0x578] sm:$0xff]  ;;  %v1761_v34 = vld [vmem:[#allocation4 + $0xb68] sm:$0xff] }
 0x1ae   : > { %1220 = vmatprep.mubr.f32.mxu0 %v726_v36  ;;  %2235 = vmatprep.mubr.f32.mxu1 %v1741_v5  ;;  %v1750_v5 = vld [vmem:[#allocation4 + $0xb10] sm:$0xff]  ;;  %v1760_v36 = vld [vmem:[#allocation4 + $0xb60] sm:$0xff] }
 0x1af   : > { %11786 = vmatpush1.bf16.msra.mxu0 %v13899_v49  ;;  %12026 = vmatpush1.bf16.msra.mxu1 %v13899_v49  ;;  %v1603_v49 = vld [vmem:[#allocation4 + $0x678] sm:$0xff] }
 0x1b0   : > { %11787 = vmatprep.subr.bf16.mxu0 %v16034_v0  ;;  %12027 = vmatprep.subr.bf16.mxu1 %v16034_v0 }
 0x1b1   : > { %1221 = vmatmul.mubr.f32.gmra.mrb[30].mxu0 %v725_v55  ;;  %2236 = vmatmul.mubr.f32.gmra.mrb[30].mxu1 %v1740_v53  ;;  %v1771_v55 = vld [vmem:[#allocation4 + $0xbb8] sm:$0xff]  ;;  %v755_v53 = vld [vmem:[#allocation4 + $0x5c0] sm:$0xff] }
 0x1b2   : > { %1225 = vmatprep.mubr.f32.mxu0 %v736_v59  ;;  %2240 = vmatprep.mubr.f32.mxu1 %v1751_v3  ;;  %v1770_v59 = vld [vmem:[#allocation4 + $0xbb0] sm:$0xff]  ;;  %v578_v3 = vld [vmem:[#allocation4 + $0x38] sm:$0xff] }
 0x1b3   : > { %11789 = vmatpush1.bf16.msra.mxu0 %v13907_v12  ;;  %12029 = vmatpush1.bf16.msra.mxu1 %v13907_v12  ;;  %v540_v12 = vld [vmem:[%s13387_s17 + $0x408] sm:$0xff] }
 0x1b4   : > { %11790 = vmatprep.subr.bf16.mxu0 %v16034_v0  ;;  %12030 = vmatprep.subr.bf16.mxu1 %v16034_v0  ;;  %v1593_v0 = vld [vmem:[#allocation4 + $0x628] sm:$0xff] }
 0x1b5   : > { %1226 = vmatmul.mubr.f32.gmra.mrb[32].mxu0 %v735_v22  ;;  %2241 = vmatmul.mubr.f32.gmra.mrb[32].mxu1 %v1750_v5  ;;  %v539_v22 = vld [vmem:[%s13387_s17 + $0x400] sm:$0xff]  ;;  %v577_v5 = vld [vmem:[#allocation4 + $0x30] sm:$0xff] }
 0x1b6   : > { %1230 = vmatprep.mubr.f32.mxu0 %v746_v24  ;;  %2245 = vmatprep.mubr.f32.mxu1 %v1761_v34  ;;  %v1592_v24 = vld [vmem:[#allocation4 + $0x620] sm:$0xff]  ;;  %v588_v34 = vld [vmem:[#allocation4 + $0x88] sm:$0xff] }
 0x1b9   : > { %1231 = vmatmul.mubr.f32.gmra.mrb[34].mxu0 %v745_v37  ;;  %2246 = vmatmul.mubr.f32.gmra.mrb[34].mxu1 %v1760_v36  ;;  %v13917_v37 = vpack.c.bf16 %v540_v12, %v539_v22  ;;  %v541_v36 = vld [vmem:[%s13387_s17 + $0x410] sm:$0xff]  ;;  %v16102_v12 = vmov 0.0|0.0   ;;  %v544_v22 = vld [vmem:[%s13387_s17 + $0x428] sm:$0xff] }
 0x1ba   : > { %1235 = vmatprep.mubr.f32.mxu0 %v756_v51  ;;  %2250 = vmatprep.mubr.f32.mxu1 %v1771_v55  ;;  %v542_v51 = vld [vmem:[%s13387_s17 + $0x418] sm:$0xff]  ;;  %v587_v55 = vld [vmem:[#allocation4 + $0x80] sm:$0xff] }
 0x1bb   : > { %16100 = vst [vmem:[#allocation30_spill] sm:$0xff] %v13917_v37 }
 0x1bd   : > { %1236 = vmatmul.mubr.f32.gmra.mrb[36].mxu0 %v755_v53  ;;  %2251 = vmatmul.mubr.f32.gmra.mrb[36].mxu1 %v1770_v59  ;;  %v598_v53 = vld [vmem:[#allocation4 + $0xd8] sm:$0xff]  ;;  %v1613_v59 = vld [vmem:[#allocation4 + $0x6c8] sm:$0xff] }
 0x1be   : > { %1305 = vmatprep.mubr.f32.mxu0 %v578_v3  ;;  %2320 = vmatprep.mubr.f32.mxu1 %v1593_v0  ;;  %v13923_v0 = vpack.c.bf16 %v542_v51, %v541_v36  ;;  %v543_v3 = vld [vmem:[%s13387_s17 + $0x420] sm:$0xff]  ;;  %v545_v51 = vld [vmem:[%s13387_s17 + $0x430] sm:$0xff] }
 0x1bf   : > { %v13931_v36 = vpack.c.bf16 %v544_v22, %v543_v3  ;;  %v547_v22 = vld [vmem:[%s13387_s17 + $0x440] sm:$0xff] }
 0x1c0   : > { %16101 = vst [vmem:[#allocation31_spill] sm:$0xff] %v13923_v0 }
 0x1c1   : > { %1306 = vmatmul.mubr.f32.vlgmr.msra.gmra.mrb[0].mxu0 %v577_v5  ;;  %2321 = vmatmul.mubr.f32.vlgmr.msra.gmra.mrb[0].mxu1 %v1592_v24  ;;  %v1612_v5 = vld [vmem:[#allocation4 + $0x6c0] sm:$0xff]  ;;  %v608_v24 = vld [vmem:[#allocation4 + $0x128] sm:$0xff]  ;;  %16103 = vst [vmem:[#allocation32_spill] sm:$0xff] %v13931_v36 }
 0x1c2   : > { %1310 = vmatprep.mubr.f32.mxu0 %v588_v34  ;;  %2325 = vmatprep.mubr.f32.mxu1 %v1603_v49  ;;  %v597_v49 = vld [vmem:[#allocation4 + $0xd0] sm:$0xff]  ;;  %v1623_v34 = vld [vmem:[#allocation4 + $0x718] sm:$0xff] }
 0x1c3   : > { %11792 = vmatpush1.bf16.msra.mxu0 %v13917_v37  ;;  %12032 = vmatpush1.bf16.msra.mxu1 %v13917_v37  ;;  %v1633_v37 = vld [vmem:[#allocation4 + $0x768] sm:$0xff] }
 0x1c4   : > { %11793 = vmatprep.subr.bf16.mxu0 %v16102_v12  ;;  %12033 = vmatprep.subr.bf16.mxu1 %v16102_v12 }
 0x1c5   : > { %1311 = vmatmul.mubr.f32.gmra.mrb[2].mxu0 %v587_v55  ;;  %2326 = vmatmul.mubr.f32.gmra.mrb[2].mxu1 %v1602_v8  ;;  %v546_v8 = vld [vmem:[%s13387_s17 + $0x438] sm:$0xff]  ;;  %v607_v55 = vld [vmem:[#allocation4 + $0x120] sm:$0xff] }
 0x1c6   : > { %1315 = vmatprep.mubr.f32.mxu0 %v598_v53  ;;  %2330 = vmatprep.mubr.f32.mxu1 %v1613_v59  ;;  %v1622_v53 = vld [vmem:[#allocation4 + $0x710] sm:$0xff]  ;;  %v618_v59 = vld [vmem:[#allocation4 + $0x178] sm:$0xff]  ;;  %v13939_v3 = vpack.c.bf16 %v546_v8, %v545_v51 }
 0x1c7   : > { %11795 = vmatpush1.bf16.msra.mxu0 %v13923_v0  ;;  %12035 = vmatpush1.bf16.msra.mxu1 %v13923_v0  ;;  %v1643_v0 = vld [vmem:[#allocation4 + $0x7b8] sm:$0xff]  ;;  %v549_v8 = vld [vmem:[%s13387_s17 + $0x450] sm:$0xff] }
 0x1c8   : > { %11796 = vmatprep.subr.bf16.mxu0 %v16102_v12  ;;  %12036 = vmatprep.subr.bf16.mxu1 %v16102_v12  ;;  %16104 = vst [vmem:[#allocation33_spill] sm:$0xff] %v13939_v3 }
 0x1c9   : > { %1316 = vmatmul.mubr.f32.gmra.mrb[4].mxu0 %v597_v49  ;;  %2331 = vmatmul.mubr.f32.gmra.mrb[4].mxu1 %v1612_v5  ;;  %v548_v49 = vld [vmem:[%s13387_s17 + $0x448] sm:$0xff]  ;;  %v617_v5 = vld [vmem:[#allocation4 + $0x170] sm:$0xff] }
 0x1ca   : > { %1320 = vmatprep.mubr.f32.mxu0 %v608_v24  ;;  %2335 = vmatprep.mubr.f32.mxu1 %v1623_v34  ;;  %v1632_v24 = vld [vmem:[#allocation4 + $0x760] sm:$0xff]  ;;  %v628_v34 = vld [vmem:[#allocation4 + $0x1c8] sm:$0xff]  ;;  %v13947_v51 = vpack.c.bf16 %v548_v49, %v547_v22 }
 0x1cb   : > { %11798 = vmatpush1.bf16.msra.mxu0 %v13931_v36  ;;  %12038 = vmatpush1.bf16.msra.mxu1 %v13931_v36  ;;  %v1653_v36 = vld [vmem:[#allocation4 + $0x808] sm:$0xff]  ;;  %v551_v49 = vld [vmem:[%s13387_s17 + $0x460] sm:$0xff] }
 0x1cc   : > { %11799 = vmatprep.subr.bf16.mxu0 %v16102_v12  ;;  %12039 = vmatprep.subr.bf16.mxu1 %v16102_v12  ;;  %16105 = vst [vmem:[#allocation34_spill] sm:$0xff] %v13947_v51 }
 0x1cd   : > { %1321 = vmatmul.mubr.f32.gmra.mrb[6].mxu0 %v607_v55  ;;  %2336 = vmatmul.mubr.f32.gmra.mrb[6].mxu1 %v1622_v53  ;;  %v550_v55 = vld [vmem:[%s13387_s17 + $0x458] sm:$0xff]  ;;  %v1642_v53 = vld [vmem:[#allocation4 + $0x7b0] sm:$0xff] }
 0x1ce   : > { %1325 = vmatprep.mubr.f32.mxu0 %v618_v59  ;;  %2340 = vmatprep.mubr.f32.mxu1 %v1633_v37  ;;  %v627_v37 = vld [vmem:[#allocation4 + $0x1c0] sm:$0xff]  ;;  %v638_v59 = vld [vmem:[#allocation4 + $0x218] sm:$0xff]  ;;  %v13955_v22 = vpack.c.bf16 %v550_v55, %v549_v8  ;;  %v553_v55 = vld [vmem:[%s13387_s17 + $0x470] sm:$0xff] }
 0x1cf   : > { %11801 = vmatpush1.bf16.msra.mxu0 %v13939_v3  ;;  %12041 = vmatpush1.bf16.msra.mxu1 %v13939_v3  ;;  %v1663_v3 = vld [vmem:[#allocation4 + $0x858] sm:$0xff] }
 0x1d0   : > { %11802 = vmatprep.subr.bf16.mxu0 %v16102_v12  ;;  %12042 = vmatprep.subr.bf16.mxu1 %v16102_v12  ;;  %16106 = vst [vmem:[#allocation35_spill] sm:$0xff] %v13955_v22 }
 0x1d1   : > { %1326 = vmatmul.mubr.f32.gmra.mrb[8].mxu0 %v617_v5  ;;  %2341 = vmatmul.mubr.f32.gmra.mrb[8].mxu1 %v1632_v24  ;;  %v552_v5 = vld [vmem:[%s13387_s17 + $0x468] sm:$0xff]  ;;  %v1652_v24 = vld [vmem:[#allocation4 + $0x800] sm:$0xff] }
 0x1d2   : > { %1330 = vmatprep.mubr.f32.mxu0 %v628_v34  ;;  %2345 = vmatprep.mubr.f32.mxu1 %v1643_v0  ;;  %v637_v0 = vld [vmem:[#allocation4 + $0x210] sm:$0xff]  ;;  %v648_v34 = vld [vmem:[#allocation4 + $0x268] sm:$0xff]  ;;  %v13963_v8 = vpack.c.bf16 %v552_v5, %v551_v49  ;;  %v555_v5 = vld [vmem:[%s13387_s17 + $0x480] sm:$0xff] }
 0x1d3   : > { %11804 = vmatpush1.bf16.msra.mxu0 %v13947_v51  ;;  %12044 = vmatpush1.bf16.msra.mxu1 %v13947_v51  ;;  %v1673_v51 = vld [vmem:[#allocation4 + $0x8a8] sm:$0xff] }
 0x1d4   : > { %11805 = vmatprep.subr.bf16.mxu0 %v16102_v12  ;;  %12045 = vmatprep.subr.bf16.mxu1 %v16102_v12  ;;  %16107 = vst [vmem:[#allocation36_spill] sm:$0xff] %v13963_v8 }
 0x1d5   : > { %1331 = vmatmul.mubr.f32.gmra.mrb[10].mxu0 %v627_v37  ;;  %2346 = vmatmul.mubr.f32.gmra.mrb[10].mxu1 %v1642_v53  ;;  %v554_v37 = vld [vmem:[%s13387_s17 + $0x478] sm:$0xff]  ;;  %v1662_v53 = vld [vmem:[#allocation4 + $0x850] sm:$0xff] }
 0x1d6   : > { %1335 = vmatprep.mubr.f32.mxu0 %v638_v59  ;;  %2350 = vmatprep.mubr.f32.mxu1 %v1653_v36  ;;  %v647_v36 = vld [vmem:[#allocation4 + $0x260] sm:$0xff]  ;;  %v658_v59 = vld [vmem:[#allocation4 + $0x2b8] sm:$0xff]  ;;  %v13971_v49 = vpack.c.bf16 %v554_v37, %v553_v55  ;;  %v557_v37 = vld [vmem:[%s13387_s17 + $0x490] sm:$0xff] }
 0x1d7   : > { %11807 = vmatpush1.bf16.msra.mxu0 %v13955_v22  ;;  %12047 = vmatpush1.bf16.msra.mxu1 %v13955_v22  ;;  %v1683_v22 = vld [vmem:[#allocation4 + $0x8f8] sm:$0xff] }
 0x1d8   : > { %11808 = vmatprep.subr.bf16.mxu0 %v16102_v12  ;;  %12048 = vmatprep.subr.bf16.mxu1 %v16102_v12  ;;  %16108 = vst [vmem:[#allocation37_spill] sm:$0xff] %v13971_v49 }
 0x1d9   : > { %1336 = vmatmul.mubr.f32.gmra.mrb[12].mxu0 %v637_v0  ;;  %2351 = vmatmul.mubr.f32.gmra.mrb[12].mxu1 %v1652_v24  ;;  %v556_v0 = vld [vmem:[%s13387_s17 + $0x488] sm:$0xff]  ;;  %v1672_v24 = vld [vmem:[#allocation4 + $0x8a0] sm:$0xff] }
 0x1da   : > { %1340 = vmatprep.mubr.f32.mxu0 %v648_v34  ;;  %2355 = vmatprep.mubr.f32.mxu1 %v1663_v3  ;;  %v657_v3 = vld [vmem:[#allocation4 + $0x2b0] sm:$0xff]  ;;  %v668_v34 = vld [vmem:[#allocation4 + $0x308] sm:$0xff]  ;;  %v13979_v55 = vpack.c.bf16 %v556_v0, %v555_v5  ;;  %v559_v0 = vld [vmem:[%s13387_s17 + $0x4a0] sm:$0xff] }
 0x1db   : > { %11810 = vmatpush1.bf16.msra.mxu0 %v13963_v8  ;;  %12050 = vmatpush1.bf16.msra.mxu1 %v13963_v8  ;;  %v1693_v8 = vld [vmem:[#allocation4 + $0x948] sm:$0xff] }
 0x1dc   : > { %11811 = vmatprep.subr.bf16.mxu0 %v16102_v12  ;;  %12051 = vmatprep.subr.bf16.mxu1 %v16102_v12  ;;  %16109 = vst [vmem:[#allocation38_spill] sm:$0xff] %v13979_v55 }
 0x1dd   : > { %1341 = vmatmul.mubr.f32.gmra.mrb[14].mxu0 %v647_v36  ;;  %2356 = vmatmul.mubr.f32.gmra.mrb[14].mxu1 %v1662_v53  ;;  %v558_v36 = vld [vmem:[%s13387_s17 + $0x498] sm:$0xff]  ;;  %v1682_v53 = vld [vmem:[#allocation4 + $0x8f0] sm:$0xff] }
 0x1de   : > { %1345 = vmatprep.mubr.f32.mxu0 %v658_v59  ;;  %2360 = vmatprep.mubr.f32.mxu1 %v1673_v51  ;;  %v667_v51 = vld [vmem:[#allocation4 + $0x300] sm:$0xff]  ;;  %v678_v59 = vld [vmem:[#allocation4 + $0x358] sm:$0xff]  ;;  %v13987_v5 = vpack.c.bf16 %v558_v36, %v557_v37  ;;  %v561_v36 = vld [vmem:[%s13387_s17 + $0x4b0] sm:$0xff] }
 0x1df   : > { %11813 = vmatpush1.bf16.msra.mxu0 %v13971_v49  ;;  %12053 = vmatpush1.bf16.msra.mxu1 %v13971_v49  ;;  %v1703_v49 = vld [vmem:[#allocation4 + $0x998] sm:$0xff] }
 0x1e0   : > { %11814 = vmatprep.subr.bf16.mxu0 %v16102_v12  ;;  %12054 = vmatprep.subr.bf16.mxu1 %v16102_v12  ;;  %16110 = vst [vmem:[#allocation39_spill] sm:$0xff] %v13987_v5 }
 0x1e1   : > { %1346 = vmatmul.mubr.f32.gmra.mrb[16].mxu0 %v657_v3  ;;  %2361 = vmatmul.mubr.f32.gmra.mrb[16].mxu1 %v1672_v24  ;;  %v560_v3 = vld [vmem:[%s13387_s17 + $0x4a8] sm:$0xff]  ;;  %v1692_v24 = vld [vmem:[#allocation4 + $0x940] sm:$0xff] }
 0x1e2   : > { %1350 = vmatprep.mubr.f32.mxu0 %v668_v34  ;;  %2365 = vmatprep.mubr.f32.mxu1 %v1683_v22  ;;  %v677_v22 = vld [vmem:[#allocation4 + $0x350] sm:$0xff]  ;;  %v688_v34 = vld [vmem:[#allocation4 + $0x3a8] sm:$0xff]  ;;  %v13995_v37 = vpack.c.bf16 %v560_v3, %v559_v0  ;;  %v563_v3 = vld [vmem:[%s13387_s17 + $0x4c0] sm:$0xff] }
 0x1e3   : > { %11816 = vmatpush1.bf16.msra.mxu0 %v13979_v55  ;;  %12056 = vmatpush1.bf16.msra.mxu1 %v13979_v55  ;;  %v1713_v55 = vld [vmem:[#allocation4 + $0x9e8] sm:$0xff] }
 0x1e4   : > { %11817 = vmatprep.subr.bf16.mxu0 %v16102_v12  ;;  %12057 = vmatprep.subr.bf16.mxu1 %v16102_v12  ;;  %16111 = vst [vmem:[#allocation40_spill] sm:$0xff] %v13995_v37 }
 0x1e5   : > { %1351 = vmatmul.mubr.f32.gmra.mrb[18].mxu0 %v667_v51  ;;  %2366 = vmatmul.mubr.f32.gmra.mrb[18].mxu1 %v1682_v53  ;;  %v562_v51 = vld [vmem:[%s13387_s17 + $0x4b8] sm:$0xff]  ;;  %v1702_v53 = vld [vmem:[#allocation4 + $0x990] sm:$0xff] }
 0x1e6   : > { %1355 = vmatprep.mubr.f32.mxu0 %v678_v59  ;;  %2370 = vmatprep.mubr.f32.mxu1 %v1693_v8  ;;  %v687_v8 = vld [vmem:[#allocation4 + $0x3a0] sm:$0xff]  ;;  %v698_v59 = vld [vmem:[#allocation4 + $0x3f8] sm:$0xff]  ;;  %v14003_v0 = vpack.c.bf16 %v562_v51, %v561_v36  ;;  %v565_v51 = vld [vmem:[%s13387_s17 + $0x4d0] sm:$0xff] }
 0x1e7   : > { %11819 = vmatpush1.bf16.msra.mxu0 %v13987_v5  ;;  %12059 = vmatpush1.bf16.msra.mxu1 %v13987_v5  ;;  %v1723_v5 = vld [vmem:[#allocation4 + $0xa38] sm:$0xff] }
 0x1e8   : > { %11820 = vmatprep.subr.bf16.mxu0 %v16102_v12  ;;  %12060 = vmatprep.subr.bf16.mxu1 %v16102_v12  ;;  %16112 = vst [vmem:[#allocation41_spill] sm:$0xff] %v14003_v0 }
 0x1e9   : > { %1356 = vmatmul.mubr.f32.gmra.mrb[20].mxu0 %v677_v22  ;;  %2371 = vmatmul.mubr.f32.gmra.mrb[20].mxu1 %v1692_v24  ;;  %v564_v22 = vld [vmem:[%s13387_s17 + $0x4c8] sm:$0xff]  ;;  %v1712_v24 = vld [vmem:[#allocation4 + $0x9e0] sm:$0xff] }
 0x1ea   : > { %1360 = vmatprep.mubr.f32.mxu0 %v688_v34  ;;  %2375 = vmatprep.mubr.f32.mxu1 %v1703_v49  ;;  %v697_v49 = vld [vmem:[#allocation4 + $0x3f0] sm:$0xff]  ;;  %v708_v34 = vld [vmem:[#allocation4 + $0x448] sm:$0xff]  ;;  %v14011_v36 = vpack.c.bf16 %v564_v22, %v563_v3  ;;  %v567_v22 = vld [vmem:[%s13387_s17 + $0x4e0] sm:$0xff] }
 0x1eb   : > { %11822 = vmatpush1.bf16.msra.mxu0 %v13995_v37  ;;  %12062 = vmatpush1.bf16.msra.mxu1 %v13995_v37  ;;  %v1733_v37 = vld [vmem:[#allocation4 + $0xa88] sm:$0xff] }
 0x1ec   : > { %11823 = vmatprep.subr.bf16.mxu0 %v16102_v12  ;;  %12063 = vmatprep.subr.bf16.mxu1 %v16102_v12  ;;  %16113 = vst [vmem:[#allocation42_spill] sm:$0xff] %v14011_v36 }
 0x1ed   : > { %1361 = vmatmul.mubr.f32.gmra.mrb[22].mxu0 %v687_v8  ;;  %2376 = vmatmul.mubr.f32.gmra.mrb[22].mxu1 %v1702_v53  ;;  %v566_v8 = vld [vmem:[%s13387_s17 + $0x4d8] sm:$0xff]  ;;  %v1722_v53 = vld [vmem:[#allocation4 + $0xa30] sm:$0xff] }
 0x1ee   : > { %1365 = vmatprep.mubr.f32.mxu0 %v698_v59  ;;  %2380 = vmatprep.mubr.f32.mxu1 %v1713_v55  ;;  %v707_v55 = vld [vmem:[#allocation4 + $0x440] sm:$0xff]  ;;  %v718_v59 = vld [vmem:[#allocation4 + $0x498] sm:$0xff]  ;;  %v14019_v3 = vpack.c.bf16 %v566_v8, %v565_v51  ;;  %v569_v8 = vld [vmem:[%s13387_s17 + $0x4f0] sm:$0xff] }
 0x1ef   : > { %11825 = vmatpush1.bf16.msra.mxu0 %v14003_v0  ;;  %12065 = vmatpush1.bf16.msra.mxu1 %v14003_v0  ;;  %v1743_v0 = vld [vmem:[#allocation4 + $0xad8] sm:$0xff] }
 0x1f0   : > { %11826 = vmatprep.subr.bf16.mxu0 %v16102_v12  ;;  %12066 = vmatprep.subr.bf16.mxu1 %v16102_v12  ;;  %16114 = vst [vmem:[#allocation43_spill] sm:$0xff] %v14019_v3 }
 0x1f1   : > { %1366 = vmatmul.mubr.f32.gmra.mrb[24].mxu0 %v697_v49  ;;  %2381 = vmatmul.mubr.f32.gmra.mrb[24].mxu1 %v1712_v24  ;;  %v568_v49 = vld [vmem:[%s13387_s17 + $0x4e8] sm:$0xff]  ;;  %v1732_v24 = vld [vmem:[#allocation4 + $0xa80] sm:$0xff] }
 0x1f2   : > { %1370 = vmatprep.mubr.f32.mxu0 %v708_v34  ;;  %2385 = vmatprep.mubr.f32.mxu1 %v1723_v5  ;;  %v717_v5 = vld [vmem:[#allocation4 + $0x490] sm:$0xff]  ;;  %v728_v34 = vld [vmem:[#allocation4 + $0x4e8] sm:$0xff]  ;;  %v14027_v51 = vpack.c.bf16 %v568_v49, %v567_v22 }
 0x1f3   : > { %11828 = vmatpush1.bf16.msra.mxu0 %v14011_v36  ;;  %12068 = vmatpush1.bf16.msra.mxu1 %v14011_v36  ;;  %v570_v36 = vld [vmem:[%s13387_s17 + $0x4f8] sm:$0xff] }
 0x1f4   : > { %11829 = vmatprep.subr.bf16.mxu0 %v16102_v12  ;;  %12069 = vmatprep.subr.bf16.mxu1 %v16102_v12  ;;  %16115 = vst [vmem:[#allocation44_spill] sm:$0xff] %v14027_v51  ;;  %v14035_v22 = vpack.c.bf16 %v570_v36, %v569_v8 }
 0x1f5   : > { %1371 = vmatmul.mubr.f32.gmra.mrb[26].mxu0 %v707_v55  ;;  %2386 = vmatmul.mubr.f32.gmra.mrb[26].mxu1 %v1722_v53  ;;  %v1561_v55 = vlaneseq  ;;  %v1742_v53 = vld [vmem:[#allocation4 + $0xad0] sm:$0xff] }
 0x1f6   : > { %1375 = vmatprep.mubr.f32.mxu0 %v718_v59  ;;  %2390 = vmatprep.mubr.f32.mxu1 %v1733_v37  ;;  %v727_v37 = vld [vmem:[#allocation4 + $0x4e0] sm:$0xff]  ;;  %v738_v59 = vld [vmem:[#allocation4 + $0x538] sm:$0xff]  ;;  %16116 = vst [vmem:[#allocation45_spill] sm:$0xff] %v14035_v22 }
 0x1f7   : > { %11831 = vmatpush1.bf16.msra.mxu0 %v14019_v3  ;;  %12071 = vmatpush1.bf16.msra.mxu1 %v14019_v3  ;;  %v14039_v49 = vand.u32 127, %v1561_v55  ;;  %v14044_v36 = vshrl.u32 %v1561_v55, 7  ;;  %v16064_v3 = vmov 0.0  }
 0x1f8   : > { %11832 = vmatprep.subr.bf16.mxu0 %v16102_v12  ;;  %12072 = vmatprep.subr.bf16.mxu1 %v16102_v12 }
 0x1f9   : > { %1376 = vmatmul.mubr.f32.gmra.mrb[28].mxu0 %v717_v5  ;;  %2391 = vmatmul.mubr.f32.gmra.mrb[28].mxu1 %v1732_v24  ;;  %16117 = vst [vmem:[#allocation46_spill] sm:$0xff] %v14039_v49  ;;  %v1752_v5 = vld [vmem:[#allocation4 + $0xb20] sm:$0xff]  ;;  %v748_v24 = vld [vmem:[#allocation4 + $0x588] sm:$0xff]  ;;  %16118 = vst [vmem:[#allocation47_spill] sm:$0xff] %v14044_v36  ;;  %v14048_v8 = vmul.u32 2, %v14039_v49 }
 0x1fa   : > { %1380 = vmatprep.mubr.f32.mxu0 %v728_v34  ;;  %2395 = vmatprep.mubr.f32.mxu1 %v1743_v0  ;;  %v737_v0 = vld [vmem:[#allocation4 + $0x530] sm:$0xff]  ;;  %v1763_v34 = vld [vmem:[#allocation4 + $0xb78] sm:$0xff]  ;;  %v580_v49 = vld [vmem:[#allocation4 + $0x48] sm:$0xff] }
 0x1fb   : > { %11834 = vmatpush1.bf16.msra.mxu0 %v14027_v51  ;;  %12074 = vmatpush1.bf16.msra.mxu1 %v14027_v51  ;;  %v14051_v51 = vadd.s32 8, %v14044_v36  ;;  %v14054_v55 = vadd.s32 1, %v14048_v8  ;;  %vm1570_vm0 = vcmp.eq.s32.totalorder %v14044_v36, %v14048_v8 }
 0x1fc   : > { %11835 = vmatprep.subr.bf16.mxu0 %v16102_v12  ;;  %12075 = vmatprep.subr.bf16.mxu1 %v16102_v12 }
 0x1fd   : > { %1381 = vmatmul.mubr.f32.gmra.mrb[30].mxu0 %v727_v37  ;;  %2396 = vmatmul.mubr.f32.gmra.mrb[30].mxu1 %v1742_v53  ;;  %v1762_v37 = vld [vmem:[#allocation4 + $0xb70] sm:$0xff]  ;;  %v758_v53 = vld [vmem:[#allocation4 + $0x5d8] sm:$0xff]  ;;  %16119 = vst [vmem:[#allocation48_spill] sm:$0xff] %v14051_v51  ;;  %vm1571_vm1 = vcmp.eq.s32.totalorder %v14051_v51, %v14048_v8  ;;  %vm2577_vm2 = vcmp.eq.s32.totalorder %v14044_v36, %v14054_v55 }
 0x1fe   : > { %1385 = vmatprep.mubr.f32.mxu0 %v738_v59  ;;  %2400 = vmatprep.mubr.f32.mxu1 %v1753_v45  ;;  %v747_v45 = vld [vmem:[#allocation4 + $0x580] sm:$0xff]  ;;  %v1773_v59 = vld [vmem:[#allocation4 + $0xbc8] sm:$0xff]  ;;  %vm2578_vm3 = vcmp.eq.s32.totalorder %v14051_v51, %v14054_v55  ;;  %vm14070_vm4 = vmpackc.low %vm1571_vm1, %vm1570_vm0  ;;  %v16061_v51 = vmov 1.0|1.0  }
 0x1ff   : > { %11837 = vmatpush1.bf16.msra.mxu0 %v14035_v22  ;;  %12077 = vmatpush1.bf16.msra.mxu1 %v14035_v22  ;;  %v1595_v22 = vld [vmem:[#allocation4 + $0x638] sm:$0xff]  ;;  %vm12079_vm5 = vmpackc.low %vm2578_vm3, %vm2577_vm2 }
 0x200   : > { %12078 = vmatprep.subr.bf16.mxu0 %v16102_v12  ;;  %12084 = vmatprep.subr.bf16.mxu1 %v16102_v12 }
 0x201   : > { %1386 = vmatmul.mubr.f32.gmra.mrb[32].mxu0 %v737_v0  ;;  %2401 = vmatmul.mubr.f32.gmra.mrb[32].mxu1 %v1752_v5  ;;  %v757_v0 = vld [vmem:[#allocation4 + $0x5d0] sm:$0xff]  ;;  %v1772_v5 = vld [vmem:[#allocation4 + $0xbc0] sm:$0xff] }
 0x202   : > { %1390 = vmatprep.mubr.f32.mxu0 %v748_v24  ;;  %2405 = vmatprep.mubr.f32.mxu1 %v1763_v34  ;;  %v14057_v24 = vadd.s32 16, %v14044_v36  ;;  %v14060_v34 = vadd.s32 24, %v14044_v36 }
 0x204   : > { %16120 = vst [vmem:[#allocation49_spill] sm:$0xff] %v14057_v24  ;;  %16121 = vst [vmem:[#allocation50_spill] sm:$0xff] %v14060_v34  ;;  %vm1572_vm6 = vcmp.eq.s32.totalorder %v14057_v24, %v14048_v8  ;;  %vm1573_vm7 = vcmp.eq.s32.totalorder %v14060_v34, %v14048_v8  ;;  %vm2579_vm8 = vcmp.eq.s32.totalorder %v14057_v24, %v14054_v55  ;;  %v1634_v24 = vld [vmem:[#allocation4 + $0x770] sm:$0xff] }
 0x205   : > { %1391 = vmatmul.mubr.f32.gmra.mrb[34].mxu0 %v747_v45  ;;  %2406 = vmatmul.mubr.f32.gmra.mrb[34].mxu1 %v1762_v37  ;;  %v579_v45 = vld [vmem:[#allocation4 + $0x40] sm:$0xff]  ;;  %v1594_v37 = vld [vmem:[#allocation4 + $0x630] sm:$0xff]  ;;  %vm2580_vm9 = vcmp.eq.s32.totalorder %v14060_v34, %v14054_v55  ;;  %vm12088_vm10 = vmpackc.low %vm1573_vm7, %vm1572_vm6  ;;  %vm5745_vm7 = vcmask 153600  }
 0x206   : > { %1395 = vmatprep.mubr.f32.mxu0 %v758_v53  ;;  %2410 = vmatprep.mubr.f32.mxu1 %v1773_v59  ;;  %v590_v53 = vld [vmem:[#allocation4 + $0x98] sm:$0xff]  ;;  %v1605_v59 = vld [vmem:[#allocation4 + $0x688] sm:$0xff]  ;;  %vm12082_vm11 = vmpackc.low %vm2580_vm9, %vm2579_vm8  ;;  %vm7594_vm8 = vcmask 1040384   ;;  %vm7603_vm9 = vcmask 1041408  }
 0x207   : > { %v619_v34 = vld [vmem:[#allocation4 + $0x180] sm:$0xff] }
 0x209   : > { %1396 = vmatmul.mubr.f32.gmra.mrb[36].mxu0 %v757_v0  ;;  %2411 = vmatmul.mubr.f32.gmra.mrb[36].mxu1 %v1772_v5  ;;  %v600_v0 = vld [vmem:[#allocation4 + $0xe8] sm:$0xff]  ;;  %v1615_v5 = vld [vmem:[#allocation4 + $0x6d8] sm:$0xff] }
 0x20a   : > { %1465 = vmatprep.mubr.f32.mxu0 %v580_v49  ;;  %2480 = vmatprep.mubr.f32.mxu1 %v1595_v22  ;;  %v589_v22 = vld [vmem:[#allocation4 + $0x90] sm:$0xff]  ;;  %v1604_v49 = vld [vmem:[#allocation4 + $0x680] sm:$0xff] }
 0x20d   : > { %1466 = vmatmul.mubr.f32.vlgmr.msra.gmra.mrb[0].mxu0 %v579_v45  ;;  %2481 = vmatmul.mubr.f32.vlgmr.msra.gmra.mrb[0].mxu1 %v1594_v37  ;;  %v599_v45 = vld [vmem:[#allocation4 + $0xe0] sm:$0xff]  ;;  %v1614_v37 = vld [vmem:[#allocation4 + $0x6d0] sm:$0xff] }
 0x20e   : > { %1470 = vmatprep.mubr.f32.mxu0 %v590_v53  ;;  %2485 = vmatprep.mubr.f32.mxu1 %v1605_v59  ;;  %v610_v53 = vld [vmem:[#allocation4 + $0x138] sm:$0xff]  ;;  %v1625_v59 = vld [vmem:[#allocation4 + $0x728] sm:$0xff] }
 0x20f   : > { %12080 = vmatpush3.bf16.msk.msra.mxu0 %vm12079_vm5, %v16061_v51  ;;  %12086 = vmatpush3.bf16.msk.msra.mxu1 %vm14070_vm4, %v16061_v51 }
 0x210   : > { %12081 = vmatprep.subr.bf16.mxu0 %v16102_v12  ;;  %12087 = vmatprep.subr.bf16.mxu1 %v16102_v12 }
 0x211   : > { %1471 = vmatmul.mubr.f32.gmra.mrb[2].mxu0 %v589_v22  ;;  %2486 = vmatmul.mubr.f32.gmra.mrb[2].mxu1 %v1604_v49  ;;  %v609_v22 = vld [vmem:[#allocation4 + $0x130] sm:$0xff]  ;;  %v1624_v49 = vld [vmem:[#allocation4 + $0x720] sm:$0xff] }
 0x212   : > { %1475 = vmatprep.mubr.f32.mxu0 %v600_v0  ;;  %2490 = vmatprep.mubr.f32.mxu1 %v1615_v5  ;;  %v620_v0 = vld [vmem:[#allocation4 + $0x188] sm:$0xff]  ;;  %v1635_v5 = vld [vmem:[#allocation4 + $0x778] sm:$0xff] }
 0x213   : > { %12083 = vmatpush3.bf16.msk.msra.mxu0 %vm12082_vm11, %v16061_v51  ;;  %12089 = vmatpush3.bf16.msk.msra.mxu1 %vm12088_vm10, %v16061_v51  ;;  %v630_v51 = vld [vmem:[#allocation4 + $0x1d8] sm:$0xff]  ;;  %vm7612_vm10 = vcmask 1042432   ;;  %vm7621_vm11 = vcmask 1043456  }
 0x214   : > { %11027 = vmatprep.subr.mxu0 %v16064_v3  ;;  %11094 = vmatprep.subr.mxu1 %v16064_v3 }
 0x215   : > { %1476 = vmatmul.mubr.f32.gmra.mrb[4].mxu0 %v599_v45  ;;  %2491 = vmatmul.mubr.f32.gmra.mrb[4].mxu1 %v1614_v37  ;;  %v629_v45 = vld [vmem:[#allocation4 + $0x1d0] sm:$0xff]  ;;  %v1644_v37 = vld [vmem:[#allocation4 + $0x7c0] sm:$0xff] }
 0x216   : > { %1480 = vmatprep.mubr.f32.mxu0 %v610_v53  ;;  %2495 = vmatprep.mubr.f32.mxu1 %v1625_v59  ;;  %v640_v53 = vld [vmem:[#allocation4 + $0x228] sm:$0xff]  ;;  %v1655_v59 = vld [vmem:[#allocation4 + $0x818] sm:$0xff] }
 0x219   : > { %1481 = vmatmul.mubr.f32.gmra.mrb[6].mxu0 %v609_v22  ;;  %2496 = vmatmul.mubr.f32.gmra.mrb[6].mxu1 %v1624_v49  ;;  %v639_v22 = vld [vmem:[#allocation4 + $0x220] sm:$0xff]  ;;  %v1654_v49 = vld [vmem:[#allocation4 + $0x810] sm:$0xff] }
 0x21a   : > { %1485 = vmatprep.mubr.f32.mxu0 %v620_v0  ;;  %2500 = vmatprep.mubr.f32.mxu1 %v1635_v5  ;;  %v650_v0 = vld [vmem:[#allocation4 + $0x278] sm:$0xff]  ;;  %v1665_v5 = vld [vmem:[#allocation4 + $0x868] sm:$0xff] }
 0x21d   : > { %1486 = vmatmul.mubr.f32.gmra.mrb[8].mxu0 %v619_v34  ;;  %2501 = vmatmul.mubr.f32.gmra.mrb[8].mxu1 %v1634_v24  ;;  %v649_v34 = vld [vmem:[#allocation4 + $0x270] sm:$0xff]  ;;  %v1664_v24 = vld [vmem:[#allocation4 + $0x860] sm:$0xff] }
 0x21e   : > { %1490 = vmatprep.mubr.f32.mxu0 %v630_v51  ;;  %2505 = vmatprep.mubr.f32.mxu1 %v1645_v25  ;;  %v660_v51 = vld [vmem:[#allocation4 + $0x2c8] sm:$0xff]  ;;  %v1675_v25 = vld [vmem:[#allocation4 + $0x8b8] sm:$0xff] }
 0x221   : > { %1491 = vmatmul.mubr.f32.gmra.mrb[10].mxu0 %v629_v45  ;;  %2506 = vmatmul.mubr.f32.gmra.mrb[10].mxu1 %v1644_v37  ;;  %v659_v45 = vld [vmem:[#allocation4 + $0x2c0] sm:$0xff]  ;;  %v1674_v37 = vld [vmem:[#allocation4 + $0x8b0] sm:$0xff] }
 0x222   : > { %1495 = vmatprep.mubr.f32.mxu0 %v640_v53  ;;  %2510 = vmatprep.mubr.f32.mxu1 %v1655_v59  ;;  %v670_v53 = vld [vmem:[#allocation4 + $0x318] sm:$0xff]  ;;  %v1685_v59 = vld [vmem:[#allocation4 + $0x908] sm:$0xff] }
 0x225   : > { %1496 = vmatmul.mubr.f32.gmra.mrb[12].mxu0 %v639_v22  ;;  %2511 = vmatmul.mubr.f32.gmra.mrb[12].mxu1 %v1654_v49  ;;  %v669_v22 = vld [vmem:[#allocation4 + $0x310] sm:$0xff]  ;;  %v1684_v49 = vld [vmem:[#allocation4 + $0x900] sm:$0xff] }
 0x226   : > { %1500 = vmatprep.mubr.f32.mxu0 %v650_v0  ;;  %2515 = vmatprep.mubr.f32.mxu1 %v1665_v5  ;;  %v680_v0 = vld [vmem:[#allocation4 + $0x368] sm:$0xff]  ;;  %v1695_v5 = vld [vmem:[#allocation4 + $0x958] sm:$0xff] }
 0x229   : > { %1501 = vmatmul.mubr.f32.gmra.mrb[14].mxu0 %v649_v34  ;;  %2516 = vmatmul.mubr.f32.gmra.mrb[14].mxu1 %v1664_v24  ;;  %v679_v34 = vld [vmem:[#allocation4 + $0x360] sm:$0xff]  ;;  %v1694_v24 = vld [vmem:[#allocation4 + $0x950] sm:$0xff] }
 0x22a   : > { %1505 = vmatprep.mubr.f32.mxu0 %v660_v51  ;;  %2520 = vmatprep.mubr.f32.mxu1 %v1675_v25  ;;  %v690_v51 = vld [vmem:[#allocation4 + $0x3b8] sm:$0xff]  ;;  %v1705_v25 = vld [vmem:[#allocation4 + $0x9a8] sm:$0xff] }
 0x22d   : > { %1506 = vmatmul.mubr.f32.gmra.mrb[16].mxu0 %v659_v45  ;;  %2521 = vmatmul.mubr.f32.gmra.mrb[16].mxu1 %v1674_v37  ;;  %v689_v45 = vld [vmem:[#allocation4 + $0x3b0] sm:$0xff]  ;;  %v1704_v37 = vld [vmem:[#allocation4 + $0x9a0] sm:$0xff] }
 0x22e   : > { %1510 = vmatprep.mubr.f32.mxu0 %v670_v53  ;;  %2525 = vmatprep.mubr.f32.mxu1 %v1685_v59  ;;  %v700_v53 = vld [vmem:[#allocation4 + $0x408] sm:$0xff]  ;;  %v1715_v59 = vld [vmem:[#allocation4 + $0x9f8] sm:$0xff] }
 0x231   : > { %1511 = vmatmul.mubr.f32.gmra.mrb[18].mxu0 %v669_v22  ;;  %2526 = vmatmul.mubr.f32.gmra.mrb[18].mxu1 %v1684_v49  ;;  %v699_v22 = vld [vmem:[#allocation4 + $0x400] sm:$0xff]  ;;  %v1714_v49 = vld [vmem:[#allocation4 + $0x9f0] sm:$0xff] }
 0x232   : > { %1515 = vmatprep.mubr.f32.mxu0 %v680_v0  ;;  %2530 = vmatprep.mubr.f32.mxu1 %v1695_v5  ;;  %v710_v0 = vld [vmem:[#allocation4 + $0x458] sm:$0xff]  ;;  %v1725_v5 = vld [vmem:[#allocation4 + $0xa48] sm:$0xff] }
 0x235   : > { %1516 = vmatmul.mubr.f32.gmra.mrb[20].mxu0 %v679_v34  ;;  %2531 = vmatmul.mubr.f32.gmra.mrb[20].mxu1 %v1694_v24  ;;  %v709_v34 = vld [vmem:[#allocation4 + $0x450] sm:$0xff]  ;;  %v1724_v24 = vld [vmem:[#allocation4 + $0xa40] sm:$0xff] }
 0x236   : > { %1520 = vmatprep.mubr.f32.mxu0 %v690_v51  ;;  %2535 = vmatprep.mubr.f32.mxu1 %v1705_v25  ;;  %v720_v51 = vld [vmem:[#allocation4 + $0x4a8] sm:$0xff]  ;;  %v1735_v25 = vld [vmem:[#allocation4 + $0xa98] sm:$0xff] }
 0x239   : > { %1521 = vmatmul.mubr.f32.gmra.mrb[22].mxu0 %v689_v45  ;;  %2536 = vmatmul.mubr.f32.gmra.mrb[22].mxu1 %v1704_v37  ;;  %v719_v45 = vld [vmem:[#allocation4 + $0x4a0] sm:$0xff]  ;;  %v1734_v37 = vld [vmem:[#allocation4 + $0xa90] sm:$0xff] }
 0x23a   : > { %1525 = vmatprep.mubr.f32.mxu0 %v700_v53  ;;  %2540 = vmatprep.mubr.f32.mxu1 %v1715_v59  ;;  %v730_v53 = vld [vmem:[#allocation4 + $0x4f8] sm:$0xff]  ;;  %v1745_v59 = vld [vmem:[#allocation4 + $0xae8] sm:$0xff] }
 0x23d   : > { %1526 = vmatmul.mubr.f32.gmra.mrb[24].mxu0 %v699_v22  ;;  %2541 = vmatmul.mubr.f32.gmra.mrb[24].mxu1 %v1714_v49  ;;  %v729_v22 = vld [vmem:[#allocation4 + $0x4f0] sm:$0xff]  ;;  %v1744_v49 = vld [vmem:[#allocation4 + $0xae0] sm:$0xff] }
 0x23e   : > { %1530 = vmatprep.mubr.f32.mxu0 %v710_v0  ;;  %2545 = vmatprep.mubr.f32.mxu1 %v1725_v5  ;;  %v740_v0 = vld [vmem:[#allocation4 + $0x548] sm:$0xff]  ;;  %v1755_v5 = vld [vmem:[#allocation4 + $0xb38] sm:$0xff] }
 0x241   : > { %1531 = vmatmul.mubr.f32.gmra.mrb[26].mxu0 %v709_v34  ;;  %2546 = vmatmul.mubr.f32.gmra.mrb[26].mxu1 %v1724_v24  ;;  %v739_v34 = vld [vmem:[#allocation4 + $0x540] sm:$0xff]  ;;  %v1754_v24 = vld [vmem:[#allocation4 + $0xb30] sm:$0xff] }
 0x242   : > { %1535 = vmatprep.mubr.f32.mxu0 %v720_v51  ;;  %2550 = vmatprep.mubr.f32.mxu1 %v1735_v25  ;;  %v750_v51 = vld [vmem:[#allocation4 + $0x598] sm:$0xff]  ;;  %v1765_v25 = vld [vmem:[#allocation4 + $0xb88] sm:$0xff] }
 0x245   : > { %1536 = vmatmul.mubr.f32.gmra.mrb[28].mxu0 %v719_v45  ;;  %2551 = vmatmul.mubr.f32.gmra.mrb[28].mxu1 %v1734_v37  ;;  %v749_v45 = vld [vmem:[#allocation4 + $0x590] sm:$0xff]  ;;  %v1764_v37 = vld [vmem:[#allocation4 + $0xb80] sm:$0xff] }
 0x246   : > { %1540 = vmatprep.mubr.f32.mxu0 %v730_v53  ;;  %2555 = vmatprep.mubr.f32.mxu1 %v1745_v59  ;;  %v760_v53 = vld [vmem:[#allocation4 + $0x5e8] sm:$0xff]  ;;  %v1775_v59 = vld [vmem:[#allocation4 + $0xbd8] sm:$0xff] }
 0x249   : > { %1541 = vmatmul.mubr.f32.gmra.mrb[30].mxu0 %v729_v22  ;;  %2556 = vmatmul.mubr.f32.gmra.mrb[30].mxu1 %v1744_v49  ;;  %v759_v22 = vld [vmem:[#allocation4 + $0x5e0] sm:$0xff]  ;;  %v1774_v49 = vld [vmem:[#allocation4 + $0xbd0] sm:$0xff] }
 0x24a   : > { %1545 = vmatprep.mubr.f32.mxu0 %v740_v0  ;;  %2560 = vmatprep.mubr.f32.mxu1 %v1755_v5  ;;  %v14096_v0 = vadd.s32 32, %v14044_v36  ;;  %v13143_v5 = vmov 1.0  }
 0x24c   : > { %vm2581_vm12 = vcmp.eq.s32.totalorder %v14096_v0, %v14054_v55  ;;  %vm1574_vm13 = vcmp.eq.s32.totalorder %v14096_v0, %v14048_v8 }
 0x24d   : > { %1546 = vmatmul.mubr.f32.gmra.mrb[32].mxu0 %v739_v34  ;;  %2561 = vmatmul.mubr.f32.gmra.mrb[32].mxu1 %v1754_v24 }
 0x24e   : > { %1550 = vmatprep.mubr.f32.mxu0 %v750_v51  ;;  %2565 = vmatprep.mubr.f32.mxu1 %v1765_v25 }
 0x24f   : > { %11028 = vmatpush3.msk.msra.mxu0 %vm2581_vm12, %v13143_v5  ;;  %11095 = vmatpush3.msk.msra.mxu1 %vm1574_vm13, %v13143_v5  ;;  %vm7680_vm12 = vcmask 102448   ;;  %vm7630_vm13 = vcmask 53248  }
 0x250   : > { %12090 = vmatprep.subr.bf16.mxu0 %v16102_v12  ;;  %12330 = vmatprep.subr.bf16.mxu1 %v16102_v12 }
 0x251   : > { %1551 = vmatmul.mubr.f32.gmra.mrb[34].mxu0 %v749_v45  ;;  %2566 = vmatmul.mubr.f32.gmra.mrb[34].mxu1 %v1764_v37 }
 0x252   : > { %1555 = vmatprep.mubr.f32.mxu0 %v760_v53  ;;  %2570 = vmatprep.mubr.f32.mxu1 %v1775_v59 }
 0x255   : > { %1556 = vmatmul.mubr.f32.gmra.mrb[36].mxu0 %v759_v22  ;;  %2571 = vmatmul.mubr.f32.gmra.mrb[36].mxu1 %v1774_v49 }
 0x256   : > { %11029 = vmatprep.mubr.msk.f32.mxu0 %vm13144_vm14, %v16064_v3  ;;  %11096 = vmatprep.mubr.msk.f32.mxu1 %vm13144_vm14, %v16064_v3 }
 0x2e0   : > { %v1467_v55 = vpop.f32.mrb[0].mxu0  ;;  %v2482_v34 = vpop.f32.mrb[0].mxu1 }
 0x2e1   : > { %v1469_v24 = vpop.f32.mrb[1].mxu0  ;;  %v2484_v51 = vpop.f32.mrb[1].mxu1  ;;  %11030 = vmatmul.mubr.msk.f32.vlgmr.msra.gmra.mrb[38].mxu0 %vm2592_vm15, %v2482_v34  ;;  %11097 = vmatmul.mubr.msk.f32.vlgmr.msra.gmra.mrb[38].mxu1 %vm2592_vm15, %v1467_v55 }
 0x2e2   : > { %11032 = vmatprep.mubr.msk.f32.mxu0 %vm13144_vm14, %v16064_v3  ;;  %11099 = vmatprep.mubr.msk.f32.mxu1 %vm13144_vm14, %v16064_v3 }
 0x2e3   : > { %12092 = vmatpush1.bf16.msra.mxu0 %v13406_v4 }
 0x2e4   : > { %v1472_v25 = vpop.f32.mrb[2].mxu0  ;;  %v2487_v45 = vpop.f32.mrb[2].mxu1  ;;  %12093 = vmatprep.subr.bf16.mxu0 %v16102_v12 }
 0x2e5   : > { %v1474_v37 = vpop.f32.mrb[3].mxu0  ;;  %v2489_v53 = vpop.f32.mrb[3].mxu1  ;;  %11033 = vmatmul.mubr.msk.f32.gmra.mrb[40].mxu0 %vm2592_vm15, %v2487_v45  ;;  %11100 = vmatmul.mubr.msk.f32.gmra.mrb[40].mxu1 %vm2592_vm15, %v1472_v25 }
 0x2e6   : > { %11035 = vmatprep.mubr.msk.f32.mxu0 %vm13144_vm14, %v16064_v3  ;;  %11102 = vmatprep.mubr.msk.f32.mxu1 %vm13144_vm14, %v16064_v3 }
 0x2e7   : > { %12095 = vmatpush1.bf16.msra.mxu0 %v13411_v6 }
 0x2e8   : > { %v1477_v59 = vpop.f32.mrb[4].mxu0  ;;  %v2492_v4 = vpop.f32.mrb[4].mxu1  ;;  %12096 = vmatprep.subr.bf16.mxu0 %v16102_v12 }
 0x2e9   : > { %v1479_v22 = vpop.f32.mrb[5].mxu0  ;;  %v2494_v49 = vpop.f32.mrb[5].mxu1  ;;  %11036 = vmatmul.mubr.msk.f32.gmra.mrb[42].mxu0 %vm2592_vm15, %v2492_v4  ;;  %11103 = vmatmul.mubr.msk.f32.gmra.mrb[42].mxu1 %vm2592_vm15, %v1477_v59 }
 0x2ea   : > { %11038 = vmatprep.mubr.msk.f32.mxu0 %vm13144_vm14, %v16064_v3  ;;  %11105 = vmatprep.mubr.msk.f32.mxu1 %vm13144_vm14, %v16064_v3 }
 0x2eb   : > { %12098 = vmatpush1.bf16.msra.mxu0 %v13419_v9 }
 0x2ec   : > { %v1482_v55 = vpop.f32.mrb[6].mxu0  ;;  %v2497_v6 = vpop.f32.mrb[6].mxu1  ;;  %12099 = vmatprep.subr.bf16.mxu0 %v16102_v12 }
 0x2ed   : > { %v1484_v34 = vpop.f32.mrb[7].mxu0  ;;  %v2499_v24 = vpop.f32.mrb[7].mxu1  ;;  %11039 = vmatmul.mubr.msk.f32.gmra.mrb[44].mxu0 %vm2592_vm15, %v2497_v6  ;;  %11106 = vmatmul.mubr.msk.f32.gmra.mrb[44].mxu1 %vm2592_vm15, %v1482_v55 }
 0x2ee   : > { %11041 = vmatprep.mubr.msk.f32.mxu0 %vm13144_vm14, %v16064_v3  ;;  %11108 = vmatprep.mubr.msk.f32.mxu1 %vm13144_vm14, %v16064_v3 }
 0x2ef   : > { %12101 = vmatpush1.bf16.msra.mxu0 %v13427_v13 }
 0x2f0   : > { %v1487_v51 = vpop.f32.mrb[8].mxu0  ;;  %v2502_v9 = vpop.f32.mrb[8].mxu1  ;;  %12102 = vmatprep.subr.bf16.mxu0 %v16102_v12 }
 0x2f1   : > { %v1489_v25 = vpop.f32.mrb[9].mxu0  ;;  %v2504_v45 = vpop.f32.mrb[9].mxu1  ;;  %11042 = vmatmul.mubr.msk.f32.gmra.mrb[46].mxu0 %vm2592_vm15, %v2502_v9  ;;  %11109 = vmatmul.mubr.msk.f32.gmra.mrb[46].mxu1 %vm2592_vm15, %v1487_v51 }
 0x2f2   : > { %11044 = vmatprep.mubr.msk.f32.mxu0 %vm13144_vm14, %v16064_v3  ;;  %11111 = vmatprep.mubr.msk.f32.mxu1 %vm13144_vm14, %v16064_v3 }
 0x2f3   : > { %12104 = vmatpush1.bf16.msra.mxu0 %v13435_v17 }
 0x2f4   : > { %v1492_v37 = vpop.f32.mrb[10].mxu0  ;;  %v2507_v13 = vpop.f32.mrb[10].mxu1  ;;  %12105 = vmatprep.subr.bf16.mxu0 %v16102_v12 }
 0x2f5   : > { %v1494_v53 = vpop.f32.mrb[11].mxu0  ;;  %v2509_v59 = vpop.f32.mrb[11].mxu1  ;;  %11045 = vmatmul.mubr.msk.f32.gmra.mrb[48].mxu0 %vm2592_vm15, %v2507_v13  ;;  %11112 = vmatmul.mubr.msk.f32.gmra.mrb[48].mxu1 %vm2592_vm15, %v1492_v37 }
 0x2f6   : > { %11047 = vmatprep.mubr.msk.f32.mxu0 %vm13144_vm14, %v16064_v3  ;;  %11114 = vmatprep.mubr.msk.f32.mxu1 %vm13144_vm14, %v16064_v3 }
 0x2f7   : > { %12107 = vmatpush1.bf16.msra.mxu0 %v13443_v20 }
 0x2f8   : > { %v1497_v4 = vpop.f32.mrb[12].mxu0  ;;  %v2512_v17 = vpop.f32.mrb[12].mxu1  ;;  %12108 = vmatprep.subr.bf16.mxu0 %v16102_v12 }
 0x2f9   : > { %v1499_v22 = vpop.f32.mrb[13].mxu0  ;;  %v2514_v49 = vpop.f32.mrb[13].mxu1  ;;  %11048 = vmatmul.mubr.msk.f32.gmra.mrb[50].mxu0 %vm2592_vm15, %v2512_v17  ;;  %11115 = vmatmul.mubr.msk.f32.gmra.mrb[50].mxu1 %vm2592_vm15, %v1497_v4 }
 0x2fa   : > { %11050 = vmatprep.mubr.msk.f32.mxu0 %vm13144_vm14, %v16064_v3  ;;  %11117 = vmatprep.mubr.msk.f32.mxu1 %vm13144_vm14, %v16064_v3 }
 0x2fb   : > { %12110 = vmatpush1.bf16.msra.mxu0 %v13451_v23 }
 0x2fc   : > { %v1502_v55 = vpop.f32.mrb[14].mxu0  ;;  %v2517_v20 = vpop.f32.mrb[14].mxu1  ;;  %12111 = vmatprep.subr.bf16.mxu0 %v16102_v12 }
 0x2fd   : > { %v1504_v6 = vpop.f32.mrb[15].mxu0  ;;  %v2519_v34 = vpop.f32.mrb[15].mxu1  ;;  %11051 = vmatmul.mubr.msk.f32.gmra.mrb[52].mxu0 %vm2592_vm15, %v2517_v20  ;;  %11118 = vmatmul.mubr.msk.f32.gmra.mrb[52].mxu1 %vm2592_vm15, %v1502_v55 }
 0x2fe   : > { %11053 = vmatprep.mubr.msk.f32.mxu0 %vm13144_vm14, %v16064_v3  ;;  %11120 = vmatprep.mubr.msk.f32.mxu1 %vm13144_vm14, %v16064_v3 }
 0x2ff   : > { %12113 = vmatpush1.bf16.msra.mxu0 %v13459_v26 }
 0x300   : > { %v1507_v24 = vpop.f32.mrb[16].mxu0  ;;  %v2522_v23 = vpop.f32.mrb[16].mxu1  ;;  %12114 = vmatprep.subr.bf16.mxu0 %v16102_v12 }
 0x301   : > { %v1509_v51 = vpop.f32.mrb[17].mxu0  ;;  %v2524_v9 = vpop.f32.mrb[17].mxu1  ;;  %11054 = vmatmul.mubr.msk.f32.gmra.mrb[54].mxu0 %vm2592_vm15, %v2522_v23  ;;  %11121 = vmatmul.mubr.msk.f32.gmra.mrb[54].mxu1 %vm2592_vm15, %v1507_v24 }
 0x302   : > { %11056 = vmatprep.mubr.msk.f32.mxu0 %vm13144_vm14, %v16064_v3  ;;  %11123 = vmatprep.mubr.msk.f32.mxu1 %vm13144_vm14, %v16064_v3 }
 0x303   : > { %12116 = vmatpush1.bf16.msra.mxu0 %v13467_v29 }
 0x304   : > { %v1512_v25 = vpop.f32.mrb[18].mxu0  ;;  %v2527_v26 = vpop.f32.mrb[18].mxu1  ;;  %12117 = vmatprep.subr.bf16.mxu0 %v16102_v12 }
 0x305   : > { %v1514_v45 = vpop.f32.mrb[19].mxu0  ;;  %v2529_v37 = vpop.f32.mrb[19].mxu1  ;;  %11057 = vmatmul.mubr.msk.f32.gmra.mrb[56].mxu0 %vm2592_vm15, %v2527_v26  ;;  %11124 = vmatmul.mubr.msk.f32.gmra.mrb[56].mxu1 %vm2592_vm15, %v1512_v25 }
 0x306   : > { %11059 = vmatprep.mubr.msk.f32.mxu0 %vm13144_vm14, %v16064_v3  ;;  %11126 = vmatprep.mubr.msk.f32.mxu1 %vm13144_vm14, %v16064_v3 }
 0x307   : > { %12119 = vmatpush1.bf16.msra.mxu0 %v13475_v32 }
 0x308   : > { %v1517_v13 = vpop.f32.mrb[20].mxu0  ;;  %v2532_v29 = vpop.f32.mrb[20].mxu1  ;;  %12120 = vmatprep.subr.bf16.mxu0 %v16102_v12 }
 0x309   : > { %v1519_v53 = vpop.f32.mrb[21].mxu0  ;;  %v2534_v59 = vpop.f32.mrb[21].mxu1  ;;  %11060 = vmatmul.mubr.msk.f32.gmra.mrb[58].mxu0 %vm2592_vm15, %v2532_v29  ;;  %11127 = vmatmul.mubr.msk.f32.gmra.mrb[58].mxu1 %vm2592_vm15, %v1517_v13 }
 0x30a   : > { %11062 = vmatprep.mubr.msk.f32.mxu0 %vm13144_vm14, %v16064_v3  ;;  %11129 = vmatprep.mubr.msk.f32.mxu1 %vm13144_vm14, %v16064_v3 }
 0x30b   : > { %12122 = vmatpush1.bf16.msra.mxu0 %v13483_v35 }
 0x30c   : > { %v1522_v4 = vpop.f32.mrb[22].mxu0  ;;  %v2537_v32 = vpop.f32.mrb[22].mxu1  ;;  %12123 = vmatprep.subr.bf16.mxu0 %v16102_v12 }
 0x30d   : > { %v1524_v17 = vpop.f32.mrb[23].mxu0  ;;  %v2539_v22 = vpop.f32.mrb[23].mxu1  ;;  %11063 = vmatmul.mubr.msk.f32.gmra.mrb[60].mxu0 %vm2592_vm15, %v2537_v32  ;;  %11130 = vmatmul.mubr.msk.f32.gmra.mrb[60].mxu1 %vm2592_vm15, %v1522_v4  ;;  %v3029_v32 = vld [vmem:[#allocation4 + $0xbe8] sm:$0xff] }
 0x30e   : > { %11065 = vmatprep.mubr.msk.f32.mxu0 %vm13144_vm14, %v16064_v3  ;;  %11132 = vmatprep.mubr.msk.f32.mxu1 %vm13144_vm14, %v16064_v3 }
 0x30f   : > { %12125 = vmatpush1.bf16.msra.mxu0 %v13491_v38 }
 0x310   : > { %v1527_v49 = vpop.f32.mrb[24].mxu0  ;;  %v2542_v35 = vpop.f32.mrb[24].mxu1  ;;  %12126 = vmatprep.subr.bf16.mxu0 %v16102_v12 }
 0x311   : > { %v1529_v55 = vpop.f32.mrb[25].mxu0  ;;  %v2544_v20 = vpop.f32.mrb[25].mxu1  ;;  %11066 = vmatmul.mubr.msk.f32.gmra.mrb[62].mxu0 %vm2592_vm15, %v2542_v35  ;;  %11133 = vmatmul.mubr.msk.f32.gmra.mrb[62].mxu1 %vm2592_vm15, %v1527_v49 }
 0x312   : > { %11068 = vmatprep.mubr.msk.f32.mxu0 %vm13144_vm14, %v16064_v3  ;;  %11135 = vmatprep.mubr.msk.f32.mxu1 %vm13144_vm14, %v16064_v3  ;;  %v3028_v55 = vld [vmem:[#allocation4 + $0xbe0] sm:$0xff]  ;;  %v3039_v20 = vld [vmem:[#allocation4 + $0xc38] sm:$0xff] }
 0x313   : > { %12128 = vmatpush1.bf16.msra.mxu0 %v13499_v41 }
 0x314   : > { %v1532_v6 = vpop.f32.mrb[26].mxu0  ;;  %v2547_v38 = vpop.f32.mrb[26].mxu1  ;;  %12129 = vmatprep.subr.bf16.mxu0 %v16102_v12 }
 0x315   : > { %v1534_v34 = vpop.f32.mrb[27].mxu0  ;;  %v2549_v24 = vpop.f32.mrb[27].mxu1  ;;  %11069 = vmatmul.mubr.msk.f32.gmra.mrb[64].mxu0 %vm2592_vm15, %v2547_v38  ;;  %11136 = vmatmul.mubr.msk.f32.gmra.mrb[64].mxu1 %vm2592_vm15, %v1532_v6  ;;  %v3038_v6 = vld [vmem:[#allocation4 + $0xc30] sm:$0xff]  ;;  %v3049_v38 = vld [vmem:[#allocation4 + $0xc88] sm:$0xff] }
 0x316   : > { %11071 = vmatprep.mubr.msk.f32.mxu0 %vm13144_vm14, %v16064_v3  ;;  %11138 = vmatprep.mubr.msk.f32.mxu1 %vm13144_vm14, %v16064_v3  ;;  %v3048_v34 = vld [vmem:[#allocation4 + $0xc80] sm:$0xff]  ;;  %v3059_v24 = vld [vmem:[#allocation4 + $0xcd8] sm:$0xff] }
 0x317   : > { %12131 = vmatpush1.bf16.msra.mxu0 %v13507_v44 }
 0x318   : > { %v1537_v23 = vpop.f32.mrb[28].mxu0  ;;  %v2552_v41 = vpop.f32.mrb[28].mxu1  ;;  %12132 = vmatprep.subr.bf16.mxu0 %v16102_v12 }
 0x319   : > { %v1539_v51 = vpop.f32.mrb[29].mxu0  ;;  %v2554_v9 = vpop.f32.mrb[29].mxu1  ;;  %11072 = vmatmul.mubr.msk.f32.gmra.mrb[66].mxu0 %vm2592_vm15, %v2552_v41  ;;  %11139 = vmatmul.mubr.msk.f32.gmra.mrb[66].mxu1 %vm2592_vm15, %v1537_v23  ;;  %v3058_v23 = vld [vmem:[#allocation4 + $0xcd0] sm:$0xff]  ;;  %v3069_v41 = vld [vmem:[#allocation4 + $0xd28] sm:$0xff] }
 0x31a   : > { %11074 = vmatprep.mubr.msk.f32.mxu0 %vm13144_vm14, %v16064_v3  ;;  %11141 = vmatprep.mubr.msk.f32.mxu1 %vm13144_vm14, %v16064_v3  ;;  %v3079_v51 = vld [vmem:[#allocation4 + $0xd78] sm:$0xff]  ;;  %v3089_v9 = vld [vmem:[#allocation4 + $0xdc8] sm:$0xff] }
 0x31b   : > { %12134 = vmatpush1.bf16.msra.mxu0 %v13515_v47 }
 0x31c   : > { %v1542_v25 = vpop.f32.mrb[30].mxu0  ;;  %v2557_v44 = vpop.f32.mrb[30].mxu1  ;;  %12135 = vmatprep.subr.bf16.mxu0 %v16102_v12 }
 0x31d   : > { %v1544_v26 = vpop.f32.mrb[31].mxu0  ;;  %v2559_v45 = vpop.f32.mrb[31].mxu1  ;;  %11075 = vmatmul.mubr.msk.f32.gmra.mrb[68].mxu0 %vm2592_vm15, %v2557_v44  ;;  %11142 = vmatmul.mubr.msk.f32.gmra.mrb[68].mxu1 %vm2592_vm15, %v1542_v25  ;;  %v3099_v25 = vld [vmem:[#allocation4 + $0xe18] sm:$0xff]  ;;  %v3109_v44 = vld [vmem:[#allocation4 + $0xe68] sm:$0xff] }
 0x31e   : > { %11077 = vmatprep.mubr.msk.f32.mxu0 %vm13144_vm14, %v16064_v3  ;;  %11144 = vmatprep.mubr.msk.f32.mxu1 %vm13144_vm14, %v16064_v3  ;;  %v3119_v26 = vld [vmem:[#allocation4 + $0xeb8] sm:$0xff]  ;;  %v3129_v45 = vld [vmem:[#allocation4 + $0xf08] sm:$0xff] }
 0x31f   : > { %12137 = vmatpush1.bf16.msra.mxu0 %v13523_v50 }
 0x320   : > { %v1547_v37 = vpop.f32.mrb[32].mxu0  ;;  %v2562_v47 = vpop.f32.mrb[32].mxu1  ;;  %12138 = vmatprep.subr.bf16.mxu0 %v16102_v12 }
 0x321   : > { %v1549_v13 = vpop.f32.mrb[33].mxu0  ;;  %v2564_v29 = vpop.f32.mrb[33].mxu1  ;;  %11078 = vmatmul.mubr.msk.f32.gmra.mrb[70].mxu0 %vm2592_vm15, %v2562_v47  ;;  %11145 = vmatmul.mubr.msk.f32.gmra.mrb[70].mxu1 %vm2592_vm15, %v1547_v37  ;;  %v3139_v37 = vld [vmem:[#allocation4 + $0xf58] sm:$0xff]  ;;  %v3149_v47 = vld [vmem:[#allocation4 + $0xfa8] sm:$0xff] }
 0x322   : > { %11080 = vmatprep.mubr.msk.f32.mxu0 %vm13144_vm14, %v16064_v3  ;;  %11147 = vmatprep.mubr.msk.f32.mxu1 %vm13144_vm14, %v16064_v3  ;;  %v3159_v13 = vld [vmem:[#allocation4 + $0xff8] sm:$0xff]  ;;  %v3169_v29 = vld [vmem:[#allocation4 + $0x1048] sm:$0xff] }
 0x324   : > { %v1552_v53 = vpop.f32.mrb[34].mxu0  ;;  %v2567_v59 = vpop.f32.mrb[34].mxu1 }
 0x325   : > { %v1554_v4 = vpop.f32.mrb[35].mxu0  ;;  %v2569_v50 = vpop.f32.mrb[35].mxu1  ;;  %11081 = vmatmul.mubr.msk.f32.gmra.mrb[72].mxu0 %vm2592_vm15, %v2567_v59  ;;  %11148 = vmatmul.mubr.msk.f32.gmra.mrb[72].mxu1 %vm2592_vm15, %v1552_v53  ;;  %v3179_v53 = vld [vmem:[#allocation4 + $0x1098] sm:$0xff]  ;;  %v3189_v59 = vld [vmem:[#allocation4 + $0x10e8] sm:$0xff] }
 0x326   : > { %11083 = vmatprep.mubr.msk.f32.mxu0 %vm13144_vm14, %v16064_v3  ;;  %11150 = vmatprep.mubr.msk.f32.mxu1 %vm13144_vm14, %v16064_v3  ;;  %v3199_v4 = vld [vmem:[#allocation4 + $0x1138] sm:$0xff]  ;;  %v3209_v50 = vld [vmem:[#allocation4 + $0x1188] sm:$0xff] }
 0x328   : > { %v1557_v17 = vpop.f32.mrb[36].mxu0  ;;  %v2572_v22 = vpop.f32.mrb[36].mxu1 }
 0x329   : > { %v1559_v49 = vpop.f32.mrb[37].mxu0  ;;  %v2574_v35 = vpop.f32.mrb[37].mxu1  ;;  %11084 = vmatmul.mubr.msk.f32.gmra.mrb[74].mxu0 %vm2592_vm15, %v2572_v22  ;;  %11151 = vmatmul.mubr.msk.f32.gmra.mrb[74].mxu1 %vm2592_vm15, %v1557_v17  ;;  %v3031_v17 = vld [vmem:[#allocation4 + $0xbf8] sm:$0xff]  ;;  %v3041_v22 = vld [vmem:[#allocation4 + $0xc48] sm:$0xff] }
 0x32a   : > { %3282 = vmatprep.mubr.f32.mxu0 %v3029_v32  ;;  %11163 = vmatprep.mubr.msk.f32.mxu1 %vm13144_vm14, %v16064_v3  ;;  %v3208_v32 = vld [vmem:[#allocation4 + $0x1180] sm:$0xff]  ;;  %v3050_v35 = vld [vmem:[#allocation4 + $0xc90] sm:$0xff] }
 0x32b   : > { %v3040_v49 = vld [vmem:[#allocation4 + $0xc40] sm:$0xff] }
 0x32d   : > { %3283 = vmatmul.mubr.f32.vlgmr.msra.gmra.mrb[76].mxu0 %v3028_v55  ;;  %v3061_v55 = vld [vmem:[#allocation4 + $0xce8] sm:$0xff] }
 0x32e   : > { %3287 = vmatprep.mubr.f32.mxu0 %v3039_v20  ;;  %12140 = vmatpush1.bf16.msra.mxu0 %v13533_v57  ;;  %v3068_v57 = vld [vmem:[#allocation4 + $0xd20] sm:$0xff] }
 0x32f   : > { %12141 = vmatprep.subr.bf16.mxu0 %v16102_v12  ;;  %v3060_v20 = vld [vmem:[#allocation4 + $0xce0] sm:$0xff] }
 0x331   : > { %3288 = vmatmul.mubr.f32.gmra.mrb[78].mxu0 %v3038_v6  ;;  %v3071_v6 = vld [vmem:[#allocation4 + $0xd38] sm:$0xff] }
 0x332   : > { %3292 = vmatprep.mubr.f32.mxu0 %v3049_v38  ;;  %12143 = vmatpush1.bf16.msra.mxu0 %v13539_v1  ;;  %v3078_v1 = vld [vmem:[#allocation4 + $0xd70] sm:$0xff]  ;;  %v3081_v38 = vld [vmem:[#allocation4 + $0xd88] sm:$0xff] }
 0x333   : > { %12144 = vmatprep.subr.bf16.mxu0 %v16102_v12 }
 0x335   : > { %3293 = vmatmul.mubr.f32.gmra.mrb[80].mxu0 %v3048_v34  ;;  %v3091_v34 = vld [vmem:[#allocation4 + $0xdd8] sm:$0xff] }
 0x336   : > { %3297 = vmatprep.mubr.f32.mxu0 %v3059_v24  ;;  %12146 = vmatpush1.bf16.msra.mxu0 %v13547_v11  ;;  %v3088_v11 = vld [vmem:[#allocation4 + $0xdc0] sm:$0xff]  ;;  %v3101_v24 = vld [vmem:[#allocation4 + $0xe28] sm:$0xff] }
 0x337   : > { %12147 = vmatprep.subr.bf16.mxu0 %v16102_v12 }
 0x339   : > { %3298 = vmatmul.mubr.f32.gmra.mrb[82].mxu0 %v3058_v23  ;;  %v3111_v23 = vld [vmem:[#allocation4 + $0xe78] sm:$0xff] }
 0x33a   : > { %3302 = vmatprep.mubr.f32.mxu0 %v3069_v41  ;;  %12149 = vmatpush1.bf16.msra.mxu0 %v13555_v21  ;;  %v3098_v21 = vld [vmem:[#allocation4 + $0xe10] sm:$0xff]  ;;  %v3121_v41 = vld [vmem:[#allocation4 + $0xec8] sm:$0xff] }
 0x33b   : > { %12150 = vmatprep.subr.bf16.mxu0 %v16102_v12 }
 0x33d   : > { %3303 = vmatmul.mubr.f32.gmra.mrb[84].mxu0 %v3068_v57  ;;  %v3131_v57 = vld [vmem:[#allocation4 + $0xf18] sm:$0xff] }
 0x33e   : > { %3307 = vmatprep.mubr.f32.mxu0 %v3079_v51  ;;  %12152 = vmatpush1.bf16.msra.mxu0 %v13563_v31  ;;  %v3108_v31 = vld [vmem:[#allocation4 + $0xe60] sm:$0xff]  ;;  %v3141_v51 = vld [vmem:[#allocation4 + $0xf68] sm:$0xff] }
 0x33f   : > { %12153 = vmatprep.subr.bf16.mxu0 %v16102_v12 }
 0x341   : > { %3308 = vmatmul.mubr.f32.gmra.mrb[86].mxu0 %v3078_v1  ;;  %v3151_v1 = vld [vmem:[#allocation4 + $0xfb8] sm:$0xff] }
 0x342   : > { %3312 = vmatprep.mubr.f32.mxu0 %v3089_v9  ;;  %12155 = vmatpush1.bf16.msra.mxu0 %v13571_v42  ;;  %v3118_v42 = vld [vmem:[#allocation4 + $0xeb0] sm:$0xff]  ;;  %v3161_v9 = vld [vmem:[#allocation4 + $0x1008] sm:$0xff] }
 0x343   : > { %12156 = vmatprep.subr.bf16.mxu0 %v16102_v12 }
 0x345   : > { %3313 = vmatmul.mubr.f32.gmra.mrb[88].mxu0 %v3088_v11  ;;  %v3171_v11 = vld [vmem:[#allocation4 + $0x1058] sm:$0xff] }
 0x346   : > { %3317 = vmatprep.mubr.f32.mxu0 %v3099_v25  ;;  %12158 = vmatpush1.bf16.msra.mxu0 %v13579_v52  ;;  %v3128_v52 = vld [vmem:[#allocation4 + $0xf00] sm:$0xff]  ;;  %v3181_v25 = vld [vmem:[#allocation4 + $0x10a8] sm:$0xff] }
 0x347   : > { %12159 = vmatprep.subr.bf16.mxu0 %v16102_v12 }
 0x349   : > { %3318 = vmatmul.mubr.f32.gmra.mrb[90].mxu0 %v3098_v21  ;;  %v3191_v21 = vld [vmem:[#allocation4 + $0x10f8] sm:$0xff] }
 0x34a   : > { %3322 = vmatprep.mubr.f32.mxu0 %v3109_v44  ;;  %12161 = vmatpush1.bf16.msra.mxu0 %v13587_v60  ;;  %v3138_v60 = vld [vmem:[#allocation4 + $0xf50] sm:$0xff] }
 0x34b   : > { %12162 = vmatprep.subr.bf16.mxu0 %v16102_v12 }
 0x34d   : > { %3323 = vmatmul.mubr.f32.gmra.mrb[92].mxu0 %v3108_v31 }
 0x34e   : > { %3327 = vmatprep.mubr.f32.mxu0 %v3119_v26  ;;  %12164 = vmatpush1.bf16.msra.mxu0 %v13595_v7  ;;  %v3148_v7 = vld [vmem:[#allocation4 + $0xfa0] sm:$0xff] }
 0x34f   : > { %12165 = vmatprep.subr.bf16.mxu0 %v16102_v12 }
 0x351   : > { %3328 = vmatmul.mubr.f32.gmra.mrb[94].mxu0 %v3118_v42 }
 0x352   : > { %3332 = vmatprep.mubr.f32.mxu0 %v3129_v45  ;;  %12167 = vmatpush1.bf16.msra.mxu0 %v13603_v18  ;;  %v3158_v18 = vld [vmem:[#allocation4 + $0xff0] sm:$0xff]  ;;  %v16124_v45 = vld [vmem:[#allocation13_spill] sm:$0xff] }
 0x353   : > { %12168 = vmatprep.subr.bf16.mxu0 %v16102_v12 }
 0x355   : > { %3333 = vmatmul.mubr.f32.gmra.mrb[96].mxu0 %v3128_v52  ;;  %v3201_v52 = vld [vmem:[#allocation4 + $0x1148] sm:$0xff] }
 0x356   : > { %3337 = vmatprep.mubr.f32.mxu0 %v3139_v37  ;;  %12170 = vmatpush1.bf16.msra.mxu0 %v13611_v30  ;;  %v3168_v30 = vld [vmem:[#allocation4 + $0x1040] sm:$0xff] }
 0x357   : > { %12171 = vmatprep.subr.bf16.mxu0 %v16102_v12 }
 0x359   : > { %3338 = vmatmul.mubr.f32.gmra.mrb[98].mxu0 %v3138_v60 }
 0x35a   : > { %3342 = vmatprep.mubr.f32.mxu0 %v3149_v47  ;;  %12173 = vmatpush1.bf16.msra.mxu0 %v13619_v43  ;;  %v3178_v43 = vld [vmem:[#allocation4 + $0x1090] sm:$0xff] }
 0x35b   : > { %12174 = vmatprep.subr.bf16.mxu0 %v16102_v12 }
 0x35d   : > { %3343 = vmatmul.mubr.f32.gmra.mrb[100].mxu0 %v3148_v7 }
 0x35e   : > { %3347 = vmatprep.mubr.f32.mxu0 %v3159_v13  ;;  %12176 = vmatpush1.bf16.msra.mxu0 %v13627_v54  ;;  %v3188_v54 = vld [vmem:[#allocation4 + $0x10e0] sm:$0xff] }
 0x35f   : > { %12177 = vmatprep.subr.bf16.mxu0 %v16102_v12  ;;  %v3200_v13 = vld [vmem:[#allocation4 + $0x1140] sm:$0xff] }
 0x361   : > { %3348 = vmatmul.mubr.f32.gmra.mrb[102].mxu0 %v3158_v18  ;;  %v3211_v18 = vld [vmem:[#allocation4 + $0x1198] sm:$0xff] }
 0x362   : > { %3352 = vmatprep.mubr.f32.mxu0 %v3169_v29  ;;  %12179 = vmatpush1.bf16.msra.mxu0 %v13635_v63  ;;  %v3198_v63 = vld [vmem:[#allocation4 + $0x1130] sm:$0xff] }
 0x363   : > { %12180 = vmatprep.subr.bf16.mxu0 %v16102_v12 }
 0x365   : > { %3353 = vmatmul.mubr.f32.gmra.mrb[104].mxu0 %v3168_v30 }
 0x366   : > { %3357 = vmatprep.mubr.f32.mxu0 %v3179_v53  ;;  %12182 = vmatpush1.bf16.msra.mxu0 %v13643_v14  ;;  %v3030_v14 = vld [vmem:[#allocation4 + $0xbf0] sm:$0xff] }
 0x367   : > { %12183 = vmatprep.subr.bf16.mxu0 %v16102_v12 }
 0x369   : > { %3358 = vmatmul.mubr.f32.gmra.mrb[106].mxu0 %v3178_v43 }
 0x36a   : > { %3362 = vmatprep.mubr.f32.mxu0 %v3189_v59  ;;  %12185 = vmatpush1.bf16.msra.mxu0 %v13651_v27  ;;  %v3051_v27 = vld [vmem:[#allocation4 + $0xc98] sm:$0xff] }
 0x36b   : > { %12186 = vmatprep.subr.bf16.mxu0 %v16102_v12 }
 0x36d   : > { %3363 = vmatmul.mubr.f32.gmra.mrb[108].mxu0 %v3188_v54  ;;  %v3210_v54 = vld [vmem:[#allocation4 + $0x1190] sm:$0xff] }
 0x36e   : > { %3367 = vmatprep.mubr.f32.mxu0 %v3199_v4  ;;  %v3033_v4 = vld [vmem:[#allocation4 + $0xc08] sm:$0xff] }
 0x371   : > { %3368 = vmatmul.mubr.f32.gmra.mrb[110].mxu0 %v3198_v63 }
 0x372   : > { %3372 = vmatprep.mubr.f32.mxu0 %v3209_v50 }
 0x375   : > { %3373 = vmatmul.mubr.f32.gmra.mrb[112].mxu0 %v3208_v32 }
 0x376   : > { %3442 = vmatprep.mubr.f32.mxu0 %v3031_v17 }
 0x379   : > { %3443 = vmatmul.mubr.f32.vlgmr.msra.gmra.mrb[76].mxu0 %v3030_v14 }
 0x37a   : > { %3447 = vmatprep.mubr.f32.mxu0 %v3041_v22  ;;  %12188 = vmatpush1.bf16.msra.mxu0 %v13661_v62  ;;  %v3070_v62 = vld [vmem:[#allocation4 + $0xd30] sm:$0xff]  ;;  %v3032_v22 = vld [vmem:[#allocation4 + $0xc00] sm:$0xff] }
 0x37b   : > { %12189 = vmatprep.subr.bf16.mxu0 %v16102_v12 }
 0x37d   : > { %3448 = vmatmul.mubr.f32.gmra.mrb[78].mxu0 %v3040_v49  ;;  %v3043_v49 = vld [vmem:[#allocation4 + $0xc58] sm:$0xff] }
 0x37e   : > { %3452 = vmatprep.mubr.f32.mxu0 %v3051_v27  ;;  %12191 = vmatpush1.bf16.msra.mxu0 %v13667_v15  ;;  %v3080_v15 = vld [vmem:[#allocation4 + $0xd80] sm:$0xff] }
 0x37f   : > { %12192 = vmatprep.subr.bf16.mxu0 %v16102_v12 }
 0x381   : > { %3453 = vmatmul.mubr.f32.gmra.mrb[80].mxu0 %v3050_v35 }
 0x382   : > { %3457 = vmatprep.mubr.f32.mxu0 %v3061_v55  ;;  %12194 = vmatpush1.bf16.msra.mxu0 %v13675_v33  ;;  %v3090_v33 = vld [vmem:[#allocation4 + $0xdd0] sm:$0xff] }
 0x383   : > { %12195 = vmatprep.subr.bf16.mxu0 %v16102_v12 }
 0x385   : > { %3458 = vmatmul.mubr.f32.gmra.mrb[82].mxu0 %v3060_v20 }
 0x386   : > { %3462 = vmatprep.mubr.f32.mxu0 %v3071_v6  ;;  %12197 = vmatpush1.bf16.msra.mxu0 %v13683_v46  ;;  %v3100_v46 = vld [vmem:[#allocation4 + $0xe20] sm:$0xff] }
 0x387   : > { %12198 = vmatprep.subr.bf16.mxu0 %v16102_v12 }
 0x389   : > { %3463 = vmatmul.mubr.f32.gmra.mrb[84].mxu0 %v3070_v62  ;;  %v3042_v62 = vld [vmem:[#allocation4 + $0xc50] sm:$0xff] }
 0x38a   : > { %3467 = vmatprep.mubr.f32.mxu0 %v3081_v38  ;;  %12200 = vmatpush1.bf16.msra.mxu0 %v13691_v58  ;;  %v3110_v58 = vld [vmem:[#allocation4 + $0xe70] sm:$0xff]  ;;  %v16125_v38 = vld [vmem:[#allocation14_spill] sm:$0xff] }
 0x38b   : > { %12201 = vmatprep.subr.bf16.mxu0 %v16102_v12 }
 0x38d   : > { %3468 = vmatmul.mubr.f32.gmra.mrb[86].mxu0 %v3080_v15  ;;  %v3053_v15 = vld [vmem:[#allocation4 + $0xca8] sm:$0xff] }
 0x38e   : > { %3472 = vmatprep.mubr.f32.mxu0 %v3091_v34  ;;  %12203 = vmatpush1.bf16.msra.mxu0 %v13699_v10  ;;  %v3120_v10 = vld [vmem:[#allocation4 + $0xec0] sm:$0xff] }
 0x38f   : > { %12204 = vmatprep.subr.bf16.mxu0 %v16102_v12 }
 0x391   : > { %3473 = vmatmul.mubr.f32.gmra.mrb[88].mxu0 %v3090_v33 }
 0x392   : > { %3477 = vmatprep.mubr.f32.mxu0 %v3101_v24  ;;  %12206 = vmatpush1.bf16.msra.mxu0 %v13707_v28  ;;  %v3130_v28 = vld [vmem:[#allocation4 + $0xf10] sm:$0xff] }
 0x393   : > { %12207 = vmatprep.subr.bf16.mxu0 %v16102_v12 }
 0x395   : > { %3478 = vmatmul.mubr.f32.gmra.mrb[90].mxu0 %v3100_v46 }
 0x396   : > { %3482 = vmatprep.mubr.f32.mxu0 %v3111_v23  ;;  %12209 = vmatpush1.bf16.msra.mxu0 %v13715_v48  ;;  %v3140_v48 = vld [vmem:[#allocation4 + $0xf60] sm:$0xff] }
 0x397   : > { %12210 = vmatprep.subr.bf16.mxu0 %v16102_v12 }
 0x399   : > { %3483 = vmatmul.mubr.f32.gmra.mrb[92].mxu0 %v3110_v58  ;;  %v3052_v58 = vld [vmem:[#allocation4 + $0xca0] sm:$0xff] }
 0x39a   : > { %3487 = vmatprep.mubr.f32.mxu0 %v3121_v41  ;;  %12212 = vmatpush1.bf16.msra.mxu0 %v13723_v61  ;;  %v3150_v61 = vld [vmem:[#allocation4 + $0xfb0] sm:$0xff]  ;;  %v16126_v41 = vld [vmem:[#allocation15_spill] sm:$0xff] }
 0x39b   : > { %12213 = vmatprep.subr.bf16.mxu0 %v16102_v12 }
 0x39d   : > { %3488 = vmatmul.mubr.f32.gmra.mrb[94].mxu0 %v3120_v10  ;;  %v3063_v10 = vld [vmem:[#allocation4 + $0xcf8] sm:$0xff] }
 0x39e   : > { %3492 = vmatprep.mubr.f32.mxu0 %v3131_v57  ;;  %12215 = vmatpush1.bf16.msra.mxu0 %v13731_v19  ;;  %v3160_v19 = vld [vmem:[#allocation4 + $0x1000] sm:$0xff] }
 0x39f   : > { %12216 = vmatprep.subr.bf16.mxu0 %v16102_v12 }
 0x3a1   : > { %3493 = vmatmul.mubr.f32.gmra.mrb[96].mxu0 %v3130_v28 }
 0x3a2   : > { %3497 = vmatprep.mubr.f32.mxu0 %v3141_v51  ;;  %12218 = vmatpush1.bf16.msra.mxu0 %v13739_v39  ;;  %v3170_v39 = vld [vmem:[#allocation4 + $0x1050] sm:$0xff] }
 0x3a3   : > { %12219 = vmatprep.subr.bf16.mxu0 %v16102_v12 }
 0x3a5   : > { %3498 = vmatmul.mubr.f32.gmra.mrb[98].mxu0 %v3140_v48 }
 0x3a6   : > { %3502 = vmatprep.mubr.f32.mxu0 %v3151_v1  ;;  %12221 = vmatpush1.bf16.msra.mxu0 %v13747_v56  ;;  %v3180_v56 = vld [vmem:[#allocation4 + $0x10a0] sm:$0xff] }
 0x3a7   : > { %12222 = vmatprep.subr.bf16.mxu0 %v16102_v12 }
 0x3a9   : > { %3503 = vmatmul.mubr.f32.gmra.mrb[100].mxu0 %v3150_v61  ;;  %v3062_v61 = vld [vmem:[#allocation4 + $0xcf0] sm:$0xff] }
 0x3aa   : > { %3507 = vmatprep.mubr.f32.mxu0 %v3161_v9  ;;  %12224 = vmatpush1.bf16.msra.mxu0 %v13755_v16  ;;  %v16127_v9 = vld [vmem:[#allocation16_spill] sm:$0xff] }
 0x3ab   : > { %12225 = vmatprep.subr.bf16.mxu0 %v16102_v12 }
 0x3ad   : > { %3508 = vmatmul.mubr.f32.gmra.mrb[102].mxu0 %v3160_v19  ;;  %v3073_v19 = vld [vmem:[#allocation4 + $0xd48] sm:$0xff] }
 0x3ae   : > { %3512 = vmatprep.mubr.f32.mxu0 %v3171_v11  ;;  %12227 = vmatpush1.bf16.msra.mxu0 %v13763_v40  ;;  %v3190_v40 = vld [vmem:[#allocation4 + $0x10f0] sm:$0xff] }
 0x3af   : > { %12228 = vmatprep.subr.bf16.mxu0 %v16102_v12 }
 0x3b1   : > { %3513 = vmatmul.mubr.f32.gmra.mrb[104].mxu0 %v3170_v39 }
 0x3b2   : > { %3517 = vmatprep.mubr.f32.mxu0 %v3181_v25  ;;  %12230 = vmatpush1.bf16.msra.mxu0 %v13771_v2 }
 0x3b3   : > { %12231 = vmatprep.subr.bf16.mxu0 %v16102_v12 }
 0x3b4   : > { %v2716_v16 = vpop.f32.mrb[38].mxu0  ;;  %v2933_v44 = vpop.f32.mrb[38].mxu1 }
 0x3b5   : > { %v14316_v31 = vadd.f32 %v2933_v44, %v2716_v16  ;;  %v11031_v26 = vpop.f32.mrb[39].mxu0  ;;  %v11098_v42 = vpop.f32.mrb[39].mxu1  ;;  %3518 = vmatmul.mubr.f32.gmra.mrb[106].mxu0 %v3180_v56  ;;  %v3072_v16 = vld [vmem:[#allocation4 + $0xd40] sm:$0xff]  ;;  %v16128_v44 = vld [vmem:[#allocation17_spill] sm:$0xff] }
 0x3b6   : > { %3522 = vmatprep.mubr.f32.mxu0 %v3191_v21  ;;  %12233 = vmatpush1.bf16.msra.mxu0 %v16124_v45  ;;  %v3083_v26 = vld [vmem:[#allocation4 + $0xd98] sm:$0xff] }
 0x3b7   : > { %12234 = vmatprep.subr.bf16.mxu0 %v16102_v12 }
 0x3b8   : > { %v2721_v37 = vpop.f32.mrb[40].mxu0  ;;  %v2938_v60 = vpop.f32.mrb[40].mxu1 }
 0x3b9   : > { %v14320_v2 = vadd.f32 %v2938_v60, %v2721_v37  ;;  %v11034_v47 = vpop.f32.mrb[41].mxu0  ;;  %v11101_v7 = vpop.f32.mrb[41].mxu1  ;;  %3523 = vmatmul.mubr.f32.gmra.mrb[108].mxu0 %v3190_v40  ;;  %v3082_v60 = vld [vmem:[#allocation4 + $0xd90] sm:$0xff] }
 0x3ba   : > { %3527 = vmatprep.mubr.f32.mxu0 %v3201_v52  ;;  %v16129_v47 = vld [vmem:[#allocation18_spill] sm:$0xff]  ;;  %v3093_v7 = vld [vmem:[#allocation4 + $0xde8] sm:$0xff] }
 0x3bc   : > { %v2726_v29 = vpop.f32.mrb[42].mxu0  ;;  %v2943_v30 = vpop.f32.mrb[42].mxu1 }
 0x3bd   : > { %v14322_v53 = vadd.f32 %v2943_v30, %v2726_v29  ;;  %v11037_v43 = vpop.f32.mrb[43].mxu0  ;;  %v11104_v59 = vpop.f32.mrb[43].mxu1  ;;  %3528 = vmatmul.mubr.f32.gmra.mrb[110].mxu0 %v3200_v13 }
 0x3be   : > { %3532 = vmatprep.mubr.f32.mxu0 %v3211_v18  ;;  %v3092_v59 = vld [vmem:[#allocation4 + $0xde0] sm:$0xff] }
 0x3c0   : > { %v2731_v63 = vpop.f32.mrb[44].mxu0  ;;  %v2948_v50 = vpop.f32.mrb[44].mxu1 }
 0x3c1   : > { %v14324_v32 = vadd.f32 %v2948_v50, %v2731_v63  ;;  %v11040_v17 = vpop.f32.mrb[45].mxu0  ;;  %v11107_v14 = vpop.f32.mrb[45].mxu1  ;;  %3533 = vmatmul.mubr.f32.gmra.mrb[112].mxu0 %v3210_v54  ;;  %v16130_v54 = vld [vmem:[#allocation19_spill] sm:$0xff] }
 0x3c2   : > { %3602 = vmatprep.mubr.f32.mxu0 %v3033_v4  ;;  %v3103_v4 = vld [vmem:[#allocation4 + $0xe38] sm:$0xff] }
 0x3c4   : > { %v2736_v27 = vpop.f32.mrb[46].mxu0  ;;  %v2953_v35 = vpop.f32.mrb[46].mxu1 }
 0x3c5   : > { %v14326_v55 = vadd.f32 %v2953_v35, %v2736_v27  ;;  %v11043_v20 = vpop.f32.mrb[47].mxu0  ;;  %v11110_v6 = vpop.f32.mrb[47].mxu1  ;;  %3603 = vmatmul.mubr.f32.vlgmr.msra.gmra.mrb[76].mxu0 %v3032_v22  ;;  %v16131_v27 = vld [vmem:[#allocation20_spill] sm:$0xff]  ;;  %v3113_v35 = vld [vmem:[#allocation4 + $0xe88] sm:$0xff] }
 0x3c6   : > { %3607 = vmatprep.mubr.f32.mxu0 %v3043_v49  ;;  %12236 = vmatpush1.bf16.msra.mxu0 %v16125_v38  ;;  %v3102_v49 = vld [vmem:[#allocation4 + $0xe30] sm:$0xff] }
 0x3c7   : > { %12237 = vmatprep.subr.bf16.mxu0 %v16102_v12 }
 0x3c8   : > { %v2741_v34 = vpop.f32.mrb[48].mxu0  ;;  %v2958_v33 = vpop.f32.mrb[48].mxu1 }
 0x3c9   : > { %v14330_v24 = vadd.f32 %v2958_v33, %v2741_v34  ;;  %v11046_v46 = vpop.f32.mrb[49].mxu0  ;;  %v11113_v23 = vpop.f32.mrb[49].mxu1  ;;  %3608 = vmatmul.mubr.f32.gmra.mrb[78].mxu0 %v3042_v62  ;;  %v3112_v34 = vld [vmem:[#allocation4 + $0xe80] sm:$0xff]  ;;  %v16132_v33 = vld [vmem:[#allocation21_spill] sm:$0xff] }
 0x3ca   : > { %3612 = vmatprep.mubr.f32.mxu0 %v3053_v15  ;;  %12239 = vmatpush1.bf16.msra.mxu0 %v16126_v41  ;;  %v3123_v46 = vld [vmem:[#allocation4 + $0xed8] sm:$0xff] }
 0x3cb   : > { %12240 = vmatprep.subr.bf16.mxu0 %v16102_v12 }
 0x3cc   : > { %v2746_v57 = vpop.f32.mrb[50].mxu0  ;;  %v2963_v28 = vpop.f32.mrb[50].mxu1 }
 0x3cd   : > { %v14334_v51 = vadd.f32 %v2963_v28, %v2746_v57  ;;  %v11049_v48 = vpop.f32.mrb[51].mxu0  ;;  %v11116_v1 = vpop.f32.mrb[51].mxu1  ;;  %3613 = vmatmul.mubr.f32.gmra.mrb[80].mxu0 %v3052_v58  ;;  %v3122_v28 = vld [vmem:[#allocation4 + $0xed0] sm:$0xff] }
 0x3ce   : > { %3617 = vmatprep.mubr.f32.mxu0 %v3063_v10  ;;  %12242 = vmatpush1.bf16.msra.mxu0 %v16127_v9  ;;  %v16133_v48 = vld [vmem:[#allocation22_spill] sm:$0xff]  ;;  %v3133_v1 = vld [vmem:[#allocation4 + $0xf28] sm:$0xff] }
 0x3cf   : > { %12243 = vmatprep.subr.bf16.mxu0 %v16102_v12 }
 0x3d0   : > { %v2751_v11 = vpop.f32.mrb[52].mxu0  ;;  %v2968_v39 = vpop.f32.mrb[52].mxu1 }
 0x3d1   : > { %v14338_v25 = vadd.f32 %v2968_v39, %v2751_v11  ;;  %v11052_v56 = vpop.f32.mrb[53].mxu0  ;;  %v11119_v21 = vpop.f32.mrb[53].mxu1  ;;  %3618 = vmatmul.mubr.f32.gmra.mrb[82].mxu0 %v3062_v61 }
 0x3d2   : > { %3622 = vmatprep.mubr.f32.mxu0 %v3073_v19  ;;  %12245 = vmatpush1.bf16.msra.mxu0 %v16128_v44  ;;  %v3132_v56 = vld [vmem:[#allocation4 + $0xf20] sm:$0xff]  ;;  %v16134_v21 = vld [vmem:[#allocation23_spill] sm:$0xff] }
 0x3d3   : > { %12246 = vmatprep.subr.bf16.mxu0 %v16102_v12 }
 0x3d4   : > { %v2756_v42 = vpop.f32.mrb[54].mxu0  ;;  %v2973_v40 = vpop.f32.mrb[54].mxu1 }
 0x3d5   : > { %v14342_v45 = vadd.f32 %v2973_v40, %v2756_v42  ;;  %v11055_v52 = vpop.f32.mrb[55].mxu0  ;;  %v11122_v37 = vpop.f32.mrb[55].mxu1  ;;  %3623 = vmatmul.mubr.f32.gmra.mrb[84].mxu0 %v3072_v16  ;;  %v3143_v16 = vld [vmem:[#allocation4 + $0xf78] sm:$0xff] }
 0x3d6   : > { %3627 = vmatprep.mubr.f32.mxu0 %v3083_v26  ;;  %12248 = vmatpush1.bf16.msra.mxu0 %v16129_v47  ;;  %v3142_v37 = vld [vmem:[#allocation4 + $0xf70] sm:$0xff]  ;;  %v3153_v47 = vld [vmem:[#allocation4 + $0xfc8] sm:$0xff] }
 0x3d7   : > { %12249 = vmatprep.subr.bf16.mxu0 %v16102_v12 }
 0x3d8   : > { %v2761_v13 = vpop.f32.mrb[56].mxu0  ;;  %v2978_v18 = vpop.f32.mrb[56].mxu1 }
 0x3d9   : > { %v14346_v29 = vadd.f32 %v2978_v18, %v2761_v13  ;;  %v11058_v30 = vpop.f32.mrb[57].mxu0  ;;  %v11125_v43 = vpop.f32.mrb[57].mxu1  ;;  %3628 = vmatmul.mubr.f32.gmra.mrb[86].mxu0 %v3082_v60  ;;  %v16135_v60 = vld [vmem:[#allocation24_spill] sm:$0xff] }
 0x3da   : > { %3632 = vmatprep.mubr.f32.mxu0 %v3093_v7  ;;  %12251 = vmatpush1.bf16.msra.mxu0 %v16130_v54  ;;  %v16136_v54 = vld [vmem:[#allocation25_spill] sm:$0xff] }
 0x3db   : > { %12252 = vmatprep.subr.bf16.mxu0 %v16102_v12 }
 0x3dc   : > { %v2766_v63 = vpop.f32.mrb[58].mxu0  ;;  %v2983_v50 = vpop.f32.mrb[58].mxu1 }
 0x3dd   : > { %v14350_v17 = vadd.f32 %v2983_v50, %v2766_v63  ;;  %v11061_v14 = vpop.f32.mrb[59].mxu0  ;;  %v11128_v22 = vpop.f32.mrb[59].mxu1  ;;  %3633 = vmatmul.mubr.f32.gmra.mrb[88].mxu0 %v3092_v59  ;;  %v3152_v59 = vld [vmem:[#allocation4 + $0xfc0] sm:$0xff] }
 0x3de   : > { %3637 = vmatprep.mubr.f32.mxu0 %v3103_v4  ;;  %12254 = vmatpush1.bf16.msra.mxu0 %v16131_v27  ;;  %v3163_v4 = vld [vmem:[#allocation4 + $0x1018] sm:$0xff]  ;;  %v3162_v27 = vld [vmem:[#allocation4 + $0x1010] sm:$0xff] }
 0x3df   : > { %12255 = vmatprep.subr.bf16.mxu0 %v16102_v12 }
 0x3e0   : > { %v2771_v20 = vpop.f32.mrb[60].mxu0  ;;  %v2988_v6 = vpop.f32.mrb[60].mxu1 }
 0x3e1   : > { %v14354_v62 = vadd.f32 %v2988_v6, %v2771_v20  ;;  %v11064_v38 = vpop.f32.mrb[61].mxu0  ;;  %v11131_v15 = vpop.f32.mrb[61].mxu1  ;;  %3638 = vmatmul.mubr.f32.gmra.mrb[90].mxu0 %v3102_v49  ;;  %v3173_v20 = vld [vmem:[#allocation4 + $0x1068] sm:$0xff] }
 0x3e2   : > { %3642 = vmatprep.mubr.f32.mxu0 %v3113_v35  ;;  %12257 = vmatpush1.bf16.msra.mxu0 %v16132_v33  ;;  %v16137_v35 = vld [vmem:[#allocation26_spill] sm:$0xff] }
 0x3e3   : > { %12258 = vmatprep.subr.bf16.mxu0 %v16102_v12 }
 0x3e4   : > { %v2776_v23 = vpop.f32.mrb[62].mxu0  ;;  %v2993_v58 = vpop.f32.mrb[62].mxu1 }
 0x3e5   : > { %v14358_v41 = vadd.f32 %v2993_v58, %v2776_v23  ;;  %v11067_v10 = vpop.f32.mrb[63].mxu0  ;;  %v11134_v57 = vpop.f32.mrb[63].mxu1  ;;  %3643 = vmatmul.mubr.f32.gmra.mrb[92].mxu0 %v3112_v34  ;;  %v16138_v23 = vld [vmem:[#allocation27_spill] sm:$0xff]  ;;  %v3183_v58 = vld [vmem:[#allocation4 + $0x10b8] sm:$0xff] }
 0x3e6   : > { %3647 = vmatprep.mubr.f32.mxu0 %v3123_v46  ;;  %12260 = vmatpush1.bf16.msra.mxu0 %v16133_v48  ;;  %v3172_v46 = vld [vmem:[#allocation4 + $0x1060] sm:$0xff] }
 0x3e7   : > { %12261 = vmatprep.subr.bf16.mxu0 %v16102_v12 }
 0x3e8   : > { %v2781_v61 = vpop.f32.mrb[64].mxu0  ;;  %v2998_v9 = vpop.f32.mrb[64].mxu1 }
 0x3e9   : > { %v14362_v19 = vadd.f32 %v2998_v9, %v2781_v61  ;;  %v11070_v11 = vpop.f32.mrb[65].mxu0  ;;  %v11137_v39 = vpop.f32.mrb[65].mxu1  ;;  %3648 = vmatmul.mubr.f32.gmra.mrb[94].mxu0 %v3122_v28  ;;  %v3182_v61 = vld [vmem:[#allocation4 + $0x10b0] sm:$0xff] }
 0x3ea   : > { %3652 = vmatprep.mubr.f32.mxu0 %v3133_v1  ;;  %12263 = vmatpush1.bf16.msra.mxu0 %v16134_v21  ;;  %v16140_v9 = vld [vmem:[#allocation28_spill] sm:$0xff]  ;;  %v3193_v11 = vld [vmem:[#allocation4 + $0x1108] sm:$0xff]  ;;  %v3192_v39 = vld [vmem:[#allocation4 + $0x1100] sm:$0xff] }
 0x3eb   : > { %12264 = vmatprep.subr.bf16.mxu0 %v16102_v12  ;;  %v3203_v21 = vld [vmem:[#allocation4 + $0x1158] sm:$0xff] }
 0x3ec   : > { %v2786_v44 = vpop.f32.mrb[66].mxu0  ;;  %v3003_v26 = vpop.f32.mrb[66].mxu1 }
 0x3ed   : > { %v14366_v42 = vadd.f32 %v3003_v26, %v2786_v44  ;;  %v11073_v40 = vpop.f32.mrb[67].mxu0  ;;  %v11140_v52 = vpop.f32.mrb[67].mxu1  ;;  %3653 = vmatmul.mubr.f32.gmra.mrb[96].mxu0 %v3132_v56  ;;  %v16141_v56 = vld [vmem:[#allocation29_spill] sm:$0xff]  ;;  %v3213_v44 = vld [vmem:[#allocation4 + $0x11a8] sm:$0xff]  ;;  %v3212_v26 = vld [vmem:[#allocation4 + $0x11a0] sm:$0xff] }
 0x3ee   : > { %3657 = vmatprep.mubr.f32.mxu0 %v3143_v16  ;;  %12266 = vmatpush1.bf16.msra.mxu0 %v16135_v60  ;;  %v3202_v16 = vld [vmem:[#allocation4 + $0x1150] sm:$0xff]  ;;  %v3035_v40 = vld [vmem:[#allocation4 + $0xc18] sm:$0xff]  ;;  %v3044_v60 = vld [vmem:[#allocation4 + $0xc60] sm:$0xff] }
 0x3ef   : > { %12267 = vmatprep.subr.bf16.mxu0 %v16102_v12  ;;  %v3034_v52 = vld [vmem:[#allocation4 + $0xc10] sm:$0xff] }
 0x3f0   : > { %v2791_v7 = vpop.f32.mrb[68].mxu0  ;;  %v3008_v13 = vpop.f32.mrb[68].mxu1 }
 0x3f1   : > { %v14370_v18 = vadd.f32 %v3008_v13, %v2791_v7  ;;  %v11076_v30 = vpop.f32.mrb[69].mxu0  ;;  %v11143_v43 = vpop.f32.mrb[69].mxu1  ;;  %3658 = vmatmul.mubr.f32.gmra.mrb[98].mxu0 %v3142_v37  ;;  %v3045_v37 = vld [vmem:[#allocation4 + $0xc68] sm:$0xff]  ;;  %v3055_v7 = vld [vmem:[#allocation4 + $0xcb8] sm:$0xff]  ;;  %v3054_v13 = vld [vmem:[#allocation4 + $0xcb0] sm:$0xff] }
 0x3f2   : > { %3662 = vmatprep.mubr.f32.mxu0 %v3153_v47  ;;  %12269 = vmatpush1.bf16.msra.mxu0 %v16136_v54  ;;  %v16142_v47 = vld [vmem:[#allocation30_spill] sm:$0xff]  ;;  %v16143_v30 = vld [vmem:[#allocation31_spill] sm:$0xff]  ;;  %v16144_v54 = vld [vmem:[#allocation32_spill] sm:$0xff] }
 0x3f3   : > { %12270 = vmatprep.subr.bf16.mxu0 %v16102_v12  ;;  %v3065_v43 = vld [vmem:[#allocation4 + $0xd08] sm:$0xff] }
 0x3f4   : > { %v2796_v63 = vpop.f32.mrb[70].mxu0  ;;  %v3013_v50 = vpop.f32.mrb[70].mxu1 }
 0x3f5   : > { %v14374_v14 = vadd.f32 %v3013_v50, %v2796_v63  ;;  %v11079_v22 = vpop.f32.mrb[71].mxu0  ;;  %v11146_v49 = vpop.f32.mrb[71].mxu1  ;;  %3663 = vmatmul.mubr.f32.gmra.mrb[100].mxu0 %v3152_v59  ;;  %v3064_v59 = vld [vmem:[#allocation4 + $0xd00] sm:$0xff]  ;;  %v3074_v63 = vld [vmem:[#allocation4 + $0xd50] sm:$0xff]  ;;  %v16145_v50 = vld [vmem:[#allocation33_spill] sm:$0xff] }
 0x3f6   : > { %3667 = vmatprep.mubr.f32.mxu0 %v3163_v4  ;;  %12272 = vmatpush1.bf16.msra.mxu0 %v16137_v35  ;;  %v3075_v4 = vld [vmem:[#allocation4 + $0xd58] sm:$0xff]  ;;  %v3085_v22 = vld [vmem:[#allocation4 + $0xda8] sm:$0xff]  ;;  %v3084_v49 = vld [vmem:[#allocation4 + $0xda0] sm:$0xff] }
 0x3f7   : > { %12273 = vmatprep.subr.bf16.mxu0 %v16102_v12  ;;  %v3095_v35 = vld [vmem:[#allocation4 + $0xdf8] sm:$0xff] }
 0x3f8   : > { %v2801_v6 = vpop.f32.mrb[72].mxu0  ;;  %v3018_v38 = vpop.f32.mrb[72].mxu1 }
 0x3f9   : > { %v14378_v15 = vadd.f32 %v3018_v38, %v2801_v6  ;;  %v11082_v34 = vpop.f32.mrb[73].mxu0  ;;  %v11149_v33 = vpop.f32.mrb[73].mxu1  ;;  %3668 = vmatmul.mubr.f32.gmra.mrb[102].mxu0 %v3162_v27  ;;  %v16146_v27 = vld [vmem:[#allocation34_spill] sm:$0xff]  ;;  %v3094_v6 = vld [vmem:[#allocation4 + $0xdf0] sm:$0xff]  ;;  %v16147_v38 = vld [vmem:[#allocation35_spill] sm:$0xff] }
 0x3fa   : > { %3672 = vmatprep.mubr.f32.mxu0 %v3173_v20  ;;  %12275 = vmatpush1.bf16.msra.mxu0 %v16138_v23  ;;  %v14399_v20 = vadd.s32 2, %v14048_v8  ;;  %v3105_v34 = vld [vmem:[#allocation4 + $0xe48] sm:$0xff]  ;;  %v16148_v33 = vld [vmem:[#allocation48_spill] sm:$0xff]  ;;  %v16150_v23 = vld [vmem:[#allocation50_spill] sm:$0xff]  ;;  %v16151_v8 = vmov 1.0|1.0  }
 0x3fb   : > { %12276 = vmatprep.subr.bf16.mxu0 %v16102_v12 }
 0x3fc   : > { %v2806_v10 = vpop.f32.mrb[74].mxu0  ;;  %v3023_v57 = vpop.f32.mrb[74].mxu1  ;;  %vm4019_vm0 = vcmp.eq.s32.totalorder %v14044_v36, %v14399_v20  ;;  %vm4020_vm1 = vcmp.eq.s32.totalorder %v16148_v33, %v14399_v20  ;;  %vm4022_vm3 = vcmp.eq.s32.totalorder %v16150_v23, %v14399_v20  ;;  %v3047_v33 = vld [vmem:[#allocation4 + $0xc78] sm:$0xff]  ;;  %v3057_v23 = vld [vmem:[#allocation4 + $0xcc8] sm:$0xff]  ;;  %vm4023_vm6 = vcmp.eq.s32.totalorder %v14096_v0, %v14399_v20 }
 0x3fd   : > { %v14382_v28 = vadd.f32 %v3023_v57, %v2806_v10  ;;  %v11085_v48 = vpop.f32.mrb[75].mxu0  ;;  %v11152_v1 = vpop.f32.mrb[75].mxu1  ;;  %3673 = vmatmul.mubr.f32.gmra.mrb[104].mxu0 %v3172_v46  ;;  %v16149_v46 = vld [vmem:[#allocation49_spill] sm:$0xff]  ;;  %vm12331_vm4 = vmpackc.low %vm4020_vm1, %vm4019_vm0  ;;  %v16152_v10 = vld [vmem:[#allocation36_spill] sm:$0xff]  ;;  %vm7655_vm0 = vcmask 77848   ;;  %vm7705_vm1 = vcmask 127048  }
 0x3fe   : > { %3677 = vmatprep.mubr.f32.mxu0 %v3183_v58  ;;  %12278 = vmatpush1.bf16.msra.mxu0 %v16140_v9  ;;  %vm4021_vm2 = vcmp.eq.s32.totalorder %v16149_v46, %v14399_v20  ;;  %v3104_v58 = vld [vmem:[#allocation4 + $0xe40] sm:$0xff]  ;;  %v3115_v57 = vld [vmem:[#allocation4 + $0xe98] sm:$0xff]  ;;  %v3114_v48 = vld [vmem:[#allocation4 + $0xe90] sm:$0xff] }
 0x3ff   : > { %16139 = vst [vmem:[#allocation13_spill] sm:$0xff] %v14382_v28  ;;  %12279 = vmatprep.subr.bf16.mxu0 %v16102_v12  ;;  %12332 = vmatpush3.bf16.msk.msra.mxu1 %vm12331_vm4, %v16151_v8  ;;  %vm12334_vm5 = vmpackc.low %vm4022_vm3, %vm4021_vm2  ;;  %v16153_v1 = vld [vmem:[#allocation37_spill] sm:$0xff]  ;;  %v3124_v9 = vld [vmem:[#allocation4 + $0xee0] sm:$0xff]  ;;  %vm7730_vm2 = vcmask 151648   ;;  %vm7755_vm3 = vcmask 7168   ;;  %vm7764_vm4 = vcmask 15360  }
 0x400   : > { %12333 = vmatprep.subr.bf16.mxu1 %v16102_v12  ;;  %v3046_v46 = vld [vmem:[#allocation4 + $0xc70] sm:$0xff]  ;;  %v4275_v0 = vld [vmem:[%s16010_s2 + $0x28] sm:$0xff] }
 0x401   : > { %3678 = vmatmul.mubr.f32.gmra.mrb[106].mxu0 %v3182_v61  ;;  %v3125_v61 = vld [vmem:[#allocation4 + $0xee8] sm:$0xff] }
 0x402   : > { %3682 = vmatprep.mubr.f32.mxu0 %v3193_v11  ;;  %12281 = vmatpush1.bf16.msra.mxu0 %v16141_v56  ;;  %v16154_v11 = vld [vmem:[#allocation38_spill] sm:$0xff]  ;;  %v3134_v56 = vld [vmem:[#allocation4 + $0xf30] sm:$0xff]  ;;  %v4271_v20 = vld [vmem:[%s16010_s2 + $0x8] sm:$0xff] }
 0x403   : > { %12282 = vmatprep.subr.bf16.mxu0 %v16102_v12  ;;  %12335 = vmatpush3.bf16.msk.msra.mxu1 %vm12334_vm5, %v16151_v8  ;;  %v3056_v8 = vld [vmem:[#allocation4 + $0xcc0] sm:$0xff]  ;;  %vm7773_vm5 = vcmask 23552  }
 0x404   : > { %11161 = vmatprep.subr.mxu1 %v16064_v3 }
 0x405   : > { %3683 = vmatmul.mubr.f32.gmra.mrb[108].mxu0 %v3192_v39  ;;  %v3135_v39 = vld [vmem:[#allocation4 + $0xf38] sm:$0xff] }
 0x406   : > { %3687 = vmatprep.mubr.f32.mxu0 %v3203_v21  ;;  %v16155_v21 = vld [vmem:[#allocation39_spill] sm:$0xff] }
 0x407   : > { %11162 = vmatpush3.msk.msra.mxu1 %vm4023_vm6, %v13143_v5  ;;  %v4277_v5 = vld [vmem:[%s16010_s2 + $0x38] sm:$0xff]  ;;  %vm7782_vm6 = vcmask 31744  }
 0x408   : > { %12336 = vmatprep.subr.bf16.mxu1 %v16102_v12 }
 0x409   : > { %3688 = vmatmul.mubr.f32.gmra.mrb[110].mxu0 %v3202_v16  ;;  %v3145_v16 = vld [vmem:[#allocation4 + $0xf88] sm:$0xff] }
 0x40a   : > { %3692 = vmatprep.mubr.f32.mxu0 %v3213_v44  ;;  %v3144_v44 = vld [vmem:[#allocation4 + $0xf80] sm:$0xff] }
 0x40d   : > { %3693 = vmatmul.mubr.f32.gmra.mrb[112].mxu0 %v3212_v26  ;;  %v16156_v26 = vld [vmem:[#allocation40_spill] sm:$0xff] }
 0x40e   : > { %3762 = vmatprep.mubr.f32.mxu0 %v3035_v40  ;;  %v3155_v40 = vld [vmem:[#allocation4 + $0xfd8] sm:$0xff] }
 0x411   : > { %3763 = vmatmul.mubr.f32.vlgmr.msra.gmra.mrb[76].mxu0 %v3034_v52  ;;  %v3154_v52 = vld [vmem:[#allocation4 + $0xfd0] sm:$0xff] }
 0x412   : > { %3767 = vmatprep.mubr.f32.mxu0 %v3045_v37  ;;  %12284 = vmatpush1.bf16.msra.mxu0 %v16142_v47  ;;  %v16157_v37 = vld [vmem:[#allocation41_spill] sm:$0xff]  ;;  %v3164_v47 = vld [vmem:[#allocation4 + $0x1020] sm:$0xff] }
 0x413   : > { %12285 = vmatprep.subr.bf16.mxu0 %v16102_v12 }
 0x415   : > { %3768 = vmatmul.mubr.f32.gmra.mrb[78].mxu0 %v3044_v60  ;;  %v3165_v60 = vld [vmem:[#allocation4 + $0x1028] sm:$0xff] }
 0x416   : > { %3772 = vmatprep.mubr.f32.mxu0 %v3055_v7  ;;  %12287 = vmatpush1.bf16.msra.mxu0 %v16143_v30  ;;  %v16158_v7 = vld [vmem:[#allocation42_spill] sm:$0xff]  ;;  %v3174_v30 = vld [vmem:[#allocation4 + $0x1070] sm:$0xff] }
 0x417   : > { %12288 = vmatprep.subr.bf16.mxu0 %v16102_v12 }
 0x419   : > { %3773 = vmatmul.mubr.f32.gmra.mrb[80].mxu0 %v3054_v13  ;;  %v3175_v13 = vld [vmem:[#allocation4 + $0x1078] sm:$0xff] }
 0x41a   : > { %3777 = vmatprep.mubr.f32.mxu0 %v3065_v43  ;;  %12290 = vmatpush1.bf16.msra.mxu0 %v16144_v54  ;;  %v16159_v43 = vld [vmem:[#allocation43_spill] sm:$0xff]  ;;  %v3184_v54 = vld [vmem:[#allocation4 + $0x10c0] sm:$0xff] }
 0x41b   : > { %12291 = vmatprep.subr.bf16.mxu0 %v16102_v12 }
 0x41d   : > { %3778 = vmatmul.mubr.f32.gmra.mrb[82].mxu0 %v3064_v59  ;;  %v3185_v59 = vld [vmem:[#allocation4 + $0x10c8] sm:$0xff] }
 0x41e   : > { %3782 = vmatprep.mubr.f32.mxu0 %v3075_v4  ;;  %12293 = vmatpush1.bf16.msra.mxu0 %v16145_v50  ;;  %v16160_v4 = vld [vmem:[#allocation44_spill] sm:$0xff] }
 0x41f   : > { %12294 = vmatprep.subr.bf16.mxu0 %v16102_v12  ;;  %v3194_v50 = vld [vmem:[#allocation4 + $0x1110] sm:$0xff] }
 0x421   : > { %3783 = vmatmul.mubr.f32.gmra.mrb[84].mxu0 %v3074_v63  ;;  %v3195_v63 = vld [vmem:[#allocation4 + $0x1118] sm:$0xff] }
 0x422   : > { %3787 = vmatprep.mubr.f32.mxu0 %v3085_v22  ;;  %12296 = vmatpush1.bf16.msra.mxu0 %v16146_v27  ;;  %v16161_v22 = vld [vmem:[#allocation45_spill] sm:$0xff]  ;;  %v3204_v27 = vld [vmem:[#allocation4 + $0x1160] sm:$0xff] }
 0x423   : > { %12297 = vmatprep.subr.bf16.mxu0 %v16102_v12 }
 0x425   : > { %3788 = vmatmul.mubr.f32.gmra.mrb[86].mxu0 %v3084_v49  ;;  %v3205_v49 = vld [vmem:[#allocation4 + $0x1168] sm:$0xff] }
 0x426   : > { %3792 = vmatprep.mubr.f32.mxu0 %v3095_v35  ;;  %12299 = vmatpush1.bf16.msra.mxu0 %v16147_v38  ;;  %v3215_v35 = vld [vmem:[#allocation4 + $0x11b8] sm:$0xff]  ;;  %v3037_v38 = vld [vmem:[#allocation4 + $0xc28] sm:$0xff] }
 0x427   : > { %12300 = vmatprep.subr.bf16.mxu0 %v16102_v12 }
 0x429   : > { %3793 = vmatmul.mubr.f32.gmra.mrb[88].mxu0 %v3094_v6  ;;  %v3214_v6 = vld [vmem:[#allocation4 + $0x11b0] sm:$0xff] }
 0x42a   : > { %3797 = vmatprep.mubr.f32.mxu0 %v3105_v34  ;;  %12302 = vmatpush1.bf16.msra.mxu0 %v16152_v10  ;;  %v3036_v34 = vld [vmem:[#allocation4 + $0xc20] sm:$0xff]  ;;  %v3066_v10 = vld [vmem:[#allocation4 + $0xd10] sm:$0xff] }
 0x42b   : > { %12303 = vmatprep.subr.bf16.mxu0 %v16102_v12 }
 0x42d   : > { %3798 = vmatmul.mubr.f32.gmra.mrb[90].mxu0 %v3104_v58  ;;  %v3067_v58 = vld [vmem:[#allocation4 + $0xd18] sm:$0xff] }
 0x42e   : > { %3802 = vmatprep.mubr.f32.mxu0 %v3115_v57  ;;  %12305 = vmatpush1.bf16.msra.mxu0 %v16153_v1  ;;  %v3077_v57 = vld [vmem:[#allocation4 + $0xd68] sm:$0xff]  ;;  %v3087_v1 = vld [vmem:[#allocation4 + $0xdb8] sm:$0xff] }
 0x42f   : > { %12306 = vmatprep.subr.bf16.mxu0 %v16102_v12 }
 0x431   : > { %3803 = vmatmul.mubr.f32.gmra.mrb[92].mxu0 %v3114_v48  ;;  %v3076_v48 = vld [vmem:[#allocation4 + $0xd60] sm:$0xff] }
 0x432   : > { %3807 = vmatprep.mubr.f32.mxu0 %v3125_v61  ;;  %12308 = vmatpush1.bf16.msra.mxu0 %v16154_v11  ;;  %v3086_v61 = vld [vmem:[#allocation4 + $0xdb0] sm:$0xff]  ;;  %v3096_v11 = vld [vmem:[#allocation4 + $0xe00] sm:$0xff] }
 0x433   : > { %12309 = vmatprep.subr.bf16.mxu0 %v16102_v12 }
 0x435   : > { %3808 = vmatmul.mubr.f32.gmra.mrb[94].mxu0 %v3124_v9  ;;  %v3097_v9 = vld [vmem:[#allocation4 + $0xe08] sm:$0xff] }
 0x436   : > { %3812 = vmatprep.mubr.f32.mxu0 %v3135_v39  ;;  %12311 = vmatpush1.bf16.msra.mxu0 %v16155_v21  ;;  %v3107_v39 = vld [vmem:[#allocation4 + $0xe58] sm:$0xff]  ;;  %v3117_v21 = vld [vmem:[#allocation4 + $0xea8] sm:$0xff] }
 0x437   : > { %12312 = vmatprep.subr.bf16.mxu0 %v16102_v12 }
 0x439   : > { %3813 = vmatmul.mubr.f32.gmra.mrb[96].mxu0 %v3134_v56  ;;  %v3106_v56 = vld [vmem:[#allocation4 + $0xe50] sm:$0xff] }
 0x43a   : > { %3817 = vmatprep.mubr.f32.mxu0 %v3145_v16  ;;  %12314 = vmatpush1.bf16.msra.mxu0 %v16156_v26  ;;  %v3116_v16 = vld [vmem:[#allocation4 + $0xea0] sm:$0xff]  ;;  %v3126_v26 = vld [vmem:[#allocation4 + $0xef0] sm:$0xff] }
 0x43b   : > { %12315 = vmatprep.subr.bf16.mxu0 %v16102_v12 }
 0x43d   : > { %3818 = vmatmul.mubr.f32.gmra.mrb[98].mxu0 %v3144_v44  ;;  %v3127_v44 = vld [vmem:[#allocation4 + $0xef8] sm:$0xff] }
 0x43e   : > { %3822 = vmatprep.mubr.f32.mxu0 %v3155_v40  ;;  %12317 = vmatpush1.bf16.msra.mxu0 %v16157_v37  ;;  %v3137_v40 = vld [vmem:[#allocation4 + $0xf48] sm:$0xff]  ;;  %v3147_v37 = vld [vmem:[#allocation4 + $0xf98] sm:$0xff] }
 0x43f   : > { %12318 = vmatprep.subr.bf16.mxu0 %v16102_v12 }
 0x441   : > { %3823 = vmatmul.mubr.f32.gmra.mrb[100].mxu0 %v3154_v52  ;;  %v3136_v52 = vld [vmem:[#allocation4 + $0xf40] sm:$0xff] }
 0x442   : > { %3827 = vmatprep.mubr.f32.mxu0 %v3165_v60  ;;  %12320 = vmatpush1.bf16.msra.mxu0 %v16158_v7  ;;  %v3146_v60 = vld [vmem:[#allocation4 + $0xf90] sm:$0xff]  ;;  %v3156_v7 = vld [vmem:[#allocation4 + $0xfe0] sm:$0xff] }
 0x443   : > { %12321 = vmatprep.subr.bf16.mxu0 %v16102_v12 }
 0x445   : > { %3828 = vmatmul.mubr.f32.gmra.mrb[102].mxu0 %v3164_v47  ;;  %v3157_v47 = vld [vmem:[#allocation4 + $0xfe8] sm:$0xff] }
 0x446   : > { %3832 = vmatprep.mubr.f32.mxu0 %v3175_v13  ;;  %12323 = vmatpush1.bf16.msra.mxu0 %v16159_v43  ;;  %v3167_v13 = vld [vmem:[#allocation4 + $0x1038] sm:$0xff]  ;;  %v3177_v43 = vld [vmem:[#allocation4 + $0x1088] sm:$0xff] }
 0x447   : > { %12324 = vmatprep.subr.bf16.mxu0 %v16102_v12 }
 0x449   : > { %3833 = vmatmul.mubr.f32.gmra.mrb[104].mxu0 %v3174_v30  ;;  %v3166_v30 = vld [vmem:[#allocation4 + $0x1030] sm:$0xff] }
 0x44a   : > { %3837 = vmatprep.mubr.f32.mxu0 %v3185_v59  ;;  %12326 = vmatpush1.bf16.msra.mxu0 %v16160_v4  ;;  %v3176_v59 = vld [vmem:[#allocation4 + $0x1080] sm:$0xff]  ;;  %v3186_v4 = vld [vmem:[#allocation4 + $0x10d0] sm:$0xff] }
 0x44b   : > { %12327 = vmatprep.subr.bf16.mxu0 %v16102_v12 }
 0x44d   : > { %3838 = vmatmul.mubr.f32.gmra.mrb[106].mxu0 %v3184_v54  ;;  %v3187_v54 = vld [vmem:[#allocation4 + $0x10d8] sm:$0xff] }
 0x44e   : > { %3842 = vmatprep.mubr.f32.mxu0 %v3195_v63  ;;  %12329 = vmatpush1.bf16.msra.mxu0 %v16161_v22  ;;  %v3197_v63 = vld [vmem:[#allocation4 + $0x1128] sm:$0xff]  ;;  %v3207_v22 = vld [vmem:[#allocation4 + $0x1178] sm:$0xff] }
 0x44f   : > { %12384 = vmatprep.subr.bf16.mxu0 %v16102_v12 }
 0x451   : > { %3843 = vmatmul.mubr.f32.gmra.mrb[108].mxu0 %v3194_v50  ;;  %v3196_v50 = vld [vmem:[#allocation4 + $0x1120] sm:$0xff] }
 0x452   : > { %3847 = vmatprep.mubr.f32.mxu0 %v3205_v49  ;;  %v3206_v49 = vld [vmem:[#allocation4 + $0x1170] sm:$0xff] }
 0x455   : > { %3848 = vmatmul.mubr.f32.gmra.mrb[110].mxu0 %v3204_v27  ;;  %v3217_v27 = vld [vmem:[#allocation4 + $0x11c8] sm:$0xff] }
 0x456   : > { %3852 = vmatprep.mubr.f32.mxu0 %v3215_v35  ;;  %v3216_v35 = vld [vmem:[#allocation4 + $0x11c0] sm:$0xff] }
 0x459   : > { %3853 = vmatmul.mubr.f32.gmra.mrb[112].mxu0 %v3214_v6  ;;  %v4272_v6 = vld [vmem:[%s16010_s2 + $0x10] sm:$0xff] }
 0x45a   : > { %3922 = vmatprep.mubr.f32.mxu0 %v3037_v38  ;;  %v13145_v38 = vmov 0  }
 0x45b   : > { %12943 = vset.pattern.permute.xlu0 %v13145_v38  ;;  %12944 = vset.pattern.permute.xlu1 %v13145_v38 }
 0x45c   : > { %4301 = vperm.xlu0 %12943, %v4272_v6  }
 0x45d   : > { %3923 = vmatmul.mubr.f32.vlgmr.msra.gmra.mrb[76].mxu0 %v3036_v34  ;;  %v4270_v34 = vld [vmem:[%s16010_s2] sm:$0xff] }
 0x45e   : > { %3927 = vmatprep.mubr.f32.mxu0 %v3047_v33  ;;  %v4273_v33 = vld [vmem:[%s16010_s2 + $0x18] sm:$0xff] }
 0x45f   : > { %4306 = vperm.xlu1 %12944, %v4273_v33  }
 0x460   : > { %4291 = vperm.xlu0 %12943, %v4270_v34  }
 0x461   : > { %3928 = vmatmul.mubr.f32.gmra.mrb[78].mxu0 %v3046_v46  ;;  %v4279_v46 = vld [vmem:[%s16010_s2 + $0x48] sm:$0xff] }
 0x462   : > { %3932 = vmatprep.mubr.f32.mxu0 %v3057_v23  ;;  %v4274_v23 = vld [vmem:[%s16010_s2 + $0x20] sm:$0xff] }
 0x463   : > { %4311 = vperm.xlu1 %12944, %v4274_v23  }
 0x464   : > { %4316 = vperm.xlu0 %12943, %v4275_v0  }
 0x465   : > { %3933 = vmatmul.mubr.f32.gmra.mrb[80].mxu0 %v3056_v8  ;;  %v4278_v8 = vld [vmem:[%s16010_s2 + $0x40] sm:$0xff] }
 0x466   : > { %3937 = vmatprep.mubr.f32.mxu0 %v3067_v58  ;;  %v4281_v58 = vld [vmem:[%s16010_s2 + $0x58] sm:$0xff] }
 0x467   : > { %4346 = vperm.xlu1 %12944, %v4281_v58  }
 0x468   : > { %4326 = vperm.xlu0 %12943, %v4277_v5  }
 0x469   : > { %3938 = vmatmul.mubr.f32.gmra.mrb[82].mxu0 %v3066_v10  ;;  %v4280_v10 = vld [vmem:[%s16010_s2 + $0x50] sm:$0xff] }
 0x46a   : > { %3942 = vmatprep.mubr.f32.mxu0 %v3077_v57  ;;  %v4282_v57 = vld [vmem:[%s16010_s2 + $0x60] sm:$0xff] }
 0x46b   : > { %4351 = vperm.xlu1 %12944, %v4282_v57  }
 0x46c   : > { %4296 = vperm.xlu0 %12943, %v4271_v20  }
 0x46d   : > { %3943 = vmatmul.mubr.f32.gmra.mrb[84].mxu0 %v3076_v48  ;;  %v4286_v48 = vld [vmem:[%s16010_s2 + $0x80] sm:$0xff] }
 0x46e   : > { %3947 = vmatprep.mubr.f32.mxu0 %v3087_v1  ;;  %v4276_v1 = vld [vmem:[%s16010_s2 + $0x30] sm:$0xff] }
 0x46f   : > { %4321 = vperm.xlu1 %12944, %v4276_v1  }
 0x470   : > { %4336 = vperm.xlu0 %12943, %v4279_v46  }
 0x471   : > { %3948 = vmatmul.mubr.f32.gmra.mrb[86].mxu0 %v3086_v61  ;;  %v4288_v61 = vld [vmem:[%s16010_s2 + $0x90] sm:$0xff] }
 0x472   : > { %3952 = vmatprep.mubr.f32.mxu0 %v3097_v9  ;;  %v4284_v9 = vld [vmem:[%s16010_s2 + $0x70] sm:$0xff] }
 0x473   : > { %4361 = vperm.xlu1 %12944, %v4284_v9  }
 0x474   : > { %4331 = vperm.xlu0 %12943, %v4278_v8  }
 0x475   : > { %3953 = vmatmul.mubr.f32.gmra.mrb[88].mxu0 %v3096_v11  ;;  %v4283_v11 = vld [vmem:[%s16010_s2 + $0x68] sm:$0xff] }
 0x476   : > { %3957 = vmatprep.mubr.f32.mxu0 %v3107_v39  ;;  %v4285_v39 = vld [vmem:[%s16010_s2 + $0x78] sm:$0xff] }
 0x477   : > { %4356 = vperm.xlu1 %12944, %v4283_v11  }
 0x478   : > { %4341 = vperm.xlu0 %12943, %v4280_v10  }
 0x479   : > { %3958 = vmatmul.mubr.f32.gmra.mrb[90].mxu0 %v3106_v56  ;;  %v4287_v56 = vld [vmem:[%s16010_s2 + $0x88] sm:$0xff] }
 0x47a   : > { %3962 = vmatprep.mubr.f32.mxu0 %v3117_v21 }
 0x47b   : > { %4366 = vperm.xlu1 %12944, %v4285_v39   ;;  %v13146_v39 = vmov 1966171168  }
 0x47c   : > { %4371 = vperm.xlu0 %12943, %v4286_v48  }
 0x47d   : > { %3963 = vmatmul.mubr.f32.gmra.mrb[92].mxu0 %v3116_v16 }
 0x47e   : > { %3967 = vmatprep.mubr.f32.mxu0 %v3127_v44 }
 0x47f   : > { %4376 = vperm.xlu1 %12944, %v4287_v56   ;;  %v4424_v56 = vunpack.c.l.s4 %v13146_v39 }
 0x480   : > { %4381 = vperm.xlu0 %12943, %v4288_v61  }
 0x481   : > { %3968 = vmatmul.mubr.f32.gmra.mrb[94].mxu0 %v3126_v26 }
 0x482   : > { %3972 = vmatprep.mubr.f32.mxu0 %v3137_v40 }
 0x485   : > { %3973 = vmatmul.mubr.f32.gmra.mrb[96].mxu0 %v3136_v52 }
 0x486   : > { %3977 = vmatprep.mubr.f32.mxu0 %v3147_v37 }
 0x489   : > { %3978 = vmatmul.mubr.f32.gmra.mrb[98].mxu0 %v3146_v60 }
 0x48a   : > { %3982 = vmatprep.mubr.f32.mxu0 %v3157_v47 }
 0x48d   : > { %3983 = vmatmul.mubr.f32.gmra.mrb[100].mxu0 %v3156_v7 }
 0x48e   : > { %3987 = vmatprep.mubr.f32.mxu0 %v3167_v13 }
 0x491   : > { %3988 = vmatmul.mubr.f32.gmra.mrb[102].mxu0 %v3166_v30 }
 0x492   : > { %3992 = vmatprep.mubr.f32.mxu0 %v3177_v43 }
 0x495   : > { %3993 = vmatmul.mubr.f32.gmra.mrb[104].mxu0 %v3176_v59 }
 0x496   : > { %3997 = vmatprep.mubr.f32.mxu0 %v3187_v54 }
 0x499   : > { %3998 = vmatmul.mubr.f32.gmra.mrb[106].mxu0 %v3186_v4 }
 0x49a   : > { %4002 = vmatprep.mubr.f32.mxu0 %v3197_v63 }
 0x49d   : > { %4003 = vmatmul.mubr.f32.gmra.mrb[108].mxu0 %v3196_v50 }
 0x49e   : > { %4007 = vmatprep.mubr.f32.mxu0 %v3207_v22 }
 0x4a1   : > { %4008 = vmatmul.mubr.f32.gmra.mrb[110].mxu0 %v3206_v49 }
 0x4a2   : > { %4012 = vmatprep.mubr.f32.mxu0 %v3217_v27 }
 0x4a5   : > { %4013 = vmatmul.mubr.f32.gmra.mrb[112].mxu0 %v3216_v35 }
 0x4a6   : > { %11566 = vmatprep.mubr.msk.f32.mxu0 %vm13144_vm14, %v16064_v3 }
 0x4db   : > { %v14555_v9 = vpop.permute.xlu0 %4301 }
 0x4df   : > { %v4292_v11 = vpop.permute.xlu0 %4291 }
 0x530   : > { %v3924_v21 = vpop.f32.mrb[76].mxu0 }
 0x531   : > { %v3926_v16 = vpop.f32.mrb[77].mxu0  ;;  %11164 = vmatmul.mubr.msk.f32.vlgmr.msra.gmra.mrb[76].mxu1 %vm2592_vm15, %v3924_v21  ;;  %v14557_v21 = vpop.permute.xlu0 %4316 }
 0x532   : > { %11166 = vmatprep.mubr.msk.f32.mxu1 %vm13144_vm14, %v16064_v3  ;;  %v4425_v16 = vunpack.c.0.s8 %v4424_v56 }
 0x534   : > { %v3929_v44 = vpop.f32.mrb[78].mxu0 }
 0x535   : > { %v3931_v26 = vpop.f32.mrb[79].mxu0  ;;  %11167 = vmatmul.mubr.msk.f32.gmra.mrb[78].mxu1 %vm2592_vm15, %v3929_v44  ;;  %v14559_v44 = vpop.permute.xlu0 %4326 }
 0x536   : > { %11169 = vmatprep.mubr.msk.f32.mxu1 %vm13144_vm14, %v16064_v3 }
 0x538   : > { %v3934_v40 = vpop.f32.mrb[80].mxu0 }
 0x539   : > { %v3936_v52 = vpop.f32.mrb[81].mxu0  ;;  %11170 = vmatmul.mubr.msk.f32.gmra.mrb[80].mxu1 %vm2592_vm15, %v3934_v40  ;;  %v14562_v40 = vsub.s32 %v4425_v16, %v14044_v36 }
 0x53a   : > { %11172 = vmatprep.mubr.msk.f32.mxu1 %vm13144_vm14, %v16064_v3 }
 0x53c   : > { %v3939_v37 = vpop.f32.mrb[82].mxu0 }
 0x53d   : > { %v3941_v60 = vpop.f32.mrb[83].mxu0  ;;  %11173 = vmatmul.mubr.msk.f32.gmra.mrb[82].mxu1 %vm2592_vm15, %v3939_v37 }
 0x53e   : > { %11175 = vmatprep.mubr.msk.f32.mxu1 %vm13144_vm14, %v16064_v3 }
 0x540   : > { %v3944_v47 = vpop.f32.mrb[84].mxu0 }
 0x541   : > { %v3946_v7 = vpop.f32.mrb[85].mxu0  ;;  %11176 = vmatmul.mubr.msk.f32.gmra.mrb[84].mxu1 %vm2592_vm15, %v3944_v47 }
 0x542   : > { %11178 = vmatprep.mubr.msk.f32.mxu1 %vm13144_vm14, %v16064_v3 }
 0x544   : > { %v3949_v13 = vpop.f32.mrb[86].mxu0 }
 0x545   : > { %v3951_v30 = vpop.f32.mrb[87].mxu0  ;;  %11179 = vmatmul.mubr.msk.f32.gmra.mrb[86].mxu1 %vm2592_vm15, %v3949_v13 }
 0x546   : > { %11181 = vmatprep.mubr.msk.f32.mxu1 %vm13144_vm14, %v16064_v3 }
 0x548   : > { %v3954_v43 = vpop.f32.mrb[88].mxu0 }
 0x549   : > { %v3956_v59 = vpop.f32.mrb[89].mxu0  ;;  %11182 = vmatmul.mubr.msk.f32.gmra.mrb[88].mxu1 %vm2592_vm15, %v3954_v43 }
 0x54a   : > { %11184 = vmatprep.mubr.msk.f32.mxu1 %vm13144_vm14, %v16064_v3  ;;  %v4297_v59 = vpop.permute.xlu0 %4296 }
 0x54c   : > { %v3959_v54 = vpop.f32.mrb[90].mxu0 }
 0x54d   : > { %v3961_v4 = vpop.f32.mrb[91].mxu0  ;;  %11185 = vmatmul.mubr.msk.f32.gmra.mrb[90].mxu1 %vm2592_vm15, %v3959_v54 }
 0x54e   : > { %11187 = vmatprep.mubr.msk.f32.mxu1 %vm13144_vm14, %v16064_v3  ;;  %v14766_v36 = vpop.permute.xlu0 %4336 }
 0x550   : > { %v3964_v63 = vpop.f32.mrb[92].mxu0 }
 0x551   : > { %v3966_v50 = vpop.f32.mrb[93].mxu0  ;;  %11188 = vmatmul.mubr.msk.f32.gmra.mrb[92].mxu1 %vm2592_vm15, %v3964_v63 }
 0x552   : > { %11190 = vmatprep.mubr.msk.f32.mxu1 %vm13144_vm14, %v16064_v3 }
 0x554   : > { %v3969_v22 = vpop.f32.mrb[94].mxu0 }
 0x555   : > { %v3971_v49 = vpop.f32.mrb[95].mxu0  ;;  %11191 = vmatmul.mubr.msk.f32.gmra.mrb[94].mxu1 %vm2592_vm15, %v3969_v22 }
 0x556   : > { %11193 = vmatprep.mubr.msk.f32.mxu1 %vm13144_vm14, %v16064_v3 }
 0x558   : > { %v3974_v27 = vpop.f32.mrb[96].mxu0 }
 0x559   : > { %v3976_v35 = vpop.f32.mrb[97].mxu0  ;;  %11194 = vmatmul.mubr.msk.f32.gmra.mrb[96].mxu1 %vm2592_vm15, %v3974_v27 }
 0x55a   : > { %11196 = vmatprep.mubr.msk.f32.mxu1 %vm13144_vm14, %v16064_v3 }
 0x55c   : > { %v3979_v6 = vpop.f32.mrb[98].mxu0 }
 0x55d   : > { %v3981_v38 = vpop.f32.mrb[99].mxu0  ;;  %11197 = vmatmul.mubr.msk.f32.gmra.mrb[98].mxu1 %vm2592_vm15, %v3979_v6 }
 0x55e   : > { %11199 = vmatprep.mubr.msk.f32.mxu1 %vm13144_vm14, %v16064_v3 }
 0x560   : > { %v3984_v34 = vpop.f32.mrb[100].mxu0 }
 0x561   : > { %v3986_v0 = vpop.f32.mrb[101].mxu0  ;;  %11200 = vmatmul.mubr.msk.f32.gmra.mrb[100].mxu1 %vm2592_vm15, %v3984_v34 }
 0x562   : > { %11202 = vmatprep.mubr.msk.f32.mxu1 %vm13144_vm14, %v16064_v3 }
 0x564   : > { %v3989_v5 = vpop.f32.mrb[102].mxu0 }
 0x565   : > { %v3991_v20 = vpop.f32.mrb[103].mxu0  ;;  %11203 = vmatmul.mubr.msk.f32.gmra.mrb[102].mxu1 %vm2592_vm15, %v3989_v5 }
 0x566   : > { %11205 = vmatprep.mubr.msk.f32.mxu1 %vm13144_vm14, %v16064_v3 }
 0x568   : > { %v3994_v33 = vpop.f32.mrb[104].mxu0 }
 0x569   : > { %v3996_v46 = vpop.f32.mrb[105].mxu0  ;;  %11206 = vmatmul.mubr.msk.f32.gmra.mrb[104].mxu1 %vm2592_vm15, %v3994_v33 }
 0x56a   : > { %11208 = vmatprep.mubr.msk.f32.mxu1 %vm13144_vm14, %v16064_v3 }
 0x56c   : > { %v3999_v23 = vpop.f32.mrb[106].mxu0 }
 0x56d   : > { %v4001_v8 = vpop.f32.mrb[107].mxu0  ;;  %11209 = vmatmul.mubr.msk.f32.gmra.mrb[106].mxu1 %vm2592_vm15, %v3999_v23 }
 0x56e   : > { %11211 = vmatprep.mubr.msk.f32.mxu1 %vm13144_vm14, %v16064_v3 }
 0x570   : > { %v4004_v58 = vpop.f32.mrb[108].mxu0 }
 0x571   : > { %v4006_v10 = vpop.f32.mrb[109].mxu0  ;;  %11212 = vmatmul.mubr.msk.f32.gmra.mrb[108].mxu1 %vm2592_vm15, %v4004_v58 }
 0x572   : > { %11214 = vmatprep.mubr.msk.f32.mxu1 %vm13144_vm14, %v16064_v3 }
 0x574   : > { %v4009_v57 = vpop.f32.mrb[110].mxu0 }
 0x575   : > { %v4011_v48 = vpop.f32.mrb[111].mxu0  ;;  %11215 = vmatmul.mubr.msk.f32.gmra.mrb[110].mxu1 %vm2592_vm15, %v4009_v57 }
 0x576   : > { %11217 = vmatprep.mubr.msk.f32.mxu1 %vm13144_vm14, %v16064_v3 }
 0x578   : > { %v4014_v1 = vpop.f32.mrb[112].mxu0 }
 0x579   : > { %v4016_v61 = vpop.f32.mrb[113].mxu0  ;;  %11218 = vmatmul.mubr.msk.f32.gmra.mrb[112].mxu1 %vm2592_vm15, %v4014_v1 }
 0x57a   : > { %11230 = vmatprep.mubr.msk.f32.mxu1 %vm13144_vm14, %v16064_v3 }
 0x604   : > { %v4157_v26 = vpop.f32.mrb[76].mxu1 }
 0x605   : > { %v4251_v52 = vadd.f32 %v4157_v26, %v14316_v31  ;;  %v11165_v37 = vpop.f32.mrb[77].mxu1 }
 0x607   : > { %v4384_v60 = vadd.f32 %v4292_v11, %v4251_v52 }
 0x608   : > { %v4162_v47 = vpop.f32.mrb[78].mxu1 }
 0x609   : > { %v4422_v7 = vcombine.high %v4384_v60, %v4384_v60  ;;  %v4429_v13 = vrot.slane %v4384_v60, %v14562_v40  ;;  %v4252_v30 = vadd.f32 %v4162_v47, %v14320_v2  ;;  %v11168_v43 = vpop.f32.mrb[79].mxu1 }
 0x60b   : > { %v4436_v54 = vrot.slane %v4422_v7, %v14562_v40  ;;  %v4437_v4 = vcombine.high %v4429_v13, %v4429_v13  ;;  %v4385_v63 = vadd.f32 %v4297_v59, %v4252_v30  ;;  %v4445_v50 = vrot.slane %v4429_v13, %v14562_v40 }
 0x60c   : > { %v4167_v22 = vpop.f32.mrb[80].mxu1 }
 0x60d   : > { %v4438_v49 = vcombine.high %v4436_v54, %v4436_v54  ;;  %v4452_v31 = vrot.slane %v4436_v54, %v14562_v40  ;;  %v4459_v27 = vrot.slane %v4437_v4, %v14562_v40  ;;  %v4471_v35 = vcombine.high %v4385_v63, %v4385_v63  ;;  %v11171_v6 = vpop.f32.mrb[81].mxu1 }
 0x60e   : > { %v4478_v38 = vrot.slane %v4385_v63, %v14562_v40  ;;  %v14573_v2 = vadd.f32 %v4167_v22, %v14322_v53 }
 0x60f   : > { %v4466_v34 = vrot.slane %v4438_v49, %v14562_v40  ;;  %v4468_v0 = vcombine.high %v4452_v31, %v4452_v31  ;;  %v4469_v5 = vcombine.high %v4459_v27, %v4459_v27  ;;  %v5353_v20 = vcombine.low %v4445_v50, %v4459_v27 }
 0x610   : > { %v10665_v33 = vcombine.high %v4445_v50, %v4459_v27  ;;  %v4485_v46 = vrot.slane %v4471_v35, %v14562_v40  ;;  %v4486_v23 = vcombine.high %v4478_v38, %v4478_v38  ;;  %v4494_v8 = vrot.slane %v4478_v38, %v14562_v40  ;;  %v14578_v58 = vpop.f32.mrb[82].mxu1 }
 0x611   : > { %v5355_v10 = vcombine.low %v4452_v31, %v4466_v34  ;;  %v5362_v57 = vrot.slane %v5353_v20, %v14562_v40  ;;  %v5383_v48 = vrot.slane %v4468_v0, %v14562_v40  ;;  %v5802_v53 = vcombine.low %v4469_v5, %v4452_v31  ;;  %v11174_v1 = vpop.f32.mrb[83].mxu1 }
 0x612   : > { %v5369_v61 = vrot.slane %v10665_v33, %v14562_v40  ;;  %v5803_v11 = vcombine.low %v4466_v34, %v4468_v0  ;;  %v10677_v39 = vcombine.high %v4452_v31, %v4466_v34  ;;  %v4470_v56 = vcombine.high %v4466_v34, %v4466_v34 }
 0x613   : > { %v5376_v16 = vrot.slane %v5355_v10, %v14562_v40  ;;  %v5811_v26 = vrot.slane %v5802_v53, %v14562_v40  ;;  %v4487_v52 = vcombine.high %v4485_v46, %v4485_v46  ;;  %v4501_v37 = vrot.slane %v4485_v46, %v14562_v40 }
 0x614   : > { %v5384_v60 = vcombine.low %v5362_v57, %v5369_v61  ;;  %v5818_v47 = vrot.slane %v5803_v11, %v14562_v40  ;;  %v4508_v7 = vrot.slane %v4486_v23, %v14562_v40  ;;  %v4177_v13 = vpop.f32.mrb[84].mxu1  ;;  %v4516_v59 = vcombine.high %v4494_v8, %v4494_v8  ;;  %v4307_v61 = vpop.permute.xlu1 %4306 }
 0x615   : > { %v5385_v30 = vcombine.low %v5376_v16, %v5383_v48  ;;  %v4515_v43 = vrot.slane %v4487_v52, %v14562_v40  ;;  %v11177_v54 = vpop.f32.mrb[85].mxu1  ;;  %v6259_v4 = vrot.slane %v10677_v39, %v14562_v40  ;;  %v4517_v63 = vcombine.high %v4501_v37, %v4501_v37 }
 0x616   : > { %v4518_v50 = vcombine.high %v4508_v7, %v4508_v7  ;;  %v5804_v22 = vcombine.low %v4470_v56, %v4494_v8  ;;  %v5392_v49 = vrot.slane %v5384_v60, %v14562_v40  ;;  %v5833_v27 = vcombine.low %v5811_v26, %v5818_v47 }
 0x617   : > { %v5399_v31 = vrot.slane %v5385_v30, %v14562_v40  ;;  %v6251_v35 = vcombine.low %v4494_v8, %v4508_v7  ;;  %v4519_v6 = vcombine.high %v4515_v43, %v4515_v43  ;;  %v5832_v34 = vrot.slane %v4508_v7, %v14562_v40 }
 0x618   : > { %v5825_v38 = vrot.slane %v5804_v22, %v14562_v40  ;;  %v10678_v0 = vcombine.high %v4494_v8, %v4508_v7  ;;  %v4182_v5 = vpop.f32.mrb[86].mxu1  ;;  %v6698_v46 = vcombine.low %v4508_v7, %v4516_v59  ;;  %v6699_v23 = vcombine.low %v4518_v50, %v4501_v37 }
 0x619   : > { %v5400_v20 = vcombine.low %v5392_v49, %v5399_v31  ;;  %v6266_v33 = vrot.slane %v6251_v35, %v14562_v40  ;;  %v11180_v10 = vpop.f32.mrb[87].mxu1  ;;  %v6280_v53 = vrot.slane %v4501_v37, %v14562_v40  ;;  %v6700_v1 = vcombine.low %v4515_v43, %v4517_v63 }
 0x61a   : > { %v5834_v57 = vcombine.low %v5825_v38, %v5832_v34  ;;  %v6273_v48 = vrot.slane %v10678_v0, %v14562_v40  ;;  %v5841_v39 = vrot.slane %v5833_v27, %v14562_v40  ;;  %v6714_v8 = vrot.slane %v6699_v23, %v14562_v40 }
 0x61b   : > { %v5746_v11 = vsel %vm5745_vm7, %v5400_v20, -inf  ;;  %v6281_v56 = vcombine.low %v6259_v4, %v6266_v33  ;;  %v6707_v60 = vrot.slane %v6698_v46, %v14562_v40  ;;  %v6728_v30 = vrot.slane %v4519_v6, %v14562_v40  ;;  %v4312_v20 = vpop.permute.xlu1 %4311 }
 0x61c   : > { %v5747_v16 = vrot.slane %v5746_v11, 4  ;;  %v5848_v26 = vrot.slane %v5834_v57, %v14562_v40  ;;  %v6282_v52 = vcombine.low %v6273_v48, %v6280_v53  ;;  %v4187_v47 = vpop.f32.mrb[88].mxu1  ;;  %v7146_v59 = vcombine.low %v4501_v37, %v4515_v43 }
 0x61d   : > { %v6289_v7 = vrot.slane %v6281_v56, %v14562_v40  ;;  %v10689_v54 = vcombine.high %v4501_v37, %v4515_v43  ;;  %v11183_v63 = vpop.f32.mrb[89].mxu1  ;;  %v6721_v22 = vrot.slane %v6700_v1, %v14562_v40  ;;  %v14608_v49 = vcombine.low %v6707_v60, %v6714_v8 }
 0x61e   : > { %v14604_v50 = vcombine.low %v5841_v39, %v5848_v26  ;;  %v6296_v4 = vrot.slane %v6282_v52, %v14562_v40  ;;  %v7155_v31 = vrot.slane %v7146_v59, %v14562_v40  ;;  %v4386_v35 = vadd.f32 %v14555_v9, %v14573_v2 }
 0x61f   : > { %v7162_v27 = vrot.slane %v10689_v54, %v14562_v40  ;;  %v4254_v6 = vadd.f32 %v14578_v58, %v14324_v32  ;;  %v14616_v37 = vmax.f32 %v5746_v11, %v5747_v16  ;;  %v4255_v38 = vadd.f32 %v4177_v13, %v14326_v55 }
 0x620   : > { %v14618_v43 = vcombine.low %v6289_v7, %v6296_v4  ;;  %v4256_v34 = vadd.f32 %v4182_v5, %v14330_v24  ;;  %v4192_v0 = vpop.f32.mrb[90].mxu1  ;;  %v4520_v33 = vcombine.high %v4386_v35, %v4386_v35  ;;  %v4527_v46 = vrot.slane %v4386_v35, %v14562_v40 }
 0x621   : > { %v7177_v23 = vcombine.low %v7155_v31, %v7162_v27  ;;  %v4387_v10 = vadd.f32 %v4307_v61, %v4254_v6  ;;  %v11186_v57 = vpop.f32.mrb[91].mxu1  ;;  %v14623_v9 = vcombine.low %v6721_v22, %v6728_v30  ;;  %v4388_v2 = vadd.f32 %v4312_v20, %v4255_v38 }
 0x622   : > { %v14626_v32 = vadd.f32 %v4187_v47, %v14334_v51  ;;  %v14629_v58 = vadd.f32 %v4192_v0, %v14338_v25  ;;  %v4534_v55 = vrot.slane %v4520_v33, %v14562_v40  ;;  %v4535_v24 = vcombine.high %v4527_v46, %v4527_v46 }
 0x623   : > { %v4543_v13 = vrot.slane %v4527_v46, %v14562_v40  ;;  %v14634_v5 = vadd.f32 %v14557_v21, %v4256_v34  ;;  %v14637_v48 = vrot.slane %v7177_v23, %v14562_v40  ;;  %v4569_v53 = vcombine.high %v4387_v10, %v4387_v10 }
 0x624   : > { %v4576_v1 = vrot.slane %v4387_v10, %v14562_v40  ;;  %v4618_v61 = vcombine.high %v4388_v2, %v4388_v2  ;;  %v14640_v51 = vpop.f32.mrb[92].mxu1  ;;  %v4536_v11 = vcombine.high %v4534_v55, %v4534_v55  ;;  %v4550_v25 = vrot.slane %v4534_v55, %v14562_v40 }
 0x625   : > { %v4557_v39 = vrot.slane %v4535_v24, %v14562_v40  ;;  %v14645_v56 = vrot.slane %v4388_v2, %v14562_v40  ;;  %v11189_v8 = vpop.f32.mrb[93].mxu1  ;;  %v4565_v21 = vcombine.high %v4543_v13, %v4543_v13  ;;  %v4583_v16 = vrot.slane %v4569_v53, %v14562_v40 }
 0x626   : > { %v4584_v26 = vcombine.high %v4576_v1, %v4576_v1  ;;  %v4592_v52 = vrot.slane %v4576_v1, %v14562_v40  ;;  %v4564_v60 = vrot.slane %v4536_v11, %v14562_v40  ;;  %v4566_v47 = vcombine.high %v4550_v25, %v4550_v25  ;;  %v14664_v8 = vpop.permute.xlu1 %4346 }
 0x627   : > { %v4567_v7 = vcombine.high %v4557_v39, %v4557_v39  ;;  %v7148_v30 = vcombine.low %v4543_v13, %v4557_v39  ;;  %v4585_v59 = vcombine.high %v4583_v16, %v4583_v16  ;;  %v4599_v54 = vrot.slane %v4583_v16, %v14562_v40 }
 0x628   : > { %v4606_v63 = vrot.slane %v4584_v26, %v14562_v40  ;;  %v4632_v4 = vrot.slane %v4618_v61, %v14562_v40  ;;  %v14653_v22 = vpop.f32.mrb[94].mxu1  ;;  %v4568_v31 = vcombine.high %v4564_v60, %v4564_v60  ;;  %v5402_v35 = vcombine.low %v4564_v60, %v4566_v47 }
 0x629   : > { %v5401_v27 = vcombine.low %v4567_v7, %v4550_v25  ;;  %v10671_v6 = vcombine.high %v4550_v25, %v4564_v60  ;;  %v11192_v38 = vpop.f32.mrb[95].mxu1  ;;  %v7169_v34 = vrot.slane %v7148_v30, %v14562_v40  ;;  %v7176_v0 = vrot.slane %v4565_v21, %v14562_v40 }
 0x62a   : > { %v4613_v20 = vrot.slane %v4585_v59, %v14562_v40  ;;  %v4614_v33 = vcombine.high %v4592_v52, %v4592_v52  ;;  %v5417_v23 = vrot.slane %v5402_v35, %v14562_v40  ;;  %v4615_v10 = vcombine.high %v4599_v54, %v4599_v54 }
 0x62b   : > { %v5410_v46 = vrot.slane %v5401_v27, %v14562_v40  ;;  %v4616_v57 = vcombine.high %v4606_v63, %v4606_v63  ;;  %v5859_v2 = vrot.slane %v10671_v6, %v14562_v40  ;;  %v7178_v55 = vcombine.low %v7169_v34, %v7176_v0 }
 0x62c   : > { %v5403_v24 = vcombine.low %v4568_v31, %v4592_v52  ;;  %v5851_v13 = vcombine.low %v4592_v52, %v4606_v63  ;;  %v14661_v53 = vpop.f32.mrb[96].mxu1  ;;  %v5431_v61 = vrot.slane %v4606_v63, %v14562_v40  ;;  %v10672_v11 = vcombine.high %v4592_v52, %v4606_v63 }
 0x62d   : > { %v5432_v1 = vcombine.low %v5410_v46, %v5417_v23  ;;  %v6298_v25 = vcombine.low %v4606_v63, %v4614_v33  ;;  %v11195_v39 = vpop.f32.mrb[97].mxu1  ;;  %v14667_v21 = vrot.slane %v7178_v55, %v14562_v40  ;;  %v6299_v60 = vcombine.low %v4616_v57, %v4599_v54 }
 0x62e   : > { %v5424_v16 = vrot.slane %v5403_v24, %v14562_v40  ;;  %v5866_v26 = vrot.slane %v5851_v13, %v14562_v40  ;;  %v5873_v7 = vrot.slane %v10672_v11, %v14562_v40  ;;  %v5880_v30 = vrot.slane %v4599_v54, %v14562_v40 }
 0x62f   : > { %v5440_v47 = vrot.slane %v5432_v1, %v14562_v40  ;;  %v6300_v59 = vcombine.low %v4613_v20, %v4615_v10  ;;  %v6314_v27 = vrot.slane %v6299_v60, %v14562_v40  ;;  %v6307_v38 = vrot.slane %v6298_v25, %v14562_v40  ;;  %v14687_v1 = vpop.permute.xlu1 %4351 }
 0x630   : > { %v5433_v63 = vcombine.low %v5424_v16, %v5431_v61  ;;  %v5881_v31 = vcombine.low %v5859_v2, %v5866_v26  ;;  %v14677_v35 = vpop.f32.mrb[98].mxu1  ;;  %v5882_v6 = vcombine.low %v5873_v7, %v5880_v30  ;;  %v6746_v34 = vcombine.low %v4599_v54, %v4613_v20 }
 0x631   : > { %v10683_v0 = vcombine.high %v4599_v54, %v4613_v20  ;;  %v11198_v33 = vpop.f32.mrb[99].mxu1  ;;  %v4617_v10 = vcombine.high %v4613_v20, %v4613_v20  ;;  %v4633_v57 = vcombine.high %v14645_v56, %v14645_v56  ;;  %v4634_v13 = vcombine.high %v4632_v4, %v4632_v4 }
 0x632   : > { %v5447_v46 = vrot.slane %v5433_v63, %v14562_v40  ;;  %v5889_v23 = vrot.slane %v5881_v31, %v14562_v40  ;;  %v5896_v2 = vrot.slane %v5882_v6, %v14562_v40  ;;  %v6755_v55 = vrot.slane %v6746_v34, %v14562_v40 }
 0x633   : > { %v6762_v24 = vrot.slane %v10683_v0, %v14562_v40  ;;  %v6329_v54 = vcombine.low %v6307_v38, %v6314_v27  ;;  %v4641_v11 = vrot.slane %v14645_v56, %v14562_v40  ;;  %v4648_v20 = vrot.slane %v4632_v4, %v14562_v40 }
 0x634   : > { %v14689_v61 = vcombine.low %v5440_v47, %v5447_v46  ;;  %v14694_v25 = vpop.f32.mrb[100].mxu1  ;;  %v14696_v39 = vcombine.low %v5889_v23, %v5896_v2  ;;  %v4655_v26 = vrot.slane %v4633_v57, %v14562_v40  ;;  %v4662_v60 = vrot.slane %v4634_v13, %v14562_v40 }
 0x635   : > { %v6777_v16 = vcombine.low %v6755_v55, %v6762_v24  ;;  %v11201_v7 = vpop.f32.mrb[101].mxu1  ;;  %v4663_v30 = vcombine.high %v4641_v11, %v4641_v11  ;;  %v6321_v47 = vrot.slane %v6300_v59, %v14562_v40  ;;  %v6328_v63 = vrot.slane %v4617_v10, %v14562_v40  ;;  %v4322_v55 = vpop.permute.xlu1 %4321 }
 0x636   : > { %v7194_v31 = vcombine.low %v4617_v10, %v4641_v11  ;;  %v4665_v27 = vcombine.high %v4655_v26, %v4655_v26  ;;  %v10666_v4 = vcombine.high %v4648_v20, %v4662_v60  ;;  %v6748_v6 = vcombine.low %v4641_v11, %v4655_v26 }
 0x637   : > { %v6337_v38 = vrot.slane %v6329_v54, %v14562_v40  ;;  %v6330_v34 = vcombine.low %v6321_v47, %v6328_v63  ;;  %v7195_v0 = vcombine.low %v4655_v26, %v4663_v30  ;;  %v6776_v59 = vrot.slane %v4663_v30, %v14562_v40 }
 0x638   : > { %v7203_v33 = vrot.slane %v7194_v31, %v14562_v40  ;;  %v14705_v46 = vpop.f32.mrb[102].mxu1  ;;  %v6769_v23 = vrot.slane %v6748_v6, %v14562_v40  ;;  %v6785_v57 = vrot.slane %v6777_v16, %v14562_v40  ;;  %v7196_v10 = vcombine.low %v4665_v27, %v4648_v20 }
 0x639   : > { %v11204_v2 = vpop.f32.mrb[103].mxu1  ;;  %v6344_v24 = vrot.slane %v6330_v34, %v14562_v40  ;;  %v7210_v13 = vrot.slane %v7195_v0, %v14562_v40  ;;  %v4667_v54 = vcombine.high %v14634_v5, %v14634_v5  ;;  %v4674_v11 = vrot.slane %v14634_v5, %v14562_v40 }
 0x63a   : > { %v5458_v26 = vrot.slane %v10666_v4, %v14562_v40  ;;  %v6778_v7 = vcombine.low %v6769_v23, %v6776_v59  ;;  %v7217_v30 = vrot.slane %v7196_v10, %v14562_v40  ;;  %v4390_v16 = vadd.f32 %v4322_v55, %v14626_v32 }
 0x63b   : > { %v7224_v20 = vrot.slane %v4662_v60, %v14562_v40  ;;  %v7225_v47 = vcombine.low %v7203_v33, %v7210_v13  ;;  %v4681_v63 = vrot.slane %v4667_v54, %v14562_v40  ;;  %v4682_v31 = vcombine.high %v4674_v11, %v4674_v11 }
 0x63c   : > { %v14721_v27 = vpop.f32.mrb[104].mxu1  ;;  %v6792_v6 = vrot.slane %v6778_v7, %v14562_v40  ;;  %v4690_v34 = vrot.slane %v4674_v11, %v14562_v40  ;;  %v4716_v5 = vcombine.high %v4390_v16, %v4390_v16  ;;  %v14727_v4 = vadd.f32 %v14559_v44, %v14629_v58 }
 0x63d   : > { %v11207_v0 = vpop.f32.mrb[105].mxu1  ;;  %v14729_v23 = vcombine.low %v6337_v38, %v6344_v24  ;;  %v4683_v32 = vcombine.high %v4681_v63, %v4681_v63  ;;  %v4697_v60 = vrot.slane %v4681_v63, %v14562_v40  ;;  %v4704_v33 = vrot.slane %v4682_v31, %v14562_v40 }
 0x63e   : > { %v14733_v59 = vcombine.low %v6785_v57, %v6792_v6  ;;  %v14735_v10 = vcombine.low %v7217_v30, %v7224_v20  ;;  %v14738_v2 = vrot.slane %v7225_v47, %v14562_v40  ;;  %v4712_v55 = vcombine.high %v4690_v34, %v4690_v34 }
 0x63f   : > { %v4711_v13 = vrot.slane %v4683_v32, %v14562_v40  ;;  %v4713_v44 = vcombine.high %v4697_v60, %v4697_v60  ;;  %v4714_v58 = vcombine.high %v4704_v33, %v4704_v33  ;;  %v5450_v54 = vcombine.low %v4690_v34, %v4704_v33 }
 0x640   : > { %v14741_v38 = vpop.f32.mrb[106].mxu1  ;;  %v10667_v24 = vcombine.high %v4690_v34, %v4704_v33  ;;  %v5898_v11 = vcombine.low %v4704_v33, %v4712_v55  ;;  %v4723_v7 = vrot.slane %v4390_v16, %v14562_v40  ;;  %v4730_v57 = vrot.slane %v4716_v5, %v14562_v40 }
 0x641   : > { %v11210_v63 = vpop.f32.mrb[107].mxu1  ;;  %v5465_v30 = vrot.slane %v5450_v54, %v14562_v40  ;;  %v5899_v20 = vcombine.low %v4714_v58, %v4697_v60  ;;  %v5900_v47 = vcombine.low %v4711_v13, %v4713_v44  ;;  %v6346_v31 = vcombine.low %v4697_v60, %v4711_v13 }
 0x642   : > { %v5472_v6 = vrot.slane %v10667_v24, %v14562_v40  ;;  %v5479_v0 = vrot.slane %v4697_v60, %v14562_v40  ;;  %v5907_v32 = vrot.slane %v5898_v11, %v14562_v40  ;;  %v10679_v3 = vcombine.high %v4697_v60, %v4711_v13 }
 0x643   : > { %v5480_v52 = vcombine.low %v5458_v26, %v5465_v30  ;;  %v5914_v34 = vrot.slane %v5899_v20, %v14562_v40  ;;  %v6355_v16 = vrot.slane %v6346_v31, %v14562_v40  ;;  %v4715_v33 = vcombine.high %v4711_v13, %v4711_v13 }
 0x644   : > { %v14751_v5 = vpop.f32.mrb[108].mxu1  ;;  %v5481_v55 = vcombine.low %v5472_v6, %v5479_v0  ;;  %v6362_v58 = vrot.slane %v10679_v3, %v14562_v40  ;;  %v4731_v44 = vcombine.high %v4723_v7, %v4723_v7  ;;  %v4732_v54 = vcombine.high %v4730_v57, %v4730_v57 }
 0x645   : > { %v11213_v63 = vpop.f32.mrb[109].mxu1  ;;  %v5488_v24 = vrot.slane %v5480_v52, %v14562_v40  ;;  %v5921_v56 = vrot.slane %v5900_v47, %v14562_v40  ;;  %v5929_v11 = vcombine.low %v5907_v32, %v5914_v34  ;;  %v4739_v26 = vrot.slane %v4723_v7, %v14562_v40 }
 0x646   : > { %v5495_v13 = vrot.slane %v5481_v55, %v14562_v40  ;;  %v4746_v30 = vrot.slane %v4730_v57, %v14562_v40  ;;  %v4753_v20 = vrot.slane %v4731_v44, %v14562_v40  ;;  %v6377_v3 = vcombine.low %v6355_v16, %v6362_v58 }
 0x647   : > { %v4761_v31 = vcombine.high %v4739_v26, %v4739_v26  ;;  %v5928_v6 = vrot.slane %v4715_v33, %v14562_v40  ;;  %v6794_v0 = vcombine.low %v4715_v33, %v4739_v26  ;;  %v4760_v47 = vrot.slane %v4732_v54, %v14562_v40 }
 0x648   : > { %v5496_v52 = vcombine.low %v5488_v24, %v5495_v13  ;;  %v4763_v32 = vcombine.high %v4753_v20, %v4753_v20  ;;  %v6348_v34 = vcombine.low %v4739_v26, %v4753_v20  ;;  %v5937_v7 = vrot.slane %v5929_v11, %v14562_v40 }
 0x649   : > { %v5930_v63 = vcombine.low %v5921_v56, %v5928_v6  ;;  %v6795_v60 = vcombine.low %v4753_v20, %v4761_v31  ;;  %v6803_v55 = vrot.slane %v6794_v0, %v14562_v40  ;;  %v6376_v33 = vrot.slane %v4761_v31, %v14562_v40 }
 0x64a   : > { %v14769_v57 = vsel %vm5745_vm7, %v5496_v52, -inf  ;;  %v6369_v16 = vrot.slane %v6348_v34, %v14562_v40  ;;  %v6796_v58 = vcombine.low %v4763_v32, %v4746_v30  ;;  %v6385_v54 = vrot.slane %v6377_v3, %v14562_v40 }
 0x64b   : > { %v5944_v44 = vrot.slane %v5930_v63, %v14562_v40  ;;  %v6810_v24 = vrot.slane %v6795_v60, %v14562_v40  ;;  %v10690_v56 = vcombine.high %v4739_v26, %v4753_v20  ;;  %v6824_v6 = vrot.slane %v4760_v47, %v14562_v40 }
 0x64c   : > { %v6378_v11 = vcombine.low %v6369_v16, %v6376_v33  ;;  %v6817_v13 = vrot.slane %v6796_v58, %v14562_v40  ;;  %v7243_v0 = vcombine.low %v4746_v30, %v4760_v47  ;;  %v10691_v34 = vcombine.high %v4746_v30, %v4760_v47  ;;  %v4332_v47 = vpop.permute.xlu0 %4331 }
 0x64d   : > { %v6825_v12 = vcombine.low %v6803_v55, %v6810_v24  ;;  %v4765_v31 = vcombine.high %v14727_v4, %v14727_v4  ;;  %v7251_v3 = vrot.slane %v10690_v56, %v14562_v40  ;;  %v4772_v26 = vrot.slane %v14727_v4, %v14562_v40 }
 0x64e   : > { %v6392_v32 = vrot.slane %v6378_v11, %v14562_v40  ;;  %v7258_v60 = vrot.slane %v7243_v0, %v14562_v40  ;;  %v14786_v20 = vcombine.low %v5937_v7, %v5944_v44  ;;  %v14788_v63 = vcombine.low %v6817_v13, %v6824_v6 }
 0x64f   : > { %v4779_v16 = vrot.slane %v4765_v31, %v14562_v40  ;;  %v4259_v30 = vadd.f32 %v14640_v51, %v14342_v45  ;;  %v14796_v33 = vrot.slane %v6825_v12, %v14562_v40  ;;  %v4780_v24 = vcombine.high %v4772_v26, %v4772_v26 }
 0x650   : > { %v14793_v55 = vcombine.low %v6385_v54, %v6392_v32  ;;  %v7273_v58 = vcombine.low %v7251_v3, %v7258_v60  ;;  %v4788_v4 = vrot.slane %v4772_v26, %v14562_v40  ;;  %v7265_v13 = vrot.slane %v10691_v34, %v14562_v40 }
 0x651   : > { %v4781_v56 = vcombine.high %v4779_v16, %v4779_v16  ;;  %v4795_v7 = vrot.slane %v4779_v16, %v14562_v40  ;;  %v4392_v44 = vadd.f32 %v4332_v47, %v4259_v30  ;;  %v4802_v11 = vrot.slane %v4780_v24, %v14562_v40 }
 0x652   : > { %v4260_v45 = vadd.f32 %v14653_v22, %v14346_v29  ;;  %v14806_v51 = vadd.f32 %v14661_v53, %v14350_v17  ;;  %v4810_v54 = vcombine.high %v4788_v4, %v4788_v4  ;;  %v7281_v0 = vrot.slane %v7273_v58, %v14562_v40 }
 0x653   : > { %v4809_v12 = vrot.slane %v4781_v56, %v14562_v40  ;;  %v4811_v6 = vcombine.high %v4795_v7, %v4795_v7  ;;  %v4812_v31 = vcombine.high %v4802_v11, %v4802_v11  ;;  %v7272_v32 = vrot.slane %v4788_v4, %v14562_v40  ;;  %v14817_v4 = vpop.f32.mrb[110].mxu1 }
 0x654   : > { %v4814_v3 = vcombine.high %v4392_v44, %v4392_v44  ;;  %v4821_v60 = vrot.slane %v4392_v44, %v14562_v40  ;;  %v5497_v34 = vcombine.low %v4802_v11, %v4810_v54  ;;  %16162 = vst [vmem:[#allocation14_spill] sm:$0xff] %v14817_v4  ;;  %v4342_v4 = vpop.permute.xlu0 %4341 }
 0x655   : > { %v5499_v26 = vcombine.low %v4809_v12, %v4811_v6  ;;  %v5946_v16 = vcombine.low %v4795_v7, %v4809_v12  ;;  %v10673_v29 = vcombine.high %v4795_v7, %v4809_v12  ;;  %v5498_v22 = vcombine.low %v4812_v31, %v4795_v7 }
 0x656   : > { %v7274_v30 = vcombine.low %v7265_v13, %v7272_v32  ;;  %v4813_v17 = vcombine.high %v4809_v12, %v4809_v12  ;;  %v4828_v53 = vrot.slane %v4814_v3, %v14562_v40  ;;  %v5506_v47 = vrot.slane %v5497_v34, %v14562_v40  ;;  %v11216_v13 = vpop.f32.mrb[111].mxu1 }
 0x657   : > { %v5520_v24 = vrot.slane %v5499_v26, %v14562_v40  ;;  %v5955_v58 = vrot.slane %v5946_v16, %v14562_v40  ;;  %v5962_v56 = vrot.slane %v10673_v29, %v14562_v40  ;;  %v5513_v44 = vrot.slane %v5498_v22, %v14562_v40 }
 0x658   : > { %v7288_v11 = vrot.slane %v7274_v30, %v14562_v40  ;;  %v4829_v54 = vcombine.high %v4821_v60, %v4821_v60  ;;  %v4830_v7 = vcombine.high %v4828_v53, %v4828_v53  ;;  %v4837_v6 = vrot.slane %v4821_v60, %v14562_v40 }
 0x659   : > { %v5977_v12 = vcombine.low %v5955_v58, %v5962_v56  ;;  %v4844_v31 = vrot.slane %v4828_v53, %v14562_v40  ;;  %v5527_v32 = vrot.slane %v4813_v17, %v14562_v40  ;;  %v14826_v34 = vcombine.low %v5506_v47, %v5513_v44 }
 0x65a   : > { %v14828_v26 = vcombine.low %v7281_v0, %v7288_v11  ;;  %v4851_v16 = vrot.slane %v4829_v54, %v14562_v40  ;;  %v4858_v29 = vrot.slane %v4830_v7, %v14562_v40  ;;  %v4859_v22 = vcombine.high %v4837_v6, %v4837_v6 }
 0x65b   : > { %v14832_v30 = vcombine.low %v5520_v24, %v5527_v32  ;;  %v4393_v60 = vadd.f32 %v14766_v36, %v4260_v45  ;;  %v5985_v53 = vrot.slane %v5977_v12, %v14562_v40  ;;  %v6394_v13 = vcombine.low %v4813_v17, %v4837_v6 }
 0x65c   : > { %v4861_v58 = vcombine.high %v4851_v16, %v4851_v16  ;;  %v5948_v56 = vcombine.low %v4837_v6, %v4851_v16  ;;  %v4860_v44 = vcombine.high %v4844_v31, %v4844_v31  ;;  %v5976_v0 = vrot.slane %v4859_v22, %v14562_v40 }
 0x65d   : > { %v6395_v11 = vcombine.low %v4851_v16, %v4859_v22  ;;  %v6403_v24 = vrot.slane %v6394_v13, %v14562_v40  ;;  %v10684_v32 = vcombine.high %v4837_v6, %v4851_v16  ;;  %v5543_v36 = vrot.slane %v14832_v30, %v14562_v40 }
 0x65e   : > { %v5969_v54 = vrot.slane %v5948_v56, %v14562_v40  ;;  %v6396_v7 = vcombine.low %v4861_v58, %v4844_v31  ;;  %v6843_v12 = vcombine.low %v4844_v31, %v4858_v29  ;;  %v10685_v17 = vcombine.high %v4844_v31, %v4858_v29 }
 0x65f   : > { %v6410_v45 = vrot.slane %v6395_v11, %v14562_v40  ;;  %v6424_v47 = vrot.slane %v4858_v29, %v14562_v40  ;;  %v6851_v22 = vrot.slane %v10684_v32, %v14562_v40  ;;  %v7290_v56 = vcombine.low %v4858_v29, %v4860_v44 }
 0x660   : > { %v5978_v3 = vcombine.low %v5969_v54, %v5976_v0  ;;  %v6417_v52 = vrot.slane %v6396_v7, %v14562_v40  ;;  %v6858_v58 = vrot.slane %v6843_v12, %v14562_v40  ;;  %v4863_v13 = vcombine.high %v4393_v60, %v4393_v60 }
 0x661   : > { %v6425_v28 = vcombine.low %v6403_v24, %v6410_v45  ;;  %v4862_v30 = vcombine.high %v4858_v29, %v4858_v29  ;;  %v4870_v11 = vrot.slane %v4393_v60, %v14562_v40  ;;  %v6865_v7 = vrot.slane %v10685_v17, %v14562_v40 }
 0x662   : > { %v5992_v6 = vrot.slane %v5978_v3, %v14562_v40  ;;  %v6426_v16 = vcombine.low %v6417_v52, %v6424_v47  ;;  %v6873_v0 = vcombine.low %v6851_v22, %v6858_v58  ;;  %v4877_v54 = vrot.slane %v4863_v13, %v14562_v40 }
 0x663   : > { %v6433_v31 = vrot.slane %v6425_v28, %v14562_v40  ;;  %v4878_v44 = vcombine.high %v4870_v11, %v4870_v11  ;;  %v4886_v45 = vrot.slane %v4870_v11, %v14562_v40  ;;  %v7299_v29 = vrot.slane %v7290_v56, %v14562_v40 }
 0x664   : > { %v14853_v32 = vcombine.low %v5985_v53, %v5992_v6  ;;  %v6440_v24 = vrot.slane %v6426_v16, %v14562_v40  ;;  %v4879_v3 = vcombine.high %v4877_v54, %v4877_v54  ;;  %v4893_v52 = vrot.slane %v4877_v54, %v14562_v40 }
 0x665   : > { %v4394_v28 = vadd.f32 %v4342_v4, %v14806_v51  ;;  %v4900_v47 = vrot.slane %v4878_v44, %v14562_v40  ;;  %v4908_v12 = vcombine.high %v4886_v45, %v4886_v45  ;;  %v6872_v53 = vrot.slane %v4886_v45, %v14562_v40 }
 0x666   : > { %v14860_v60 = vcombine.low %v6433_v31, %v6440_v24  ;;  %v4907_v17 = vrot.slane %v4879_v3, %v14562_v40  ;;  %v7291_v22 = vcombine.low %v4862_v30, %v4886_v45  ;;  %v6881_v11 = vrot.slane %v6873_v0, %v14562_v40 }
 0x667   : > { %v4912_v58 = vcombine.high %v4394_v28, %v4394_v28  ;;  %v4919_v13 = vrot.slane %v4394_v28, %v14562_v40  ;;  %v4910_v6 = vcombine.high %v4900_v47, %v4900_v47  ;;  %v6874_v16 = vcombine.low %v6865_v7, %v6872_v53 }
 0x668   : > { %v7292_v56 = vcombine.low %v4900_v47, %v4908_v12  ;;  %v4911_v54 = vcombine.high %v4907_v17, %v4907_v17  ;;  %v5545_v51 = vcombine.low %v4893_v52, %v4907_v17  ;;  %v10668_v4 = vcombine.high %v4893_v52, %v4907_v17 }
 0x669   : > { %v7306_v31 = vrot.slane %v7291_v22, %v14562_v40  ;;  %v6888_v24 = vrot.slane %v6874_v16, %v14562_v40  ;;  %v7320_v3 = vrot.slane %v4910_v6, %v14562_v40  ;;  %v4926_v30 = vrot.slane %v4912_v58, %v14562_v40 }
 0x66a   : > { %v7313_v44 = vrot.slane %v7292_v56, %v14562_v40  ;;  %v5554_v45 = vrot.slane %v5545_v51, %v14562_v40  ;;  %v5561_v7 = vrot.slane %v10668_v4, %v14562_v40  ;;  %v4927_v0 = vcombine.high %v4919_v13, %v4919_v13 }
 0x66b   : > { %v14874_v28 = vcombine.low %v7299_v29, %v7306_v31  ;;  %v14876_v47 = vcombine.low %v6881_v11, %v6888_v24  ;;  %v4928_v12 = vcombine.high %v4926_v30, %v4926_v30  ;;  %v4935_v53 = vrot.slane %v4919_v13, %v14562_v40  ;;  %v14894_v13 = vpop.f32.mrb[112].mxu1 }
 0x66c   : > { %v14878_v52 = vcombine.low %v7313_v44, %v7320_v3  ;;  %v16163_v17 = vrot.slane %v14826_v34, %v14562_v40  ;;  %v4942_v58 = vrot.slane %v4926_v30, %v14562_v40  ;;  %v4949_v6 = vrot.slane %v4927_v0, %v14562_v40  ;;  %v11219_v44 = vpop.f32.mrb[113].mxu1 }
 0x66d   : > { %v16164_v29 = vrot.slane %v14616_v37, 2  ;;  %v5576_v11 = vcombine.low %v5554_v45, %v5561_v7  ;;  %v14892_v56 = vrot.slane %v4928_v12, %v14562_v40  ;;  %v4957_v51 = vcombine.high %v4935_v53, %v4935_v53 }
 0x66e   : > { %v14884_v22 = vcombine.low %v16163_v17, %v5543_v36  ;;  %v5994_v4 = vcombine.low %v4911_v54, %v4935_v53  ;;  %v4958_v36 = vcombine.high %v4942_v58, %v4942_v58  ;;  %v4959_v31 = vcombine.high %v4949_v6, %v4949_v6 }
 0x66f   : > { %v5750_v16 = vmax.f32 %v14616_v37, %v16164_v29  ;;  %v5547_v24 = vcombine.low %v4935_v53, %v4949_v6  ;;  %v5575_v37 = vrot.slane %v4957_v51, %v14562_v40  ;;  %v5995_v30 = vcombine.low %v4949_v6, %v4957_v51 }
 0x670   : > { %v6003_v45 = vrot.slane %v5994_v4, %v14562_v40  ;;  %v5996_v54 = vcombine.low %v4959_v31, %v4942_v58  ;;  %v10680_v0 = vcombine.high %v4935_v53, %v4949_v6  ;;  %v6443_v12 = vcombine.low %v4942_v58, %v14892_v56 }
 0x671   : > { %v5568_v7 = vrot.slane %v5547_v24, %v14562_v40  ;;  %v5584_v17 = vrot.slane %v5576_v11, %v14562_v40  ;;  %v6010_v29 = vrot.slane %v5995_v30, %v14562_v40  ;;  %v10681_v44 = vcombine.high %v4942_v58, %v14892_v56 }
 0x672   : > { %v14908_v34 = vcombine.low %v14892_v56, %v4958_v36  ;;  %v6017_v51 = vrot.slane %v5996_v54, %v14562_v40  ;;  %v6024_v4 = vrot.slane %v14892_v56, %v14562_v40  ;;  %v6458_v31 = vrot.slane %v6443_v12, %v14562_v40 }
 0x673   : > { %v5577_v3 = vcombine.low %v5568_v7, %v5575_v37  ;;  %v6025_v53 = vcombine.low %v6003_v45, %v6010_v29  ;;  %v6451_v6 = vrot.slane %v10680_v0, %v14562_v40  ;;  %v14916_v11 = vrot.slane %v10681_v44, %v14562_v40 }
 0x674   : > { %v5751_v24 = vrot.slane %v5750_v16, 1  ;;  %v6026_v30 = vcombine.low %v6017_v51, %v6024_v4  ;;  %v6899_v36 = vrot.slane %v14908_v34, %v14562_v40  ;;  %v6194_v37 = vsel %vm5745_vm7, %v14604_v50, -inf }
 0x675   : > { %v5591_v58 = vrot.slane %v5577_v3, %v14562_v40  ;;  %v6473_v7 = vcombine.low %v6451_v6, %v6458_v31  ;;  %v6195_v54 = vrot.slane %v6194_v37, 4  ;;  %v6642_v45 = vsel %vm5745_vm7, %v14618_v43, -inf }
 0x676   : > { %v6737_v0 = vrot.slane %v14608_v49, %v14562_v40  ;;  %v6033_v29 = vrot.slane %v6025_v53, %v14562_v40  ;;  %v6040_v3 = vrot.slane %v6026_v30, %v14562_v40  ;;  %v6643_v44 = vrot.slane %v6642_v45, 4 }
 0x677   : > { %v14927_v12 = vcombine.low %v5584_v17, %v5591_v58  ;;  %v6196_v51 = vmax.f32 %v6194_v37, %v6195_v54  ;;  %v6744_v50 = vrot.slane %v14623_v9, %v14562_v40  ;;  %v16165_v4 = vcombine.low %v14637_v48, %v14667_v21 }
 0x678   : > { %v4262_v49 = vadd.f32 %v14677_v35, %v14354_v62  ;;  %v14939_v17 = vcombine.low %v6033_v29, %v6040_v3  ;;  %v5752_v31 = vmax.f32 %v5750_v16, %v5751_v24  ;;  %v6644_v53 = vmax.f32 %v6642_v45, %v6643_v44 }
 0x679   : > { %v7538_v43 = vsel %vm5745_vm7, %v16165_v4, -inf  ;;  %v6197_v58 = vrot.slane %v6196_v51, 2  ;;  %v6745_v30 = vcombine.low %v6737_v0, %v6744_v50  ;;  %v4263_v9 = vadd.f32 %v14694_v25, %v14358_v41 }
 0x67a   : > { %v7539_v6 = vrot.slane %v7538_v43, 4  ;;  %v4395_v37 = vadd.f32 %v14664_v8, %v4262_v49  ;;  %v14945_v48 = vrot.slane %v6473_v7, %v14562_v40  ;;  %v6645_v21 = vrot.slane %v6644_v53, 2 }
 0x67b   : > { %v14949_v62 = vadd.f32 %v14705_v46, %v14362_v19  ;;  %v6198_v35 = vmax.f32 %v6196_v51, %v6197_v58  ;;  %v7090_v16 = vsel %vm5745_vm7, %v6745_v30, -inf  ;;  %v4960_v41 = vcombine.high %v14892_v56, %v14892_v56 }
 0x67c   : > { %v7540_v54 = vmax.f32 %v7538_v43, %v7539_v6  ;;  %v4961_v24 = vcombine.high %v4395_v37, %v4395_v37  ;;  %v4968_v45 = vrot.slane %v4395_v37, %v14562_v40  ;;  %v6646_v0 = vmax.f32 %v6644_v53, %v6645_v21  ;;  %v14960_v37 = vpop.permute.xlu1 %4361 }
 0x67d   : > { %v7091_v8 = vrot.slane %v7090_v16, 4  ;;  %v6199_v25 = vrot.slane %v6198_v35, 1  ;;  %v4396_v50 = vadd.f32 %v14687_v1, %v4263_v9  ;;  %v14966_v9 = vsel %vm5745_vm7, %v14689_v61, -inf }
 0x67e   : > { %v7541_v29 = vrot.slane %v7540_v54, 2  ;;  %v4975_v7 = vrot.slane %v4961_v24, %v14562_v40  ;;  %v4976_v3 = vcombine.high %v4968_v45, %v4968_v45  ;;  %v4984_v19 = vrot.slane %v4968_v45, %v14562_v40 }
 0x67f   : > { %v6647_v46 = vrot.slane %v6646_v0, 1  ;;  %v7092_v44 = vmax.f32 %v7090_v16, %v7091_v8  ;;  %v6200_v4 = vmax.f32 %v6198_v35, %v6199_v25  ;;  %v5010_v45 = vcombine.high %v4396_v50, %v4396_v50 }
 0x680   : > { %v7542_v51 = vmax.f32 %v7540_v54, %v7541_v29  ;;  %v4977_v43 = vcombine.high %v4975_v7, %v4975_v7  ;;  %v4991_v49 = vrot.slane %v4975_v7, %v14562_v40  ;;  %v4998_v56 = vrot.slane %v4976_v3, %v14562_v40 }
 0x681   : > { %v6648_v53 = vmax.f32 %v6646_v0, %v6647_v46  ;;  %v7093_v6 = vrot.slane %v7092_v44, 2  ;;  %v5006_v30 = vcombine.high %v4984_v19, %v4984_v19  ;;  %v7595_v21 = vsel %vm7594_vm8, %v5752_v31, %v6200_v4 }
 0x682   : > { %v7543_v58 = vrot.slane %v7542_v51, 1  ;;  %v5005_v54 = vrot.slane %v4977_v43, %v14562_v40  ;;  %v5008_v1 = vcombine.high %v4998_v56, %v4998_v56  ;;  %v6472_v24 = vrot.slane %v4984_v19, %v14562_v40 }
 0x683   : > { %v7094_v35 = vmax.f32 %v7092_v44, %v7093_v6  ;;  %v7604_v16 = vsel %vm7603_vm9, %v7595_v21, %v6648_v53  ;;  %v5007_v8 = vcombine.high %v4991_v49, %v4991_v49  ;;  %v6891_v29 = vcombine.low %v4960_v41, %v4984_v19 }
 0x684   : > { %v7544_v0 = vmax.f32 %v7542_v51, %v7543_v58  ;;  %v6892_v25 = vcombine.low %v4998_v56, %v5006_v30  ;;  %v14971_v31 = vcombine.low %v14916_v11, %v6472_v24  ;;  %v7338_v3 = vcombine.low %v4984_v19, %v4998_v56  ;;  %v4357_v58 = vpop.permute.xlu1 %4356 }
 0x685   : > { %v7095_v7 = vrot.slane %v7094_v35, 1  ;;  %v10692_v46 = vcombine.high %v4984_v19, %v4998_v56  ;;  %v6906_v61 = vrot.slane %v6891_v29, %v14562_v40  ;;  %v6920_v4 = vrot.slane %v5008_v1, %v14562_v40 }
 0x686   : > { %v6913_v44 = vrot.slane %v6892_v25, %v14562_v40  ;;  %v7340_v43 = vcombine.low %v4991_v49, %v5005_v54  ;;  %v5009_v6 = vcombine.high %v5005_v54, %v5005_v54  ;;  %v14977_v51 = vrot.slane %v7338_v3, %v14562_v40 }
 0x687   : > { %v7096_v53 = vmax.f32 %v7094_v35, %v7095_v7  ;;  %v14980_v41 = vrot.slane %v10692_v46, %v14562_v40  ;;  %v14985_v11 = vcombine.low %v6899_v36, %v6906_v61  ;;  %v14991_v56 = vrot.slane %v5007_v8, %v14562_v40 }
 0x688   : > { %v14988_v19 = vrot.slane %v7340_v43, %v14562_v40  ;;  %v5017_v49 = vrot.slane %v4396_v50, %v14562_v40  ;;  %v5024_v54 = vrot.slane %v5010_v45, %v14562_v40  ;;  %v4397_v1 = vadd.f32 %v4357_v58, %v14949_v62 }
 0x689   : > { %16166 = vst [vmem:[#allocation15_spill] sm:$0xff] %v14980_v41  ;;  %v7613_v30 = vsel %vm7612_vm10, %v7604_v16, %v7096_v53  ;;  %v15002_v36 = vcombine.low %v6913_v44, %v6920_v4 }
 0x68a   : > { %v15000_v34 = vsel %vm7621_vm11, %v7613_v30, %v7544_v0  ;;  %v5025_v35 = vcombine.high %v5017_v49, %v5017_v49  ;;  %v5033_v24 = vrot.slane %v5017_v49, %v14562_v40  ;;  %v5026_v45 = vcombine.high %v5024_v54, %v5024_v54 }
 0x68b   : > { %v7681_v50 = vsel %vm7680_vm12, %v15000_v34, -inf  ;;  %v7631_v16 = vsel %vm7630_vm13, %v15000_v34, -inf  ;;  %v7370_v62 = vcombine.low %v14988_v19, %v14991_v56  ;;  %v7656_v0 = vsel %vm7655_vm0, %v15000_v34, -inf }
 0x68c   : > { %7682 = vmax.xlane.f32.xlu0 %v7681_v50  ;;  %7632 = vmax.xlane.f32.xlu1 %v7631_v16  ;;  %v5040_v29 = vrot.slane %v5024_v54, %v14562_v40  ;;  %v5047_v25 = vrot.slane %v5025_v35, %v14562_v40  ;;  %v5054_v7 = vrot.slane %v5026_v45, %v14562_v40  ;;  %v7706_v49 = vsel %vm7705_vm1, %v15000_v34, -inf }
 0x68d   : > { %v5055_v3 = vcombine.high %v5033_v24, %v5033_v24  ;;  %v5593_v46 = vcombine.low %v5009_v6, %v5033_v24  ;;  %v5059_v61 = vcombine.high %v4397_v1, %v4397_v1  ;;  %v5066_v53 = vrot.slane %v4397_v1, %v14562_v40 }
 0x68e   : > { %v5056_v44 = vcombine.high %v5040_v29, %v5040_v29  ;;  %v5057_v4 = vcombine.high %v5047_v25, %v5047_v25  ;;  %v10674_v43 = vcombine.high %v5033_v24, %v5047_v25  ;;  %v6043_v56 = vcombine.low %v5040_v29, %v5054_v7 }
 0x68f   : > { %v5594_v58 = vcombine.low %v5047_v25, %v5055_v3  ;;  %v5602_v19 = vrot.slane %v5593_v46, %v14562_v40  ;;  %v5623_v54 = vrot.slane %v5054_v7, %v14562_v40  ;;  %v10675_v35 = vcombine.high %v5040_v29, %v5054_v7 }
 0x690   : > { %7657 = vmax.xlane.f32.xlu1 %v7656_v0  ;;  %v5595_v30 = vcombine.low %v5057_v4, %v5040_v29  ;;  %v6490_v50 = vcombine.low %v5054_v7, %v5056_v44  ;;  %v6051_v16 = vrot.slane %v10674_v43, %v14562_v40  ;;  %v6058_v24 = vrot.slane %v6043_v56, %v14562_v40 }
 0x691   : > { %v5609_v6 = vrot.slane %v5594_v58, %v14562_v40  ;;  %v5073_v1 = vrot.slane %v5059_v61, %v14562_v40  ;;  %v6065_v25 = vrot.slane %v10675_v35, %v14562_v40  ;;  %v5058_v3 = vcombine.high %v5054_v7, %v5054_v7 }
 0x692   : > { %v5616_v45 = vrot.slane %v5595_v30, %v14562_v40  ;;  %v5074_v46 = vcombine.high %v5066_v53, %v5066_v53  ;;  %v6499_v4 = vrot.slane %v6490_v50, %v14562_v40  ;;  %v5082_v29 = vrot.slane %v5066_v53, %v14562_v40 }
 0x693   : > { %v5624_v0 = vcombine.low %v5602_v19, %v5609_v6  ;;  %v5075_v8 = vcombine.high %v5073_v1, %v5073_v1  ;;  %v6073_v58 = vcombine.low %v6051_v16, %v6058_v24  ;;  %v5089_v43 = vrot.slane %v5073_v1, %v14562_v40 }
 0x694   : > { %v5625_v44 = vcombine.low %v5616_v45, %v5623_v54  ;;  %7707 = vmax.xlane.f32.xlu1 %v7706_v49  ;;  %v5096_v56 = vrot.slane %v5074_v46, %v14562_v40  ;;  %v5104_v7 = vcombine.high %v5082_v29, %v5082_v29  ;;  %v5754_v19 = vrot.slane %v14966_v9, 4 }
 0x695   : > { %v5632_v61 = vrot.slane %v5624_v0, %v14562_v40  ;;  %v15035_v30 = vrot.slane %v5075_v8, %v14562_v40  ;;  %v5105_v50 = vcombine.high %v5089_v43, %v5089_v43  ;;  %v6072_v53 = vrot.slane %v5082_v29, %v14562_v40 }
 0x696   : > { %v5639_v35 = vrot.slane %v5625_v44, %v14562_v40  ;;  %v5106_v6 = vcombine.high %v5096_v56, %v5096_v56  ;;  %v6491_v54 = vcombine.low %v5058_v3, %v5082_v29  ;;  %v6492_v49 = vcombine.low %v5096_v56, %v5104_v7 }
 0x697   : > { %v6938_v16 = vcombine.low %v5082_v29, %v5096_v56  ;;  %v10686_v24 = vcombine.high %v5082_v29, %v5096_v56  ;;  %v15040_v45 = vcombine.low %v6065_v25, %v6072_v53  ;;  %v6940_v8 = vcombine.low %v5089_v43, %v15035_v30 }
 0x698   : > { %v5640_v1 = vcombine.low %v5632_v61, %v5639_v35  ;;  %v6520_v46 = vrot.slane %v5106_v6, %v14562_v40  ;;  %v6506_v0 = vrot.slane %v6491_v54, %v14562_v40  ;;  %v6513_v21 = vrot.slane %v6492_v49, %v14562_v40 }
 0x699   : > { %v15047_v44 = vrot.slane %v6938_v16, %v14562_v40  ;;  %v15050_v41 = vrot.slane %v10686_v24, %v14562_v40  ;;  %v15053_v3 = vrot.slane %v7370_v62, %v14562_v40  ;;  %v15059_v29 = vrot.slane %v6073_v58, %v14562_v40 }
 0x69a   : > { %v15056_v25 = vsel %vm5745_vm7, %v5640_v1, -inf  ;;  %v6961_v56 = vrot.slane %v6940_v8, %v14562_v40  ;;  %v15065_v35 = vcombine.low %v6499_v4, %v6506_v0  ;;  %v6968_v53 = vrot.slane %v5105_v50, %v14562_v40 }
 0x69b   : > { %v15068_v54 = vcombine.low %v6513_v21, %v6520_v46  ;;  %v7386_v62 = vcombine.low %v5106_v6, %v5089_v43  ;;  %v7387_v49 = vcombine.low %v15035_v30, %v5105_v50  ;;  %v5755_v16 = vmax.f32 %v14966_v9, %v5754_v19 }
 0x69c   : > { %v6201_v24 = vsel %vm5745_vm7, %v14696_v39, -inf  ;;  %v6649_v1 = vsel %vm5745_vm7, %v14729_v23, -inf  ;;  %v7097_v4 = vsel %vm5745_vm7, %v14733_v59, -inf  ;;  %v15080_v8 = vcombine.low %v6961_v56, %v6968_v53 }
 0x69d   : > { %v15083_v21 = vrot.slane %v7386_v62, %v14562_v40  ;;  %v15086_v43 = vrot.slane %v7387_v49, %v14562_v40  ;;  %v5756_v9 = vrot.slane %v5755_v16, 2  ;;  %v6202_v19 = vrot.slane %v6201_v24, 4 }
 0x69e   : > { %v6650_v50 = vrot.slane %v6649_v1, 4  ;;  %v7098_v6 = vrot.slane %v7097_v4, 4  ;;  %v16167_v39 = vrot.slane %v14735_v10, %v14562_v40  ;;  %v4265_v0 = vadd.f32 %v14721_v27, %v14366_v42 }
 0x69f   : > { %v5757_v46 = vmax.f32 %v5755_v16, %v5756_v9  ;;  %v6203_v56 = vmax.f32 %v6201_v24, %v6202_v19  ;;  %v7731_v10 = vsel %vm7730_vm2, %v15000_v34, -inf  ;;  %v5107_v27 = vcombine.high %v15035_v30, %v15035_v30 }
 0x6a0   : > { %v7241_v23 = vcombine.low %v14738_v2, %v16167_v39  ;;  %v6651_v53 = vmax.f32 %v6649_v1, %v6650_v50  ;;  %v7099_v62 = vmax.f32 %v7097_v4, %v7098_v6  ;;  %v4398_v2 = vadd.f32 %v14960_v37, %v4265_v0  ;;  %7732 = vmax.xlane.f32.xlu1 %v7731_v10 }
 0x6a1   : > { %v5758_v58 = vrot.slane %v5757_v46, 1  ;;  %v7417_v39 = vcombine.low %v15083_v21, %v15086_v43  ;;  %v6204_v16 = vrot.slane %v6203_v56, 2 }
 0x6a2   : > { %v7545_v49 = vsel %vm5745_vm7, %v7241_v23, -inf  ;;  %v6652_v9 = vrot.slane %v6651_v53, 2  ;;  %v7100_v59 = vrot.slane %v7099_v62, 2  ;;  %v5108_v24 = vcombine.high %v4398_v2, %v4398_v2 }
 0x6a3   : > { %v7546_v7 = vrot.slane %v7545_v49, 4  ;;  %v5115_v1 = vrot.slane %v4398_v2, %v14562_v40  ;;  %v5759_v4 = vmax.f32 %v5757_v46, %v5758_v58  ;;  %v6205_v19 = vmax.f32 %v6203_v56, %v6204_v16 }
 0x6a4   : > { %v6653_v50 = vmax.f32 %v6651_v53, %v6652_v9  ;;  %v7101_v34 = vmax.f32 %v7099_v62, %v7100_v59  ;;  %v5122_v37 = vrot.slane %v5108_v24, %v14562_v40  ;;  %v4367_v62 = vpop.permute.xlu1 %4366 }
 0x6a5   : > { %v7547_v42 = vmax.f32 %v7545_v49, %v7546_v7  ;;  %v5123_v23 = vcombine.high %v5115_v1, %v5115_v1  ;;  %v5131_v21 = vrot.slane %v5115_v1, %v14562_v40  ;;  %v6206_v43 = vrot.slane %v6205_v19, 1 }
 0x6a6   : > { %v6654_v0 = vrot.slane %v6653_v50, 1  ;;  %v7102_v10 = vrot.slane %v7101_v34, 1  ;;  %v4266_v7 = vadd.f32 %v14741_v38, %v14370_v18  ;;  %v5124_v49 = vcombine.high %v5122_v37, %v5122_v37 }
 0x6a7   : > { %v7548_v6 = vrot.slane %v7547_v42, 2  ;;  %v5138_v2 = vrot.slane %v5122_v37, %v14562_v40  ;;  %v5145_v58 = vrot.slane %v5123_v23, %v14562_v40  ;;  %v6207_v46 = vmax.f32 %v6205_v19, %v6206_v43 }
 0x6a8   : > { %v6655_v59 = vmax.f32 %v6653_v50, %v6654_v0  ;;  %v7103_v56 = vmax.f32 %v7101_v34, %v7102_v10  ;;  %v7388_v53 = vcombine.low %v5107_v27, %v5131_v21  ;;  %v5152_v24 = vrot.slane %v5124_v49, %v14562_v40 }
 0x6a9   : > { %v7549_v30 = vmax.f32 %v7547_v42, %v7548_v6  ;;  %v5154_v1 = vcombine.high %v5138_v2, %v5138_v2  ;;  %v7596_v18 = vsel %vm7594_vm8, %v5759_v4, %v6207_v46  ;;  %v10669_v38 = vcombine.high %v5131_v21, %v5145_v58 }
 0x6aa   : > { %v7409_v42 = vrot.slane %v7388_v53, %v14562_v40  ;;  %v4399_v6 = vadd.f32 %v4367_v62, %v4266_v7  ;;  %v7605_v19 = vsel %vm7603_vm9, %v7596_v18, %v6655_v59  ;;  %v5642_v50 = vcombine.low %v5138_v2, %v5152_v24 }
 0x6ab   : > { %v7550_v9 = vrot.slane %v7549_v30, 1  ;;  %v7416_v27 = vrot.slane %v5145_v58, %v14562_v40  ;;  %v7614_v34 = vsel %vm7612_vm10, %v7605_v19, %v7103_v56  ;;  %v10670_v23 = vcombine.high %v5138_v2, %v5152_v24 }
 0x6ac   : > { %v6090_v43 = vcombine.low %v5152_v24, %v5154_v1  ;;  %v7425_v0 = vrot.slane %v7417_v39, %v14562_v40  ;;  %v5657_v4 = vrot.slane %v5642_v50, %v14562_v40  ;;  %v5157_v49 = vcombine.high %v4399_v6, %v4399_v6  ;;  %v4372_v1 = vpop.permute.xlu0 %4371 }
 0x6ad   : > { %v7551_v37 = vmax.f32 %v7549_v30, %v7550_v9  ;;  %v7418_v21 = vcombine.low %v7409_v42, %v7416_v27  ;;  %v5156_v30 = vcombine.high %v5152_v24, %v5152_v24  ;;  %v5650_v46 = vrot.slane %v10669_v38, %v14562_v40 }
 0x6ae   : > { %v5664_v59 = vrot.slane %v10670_v23, %v14562_v40  ;;  %v6099_v58 = vrot.slane %v6090_v43, %v14562_v40  ;;  %v5164_v56 = vrot.slane %v4399_v6, %v14562_v40  ;;  %v5171_v9 = vrot.slane %v5157_v49, %v14562_v40 }
 0x6af   : > { %v7623_v10 = vsel %vm7621_vm11, %v7614_v34, %v7551_v37  ;;  %v7432_v2 = vrot.slane %v7418_v21, %v14562_v40  ;;  %v5672_v53 = vcombine.low %v5650_v46, %v5657_v4  ;;  %v4267_v24 = vadd.f32 %v14751_v5, %v14374_v14 }
 0x6b0   : > { %v7659_v7 = vsel %vm7655_vm0, %v7623_v10, -inf  ;;  %v7634_v39 = vsel %vm7630_vm13, %v7623_v10, -inf  ;;  %v7684_v62 = vsel %vm7680_vm12, %v7623_v10, -inf  ;;  %v5172_v38 = vcombine.high %v5164_v56, %v5164_v56 }
 0x6b1   : > { %7660 = vmax.xlane.f32.xlu0 %v7659_v7  ;;  %7635 = vmax.xlane.f32.xlu1 %v7634_v39  ;;  %v15133_v18 = vcombine.low %v7425_v0, %v7432_v2  ;;  %v5180_v42 = vrot.slane %v5164_v56, %v14562_v40  ;;  %v7734_v37 = vsel %vm7730_vm2, %v7623_v10, -inf  ;;  %v5173_v19 = vcombine.high %v5171_v9, %v5171_v9 }
 0x6b2   : > { %v5187_v6 = vrot.slane %v5171_v9, %v14562_v40  ;;  %v7709_v50 = vsel %vm7705_vm1, %v7623_v10, -inf  ;;  %v4400_v27 = vadd.f32 %v4372_v1, %v4267_v24  ;;  %v5194_v34 = vrot.slane %v5172_v38, %v14562_v40 }
 0x6b3   : > { %v5202_v23 = vcombine.high %v5180_v42, %v5180_v42  ;;  %v5671_v14 = vrot.slane %v5180_v42, %v14562_v40  ;;  %v6091_v5 = vcombine.low %v5156_v30, %v5180_v42  ;;  %v15142_v43 = vrot.slane %v5672_v53, %v14562_v40 }
 0x6b4   : > { %v5201_v0 = vrot.slane %v5173_v19, %v14562_v40  ;;  %v5203_v4 = vcombine.high %v5187_v6, %v5187_v6  ;;  %v16168_v21 = vrot.slane %v14769_v57, 4  ;;  %v5204_v10 = vcombine.high %v5194_v34, %v5194_v34 }
 0x6b5   : > { %7685 = vmax.xlane.f32.xlu0 %v7684_v62  ;;  %7710 = vmax.xlane.f32.xlu1 %v7709_v50  ;;  %v15148_v7 = vcombine.low %v5664_v59, %v5671_v14  ;;  %v6092_v46 = vcombine.low %v5194_v34, %v5202_v23  ;;  %v6106_v2 = vrot.slane %v6091_v5, %v14562_v40 }
 0x6b6   : > { %v5762_v49 = vmax.f32 %v14769_v57, %v16168_v21  ;;  %v6538_v39 = vcombine.low %v5180_v42, %v5194_v34  ;;  %v10682_v56 = vcombine.high %v5180_v42, %v5194_v34  ;;  %v6540_v30 = vcombine.low %v5187_v6, %v5201_v0 }
 0x6b7   : > { %v5206_v62 = vcombine.high %v4400_v27, %v4400_v27  ;;  %v6113_v53 = vrot.slane %v6092_v46, %v14562_v40  ;;  %v6120_v9 = vrot.slane %v5204_v10, %v14562_v40  ;;  %v6121_v24 = vcombine.low %v6099_v58, %v6106_v2 }
 0x6b8   : > { %v5213_v1 = vrot.slane %v4400_v27, %v14562_v40  ;;  %v15155_v57 = vrot.slane %v6538_v39, %v14562_v40  ;;  %v15158_v59 = vrot.slane %v10682_v56, %v14562_v40  ;;  %v6561_v38 = vrot.slane %v6540_v30, %v14562_v40 }
 0x6b9   : > { %7735 = vmax.xlane.f32.xlu0 %v7734_v37  ;;  %v6986_v19 = vcombine.low %v5204_v10, %v5187_v6  ;;  %v6122_v42 = vcombine.low %v6113_v53, %v6120_v9  ;;  %v6129_v50 = vrot.slane %v6121_v24, %v14562_v40  ;;  %v6987_v34 = vcombine.low %v5201_v0, %v5203_v4 }
 0x6ba   : > { %v10693_v23 = vcombine.high %v5187_v6, %v5201_v0  ;;  %v6568_v37 = vrot.slane %v5203_v4, %v14562_v40  ;;  %v5205_v14 = vcombine.high %v5201_v0, %v5201_v0  ;;  %v5220_v46 = vrot.slane %v5206_v62, %v14562_v40 }
 0x6bb   : > { %v6995_v27 = vrot.slane %v6986_v19, %v14562_v40  ;;  %v6136_v5 = vrot.slane %v6122_v42, %v14562_v40  ;;  %v7002_v21 = vrot.slane %v6987_v34, %v14562_v40  ;;  %v5221_v10 = vcombine.high %v5213_v1, %v5213_v1 }
 0x6bc   : > { %v15171_v39 = vcombine.low %v6561_v38, %v6568_v37  ;;  %v5229_v6 = vrot.slane %v5213_v1, %v14562_v40  ;;  %v7443_v56 = vrot.slane %v10693_v23, %v14562_v40  ;;  %v5222_v0 = vcombine.high %v5220_v46, %v5220_v46 }
 0x6bd   : > { %v15175_v4 = vcombine.low %v6129_v50, %v6136_v5  ;;  %v7017_v30 = vcombine.low %v6995_v27, %v7002_v21  ;;  %v5236_v53 = vrot.slane %v5220_v46, %v14562_v40  ;;  %v5243_v9 = vrot.slane %v5221_v10, %v14562_v40 }
 0x6be   : > { %v6988_v24 = vcombine.low %v5205_v14, %v5229_v6  ;;  %v5763_v62 = vrot.slane %v5762_v49, 2  ;;  %v6208_v19 = vsel %vm5745_vm7, %v14786_v20, -inf  ;;  %v15182_v38 = vrot.slane %v5222_v0, %v14562_v40 }
 0x6bf   : > { %v5252_v42 = vcombine.high %v5236_v53, %v5236_v53  ;;  %v7025_v1 = vrot.slane %v7017_v30, %v14562_v40  ;;  %v7464_v50 = vrot.slane %v5236_v53, %v14562_v40  ;;  %v7016_v23 = vrot.slane %v5243_v9, %v14562_v40 }
 0x6c0   : > { %v7009_v34 = vrot.slane %v6988_v24, %v14562_v40  ;;  %v7435_v37 = vcombine.low %v5229_v6, %v5243_v9  ;;  %v10694_v27 = vcombine.high %v5229_v6, %v5243_v9  ;;  %v5254_v14 = vcombine.high %v15182_v38, %v15182_v38 }
 0x6c1   : > { %v15191_v5 = vcombine.low %v15182_v38, %v5252_v42  ;;  %v5764_v20 = vmax.f32 %v5762_v49, %v5763_v62  ;;  %v6209_v21 = vrot.slane %v6208_v19, 4  ;;  %v6656_v0 = vsel %vm5745_vm7, %v14793_v55, -inf }
 0x6c2   : > { %v7018_v46 = vcombine.low %v7009_v34, %v7016_v23  ;;  %v7450_v10 = vrot.slane %v7435_v37, %v14562_v40  ;;  %v7457_v30 = vrot.slane %v10694_v27, %v14562_v40  ;;  %v6657_v24 = vrot.slane %v6656_v0, 4 }
 0x6c3   : > { %v5765_v6 = vrot.slane %v5764_v20, 1  ;;  %v6210_v9 = vmax.f32 %v6208_v19, %v6209_v21  ;;  %v16169_v49 = vrot.slane %v14788_v63, %v14562_v40  ;;  %v7552_v55 = vsel %vm5745_vm7, %v14828_v26, -inf }
 0x6c4   : > { %v7032_v58 = vrot.slane %v7018_v46, %v14562_v40  ;;  %v7465_v42 = vcombine.low %v7443_v56, %v7450_v10  ;;  %v7466_v16 = vcombine.low %v7457_v30, %v7464_v50  ;;  %v6658_v37 = vmax.f32 %v6656_v0, %v6657_v24 }
 0x6c5   : > { %v6841_v62 = vcombine.low %v14796_v33, %v16169_v49  ;;  %v5766_v34 = vmax.f32 %v5764_v20, %v5765_v6  ;;  %v6211_v23 = vrot.slane %v6210_v9, 2  ;;  %v7553_v63 = vrot.slane %v7552_v55, 4  ;;  %v16170_v33 = vld [vmem:[#allocation14_spill] sm:$0xff] }
 0x6c6   : > { %v15206_v27 = vcombine.low %v7025_v1, %v7032_v58  ;;  %v7473_v19 = vrot.slane %v7465_v42, %v14562_v40  ;;  %v7480_v21 = vrot.slane %v7466_v16, %v14562_v40  ;;  %v6659_v46 = vrot.slane %v6658_v37, 2  ;;  %v4377_v1 = vpop.permute.xlu1 %4376 }
 0x6c7   : > { %v7104_v56 = vsel %vm5745_vm7, %v6841_v62, -inf  ;;  %v6212_v50 = vmax.f32 %v6210_v9, %v6211_v23  ;;  %v4268_v20 = vadd.f32 %v16170_v33, %v14378_v15  ;;  %v5767_v26 = vsel %vm5745_vm7, %v14884_v22, -inf }
 0x6c8   : > { %v7105_v10 = vrot.slane %v7104_v56, 4  ;;  %v15211_v30 = vcombine.low %v7473_v19, %v7480_v21  ;;  %v6215_v58 = vsel %vm5745_vm7, %v14853_v32, -inf  ;;  %v6660_v16 = vmax.f32 %v6658_v37, %v6659_v46 }
 0x6c9   : > { %v6213_v0 = vrot.slane %v6212_v50, 1  ;;  %v7554_v24 = vmax.f32 %v7552_v55, %v7553_v63  ;;  %v4401_v9 = vadd.f32 %v4377_v1, %v4268_v20  ;;  %v5768_v42 = vrot.slane %v5767_v26, 4 }
 0x6ca   : > { %v7106_v6 = vmax.f32 %v7104_v56, %v7105_v10  ;;  %v6216_v49 = vrot.slane %v6215_v58, 4  ;;  %v15221_v62 = vsel %vm5745_vm7, %v14860_v60, -inf  ;;  %v6661_v15 = vrot.slane %v6660_v16, 1 }
 0x6cb   : > { %v6214_v23 = vmax.f32 %v6212_v50, %v6213_v0  ;;  %v7555_v21 = vrot.slane %v7554_v24, 2  ;;  %v5255_v22 = vcombine.high %v4401_v9, %v4401_v9  ;;  %v5262_v33 = vrot.slane %v4401_v9, %v14562_v40 }
 0x6cc   : > { %v7107_v19 = vrot.slane %v7106_v6, 2  ;;  %v5769_v32 = vmax.f32 %v5767_v26, %v5768_v42  ;;  %v6217_v61 = vmax.f32 %v6215_v58, %v6216_v49  ;;  %v6662_v2 = vmax.f32 %v6660_v16, %v6661_v15 }
 0x6cd   : > { %v7556_v56 = vmax.f32 %v7554_v24, %v7555_v21  ;;  %v7597_v55 = vsel %vm7594_vm8, %v5766_v34, %v6214_v23  ;;  %v5269_v46 = vrot.slane %v5255_v22, %v14562_v40  ;;  %v5270_v10 = vcombine.high %v5262_v33, %v5262_v33 }
 0x6ce   : > { %v7108_v37 = vmax.f32 %v7106_v6, %v7107_v19  ;;  %v5278_v60 = vrot.slane %v5262_v33, %v14562_v40  ;;  %v5770_v63 = vrot.slane %v5769_v32, 2  ;;  %v7606_v1 = vsel %vm7603_vm9, %v7597_v55, %v6662_v2 }
 0x6cf   : > { %v7557_v20 = vrot.slane %v7556_v56, 1  ;;  %v6218_v0 = vrot.slane %v6217_v61, 2  ;;  %v5271_v53 = vcombine.high %v5269_v46, %v5269_v46  ;;  %v5285_v26 = vrot.slane %v5269_v46, %v14562_v40 }
 0x6d0   : > { %v7109_v50 = vrot.slane %v7108_v37, 1  ;;  %v5292_v58 = vrot.slane %v5270_v10, %v14562_v40  ;;  %v5300_v16 = vcombine.high %v5278_v60, %v5278_v60  ;;  %v5690_v34 = vcombine.low %v5254_v14, %v5278_v60 }
 0x6d1   : > { %v7558_v24 = vmax.f32 %v7556_v56, %v7557_v20  ;;  %v5771_v9 = vmax.f32 %v5769_v32, %v5770_v63  ;;  %v15234_v42 = vrot.slane %v5271_v53, %v14562_v40  ;;  %v5301_v49 = vcombine.high %v5285_v26, %v5285_v26 }
 0x6d2   : > { %v7110_v6 = vmax.f32 %v7108_v37, %v7109_v50  ;;  %v5302_v23 = vcombine.high %v5292_v58, %v5292_v58  ;;  %v5691_v2 = vcombine.low %v5292_v58, %v5300_v16  ;;  %v5705_v19 = vrot.slane %v5690_v34, %v14562_v40 }
 0x6d3   : > { %v6138_v21 = vcombine.low %v5278_v60, %v5292_v58  ;;  %v10676_v22 = vcombine.high %v5278_v60, %v5292_v58  ;;  %v6140_v14 = vcombine.low %v5285_v26, %v15234_v42  ;;  %v16171_v56 = vrot.slane %v15191_v5, %v14562_v40 }
 0x6d4   : > { %v7615_v15 = vsel %vm7612_vm10, %v7606_v1, %v7110_v6  ;;  %v5712_v37 = vrot.slane %v5691_v2, %v14562_v40  ;;  %v5719_v38 = vrot.slane %v5302_v23, %v14562_v40  ;;  %v6168_v1 = vrot.slane %v5301_v49, %v14562_v40 }
 0x6d5   : > { %v7624_v33 = vsel %vm7621_vm11, %v7615_v15, %v7558_v24  ;;  %v5720_v55 = vcombine.low %v16171_v56, %v5705_v19  ;;  %v6147_v46 = vrot.slane %v6138_v21, %v14562_v40  ;;  %v6154_v60 = vrot.slane %v10676_v22, %v14562_v40 }
 0x6d6   : > { %v7637_v53 = vsel %vm7630_vm13, %v7624_v33, -inf  ;;  %v7687_v32 = vsel %vm7680_vm12, %v7624_v33, -inf  ;;  %v5721_v10 = vcombine.low %v5712_v37, %v5719_v38  ;;  %v6161_v63 = vrot.slane %v6140_v14, %v14562_v40 }
 0x6d7   : > { %7638 = vmax.xlane.f32.xlu0 %v7637_v53  ;;  %7688 = vmax.xlane.f32.xlu1 %v7687_v32  ;;  %v7662_v50 = vsel %vm7655_vm0, %v7624_v33, -inf  ;;  %v5728_v20 = vrot.slane %v5720_v55, %v14562_v40  ;;  %v6586_v58 = vcombine.low %v5302_v23, %v5285_v26  ;;  %v6587_v16 = vcombine.low %v15234_v42, %v5301_v49  ;;  %v16175_v55 = vld [vmem:[#allocation13_spill] sm:$0xff] }
 0x6d8   : > { %v5735_v5 = vrot.slane %v5721_v10, %v14562_v40  ;;  %v6169_v6 = vcombine.low %v6147_v46, %v6154_v60  ;;  %v10687_v24 = vcombine.high %v5285_v26, %v15234_v42  ;;  %v5772_v34 = vrot.slane %v5771_v9, 1  ;;  %v4382_v10 = vpop.permute.xlu0 %4381 }
 0x6d9   : > { %v15256_v2 = vcombine.low %v6161_v63, %v6168_v1  ;;  %v6595_v15 = vrot.slane %v6586_v58, %v14562_v40  ;;  %v6602_v19 = vrot.slane %v6587_v16, %v14562_v40  ;;  %v6219_v21 = vmax.f32 %v6217_v61, %v6218_v0 }
 0x6da   : > { %v16172_v22 = vcombine.low %v15155_v57, %v15158_v59  ;;  %v6584_v49 = vrot.slane %v15171_v39, %v14562_v40  ;;  %v15268_v37 = vcombine.low %v5728_v20, %v5735_v5  ;;  %v15271_v26 = vrot.slane %v6169_v6, %v14562_v40 }
 0x6db   : > { %7663 = vmax.xlane.f32.xlu0 %v7662_v50  ;;  %v6617_v38 = vcombine.low %v6595_v15, %v6602_v19  ;;  %v15274_v14 = vrot.slane %v10687_v24, %v14562_v40  ;;  %v6220_v61 = vrot.slane %v6219_v21, 1  ;;  %v6664_v0 = vrot.slane %v15221_v62, 4 }
 0x6dc   : > { %v15264_v23 = vrot.slane %v16172_v22, %v14562_v40  ;;  %v5773_v53 = vmax.f32 %v5771_v9, %v5772_v34  ;;  %v7111_v57 = vsel %vm5745_vm7, %v14876_v47, -inf  ;;  %v16173_v59 = vrot.slane %v14878_v52, %v14562_v40 }
 0x6dd   : > { %v16174_v32 = vrot.slane %v14874_v28, %v14562_v40  ;;  %v4269_v46 = vadd.f32 %v14894_v13, %v16175_v55  ;;  %v6184_v60 = vrot.slane %v15256_v2, %v14562_v40  ;;  %v6221_v63 = vmax.f32 %v6219_v21, %v6220_v61 }
 0x6de   : > { %v6665_v9 = vmax.f32 %v15221_v62, %v6664_v0  ;;  %v5303_v47 = vcombine.high %v15234_v42, %v15234_v42  ;;  %v7112_v50 = vrot.slane %v7111_v57, 4  ;;  %v7712_v28 = vsel %vm7705_vm1, %v7624_v33, -inf }
 0x6df   : > { %v7337_v56 = vcombine.low %v16174_v32, %v16173_v59  ;;  %v4402_v20 = vadd.f32 %v4382_v10, %v4269_v46  ;;  %v6625_v1 = vrot.slane %v6617_v38, %v14562_v40  ;;  %v7598_v16 = vsel %vm7594_vm8, %v5773_v53, %v6221_v63  ;;  %7713 = vmax.xlane.f32.xlu0 %v7712_v28 }
 0x6e0   : > { %v6666_v58 = vrot.slane %v6665_v9, 2  ;;  %v7113_v5 = vmax.f32 %v7111_v57, %v7112_v50  ;;  %v5774_v42 = vsel %vm5745_vm7, %v14927_v12, -inf  ;;  %v7737_v15 = vsel %vm7730_vm2, %v7624_v33, -inf }
 0x6e1   : > { %v7559_v52 = vsel %vm5745_vm7, %v7337_v56, -inf  ;;  %v5304_v6 = vcombine.high %v4402_v20, %v4402_v20  ;;  %v5311_v62 = vrot.slane %v4402_v20, %v14562_v40  ;;  %v5775_v19 = vrot.slane %v5774_v42, 4 }
 0x6e2   : > { %v7560_v13 = vrot.slane %v7559_v52, 4  ;;  %v6667_v24 = vmax.f32 %v6665_v9, %v6666_v58  ;;  %v7114_v21 = vrot.slane %v7113_v5, 2  ;;  %v6222_v59 = vsel %vm5745_vm7, %v14939_v17, -inf }
 0x6e3   : > { %v5318_v22 = vrot.slane %v5304_v6, %v14562_v40  ;;  %v5319_v38 = vcombine.high %v5311_v62, %v5311_v62  ;;  %v5327_v61 = vrot.slane %v5311_v62, %v14562_v40  ;;  %7738 = vmax.xlane.f32.xlu0 %v7737_v15  ;;  %v5776_v57 = vmax.f32 %v5774_v42, %v5775_v19 }
 0x6e4   : > { %v7561_v34 = vmax.f32 %v7559_v52, %v7560_v13  ;;  %v6668_v0 = vrot.slane %v6667_v24, 1  ;;  %v7115_v32 = vmax.f32 %v7113_v5, %v7114_v21  ;;  %v5795_v39 = vsel %vm5745_vm7, %v15268_v37, -inf }
 0x6e5   : > { %v5320_v12 = vcombine.high %v5318_v22, %v5318_v22  ;;  %v5334_v56 = vrot.slane %v5318_v22, %v14562_v40  ;;  %v5341_v33 = vrot.slane %v5319_v38, %v14562_v40  ;;  %v5349_v10 = vcombine.high %v5327_v61, %v5327_v61 }
 0x6e6   : > { %v7562_v53 = vrot.slane %v7561_v34, 2  ;;  %v6669_v55 = vmax.f32 %v6667_v24, %v6668_v0  ;;  %v6588_v63 = vcombine.low %v5303_v47, %v5327_v61  ;;  %v7116_v9 = vrot.slane %v7115_v32, 1 }
 0x6e7   : > { %v5348_v50 = vrot.slane %v5320_v12, %v14562_v40  ;;  %v5350_v52 = vcombine.high %v5334_v56, %v5334_v56  ;;  %v5351_v20 = vcombine.high %v5341_v33, %v5341_v33  ;;  %v6616_v13 = vrot.slane %v5341_v33, %v14562_v40 }
 0x6e8   : > { %v7563_v46 = vmax.f32 %v7561_v34, %v7562_v53  ;;  %v7607_v58 = vsel %vm7603_vm9, %v7598_v16, %v6669_v55  ;;  %v6609_v17 = vrot.slane %v6588_v63, %v14562_v40  ;;  %v7117_v5 = vmax.f32 %v7115_v32, %v7116_v9 }
 0x6e9   : > { %v5352_v6 = vcombine.high %v5348_v50, %v5348_v50  ;;  %v7035_v62 = vcombine.low %v5327_v61, %v5341_v33  ;;  %v10688_v42 = vcombine.high %v5327_v61, %v5341_v33  ;;  %v7064_v47 = vrot.slane %v5334_v56, %v14562_v40 }
 0x6ea   : > { %v7564_v28 = vrot.slane %v7563_v46, 1  ;;  %v6618_v34 = vcombine.low %v6609_v17, %v6616_v13  ;;  %v7482_v15 = vcombine.low %v5341_v33, %v5349_v10  ;;  %v7616_v19 = vsel %vm7612_vm10, %v7607_v58, %v7117_v5 }
 0x6eb   : > { %v7050_v21 = vrot.slane %v7035_v62, %v14562_v40  ;;  %v7057_v22 = vrot.slane %v10688_v42, %v14562_v40  ;;  %v7483_v16 = vcombine.low %v5351_v20, %v5334_v56  ;;  %v7484_v53 = vcombine.low %v5348_v50, %v5350_v52 }
 0x6ec   : > { %v7565_v24 = vmax.f32 %v7563_v46, %v7564_v28  ;;  %v6632_v0 = vrot.slane %v6618_v34, %v14562_v40  ;;  %v6223_v32 = vrot.slane %v6222_v59, 4  ;;  %v7491_v10 = vrot.slane %v7482_v15, %v14562_v40 }
 0x6ed   : > { %v7065_v12 = vcombine.low %v15274_v14, %v7050_v21  ;;  %v7066_v55 = vcombine.low %v7057_v22, %v7064_v47  ;;  %v7498_v33 = vrot.slane %v7483_v16, %v14562_v40  ;;  %v7505_v56 = vrot.slane %v7484_v53, %v14562_v40 }
 0x6ee   : > { %v7625_v38 = vsel %vm7621_vm11, %v7616_v19, %v7565_v24  ;;  %v15319_v46 = vcombine.low %v6625_v1, %v6632_v0  ;;  %v7512_v63 = vrot.slane %v5352_v6, %v14562_v40  ;;  %v15328_v9 = vcombine.low %v15271_v26, %v6184_v60 }
 0x6ef   : > { %v7640_v61 = vsel %vm7630_vm13, %v7625_v38, -inf  ;;  %v7073_v14 = vrot.slane %v7065_v12, %v14562_v40  ;;  %v7080_v50 = vrot.slane %v7066_v55, %v14562_v40  ;;  %v7665_v52 = vsel %vm7655_vm0, %v7625_v38, -inf }
 0x6f0   : > { %7641 = vmax.xlane.f32.xlu1 %v7640_v61  ;;  %v15333_v1 = vcombine.low %v7491_v10, %v7498_v33  ;;  %v15335_v20 = vcombine.low %v7505_v56, %v7512_v63  ;;  %v7690_v28 = vsel %vm7680_vm12, %v7625_v38, -inf  ;;  %v5777_v58 = vrot.slane %v5776_v57, 2 }
 0x6f1   : > { %v15338_v17 = vcombine.low %v7073_v14, %v7080_v50  ;;  %v7715_v2 = vsel %vm7705_vm1, %v7625_v38, -inf  ;;  %v6224_v13 = vmax.f32 %v6222_v59, %v6223_v32  ;;  %v16176_v26 = vrot.slane %v14971_v31, %v14562_v40  ;;  %v16177_v59 = vld [vmem:[#allocation15_spill] sm:$0xff] }
 0x6f2   : > { %v7740_v5 = vsel %vm7730_vm2, %v7625_v38, -inf  ;;  %v5778_v6 = vmax.f32 %v5776_v57, %v5777_v58  ;;  %v6929_v62 = vrot.slane %v14985_v11, %v14562_v40  ;;  %v6936_v42 = vrot.slane %v15002_v36, %v14562_v40 }
 0x6f3   : > { %v6489_v60 = vcombine.low %v14945_v48, %v16176_v26  ;;  %v6225_v24 = vrot.slane %v6224_v13, 2  ;;  %v16178_v47 = vcombine.low %v14977_v51, %v16177_v59  ;;  %v16179_v48 = vrot.slane %v15056_v25, 4 }
 0x6f4   : > { %7666 = vmax.xlane.f32.xlu1 %v7665_v52  ;;  %v5779_v19 = vrot.slane %v5778_v6, 1  ;;  %v6937_v21 = vcombine.low %v6929_v62, %v6936_v42  ;;  %v16180_v11 = vrot.slane %v15040_v45, %v14562_v40  ;;  %v6529_v51 = vrot.slane %v15065_v35, %v14562_v40 }
 0x6f5   : > { %v6670_v34 = vsel %vm5745_vm7, %v6489_v60, -inf  ;;  %v7377_v31 = vrot.slane %v16178_v47, %v14562_v40  ;;  %v5783_v15 = vmax.f32 %v15056_v25, %v16179_v48  ;;  %v6226_v22 = vmax.f32 %v6224_v13, %v6225_v24 }
 0x6f6   : > { %v6671_v57 = vrot.slane %v6670_v34, 4  ;;  %v6089_v36 = vcombine.low %v15059_v29, %v16180_v11  ;;  %v5780_v0 = vmax.f32 %v5778_v6, %v5779_v19  ;;  %v7118_v25 = vsel %vm5745_vm7, %v6937_v21, -inf }
 0x6f7   : > { %v7385_v16 = vcombine.low %v7377_v31, %v15053_v3  ;;  %v5784_v38 = vrot.slane %v5783_v15, 2  ;;  %v6227_v61 = vrot.slane %v6226_v22, 1  ;;  %v7119_v12 = vrot.slane %v7118_v25, 4 }
 0x6f8   : > { %7691 = vmax.xlane.f32.xlu1 %v7690_v28  ;;  %v6672_v53 = vmax.f32 %v6670_v34, %v6671_v57  ;;  %v6229_v32 = vsel %vm5745_vm7, %v6089_v36, -inf  ;;  %v16181_v3 = vrot.slane %v15068_v54, %v14562_v40  ;;  %v16182_v50 = vcombine.low %v15047_v44, %v15050_v41 }
 0x6f9   : > { %v7566_v45 = vsel %vm5745_vm7, %v7385_v16, -inf  ;;  %v5785_v55 = vmax.f32 %v5783_v15, %v5784_v38  ;;  %v6230_v10 = vrot.slane %v6229_v32, 4  ;;  %v6228_v35 = vmax.f32 %v6226_v22, %v6227_v61 }
 0x6fa   : > { %v6673_v29 = vrot.slane %v6672_v53, 2  ;;  %v7567_v33 = vrot.slane %v7566_v45, 4  ;;  %v6537_v56 = vcombine.low %v6529_v51, %v16181_v3  ;;  %v7120_v63 = vmax.f32 %v7118_v25, %v7119_v12 }
 0x6fb   : > { %v5786_v14 = vrot.slane %v5785_v55, 1  ;;  %v6977_v52 = vrot.slane %v16182_v50, %v14562_v40  ;;  %v6231_v13 = vmax.f32 %v6229_v32, %v6230_v10  ;;  %v7599_v6 = vsel %vm7594_vm8, %v5780_v0, %v6228_v35 }
 0x6fc   : > { %7716 = vmax.xlane.f32.xlu1 %v7715_v2  ;;  %v6674_v28 = vmax.f32 %v6672_v53, %v6673_v29  ;;  %v7568_v58 = vmax.f32 %v7566_v45, %v7567_v33  ;;  %v6677_v26 = vsel %vm5745_vm7, %v6537_v56, -inf  ;;  %v7121_v60 = vrot.slane %v7120_v63, 2 }
 0x6fd   : > { %v5787_v62 = vmax.f32 %v5785_v55, %v5786_v14  ;;  %v6678_v54 = vrot.slane %v6677_v26, 4  ;;  %v6232_v34 = vrot.slane %v6231_v13, 2  ;;  %v16183_v59 = vrot.slane %v15080_v8, %v14562_v40 }
 0x6fe   : > { %v6675_v42 = vrot.slane %v6674_v28, 1  ;;  %v7569_v24 = vrot.slane %v7568_v58, 2  ;;  %v7122_v41 = vmax.f32 %v7120_v63, %v7121_v60  ;;  %v7573_v2 = vsel %vm5745_vm7, %v15133_v18, -inf }
 0x6ff   : > { %v6985_v47 = vcombine.low %v6977_v52, %v16183_v59  ;;  %v6679_v44 = vmax.f32 %v6677_v26, %v6678_v54  ;;  %v16184_v31 = vrot.slane %v15148_v7, %v14562_v40  ;;  %v6233_v57 = vmax.f32 %v6231_v13, %v6232_v34 }
 0x700   : > { %7741 = vmax.xlane.f32.xlu1 %v7740_v5  ;;  %v6676_v15 = vmax.f32 %v6674_v28, %v6675_v42  ;;  %v7570_v19 = vmax.f32 %v7568_v58, %v7569_v24  ;;  %v7123_v11 = vrot.slane %v7122_v41, 1  ;;  %v7574_v22 = vrot.slane %v7573_v2, 4 }
 0x701   : > { %v5688_v48 = vcombine.low %v15142_v43, %v16184_v31  ;;  %v7125_v21 = vsel %vm5745_vm7, %v6985_v47, -inf  ;;  %v6680_v36 = vrot.slane %v6679_v44, 2  ;;  %v6234_v51 = vrot.slane %v6233_v57, 1 }
 0x702   : > { %v7126_v8 = vrot.slane %v7125_v21, 4  ;;  %v7571_v16 = vrot.slane %v7570_v19, 1  ;;  %v7608_v38 = vsel %vm7603_vm9, %v7599_v6, %v6676_v15  ;;  %v7124_v0 = vmax.f32 %v7122_v41, %v7123_v11 }
 0x703   : > { %v5788_v18 = vsel %vm5745_vm7, %v5688_v48, -inf  ;;  %v6681_v7 = vmax.f32 %v6679_v44, %v6680_v36  ;;  %v7575_v43 = vmax.f32 %v7573_v2, %v7574_v22  ;;  %v6235_v25 = vmax.f32 %v6233_v57, %v6234_v51 }
 0x704   : > { %v7127_v53 = vmax.f32 %v7125_v21, %v7126_v8  ;;  %v7572_v5 = vmax.f32 %v7570_v19, %v7571_v16  ;;  %v5789_v32 = vrot.slane %v5788_v18, 4  ;;  %v6236_v61 = vsel %vm5745_vm7, %v15175_v4, -inf }
 0x705   : > { %v7617_v12 = vsel %vm7612_vm10, %v7608_v38, %v7124_v0  ;;  %v6682_v45 = vrot.slane %v6681_v7, 1  ;;  %v7576_v29 = vrot.slane %v7575_v43, 2  ;;  %v7600_v10 = vsel %vm7594_vm8, %v5787_v62, %v6235_v25 }
 0x706   : > { %v7128_v55 = vrot.slane %v7127_v53, 2  ;;  %v7626_v33 = vsel %vm7621_vm11, %v7617_v12, %v7572_v5  ;;  %v5790_v3 = vmax.f32 %v5788_v18, %v5789_v32  ;;  %v6237_v56 = vrot.slane %v6236_v61, 4 }
 0x707   : > { %v7643_v35 = vsel %vm7630_vm13, %v7626_v33, -inf  ;;  %v6683_v63 = vmax.f32 %v6681_v7, %v6682_v45  ;;  %v7577_v50 = vmax.f32 %v7575_v43, %v7576_v29  ;;  %v7521_v52 = vrot.slane %v15333_v1, %v14562_v40 }
 0x708   : > { %v7129_v14 = vmax.f32 %v7127_v53, %v7128_v55  ;;  %v7528_v4 = vrot.slane %v15335_v20, %v14562_v40  ;;  %7644 = vmax.xlane.f32.xlu1 %v7643_v35  ;;  %v7668_v28 = vsel %vm7655_vm0, %v7626_v33, -inf  ;;  %v7693_v58 = vsel %vm7680_vm12, %v7626_v33, -inf }
 0x709   : > { %v7578_v26 = vrot.slane %v7577_v50, 1  ;;  %v7609_v60 = vsel %vm7603_vm9, %v7600_v10, %v6683_v63  ;;  %v5791_v6 = vrot.slane %v5790_v3, 2  ;;  %v6238_v62 = vmax.f32 %v6236_v61, %v6237_v56 }
 0x70a   : > { %v7130_v13 = vrot.slane %v7129_v14, 1  ;;  %v6585_v54 = vcombine.low %v15264_v23, %v6584_v49  ;;  %v7132_v42 = vsel %vm5745_vm7, %v15206_v27, -inf  ;;  %v7580_v24 = vsel %vm5745_vm7, %v15211_v30, -inf }
 0x70b   : > { %v7579_v59 = vmax.f32 %v7577_v50, %v7578_v26  ;;  %v5792_v47 = vmax.f32 %v5790_v3, %v5791_v6  ;;  %v7133_v41 = vrot.slane %v7132_v42, 4  ;;  %v6239_v44 = vrot.slane %v6238_v62, 2 }
 0x70c   : > { %v7131_v34 = vmax.f32 %v7129_v14, %v7130_v13  ;;  %7669 = vmax.xlane.f32.xlu1 %v7668_v28  ;;  %v6684_v2 = vsel %vm5745_vm7, %v6585_v54, -inf  ;;  %v7581_v31 = vrot.slane %v7580_v24, 4  ;;  %v5796_v57 = vrot.slane %v5795_v39, 4 }
 0x70d   : > { %v5793_v49 = vrot.slane %v5792_v47, 1  ;;  %v6685_v48 = vrot.slane %v6684_v2, 4  ;;  %v7134_v27 = vmax.f32 %v7132_v42, %v7133_v41  ;;  %v6240_v30 = vmax.f32 %v6238_v62, %v6239_v44 }
 0x70e   : > { %v7618_v23 = vsel %vm7612_vm10, %v7609_v60, %v7131_v34  ;;  %v7582_v19 = vmax.f32 %v7580_v24, %v7581_v31  ;;  %v7718_v36 = vsel %vm7705_vm1, %v7626_v33, -inf  ;;  %v7743_v37 = vsel %vm7730_vm2, %v7626_v33, -inf }
 0x70f   : > { %v15415_v15 = vsel %vm7621_vm11, %v7618_v23, %v7579_v59  ;;  %v5794_v22 = vmax.f32 %v5792_v47, %v5793_v49  ;;  %v6241_v16 = vrot.slane %v6240_v30, 1  ;;  %v6686_v38 = vmax.f32 %v6684_v2, %v6685_v48 }
 0x710   : > { %v7646_v21 = vsel %vm7630_vm13, %v15415_v15, -inf  ;;  %v7671_v11 = vsel %vm7655_vm0, %v15415_v15, -inf  ;;  %7694 = vmax.xlane.f32.xlu1 %v7693_v58  ;;  %v7696_v8 = vsel %vm7680_vm12, %v15415_v15, -inf  ;;  %v7135_v51 = vrot.slane %v7134_v27, 2 }
 0x711   : > { %7647 = vmax.xlane.f32.xlu0 %v7646_v21  ;;  %v7583_v18 = vrot.slane %v7582_v19, 2  ;;  %v5797_v0 = vmax.f32 %v5795_v39, %v5796_v57  ;;  %v6243_v7 = vsel %vm5745_vm7, %v15328_v9, -inf  ;;  %v6242_v53 = vmax.f32 %v6240_v30, %v6241_v16 }
 0x712   : > { %v6687_v43 = vrot.slane %v6686_v38, 2  ;;  %v6244_v5 = vrot.slane %v6243_v7, 4  ;;  %v6691_v25 = vsel %vm5745_vm7, %v15319_v46, -inf  ;;  %v7136_v32 = vmax.f32 %v7134_v27, %v7135_v51 }
 0x713   : > { %v7584_v61 = vmax.f32 %v7582_v19, %v7583_v18  ;;  %v5798_v12 = vrot.slane %v5797_v0, 2  ;;  %v6692_v45 = vrot.slane %v6691_v25, 4  ;;  %v7601_v29 = vsel %vm7594_vm8, %v5794_v22, %v6242_v53  ;;  %v9036_v53 = vld [vmem:[%s16012_s4 + $0x8] sm:$0xff] }
 0x714   : > { %7719 = vmax.xlane.f32.xlu1 %v7718_v36  ;;  %v6688_v55 = vmax.f32 %v6686_v38, %v6687_v43  ;;  %v6245_v33 = vmax.f32 %v6243_v7, %v6244_v5  ;;  %v7139_v10 = vsel %vm5745_vm7, %v15338_v17, -inf  ;;  %v7137_v9 = vrot.slane %v7136_v32, 1  ;;  %v9037_v43 = vld [vmem:[%s16012_s4 + $0x10] sm:$0xff]  ;;  %v9039_v5 = vld [vmem:[%s16012_s4 + $0x20] sm:$0xff] }
 0x715   : > { %7672 = vmax.xlane.f32.xlu0 %v7671_v11  ;;  %v7585_v3 = vrot.slane %v7584_v61, 1  ;;  %v5799_v56 = vmax.f32 %v5797_v0, %v5798_v12  ;;  %v6693_v35 = vmax.f32 %v6691_v25, %v6692_v45  ;;  %v7140_v46 = vrot.slane %v7139_v10, 4  ;;  %v9728_v25 = vld [vmem:[%s16014_s6 + $0x8] sm:$0xff]  ;;  %v10419_v12 = vld [vmem:[%s16185_s18] sm:$0xff]  ;;  %v9038_v45 = vld [vmem:[%s16012_s4 + $0x18] sm:$0xff] }
 0x716   : > { %v6689_v63 = vrot.slane %v6688_v55, 1  ;;  %v6246_v14 = vrot.slane %v6245_v33, 2  ;;  %v7529_v50 = vcombine.low %v7521_v52, %v7528_v4  ;;  %v7138_v28 = vmax.f32 %v7136_v32, %v7137_v9  ;;  %v9730_v32 = vld [vmem:[%s16014_s6 + $0x18] sm:$0xff] }
 0x717   : > { %v7586_v58 = vmax.f32 %v7584_v61, %v7585_v3  ;;  %v5800_v13 = vrot.slane %v5799_v56, 1  ;;  %v6694_v26 = vrot.slane %v6693_v35, 2  ;;  %v7141_v6 = vmax.f32 %v7139_v10, %v7140_v46  ;;  %v9035_v61 = vld [vmem:[%s16012_s4] sm:$0xff] }
 0x718   : > { %7744 = vmax.xlane.f32.xlu1 %v7743_v37  ;;  %v6690_v17 = vmax.f32 %v6688_v55, %v6689_v63  ;;  %v6247_v60 = vmax.f32 %v6245_v33, %v6246_v14  ;;  %v7587_v62 = vsel %vm5745_vm7, %v7529_v50, -inf  ;;  %v7721_v1 = vsel %vm7705_vm1, %v15415_v15, -inf  ;;  %v10421_v33 = vld [vmem:[%s16185_s18 + $0x10] sm:$0xff]  ;;  %v9727_v10 = vld [vmem:[%s16014_s6] sm:$0xff]  ;;  %v10420_v50 = vld [vmem:[%s16185_s18 + $0x8] sm:$0xff] }
 0x719   : > { %7697 = vmax.xlane.f32.xlu0 %v7696_v8  ;;  %v6695_v54 = vmax.f32 %v6693_v35, %v6694_v26  ;;  %v7588_v42 = vrot.slane %v7587_v62, 4  ;;  %v7142_v34 = vrot.slane %v7141_v6, 2  ;;  %v5801_v41 = vmax.f32 %v5799_v56, %v5800_v13  ;;  %v7683_v55 = vpop.xlane.xlu0 %7682  ;;  %v10423_v3 = vld [vmem:[%s16185_s18 + $0x20] sm:$0xff]  ;;  %v9729_v35 = vld [vmem:[%s16014_s6 + $0x10] sm:$0xff]  ;;  %v10422_v13 = vld [vmem:[%s16185_s18 + $0x18] sm:$0xff] }
 0x71a   : > { %v7610_v24 = vsel %vm7603_vm9, %v7601_v29, %v6690_v17  ;;  %v6248_v20 = vrot.slane %v6247_v60, 1  ;;  %v7746_v48 = vsel %vm7730_vm2, %v15415_v15, -inf  ;;  %v7633_v29 = vpop.xlane.xlu1 %7632  ;;  %v9731_v14 = vld [vmem:[%s16014_s6 + $0x20] sm:$0xff] }
 0x71b   : > { %v7619_v52 = vsel %vm7612_vm10, %v7610_v24, %v7138_v28  ;;  %v6696_v4 = vrot.slane %v6695_v54, 1  ;;  %v7589_v59 = vmax.f32 %v7587_v62, %v7588_v42  ;;  %v7143_v2 = vmax.f32 %v7141_v6, %v7142_v34 }
 0x71c   : > { %v7628_v47 = vsel %vm7621_vm11, %v7619_v52, %v7586_v58  ;;  %v6249_v44 = vmax.f32 %v6247_v60, %v6248_v20 }
 0x71d   : > { %7722 = vmax.xlane.f32.xlu0 %v7721_v1  ;;  %v6697_v31 = vmax.f32 %v6695_v54, %v6696_v4  ;;  %v7590_v39 = vrot.slane %v7589_v59, 2  ;;  %v7144_v23 = vrot.slane %v7143_v2, 1  ;;  %v7649_v11 = vsel %vm7630_vm13, %v7628_v47, -inf }
 0x71e   : > { %v7602_v49 = vsel %vm7594_vm8, %v5801_v41, %v6249_v44  ;;  %v7674_v22 = vsel %vm7655_vm0, %v7628_v47, -inf  ;;  %v7699_v16 = vsel %vm7680_vm12, %v7628_v47, -inf  ;;  %v7724_v51 = vsel %vm7705_vm1, %v7628_v47, -inf  ;;  %v7658_v56 = vpop.xlane.xlu1 %7657 }
 0x71f   : > { %v7591_v27 = vmax.f32 %v7589_v59, %v7590_v39  ;;  %v7611_v30 = vsel %vm7603_vm9, %v7602_v49, %v6697_v31  ;;  %v7145_v19 = vmax.f32 %v7143_v2, %v7144_v23  ;;  %v7749_v18 = vsel %vm7730_vm2, %v7628_v47, -inf }
 0x720   : > { %v7756_v24 = vsel %vm7755_vm3, %v7633_v29, %v7658_v56  ;;  %vm8605_vm8 = vcmask 1044480  }
 0x721   : > { %7747 = vmax.xlane.f32.xlu0 %v7746_v48  ;;  %v7592_v57 = vrot.slane %v7591_v27, 1  ;;  %v7620_v21 = vsel %vm7612_vm10, %v7611_v30, %v7145_v19  ;;  %v7765_v52 = vsel %vm7764_vm4, %v7756_v24, %v7683_v55  ;;  %vm8589_vm10 = vcmask 39936  }
 0x722   : > { %v7708_v46 = vpop.xlane.xlu1 %7707 }
 0x723   : > { %v7593_v36 = vmax.f32 %v7591_v27, %v7592_v57  ;;  %v7774_v59 = vsel %vm7773_vm5, %v7765_v52, %v7708_v46 }
 0x725   : > { %7650 = vmax.xlane.f32.xlu0 %v7649_v11  ;;  %v7629_v37 = vsel %vm7621_vm11, %v7620_v21, %v7593_v36 }
 0x726   : > { %v7652_v8 = vsel %vm7630_vm13, %v7629_v37, -inf  ;;  %v7702_v15 = vsel %vm7680_vm12, %v7629_v37, -inf  ;;  %v7752_v38 = vsel %vm7730_vm2, %v7629_v37, -inf  ;;  %v7677_v0 = vsel %vm7655_vm0, %v7629_v37, -inf }
 0x727   : > { %7653 = vmax.xlane.f32.xlu1 %v7652_v8  ;;  %v7727_v7 = vsel %vm7705_vm1, %v7629_v37, -inf }
 0x729   : > { %7675 = vmax.xlane.f32.xlu0 %v7674_v22 }
 0x72b   : > { %7703 = vmax.xlane.f32.xlu1 %v7702_v15 }
 0x72d   : > { %7700 = vmax.xlane.f32.xlu0 %v7699_v16  ;;  %v7733_v58 = vpop.xlane.xlu1 %7732 }
 0x72e   : > { %v7783_v44 = vsel %vm7782_vm6, %v7774_v59, %v7733_v58 }
 0x72f   : > { %7753 = vmax.xlane.f32.xlu1 %v7752_v38  ;;  %v7806_v49 = vrot.slane %v7783_v44, %v14562_v40  ;;  %v7799_v30 = vcombine.high %v7783_v44, %v7783_v44 }
 0x731   : > { %7725 = vmax.xlane.f32.xlu0 %v7724_v51  ;;  %v7814_v21 = vcombine.high %v7806_v49, %v7806_v49  ;;  %v7813_v8 = vrot.slane %v7799_v30, %v14562_v40 }
 0x733   : > { %v7835_v16 = vrot.slane %v7814_v21, %v14562_v40 }
 0x735   : > { %7750 = vmax.xlane.f32.xlu0 %v7749_v18 }
 0x739   : > { %7678 = vmax.xlane.f32.xlu0 %v7677_v0 }
 0x73d   : > { %7728 = vmax.xlane.f32.xlu0 %v7727_v7  ;;  %v7821_v7 = vrot.slane %v7806_v49, %v14562_v40 }
 0x73e   : > { %v7661_v9 = vpop.xlane.xlu0 %7660  ;;  %v7636_v17 = vpop.xlane.xlu1 %7635 }
 0x73f   : > { %v7757_v62 = vsel %vm7755_vm3, %v7636_v17, %v7661_v9 }
 0x740   : > { %9047 = vperm.xlu1 %12944, %v9036_v53   ;;  %v7828_v53 = vrot.slane %v7813_v8, %v14562_v40 }
 0x742   : > { %v7686_v63 = vpop.xlane.xlu0 %7685  ;;  %v7711_v6 = vpop.xlane.xlu1 %7710 }
 0x743   : > { %v7766_v20 = vsel %vm7764_vm4, %v7757_v62, %v7686_v63 }
 0x744   : > { %9052 = vperm.xlu1 %12944, %v9037_v43   ;;  %v7775_v34 = vsel %vm7773_vm5, %v7766_v20, %v7711_v6 }
 0x746   : > { %v7736_v28 = vpop.xlane.xlu0 %7735 }
 0x747   : > { %v7784_v47 = vsel %vm7782_vm6, %v7775_v34, %v7736_v28 }
 0x748   : > { %9062 = vperm.xlu1 %12944, %v9039_v5   ;;  %v7845_v23 = vrot.slane %v7784_v47, %v14562_v40  ;;  %v7838_v11 = vcombine.high %v7784_v47, %v7784_v47 }
 0x74a   : > { %v7853_v19 = vcombine.high %v7845_v23, %v7845_v23  ;;  %v7860_v57 = vrot.slane %v7845_v23, %v14562_v40  ;;  %v7852_v38 = vrot.slane %v7838_v11, %v14562_v40  ;;  %v16186_v23 = vmov 0.0|0.0  }
 0x74c   : > { %9739 = vperm.xlu1 %12944, %v9728_v25   ;;  %v7874_v22 = vrot.slane %v7853_v19, %v14562_v40  ;;  %v7875_v15 = vcombine.high %v7860_v57, %v7860_v57  ;;  %v7867_v29 = vrot.slane %v7852_v38, %v14562_v40 }
 0x74e   : > { %v7876_v43 = vcombine.high %v7874_v22, %v7874_v22  ;;  %v8119_v5 = vcombine.low %v7874_v22, %v7875_v15 }
 0x750   : > { %9749 = vperm.xlu1 %12944, %v9730_v32   ;;  %v8165_v63 = vcombine.low %v7876_v43, %v7867_v29 }
 0x752   : > { %v8175_v6 = vrot.slane %v8165_v63, %v14562_v40 }
 0x753   : > { %9042 = vperm.xlu0 %12943, %v9035_v61   ;;  %v8116_v61 = vcombine.low %v7821_v7, %v7835_v16 }
 0x754   : > { %10426 = vperm.xlu1 %12944, %v10419_v12   ;;  %v10695_v12 = vcombine.high %v7821_v7, %v7835_v16 }
 0x755   : > { %v8126_v46 = vrot.slane %v8116_v61, %v14562_v40 }
 0x757   : > { %9057 = vperm.xlu0 %12943, %v9038_v45   ;;  %v8118_v45 = vcombine.low %v7828_v53, %v7860_v57 }
 0x758   : > { %10436 = vperm.xlu1 %12944, %v10421_v33  }
 0x759   : > { %v8140_v28 = vrot.slane %v8118_v45, %v14562_v40 }
 0x75b   : > { %9734 = vperm.xlu0 %12943, %v9727_v10  }
 0x75c   : > { %10446 = vperm.xlu1 %12944, %v10423_v3  }
 0x75f   : > { %9744 = vperm.xlu0 %12943, %v9729_v35   ;;  %v8147_v35 = vrot.slane %v8119_v5, %v14562_v40 }
 0x763   : > { %9754 = vperm.xlu0 %12943, %v9731_v14  }
 0x764   : > { %v7639_v26 = vpop.xlane.xlu0 %7638  ;;  %v7689_v42 = vpop.xlane.xlu1 %7688 }
 0x767   : > { %10431 = vperm.xlu0 %12943, %v10420_v50   ;;  %v8133_v50 = vrot.slane %v10695_v12, %v14562_v40 }
 0x768   : > { %v7664_v60 = vpop.xlane.xlu0 %7663 }
 0x769   : > { %v7758_v1 = vsel %vm7755_vm3, %v7639_v26, %v7664_v60  ;;  %v8149_v60 = vcombine.low %v8140_v28, %v8147_v35 }
 0x76a   : > { %v7767_v41 = vsel %vm7764_vm4, %v7758_v1, %v7689_v42 }
 0x76b   : > { %10441 = vperm.xlu0 %12943, %v10422_v13   ;;  %v8163_v52 = vrot.slane %v8149_v60, %v14562_v40 }
 0x76c   : > { %v7714_v54 = vpop.xlane.xlu0 %7713 }
 0x76d   : > { %v7776_v31 = vsel %vm7773_vm5, %v7767_v41, %v7714_v54  ;;  %v8148_v54 = vcombine.low %v8126_v46, %v8133_v50 }
 0x770   : > { %v7739_v4 = vpop.xlane.xlu0 %7738 }
 0x771   : > { %v7785_v39 = vsel %vm7782_vm6, %v7776_v31, %v7739_v4  ;;  %v8156_v4 = vrot.slane %v8148_v54, %v14562_v40 }
 0x772   : > { %v7884_v27 = vrot.slane %v7785_v39, %v14562_v40  ;;  %v7877_v51 = vcombine.high %v7785_v39, %v7785_v39 }
 0x773   : > { %v8164_v41 = vcombine.low %v8156_v4, %v8163_v52 }
 0x774   : > { %v7892_v36 = vcombine.high %v7884_v27, %v7884_v27  ;;  %v7899_v32 = vrot.slane %v7884_v27, %v14562_v40  ;;  %v7891_v33 = vrot.slane %v7877_v51, %v14562_v40 }
 0x776   : > { %v7913_v18 = vrot.slane %v7892_v36, %v14562_v40  ;;  %v7906_v58 = vrot.slane %v7891_v33, %v14562_v40 }
 0x778   : > { %v8166_v10 = vcombine.low %v7899_v32, %v7913_v18  ;;  %v10696_v13 = vcombine.high %v7899_v32, %v7913_v18 }
 0x77a   : > { %v8182_v26 = vrot.slane %v8166_v10, %v14562_v40  ;;  %v8189_v42 = vrot.slane %v10696_v13, %v14562_v40 }
 0x77c   : > { %v8197_v24 = vcombine.low %v8175_v6, %v8182_v26 }
 0x77d   : > { %v7642_v2 = vpop.xlane.xlu1 %7641 }
 0x77e   : > { %v8205_v59 = vrot.slane %v8197_v24, %v14562_v40 }
 0x781   : > { %v7667_v48 = vpop.xlane.xlu1 %7666 }
 0x782   : > { %v7759_v25 = vsel %vm7755_vm3, %v7642_v2, %v7667_v48 }
 0x785   : > { %v7692_v37 = vpop.xlane.xlu1 %7691 }
 0x786   : > { %v7768_v55 = vsel %vm7764_vm4, %v7759_v25, %v7692_v37 }
 0x789   : > { %v7717_v0 = vpop.xlane.xlu1 %7716 }
 0x78a   : > { %v7777_v9 = vsel %vm7773_vm5, %v7768_v55, %v7717_v0 }
 0x78d   : > { %v7742_v3 = vpop.xlane.xlu1 %7741 }
 0x78e   : > { %v7786_v56 = vsel %vm7782_vm6, %v7777_v9, %v7742_v3 }
 0x78f   : > { %v7923_v14 = vrot.slane %v7786_v56, %v14562_v40  ;;  %v7916_v5 = vcombine.high %v7786_v56, %v7786_v56 }
 0x791   : > { %v15543_v17 = vrot.slane %v7923_v14, %v14562_v40  ;;  %v7931_v7 = vcombine.high %v7923_v14, %v7923_v14  ;;  %v7930_v29 = vrot.slane %v7916_v5, %v14562_v40 }
 0x793   : > { %v8168_v62 = vcombine.low %v7906_v58, %v15543_v17  ;;  %v7952_v61 = vrot.slane %v7931_v7, %v14562_v40  ;;  %v7945_v28 = vrot.slane %v7930_v29, %v14562_v40  ;;  %v7953_v58 = vcombine.high %v15543_v17, %v15543_v17 }
 0x795   : > { %v8196_v20 = vrot.slane %v8168_v62, %v14562_v40  ;;  %v7645_v1 = vpop.xlane.xlu1 %7644  ;;  %v7954_v3 = vcombine.high %v7952_v61, %v7952_v61  ;;  %v8214_v4 = vcombine.low %v7952_v61, %v7953_v58 }
 0x797   : > { %v8198_v34 = vcombine.low %v8189_v42, %v8196_v20  ;;  %v8215_v42 = vcombine.low %v7954_v3, %v7945_v28 }
 0x799   : > { %v8212_v47 = vrot.slane %v8198_v34, %v14562_v40  ;;  %v7670_v31 = vpop.xlane.xlu1 %7669 }
 0x79a   : > { %v7760_v21 = vsel %vm7755_vm3, %v7645_v1, %v7670_v31  ;;  %v8231_v31 = vrot.slane %v8215_v42, %v14562_v40 }
 0x79b   : > { %v8213_v44 = vcombine.low %v8205_v59, %v8212_v47 }
 0x79d   : > { %v15553_v39 = vpack.c.bf16 %v8213_v44, %v8164_v41  ;;  %v7695_v48 = vpop.xlane.xlu1 %7694 }
 0x79e   : > { %v7648_v2 = vpop.xlane.xlu0 %7647  ;;  %v7769_v36 = vsel %vm7764_vm4, %v7760_v21, %v7695_v48 }
 0x79f   : > { %12338 = vmatpush3.bf16.msra.mxu1 %v15553_v39 }
 0x7a0   : > { %12339 = vmatprep.subr.bf16.mxu1 %v16186_v23 }
 0x7a1   : > { %v7720_v30 = vpop.xlane.xlu1 %7719 }
 0x7a2   : > { %v7673_v49 = vpop.xlane.xlu0 %7672  ;;  %v7778_v8 = vsel %vm7773_vm5, %v7769_v36, %v7720_v30 }
 0x7a3   : > { %v7761_v37 = vsel %vm7755_vm3, %v7648_v2, %v7673_v49 }
 0x7a5   : > { %v7745_v11 = vpop.xlane.xlu1 %7744 }
 0x7a6   : > { %v7698_v27 = vpop.xlane.xlu0 %7697  ;;  %v7787_v16 = vsel %vm7782_vm6, %v7778_v8, %v7745_v11  ;;  %v8224_v11 = vrot.slane %v8214_v4, %v14562_v40  ;;  %v8112_v4 = vld [vmem:[#allocation6 + $0x8] sm:$0xff] }
 0x7a7   : > { %v7770_v15 = vsel %vm7764_vm4, %v7761_v37, %v7698_v27  ;;  %v7962_v18 = vrot.slane %v7787_v16, %v14562_v40  ;;  %v7955_v53 = vcombine.high %v7787_v16, %v7787_v16 }
 0x7a9   : > { %v7970_v25 = vcombine.high %v7962_v18, %v7962_v18  ;;  %v7969_v12 = vrot.slane %v7955_v53, %v14562_v40  ;;  %v7977_v56 = vrot.slane %v7962_v18, %v14562_v40 }
 0x7aa   : > { %v7723_v19 = vpop.xlane.xlu0 %7722 }
 0x7ab   : > { %v7779_v38 = vsel %vm7773_vm5, %v7770_v15, %v7723_v19  ;;  %v7991_v33 = vrot.slane %v7970_v25, %v14562_v40  ;;  %v7984_v35 = vrot.slane %v7969_v12, %v14562_v40  ;;  %v8246_v15 = vcombine.low %v8224_v11, %v8231_v31  ;;  %v8480_v31 = vld [vmem:[#allocation6 + $0x48] sm:$0xff] }
 0x7ad   : > { %v8216_v26 = vcombine.low %v7977_v56, %v7991_v33  ;;  %v10697_v60 = vcombine.high %v7977_v56, %v7991_v33  ;;  %v8254_v29 = vrot.slane %v8246_v15, %v14562_v40 }
 0x7ae   : > { %v7748_v57 = vpop.xlane.xlu0 %7747 }
 0x7af   : > { %v7788_v51 = vsel %vm7782_vm6, %v7779_v38, %v7748_v57  ;;  %v8238_v17 = vrot.slane %v8216_v26, %v14562_v40  ;;  %v8245_v47 = vrot.slane %v10697_v60, %v14562_v40 }
 0x7b0   : > { %v8001_v43 = vrot.slane %v7788_v51, %v14562_v40  ;;  %v7994_v10 = vcombine.high %v7788_v51, %v7788_v51 }
 0x7b1   : > { %v8247_v36 = vcombine.low %v8238_v17, %v8245_v47  ;;  %v8115_v17 = vld [vmem:[#allocation6 + $0x20] sm:$0xff]  ;;  %v8476_v47 = vld [vmem:[#allocation6 + $0x28] sm:$0xff] }
 0x7b2   : > { %v7651_v22 = vpop.xlane.xlu0 %7650  ;;  %v8009_v45 = vcombine.high %v8001_v43, %v8001_v43  ;;  %v8016_v55 = vrot.slane %v8001_v43, %v14562_v40  ;;  %v8008_v6 = vrot.slane %v7994_v10, %v14562_v40 }
 0x7b4   : > { %v7654_v63 = vpop.xlane.xlu1 %7653  ;;  %v8030_v14 = vrot.slane %v8009_v45, %v14562_v40  ;;  %v8031_v46 = vcombine.high %v8016_v55, %v8016_v55  ;;  %v8263_v24 = vcombine.low %v7984_v35, %v8016_v55  ;;  %v8023_v41 = vrot.slane %v8008_v6, %v14562_v40 }
 0x7b6   : > { %v7676_v0 = vpop.xlane.xlu0 %7675  ;;  %v8032_v34 = vcombine.high %v8030_v14, %v8030_v14  ;;  %v8264_v1 = vcombine.low %v8030_v14, %v8031_v46  ;;  %v8273_v49 = vrot.slane %v8263_v24, %v14562_v40 }
 0x7b7   : > { %v7762_v50 = vsel %vm7755_vm3, %v7651_v22, %v7676_v0 }
 0x7b8   : > { %v7704_v59 = vpop.xlane.xlu1 %7703  ;;  %v8265_v30 = vcombine.low %v8032_v34, %v8023_v41  ;;  %v8280_v19 = vrot.slane %v8264_v1, %v14562_v40  ;;  %v8477_v41 = vld [vmem:[#allocation6 + $0x30] sm:$0xff] }
 0x7ba   : > { %v7701_v32 = vpop.xlane.xlu0 %7700  ;;  %v8287_v18 = vrot.slane %v8265_v30, %v14562_v40  ;;  %v8295_v0 = vcombine.low %v8273_v49, %v8280_v19  ;;  %v16188_v49 = vld [vmem:[#allocation46_spill] sm:$0xff] }
 0x7bb   : > { %v7771_v13 = vsel %vm7764_vm4, %v7762_v50, %v7701_v32  ;;  %v8261_v32 = vrot.slane %v8247_v36, %v14562_v40 }
 0x7bc   : > { %v7754_v16 = vpop.xlane.xlu1 %7753  ;;  %v8303_v33 = vrot.slane %v8295_v0, %v14562_v40 }
 0x7bd   : > { %v8262_v56 = vcombine.low %v8254_v29, %v8261_v32  ;;  %v8812_v29 = vld [vmem:[#allocation6 + $0x70] sm:$0xff] }
 0x7be   : > { %v7726_v9 = vpop.xlane.xlu0 %7725 }
 0x7bf   : > { %v7780_v62 = vsel %vm7773_vm5, %v7771_v13, %v7726_v9 }
 0x7c2   : > { %v7751_v54 = vpop.xlane.xlu0 %7750 }
 0x7c3   : > { %v7789_v20 = vsel %vm7782_vm6, %v7780_v62, %v7751_v54  ;;  %v16187_v54 = vmov 0.0  }
 0x7c4   : > { %v8040_v52 = vrot.slane %v7789_v20, %v14562_v40  ;;  %v8033_v48 = vcombine.high %v7789_v20, %v7789_v20 }
 0x7c6   : > { %v8048_v44 = vcombine.high %v8040_v52, %v8040_v52  ;;  %v7679_v2 = vpop.xlane.xlu0 %7678  ;;  %v8055_v57 = vrot.slane %v8040_v52, %v14562_v40  ;;  %v8047_v38 = vrot.slane %v8033_v48, %v14562_v40  ;;  %v8111_v52 = vld [vmem:[#allocation6] sm:$0xff]  ;;  %v16189_v48 = vld [vmem:[#allocation47_spill] sm:$0xff] }
 0x7c7   : > { %v7763_v27 = vsel %vm7755_vm3, %v7654_v63, %v7679_v2  ;;  %v8479_v2 = vld [vmem:[#allocation6 + $0x40] sm:$0xff]  ;;  %vm8586_vm7 = vcmp.eq.s32.totalorder %v16189_v48, %v16188_v49 }
 0x7c8   : > { %v8069_v21 = vrot.slane %v8048_v44, %v14562_v40  ;;  %v7772_v22 = vsel %vm7764_vm4, %v7763_v27, %v7704_v59  ;;  %v8062_v61 = vrot.slane %v8047_v38, %v14562_v40  ;;  %v8114_v59 = vld [vmem:[#allocation6 + $0x18] sm:$0xff]  ;;  %v15663_v27 = vsel %vm8586_vm7, 1.0, %v16187_v54 }
 0x7c9   : > { %v8478_v44 = vld [vmem:[#allocation6 + $0x38] sm:$0xff] }
 0x7ca   : > { %v8266_v37 = vcombine.low %v8055_v57, %v8069_v21  ;;  %v7729_v8 = vpop.xlane.xlu0 %7728  ;;  %v10698_v9 = vcombine.high %v8055_v57, %v8069_v21 }
 0x7cb   : > { %v7781_v51 = vsel %vm7773_vm5, %v7772_v22, %v7729_v8  ;;  %v8471_v8 = vadd.s32 4294967295, %v16188_v49 }
 0x7cc   : > { %v8294_v7 = vrot.slane %v8266_v37, %v14562_v40  ;;  %v7790_v53 = vsel %vm7782_vm6, %v7781_v51, %v7754_v16  ;;  %v8322_v26 = vrot.slane %v10698_v9, %v14562_v40 }
 0x7cd   : > { %v8072_v43 = vcombine.high %v7790_v53, %v7790_v53  ;;  %v8079_v5 = vrot.slane %v7790_v53, %v14562_v40  ;;  %vm8472_vm9 = vcmp.eq.s32.totalorder %v16189_v48, %v8471_v8 }
 0x7ce   : > { %v8296_v25 = vcombine.low %v8287_v18, %v8294_v7  ;;  %v15671_v38 = vsel %vm8472_vm9, 1.0, %v16187_v54 }
 0x7cf   : > { %v8086_v12 = vrot.slane %v8072_v43, %v14562_v40  ;;  %v8087_v45 = vcombine.high %v8079_v5, %v8079_v5  ;;  %v8094_v55 = vrot.slane %v8079_v5, %v14562_v40 }
 0x7d0   : > { %v8310_v10 = vrot.slane %v8296_v25, %v14562_v40 }
 0x7d1   : > { %v8108_v3 = vrot.slane %v8087_v45, %v14562_v40  ;;  %v8109_v35 = vcombine.high %v8094_v55, %v8094_v55  ;;  %v8313_v63 = vcombine.low %v8062_v61, %v8094_v55  ;;  %v8101_v46 = vrot.slane %v8086_v12, %v14562_v40  ;;  %v8809_v12 = vld [vmem:[#allocation6 + $0x58] sm:$0xff]  ;;  %v8810_v45 = vld [vmem:[#allocation6 + $0x60] sm:$0xff]  ;;  %v8811_v55 = vld [vmem:[#allocation6 + $0x68] sm:$0xff] }
 0x7d2   : > { %v8311_v14 = vcombine.low %v8303_v33, %v8310_v10  ;;  %v8918_v33 = vadd.s32 1, %v16188_v49 }
 0x7d3   : > { %v8110_v50 = vcombine.high %v8108_v3, %v8108_v3  ;;  %v8314_v28 = vcombine.low %v8108_v3, %v8109_v35  ;;  %v8329_v58 = vrot.slane %v8313_v63, %v14562_v40 }
 0x7d4   : > { %v15611_v13 = vpack.c.bf16 %v8311_v14, %v8262_v56  ;;  %vm8919_vm11 = vcmp.eq.s32.totalorder %v16189_v48, %v8918_v33 }
 0x7d5   : > { %v8315_v60 = vcombine.low %v8110_v50, %v8101_v46  ;;  %v8336_v6 = vrot.slane %v8314_v28, %v14562_v40  ;;  %v8344_v42 = vcombine.low %v8322_v26, %v8329_v58  ;;  %v15730_v10 = vsel %vm8919_vm11, 1.0, %v16187_v54 }
 0x7d6   : > { %12341 = vmatpush3.bf16.msra.mxu1 %v15611_v13 }
 0x7d7   : > { %v8343_v62 = vrot.slane %v8315_v60, %v14562_v40  ;;  %11228 = vmatprep.subr.mxu1 %v16187_v54  ;;  %v8352_v20 = vrot.slane %v8344_v42, %v14562_v40 }
 0x7d9   : > { %v8345_v24 = vcombine.low %v8336_v6, %v8343_v62 }
 0x7db   : > { %v8359_v34 = vrot.slane %v8345_v24, %v14562_v40  ;;  %v8113_v40 = vld [vmem:[#allocation6 + $0x10] sm:$0xff] }
 0x7dd   : > { %v15620_v1 = vcombine.low %v8352_v20, %v8359_v34 }
 0x7df   : > { %11229 = vmatpush3.msra.mxu1 %v15620_v1 }
 0x7e0   : > { %11231 = vmatmul.mubr.msk.f32.vlgmr.msra.gmra.mrb[114].mxu1 %vm2592_vm15, %v8111_v52  ;;  %12342 = vmatprep.subr.bf16.mxu1 %v16186_v23 }
 0x7e1   : > { %12344 = vmatpush3.bf16.msra.mxu1 %v15553_v39  ;;  %11233 = vmatprep.mubr.msk.f32.mxu1 %vm13144_vm14, %v16187_v54 }
 0x7e2   : > { %12345 = vmatprep.subr.bf16.mxu1 %v16186_v23 }
 0x7e4   : > { %11234 = vmatmul.mubr.msk.f32.gmra.mrb[116].mxu1 %vm2592_vm15, %v8112_v4 }
 0x7e5   : > { %12347 = vmatpush3.bf16.msra.mxu1 %v15611_v13  ;;  %11236 = vmatprep.mubr.msk.f32.mxu1 %vm13144_vm14, %v16187_v54 }
 0x7e6   : > { %11253 = vmatprep.subr.mxu1 %v16187_v54 }
 0x7e8   : > { %11237 = vmatmul.mubr.msk.f32.gmra.mrb[118].mxu1 %vm2592_vm15, %v8113_v40 }
 0x7e9   : > { %11254 = vmatpush3.msra.mxu1 %v15620_v1  ;;  %11239 = vmatprep.mubr.msk.f32.mxu1 %vm13144_vm14, %v16187_v54 }
 0x7ea   : > { %11270 = vmatprep.subr.mxu1 %v16187_v54 }
 0x7ec   : > { %11240 = vmatmul.mubr.msk.f32.gmra.mrb[120].mxu1 %vm2592_vm15, %v8114_v59 }
 0x7ed   : > { %11242 = vmatprep.mubr.msk.f32.mxu1 %vm13144_vm14, %v16187_v54 }
 0x7f0   : > { %11243 = vmatmul.mubr.msk.f32.gmra.mrb[122].mxu1 %vm2592_vm15, %v8115_v17 }
 0x7f1   : > { %11255 = vmatprep.mubr.msk.f32.mxu1 %vm13144_vm14, %v16187_v54 }
 0x7f4   : > { %11256 = vmatmul.mubr.msk.f32.vlgmr.msra.gmra.mrb[124].mxu1 %vm2592_vm15, %v8476_v47 }
 0x7f5   : > { %11258 = vmatprep.mubr.msk.f32.mxu1 %vm13144_vm14, %v16187_v54  ;;  %11271 = vmatpush3.msk.msra.mxu1 %vm8605_vm8, %v15663_v27 }
 0x7f6   : > { %11287 = vmatprep.subr.mxu1 %v16187_v54 }
 0x7f8   : > { %11259 = vmatmul.mubr.msk.f32.gmra.mrb[126].mxu1 %vm2592_vm15, %v8477_v41 }
 0x7f9   : > { %11261 = vmatprep.mubr.msk.f32.mxu1 %vm13144_vm14, %v16187_v54 }
 0x7fc   : > { %11262 = vmatmul.mubr.msk.f32.gmra.mrb[128].mxu1 %vm2592_vm15, %v8478_v44 }
 0x7fd   : > { %11264 = vmatprep.mubr.msk.f32.mxu1 %vm13144_vm14, %v16187_v54 }
 0x800   : > { %11265 = vmatmul.mubr.msk.f32.gmra.mrb[130].mxu1 %vm2592_vm15, %v8479_v2 }
 0x801   : > { %11267 = vmatprep.mubr.msk.f32.mxu1 %vm13144_vm14, %v16187_v54 }
 0x804   : > { %11268 = vmatmul.mubr.msk.f32.gmra.mrb[132].mxu1 %vm2592_vm15, %v8480_v31 }
 0x805   : > { %11272 = vmatprep.mubr.msk.f32.mxu1 %vm13144_vm14, %v16187_v54 }
 0x8b3   : > { %v8447_v30 = vpop.f32.mrb[114].mxu1 }
 0x8b4   : > { %v11232_v19 = vpop.f32.mrb[115].mxu1 }
 0x8b7   : > { %v8452_v57 = vpop.f32.mrb[116].mxu1 }
 0x8b8   : > { %v11235_v21 = vpop.f32.mrb[117].mxu1 }
 0x8bb   : > { %v8457_v11 = vpop.f32.mrb[118].mxu1 }
 0x8bc   : > { %v11238_v36 = vpop.f32.mrb[119].mxu1 }
 0x8bf   : > { %v8462_v37 = vpop.f32.mrb[120].mxu1 }
 0x8c0   : > { %v11241_v22 = vpop.f32.mrb[121].mxu1 }
 0x8c3   : > { %v8467_v15 = vpop.f32.mrb[122].mxu1 }
 0x8c4   : > { %v11244_v16 = vpop.f32.mrb[123].mxu1 }
 0x8c7   : > { %v8562_v51 = vpop.f32.mrb[124].mxu1 }
 0x8c8   : > { %11273 = vmatmul.mubr.msk.f32.vlgmr.msra.gmra.mrb[134].mxu1 %vm8589_vm10, %v8562_v51  ;;  %v11257_v18 = vpop.f32.mrb[125].mxu1  ;;  %v9048_v51 = vpop.permute.xlu1 %9047 }
 0x8c9   : > { %11275 = vmatprep.mubr.msk.f32.mxu1 %vm13144_vm14, %v16187_v54  ;;  %11288 = vmatpush3.msk.msra.mxu1 %vm8605_vm8, %v15671_v38 }
 0x8ca   : > { %12348 = vmatprep.subr.bf16.mxu1 %v16186_v23 }
 0x8cb   : > { %v8567_v0 = vpop.f32.mrb[126].mxu1 }
 0x8cc   : > { %11276 = vmatmul.mubr.msk.f32.gmra.mrb[136].mxu1 %vm8589_vm10, %v8567_v0  ;;  %v11260_v7 = vpop.f32.mrb[127].mxu1 }
 0x8cd   : > { %11278 = vmatprep.mubr.msk.f32.mxu1 %vm13144_vm14, %v16187_v54 }
 0x8cf   : > { %v8572_v53 = vpop.f32.mrb[128].mxu1 }
 0x8d0   : > { %11279 = vmatmul.mubr.msk.f32.gmra.mrb[138].mxu1 %vm8589_vm10, %v8572_v53  ;;  %v11263_v43 = vpop.f32.mrb[129].mxu1 }
 0x8d1   : > { %11281 = vmatprep.mubr.msk.f32.mxu1 %vm13144_vm14, %v16187_v54 }
 0x8d3   : > { %v8577_v5 = vpop.f32.mrb[130].mxu1 }
 0x8d4   : > { %11282 = vmatmul.mubr.msk.f32.gmra.mrb[140].mxu1 %vm8589_vm10, %v8577_v5  ;;  %v11266_v25 = vpop.f32.mrb[131].mxu1 }
 0x8d5   : > { %11284 = vmatprep.mubr.msk.f32.mxu1 %vm13144_vm14, %v16187_v54 }
 0x8d7   : > { %v8582_v32 = vpop.f32.mrb[132].mxu1 }
 0x8d8   : > { %11285 = vmatmul.mubr.msk.f32.gmra.mrb[142].mxu1 %vm8589_vm10, %v8582_v32  ;;  %v11269_v61 = vpop.f32.mrb[133].mxu1  ;;  %v9053_v32 = vpop.permute.xlu1 %9052 }
 0x8d9   : > { %11289 = vmatprep.mubr.msk.f32.mxu1 %vm13144_vm14, %v16187_v54 }
 0x8dc   : > { %11290 = vmatmul.mubr.msk.f32.vlgmr.msra.gmra.mrb[144].mxu1 %vm8589_vm10, %v8447_v30 }
 0x8dd   : > { %12350 = vmatpush3.bf16.msra.mxu1 %v15553_v39  ;;  %11292 = vmatprep.mubr.msk.f32.mxu1 %vm13144_vm14, %v16187_v54  ;;  %v8808_v39 = vld [vmem:[#allocation6 + $0x50] sm:$0xff] }
 0x8de   : > { %12351 = vmatprep.subr.bf16.mxu1 %v16186_v23 }
 0x8e0   : > { %11293 = vmatmul.mubr.msk.f32.gmra.mrb[146].mxu1 %vm8589_vm10, %v8452_v57 }
 0x8e1   : > { %12353 = vmatpush3.bf16.msra.mxu1 %v15611_v13  ;;  %11295 = vmatprep.mubr.msk.f32.mxu1 %vm13144_vm14, %v16187_v54 }
 0x8e2   : > { %11312 = vmatprep.subr.mxu1 %v16187_v54 }
 0x8e4   : > { %11296 = vmatmul.mubr.msk.f32.gmra.mrb[148].mxu1 %vm8589_vm10, %v8457_v11 }
 0x8e5   : > { %11313 = vmatpush3.msra.mxu1 %v15620_v1  ;;  %11298 = vmatprep.mubr.msk.f32.mxu1 %vm13144_vm14, %v16187_v54 }
 0x8e6   : > { %11329 = vmatprep.subr.mxu1 %v16187_v54 }
 0x8e8   : > { %11299 = vmatmul.mubr.msk.f32.gmra.mrb[150].mxu1 %vm8589_vm10, %v8462_v37  ;;  %v9043_v37 = vpop.permute.xlu0 %9042 }
 0x8e9   : > { %11301 = vmatprep.mubr.msk.f32.mxu1 %vm13144_vm14, %v16187_v54 }
 0x8ec   : > { %11302 = vmatmul.mubr.msk.f32.gmra.mrb[152].mxu1 %vm8589_vm10, %v8467_v15 }
 0x8ed   : > { %11314 = vmatprep.mubr.msk.f32.mxu1 %vm13144_vm14, %v16187_v54 }
 0x8f0   : > { %11315 = vmatmul.mubr.msk.f32.vlgmr.msra.gmra.mrb[154].mxu1 %vm2592_vm15, %v8808_v39 }
 0x8f1   : > { %11317 = vmatprep.mubr.msk.f32.mxu1 %vm13144_vm14, %v16187_v54  ;;  %11330 = vmatpush3.msk.msra.mxu1 %vm8605_vm8, %v15730_v10 }
 0x8f2   : > { %12354 = vmatprep.subr.bf16.mxu1 %v16186_v23 }
 0x8f4   : > { %11318 = vmatmul.mubr.msk.f32.gmra.mrb[156].mxu1 %vm2592_vm15, %v8809_v12 }
 0x8f5   : > { %11320 = vmatprep.mubr.msk.f32.mxu1 %vm13144_vm14, %v16187_v54 }
 0x8f8   : > { %11321 = vmatmul.mubr.msk.f32.gmra.mrb[158].mxu1 %vm2592_vm15, %v8810_v45 }
 0x8f9   : > { %11323 = vmatprep.mubr.msk.f32.mxu1 %vm13144_vm14, %v16187_v54 }
 0x8fc   : > { %11324 = vmatmul.mubr.msk.f32.gmra.mrb[160].mxu1 %vm2592_vm15, %v8811_v55  ;;  %v9058_v55 = vpop.permute.xlu0 %9057 }
 0x8fd   : > { %11326 = vmatprep.mubr.msk.f32.mxu1 %vm13144_vm14, %v16187_v54 }
 0x900   : > { %11327 = vmatmul.mubr.msk.f32.gmra.mrb[162].mxu1 %vm2592_vm15, %v8812_v29 }
 0x901   : > { %11331 = vmatprep.mubr.msk.f32.mxu1 %vm13144_vm14, %v16187_v54 }
 0x99b   : > { %v8675_v9 = vpop.f32.mrb[134].mxu1 }
 0x99c   : > { %v11274_v3 = vpop.f32.mrb[135].mxu1 }
 0x99f   : > { %v8680_v35 = vpop.f32.mrb[136].mxu1 }
 0x9a0   : > { %v11277_v63 = vpop.f32.mrb[137].mxu1 }
 0x9a3   : > { %v8685_v56 = vpop.f32.mrb[138].mxu1 }
 0x9a4   : > { %v11280_v14 = vpop.f32.mrb[139].mxu1 }
 0x9a7   : > { %v8690_v46 = vpop.f32.mrb[140].mxu1 }
 0x9a8   : > { %v11283_v50 = vpop.f32.mrb[141].mxu1 }
 0x9ab   : > { %v8695_v28 = vpop.f32.mrb[142].mxu1 }
 0x9ac   : > { %v11286_v58 = vpop.f32.mrb[143].mxu1 }
 0x9ad   : > { %v9076_v58 = vld [vmem:[#allocation7 + $0x8] sm:$0xff] }
 0x9af   : > { %v8783_v13 = vpop.f32.mrb[144].mxu1 }
 0x9b0   : > { %v8784_v26 = vadd.f32 %v8783_v13, %v8675_v9  ;;  %v11291_v60 = vpop.f32.mrb[145].mxu1  ;;  %v9077_v13 = vld [vmem:[#allocation7 + $0x10] sm:$0xff] }
 0x9b1   : > { %v9079_v60 = vld [vmem:[#allocation7 + $0x20] sm:$0xff] }
 0x9b3   : > { %v8788_v6 = vpop.f32.mrb[146].mxu1 }
 0x9b4   : > { %v8789_v62 = vadd.f32 %v8788_v6, %v8680_v35  ;;  %v11294_v42 = vpop.f32.mrb[147].mxu1  ;;  %v9186_v6 = vld [vmem:[#allocation7 + $0x28] sm:$0xff] }
 0x9b5   : > { %v9188_v42 = vld [vmem:[#allocation7 + $0x38] sm:$0xff] }
 0x9b7   : > { %v8793_v24 = vpop.f32.mrb[148].mxu1 }
 0x9b8   : > { %v8794_v20 = vadd.f32 %v8793_v24, %v8685_v56  ;;  %v11297_v34 = vpop.f32.mrb[149].mxu1  ;;  %v9063_v56 = vpop.permute.xlu1 %9062  ;;  %v9189_v24 = vld [vmem:[#allocation7 + $0x40] sm:$0xff] }
 0x9bb   : > { %v8798_v1 = vpop.f32.mrb[150].mxu1 }
 0x9bc   : > { %v8799_v52 = vadd.f32 %v8798_v1, %v8690_v46  ;;  %v11300_v4 = vpop.f32.mrb[151].mxu1 }
 0x9bf   : > { %v8803_v40 = vpop.f32.mrb[152].mxu1 }
 0x9c0   : > { %v8804_v59 = vadd.f32 %v8803_v40, %v8695_v28  ;;  %v11303_v17 = vpop.f32.mrb[153].mxu1  ;;  %v9075_v28 = vld [vmem:[#allocation7] sm:$0xff] }
 0x9c3   : > { %v8894_v47 = vpop.f32.mrb[154].mxu1 }
 0x9c4   : > { %11332 = vmatmul.mubr.msk.f32.vlgmr.msra.gmra.mrb[164].mxu1 %vm8589_vm10, %v8894_v47  ;;  %v11316_v41 = vpop.f32.mrb[155].mxu1 }
 0x9c5   : > { %11334 = vmatprep.mubr.msk.f32.mxu1 %vm13144_vm14, %v16187_v54 }
 0x9c7   : > { %v8899_v44 = vpop.f32.mrb[156].mxu1 }
 0x9c8   : > { %11335 = vmatmul.mubr.msk.f32.gmra.mrb[166].mxu1 %vm8589_vm10, %v8899_v44  ;;  %v11319_v2 = vpop.f32.mrb[157].mxu1 }
 0x9c9   : > { %11337 = vmatprep.mubr.msk.f32.mxu1 %vm13144_vm14, %v16187_v54 }
 0x9cb   : > { %v8904_v31 = vpop.f32.mrb[158].mxu1 }
 0x9cc   : > { %11338 = vmatmul.mubr.msk.f32.gmra.mrb[168].mxu1 %vm8589_vm10, %v8904_v31  ;;  %v11322_v49 = vpop.f32.mrb[159].mxu1 }
 0x9cd   : > { %11340 = vmatprep.mubr.msk.f32.mxu1 %vm13144_vm14, %v16187_v54 }
 0x9cf   : > { %v8909_v48 = vpop.f32.mrb[160].mxu1 }
 0x9d0   : > { %11341 = vmatmul.mubr.msk.f32.gmra.mrb[170].mxu1 %vm8589_vm10, %v8909_v48  ;;  %v11325_v30 = vpop.f32.mrb[161].mxu1 }
 0x9d1   : > { %11343 = vmatprep.mubr.msk.f32.mxu1 %vm13144_vm14, %v16187_v54 }
 0x9d3   : > { %v8914_v19 = vpop.f32.mrb[162].mxu1 }
 0x9d4   : > { %11344 = vmatmul.mubr.msk.f32.gmra.mrb[172].mxu1 %vm8589_vm10, %v8914_v19  ;;  %v11328_v57 = vpop.f32.mrb[163].mxu1 }
 0x9d5   : > { %11356 = vmatprep.mubr.msk.f32.mxu1 %vm13144_vm14, %v16187_v54 }
 0xa97   : > { %v9006_v21 = vpop.f32.mrb[164].mxu1 }
 0xa98   : > { %v9030_v11 = vadd.f32 %v9006_v21, %v8784_v26  ;;  %v11333_v36 = vpop.f32.mrb[165].mxu1  ;;  %v9078_v26 = vld [vmem:[#allocation7 + $0x18] sm:$0xff] }
 0xa9a   : > { %v9065_v22 = vadd.f32 %v9043_v37, %v9030_v11  ;;  %v9507_v37 = vld [vmem:[#allocation7 + $0x50] sm:$0xff] }
 0xa9b   : > { %v9011_v8 = vpop.f32.mrb[166].mxu1 }
 0xa9c   : > { %v9031_v15 = vadd.f32 %v9011_v8, %v8789_v62  ;;  %v11336_v16 = vpop.f32.mrb[167].mxu1  ;;  %v9070_v7 = vmax.f32 %v9065_v22, 0.0  ;;  %v9187_v62 = vld [vmem:[#allocation7 + $0x30] sm:$0xff]  ;;  %v9508_v8 = vld [vmem:[#allocation7 + $0x58] sm:$0xff]  ;;  %v9509_v22 = vld [vmem:[#allocation7 + $0x60] sm:$0xff] }
 0xa9d   : > { %v9511_v16 = vld [vmem:[#allocation7 + $0x70] sm:$0xff] }
 0xa9e   : > { %v9066_v18 = vadd.f32 %v9048_v51, %v9031_v15  ;;  %v9510_v15 = vld [vmem:[#allocation7 + $0x68] sm:$0xff] }
 0xa9f   : > { %v9016_v0 = vpop.f32.mrb[168].mxu1 }
 0xaa0   : > { %v9071_v53 = vmax.f32 %v9066_v18, 0.0  ;;  %v9032_v43 = vadd.f32 %v9016_v0, %v8794_v20  ;;  %v11339_v5 = vpop.f32.mrb[169].mxu1  ;;  %v9190_v20 = vld [vmem:[#allocation7 + $0x48] sm:$0xff] }
 0xaa2   : > { %v15750_v25 = vpack.c.bf16 %v9071_v53, %v9070_v7  ;;  %v9067_v39 = vadd.f32 %v9053_v32, %v9032_v43 }
 0xaa3   : > { %v9021_v61 = vpop.f32.mrb[170].mxu1 }
 0xaa4   : > { %v9033_v12 = vadd.f32 %v9021_v61, %v8799_v52  ;;  %12356 = vmatpush3.bf16.msra.mxu1 %v15750_v25  ;;  %v11342_v45 = vpop.f32.mrb[171].mxu1  ;;  %v9072_v9 = vmax.f32 %v9067_v39, 0.0 }
 0xaa5   : > { %12357 = vmatprep.subr.bf16.mxu1 %v16186_v23 }
 0xaa6   : > { %v9068_v29 = vadd.f32 %v9058_v55, %v9033_v12 }
 0xaa7   : > { %v9026_v33 = vpop.f32.mrb[172].mxu1 }
 0xaa8   : > { %v9073_v3 = vmax.f32 %v9068_v29, 0.0  ;;  %v9034_v35 = vadd.f32 %v9026_v33, %v8804_v59  ;;  %v11345_v63 = vpop.f32.mrb[173].mxu1 }
 0xaaa   : > { %v15754_v14 = vpack.c.bf16 %v9073_v3, %v9072_v9  ;;  %v9069_v46 = vadd.f32 %v9063_v56, %v9034_v35 }
 0xaac   : > { %12359 = vmatpush3.bf16.msra.mxu1 %v15754_v14  ;;  %v15758_v50 = vmax.f32 %v9069_v46, 0.0 }
 0xaad   : > { %11354 = vmatprep.subr.mxu1 %v16187_v54 }
 0xab0   : > { %11355 = vmatpush3.msra.mxu1 %v15758_v50 }
 0xab1   : > { %11357 = vmatmul.mubr.msk.f32.vlgmr.msra.gmra.mrb[174].mxu1 %vm2592_vm15, %v9075_v28  ;;  %12360 = vmatprep.subr.bf16.mxu1 %v16186_v23 }
 0xab2   : > { %12362 = vmatpush3.bf16.msra.mxu1 %v15750_v25  ;;  %11359 = vmatprep.mubr.msk.f32.mxu1 %vm13144_vm14, %v16187_v54 }
 0xab3   : > { %12363 = vmatprep.subr.bf16.mxu1 %v16186_v23 }
 0xab5   : > { %11360 = vmatmul.mubr.msk.f32.gmra.mrb[176].mxu1 %vm2592_vm15, %v9076_v58 }
 0xab6   : > { %12365 = vmatpush3.bf16.msra.mxu1 %v15754_v14  ;;  %11362 = vmatprep.mubr.msk.f32.mxu1 %vm13144_vm14, %v16187_v54 }
 0xab7   : > { %11379 = vmatprep.subr.mxu1 %v16187_v54 }
 0xab9   : > { %11363 = vmatmul.mubr.msk.f32.gmra.mrb[178].mxu1 %vm2592_vm15, %v9077_v13 }
 0xaba   : > { %11380 = vmatpush3.msra.mxu1 %v15758_v50  ;;  %11365 = vmatprep.mubr.msk.f32.mxu1 %vm13144_vm14, %v16187_v54 }
 0xabb   : > { %11396 = vmatprep.subr.mxu1 %v16187_v54 }
 0xabd   : > { %11366 = vmatmul.mubr.msk.f32.gmra.mrb[180].mxu1 %vm2592_vm15, %v9078_v26 }
 0xabe   : > { %11368 = vmatprep.mubr.msk.f32.mxu1 %vm13144_vm14, %v16187_v54 }
 0xac1   : > { %11369 = vmatmul.mubr.msk.f32.gmra.mrb[182].mxu1 %vm2592_vm15, %v9079_v60 }
 0xac2   : > { %11381 = vmatprep.mubr.msk.f32.mxu1 %vm13144_vm14, %v16187_v54 }
 0xac5   : > { %11382 = vmatmul.mubr.msk.f32.vlgmr.msra.gmra.mrb[184].mxu1 %vm2592_vm15, %v9186_v6 }
 0xac6   : > { %11384 = vmatprep.mubr.msk.f32.mxu1 %vm13144_vm14, %v16187_v54  ;;  %11397 = vmatpush3.msk.msra.mxu1 %vm8605_vm8, %v15663_v27 }
 0xac7   : > { %11413 = vmatprep.subr.mxu1 %v16187_v54 }
 0xac9   : > { %11385 = vmatmul.mubr.msk.f32.gmra.mrb[186].mxu1 %vm2592_vm15, %v9187_v62 }
 0xaca   : > { %11387 = vmatprep.mubr.msk.f32.mxu1 %vm13144_vm14, %v16187_v54 }
 0xacd   : > { %11388 = vmatmul.mubr.msk.f32.gmra.mrb[188].mxu1 %vm2592_vm15, %v9188_v42 }
 0xace   : > { %11390 = vmatprep.mubr.msk.f32.mxu1 %vm13144_vm14, %v16187_v54 }
 0xad1   : > { %11391 = vmatmul.mubr.msk.f32.gmra.mrb[190].mxu1 %vm2592_vm15, %v9189_v24 }
 0xad2   : > { %11393 = vmatprep.mubr.msk.f32.mxu1 %vm13144_vm14, %v16187_v54 }
 0xad5   : > { %11394 = vmatmul.mubr.msk.f32.gmra.mrb[192].mxu1 %vm2592_vm15, %v9190_v20 }
 0xad6   : > { %11398 = vmatprep.mubr.msk.f32.mxu1 %vm13144_vm14, %v16187_v54 }
 0xb84   : > { %v9161_v34 = vpop.f32.mrb[174].mxu1 }
 0xb85   : > { %v11358_v1 = vpop.f32.mrb[175].mxu1 }
 0xb88   : > { %v9166_v52 = vpop.f32.mrb[176].mxu1 }
 0xb89   : > { %v11361_v4 = vpop.f32.mrb[177].mxu1 }
 0xb8c   : > { %v9171_v40 = vpop.f32.mrb[178].mxu1 }
 0xb8d   : > { %v11364_v59 = vpop.f32.mrb[179].mxu1 }
 0xb90   : > { %v9176_v17 = vpop.f32.mrb[180].mxu1 }
 0xb91   : > { %v11367_v47 = vpop.f32.mrb[181].mxu1 }
 0xb94   : > { %v9181_v41 = vpop.f32.mrb[182].mxu1 }
 0xb95   : > { %v11370_v44 = vpop.f32.mrb[183].mxu1 }
 0xb96   : > { %v9740_v44 = vpop.permute.xlu1 %9739 }
 0xb98   : > { %v9272_v2 = vpop.f32.mrb[184].mxu1 }
 0xb99   : > { %11399 = vmatmul.mubr.msk.f32.vlgmr.msra.gmra.mrb[194].mxu1 %vm8589_vm10, %v9272_v2  ;;  %v11383_v31 = vpop.f32.mrb[185].mxu1 }
 0xb9a   : > { %11401 = vmatprep.mubr.msk.f32.mxu1 %vm13144_vm14, %v16187_v54  ;;  %11414 = vmatpush3.msk.msra.mxu1 %vm8605_vm8, %v15671_v38 }
 0xb9b   : > { %12366 = vmatprep.subr.bf16.mxu1 %v16186_v23 }
 0xb9c   : > { %v9277_v49 = vpop.f32.mrb[186].mxu1 }
 0xb9d   : > { %11402 = vmatmul.mubr.msk.f32.gmra.mrb[196].mxu1 %vm8589_vm10, %v9277_v49  ;;  %v11386_v48 = vpop.f32.mrb[187].mxu1 }
 0xb9e   : > { %11404 = vmatprep.mubr.msk.f32.mxu1 %vm13144_vm14, %v16187_v54 }
 0xba0   : > { %v9282_v30 = vpop.f32.mrb[188].mxu1 }
 0xba1   : > { %11405 = vmatmul.mubr.msk.f32.gmra.mrb[198].mxu1 %vm8589_vm10, %v9282_v30  ;;  %v11389_v19 = vpop.f32.mrb[189].mxu1 }
 0xba2   : > { %11407 = vmatprep.mubr.msk.f32.mxu1 %vm13144_vm14, %v16187_v54 }
 0xba4   : > { %v9287_v57 = vpop.f32.mrb[190].mxu1 }
 0xba5   : > { %11408 = vmatmul.mubr.msk.f32.gmra.mrb[200].mxu1 %vm8589_vm10, %v9287_v57  ;;  %v11392_v21 = vpop.f32.mrb[191].mxu1 }
 0xba6   : > { %11410 = vmatprep.mubr.msk.f32.mxu1 %vm13144_vm14, %v16187_v54 }
 0xba8   : > { %v9292_v11 = vpop.f32.mrb[192].mxu1 }
 0xba9   : > { %11411 = vmatmul.mubr.msk.f32.gmra.mrb[202].mxu1 %vm8589_vm10, %v9292_v11  ;;  %v11395_v36 = vpop.f32.mrb[193].mxu1 }
 0xbaa   : > { %11415 = vmatprep.mubr.msk.f32.mxu1 %vm13144_vm14, %v16187_v54 }
 0xbad   : > { %11416 = vmatmul.mubr.msk.f32.vlgmr.msra.gmra.mrb[204].mxu1 %vm8589_vm10, %v9161_v34 }
 0xbae   : > { %12368 = vmatpush3.bf16.msra.mxu1 %v15750_v25  ;;  %11418 = vmatprep.mubr.msk.f32.mxu1 %vm13144_vm14, %v16187_v54 }
 0xbaf   : > { %12369 = vmatprep.subr.bf16.mxu1 %v16186_v23 }
 0xbb1   : > { %11419 = vmatmul.mubr.msk.f32.gmra.mrb[206].mxu1 %vm8589_vm10, %v9166_v52 }
 0xbb2   : > { %12371 = vmatpush3.bf16.msra.mxu1 %v15754_v14  ;;  %11421 = vmatprep.mubr.msk.f32.mxu1 %vm13144_vm14, %v16187_v54 }
 0xbb3   : > { %11438 = vmatprep.subr.mxu1 %v16187_v54 }
 0xbb5   : > { %11422 = vmatmul.mubr.msk.f32.gmra.mrb[208].mxu1 %vm8589_vm10, %v9171_v40  ;;  %v9735_v40 = vpop.permute.xlu0 %9734 }
 0xbb6   : > { %11439 = vmatpush3.msra.mxu1 %v15758_v50  ;;  %11424 = vmatprep.mubr.msk.f32.mxu1 %vm13144_vm14, %v16187_v54 }
 0xbb7   : > { %11455 = vmatprep.subr.mxu1 %v16187_v54 }
 0xbb9   : > { %11425 = vmatmul.mubr.msk.f32.gmra.mrb[210].mxu1 %vm8589_vm10, %v9176_v17  ;;  %v9745_v21 = vpop.permute.xlu0 %9744 }
 0xbba   : > { %11427 = vmatprep.mubr.msk.f32.mxu1 %vm13144_vm14, %v16187_v54 }
 0xbbd   : > { %11428 = vmatmul.mubr.msk.f32.gmra.mrb[212].mxu1 %vm8589_vm10, %v9181_v41 }
 0xbbe   : > { %11440 = vmatprep.mubr.msk.f32.mxu1 %vm13144_vm14, %v16187_v54 }
 0xbc1   : > { %11441 = vmatmul.mubr.msk.f32.vlgmr.msra.gmra.mrb[214].mxu1 %vm2592_vm15, %v9507_v37 }
 0xbc2   : > { %11443 = vmatprep.mubr.msk.f32.mxu1 %vm13144_vm14, %v16187_v54  ;;  %11456 = vmatpush3.msk.msra.mxu1 %vm8605_vm8, %v15730_v10 }
 0xbc3   : > { %12372 = vmatprep.subr.bf16.mxu1 %v16186_v23 }
 0xbc5   : > { %11444 = vmatmul.mubr.msk.f32.gmra.mrb[216].mxu1 %vm2592_vm15, %v9508_v8 }
 0xbc6   : > { %11446 = vmatprep.mubr.msk.f32.mxu1 %vm13144_vm14, %v16187_v54 }
 0xbc9   : > { %11447 = vmatmul.mubr.msk.f32.gmra.mrb[218].mxu1 %vm2592_vm15, %v9509_v22  ;;  %v9750_v22 = vpop.permute.xlu1 %9749 }
 0xbca   : > { %11449 = vmatprep.mubr.msk.f32.mxu1 %vm13144_vm14, %v16187_v54 }
 0xbcd   : > { %11450 = vmatmul.mubr.msk.f32.gmra.mrb[220].mxu1 %vm2592_vm15, %v9510_v15 }
 0xbce   : > { %11452 = vmatprep.mubr.msk.f32.mxu1 %vm13144_vm14, %v16187_v54 }
 0xbd1   : > { %11453 = vmatmul.mubr.msk.f32.gmra.mrb[222].mxu1 %vm2592_vm15, %v9511_v16 }
 0xbd2   : > { %11457 = vmatprep.mubr.msk.f32.mxu1 %vm13144_vm14, %v16187_v54 }
 0xc6c   : > { %v9377_v51 = vpop.f32.mrb[194].mxu1 }
 0xc6d   : > { %v11400_v18 = vpop.f32.mrb[195].mxu1 }
 0xc70   : > { %v9382_v0 = vpop.f32.mrb[196].mxu1 }
 0xc71   : > { %v11403_v7 = vpop.f32.mrb[197].mxu1 }
 0xc74   : > { %v9387_v53 = vpop.f32.mrb[198].mxu1 }
 0xc75   : > { %v11406_v43 = vpop.f32.mrb[199].mxu1 }
 0xc78   : > { %v9392_v5 = vpop.f32.mrb[200].mxu1 }
 0xc79   : > { %v11409_v25 = vpop.f32.mrb[201].mxu1 }
 0xc7c   : > { %v9397_v32 = vpop.f32.mrb[202].mxu1 }
 0xc7d   : > { %v11412_v61 = vpop.f32.mrb[203].mxu1 }
 0xc7e   : > { %v10199_v61 = vld [vmem:[#allocation9 + $0x50] sm:$0xff] }
 0xc80   : > { %v9482_v39 = vpop.f32.mrb[204].mxu1 }
 0xc81   : > { %v9483_v12 = vadd.f32 %v9482_v39, %v9377_v51  ;;  %v11417_v45 = vpop.f32.mrb[205].mxu1  ;;  %v9768_v39 = vld [vmem:[#allocation9 + $0x8] sm:$0xff] }
 0xc82   : > { %v9769_v45 = vld [vmem:[#allocation9 + $0x10] sm:$0xff] }
 0xc84   : > { %v9487_v55 = vpop.f32.mrb[206].mxu1 }
 0xc85   : > { %v9488_v29 = vadd.f32 %v9487_v55, %v9382_v0  ;;  %v11420_v33 = vpop.f32.mrb[207].mxu1  ;;  %v9770_v55 = vld [vmem:[#allocation9 + $0x18] sm:$0xff] }
 0xc86   : > { %v9771_v33 = vld [vmem:[#allocation9 + $0x20] sm:$0xff] }
 0xc88   : > { %v9492_v9 = vpop.f32.mrb[208].mxu1 }
 0xc89   : > { %v9493_v3 = vadd.f32 %v9492_v9, %v9387_v53  ;;  %v11423_v35 = vpop.f32.mrb[209].mxu1  ;;  %v9755_v53 = vpop.permute.xlu0 %9754  ;;  %v10203_v9 = vld [vmem:[#allocation9 + $0x70] sm:$0xff] }
 0xc8a   : > { %v9879_v35 = vld [vmem:[#allocation9 + $0x30] sm:$0xff] }
 0xc8c   : > { %v9497_v63 = vpop.f32.mrb[210].mxu1 }
 0xc8d   : > { %v9498_v56 = vadd.f32 %v9497_v63, %v9392_v5  ;;  %v11426_v14 = vpop.f32.mrb[211].mxu1  ;;  %v9880_v63 = vld [vmem:[#allocation9 + $0x38] sm:$0xff] }
 0xc90   : > { %v9502_v46 = vpop.f32.mrb[212].mxu1 }
 0xc91   : > { %v9503_v50 = vadd.f32 %v9502_v46, %v9397_v32  ;;  %v11429_v28 = vpop.f32.mrb[213].mxu1  ;;  %v9767_v32 = vld [vmem:[#allocation9] sm:$0xff] }
 0xc94   : > { %v9593_v58 = vpop.f32.mrb[214].mxu1 }
 0xc95   : > { %11458 = vmatmul.mubr.msk.f32.vlgmr.msra.gmra.mrb[224].mxu1 %vm8589_vm10, %v9593_v58  ;;  %v11442_v13 = vpop.f32.mrb[215].mxu1 }
 0xc96   : > { %11460 = vmatprep.mubr.msk.f32.mxu1 %vm13144_vm14, %v16187_v54 }
 0xc98   : > { %v9598_v26 = vpop.f32.mrb[216].mxu1 }
 0xc99   : > { %11461 = vmatmul.mubr.msk.f32.gmra.mrb[226].mxu1 %vm8589_vm10, %v9598_v26  ;;  %v11445_v60 = vpop.f32.mrb[217].mxu1 }
 0xc9a   : > { %11463 = vmatprep.mubr.msk.f32.mxu1 %vm13144_vm14, %v16187_v54 }
 0xc9c   : > { %v9603_v6 = vpop.f32.mrb[218].mxu1 }
 0xc9d   : > { %11464 = vmatmul.mubr.msk.f32.gmra.mrb[228].mxu1 %vm8589_vm10, %v9603_v6  ;;  %v11448_v62 = vpop.f32.mrb[219].mxu1 }
 0xc9e   : > { %11466 = vmatprep.mubr.msk.f32.mxu1 %vm13144_vm14, %v16187_v54 }
 0xca0   : > { %v9608_v42 = vpop.f32.mrb[220].mxu1 }
 0xca1   : > { %11467 = vmatmul.mubr.msk.f32.gmra.mrb[230].mxu1 %vm8589_vm10, %v9608_v42  ;;  %v11451_v24 = vpop.f32.mrb[221].mxu1 }
 0xca2   : > { %11469 = vmatprep.mubr.msk.f32.mxu1 %vm13144_vm14, %v16187_v54 }
 0xca4   : > { %v9613_v20 = vpop.f32.mrb[222].mxu1 }
 0xca5   : > { %11470 = vmatmul.mubr.msk.f32.gmra.mrb[232].mxu1 %vm8589_vm10, %v9613_v20  ;;  %v11454_v34 = vpop.f32.mrb[223].mxu1 }
 0xca6   : > { %11482 = vmatprep.mubr.msk.f32.mxu1 %vm13144_vm14, %v16187_v54 }
 0xd68   : > { %v9698_v1 = vpop.f32.mrb[224].mxu1 }
 0xd69   : > { %v9722_v52 = vadd.f32 %v9698_v1, %v9483_v12  ;;  %v11459_v4 = vpop.f32.mrb[225].mxu1  ;;  %v10200_v12 = vld [vmem:[#allocation9 + $0x58] sm:$0xff] }
 0xd6b   : > { %v9757_v17 = vadd.f32 %v9735_v40, %v9722_v52 }
 0xd6c   : > { %v9703_v59 = vpop.f32.mrb[226].mxu1 }
 0xd6d   : > { %v9723_v47 = vadd.f32 %v9703_v59, %v9488_v29  ;;  %v11462_v41 = vpop.f32.mrb[227].mxu1  ;;  %v9762_v49 = vmax.f32 %v9757_v17, 0.0  ;;  %v10202_v29 = vld [vmem:[#allocation9 + $0x68] sm:$0xff] }
 0xd6f   : > { %v9758_v2 = vadd.f32 %v9740_v44, %v9723_v47 }
 0xd70   : > { %v9708_v31 = vpop.f32.mrb[228].mxu1 }
 0xd71   : > { %v9763_v48 = vmax.f32 %v9758_v2, 0.0  ;;  %v9724_v30 = vadd.f32 %v9708_v31, %v9493_v3  ;;  %v11465_v19 = vpop.f32.mrb[229].mxu1  ;;  %v9878_v3 = vld [vmem:[#allocation9 + $0x28] sm:$0xff] }
 0xd73   : > { %v12373_v57 = vpack.c.bf16 %v9763_v48, %v9762_v49  ;;  %v9759_v36 = vadd.f32 %v9745_v21, %v9724_v30 }
 0xd74   : > { %v9713_v11 = vpop.f32.mrb[230].mxu1 }
 0xd75   : > { %v9725_v37 = vadd.f32 %v9713_v11, %v9498_v56  ;;  %12374 = vmatpush3.bf16.msra.mxu1 %v12373_v57  ;;  %12386 = vmatpush3.bf16.msra.mxu0 %v12373_v57  ;;  %v11468_v8 = vpop.f32.mrb[231].mxu1  ;;  %v9764_v51 = vmax.f32 %v9759_v36, 0.0  ;;  %v9881_v56 = vld [vmem:[#allocation9 + $0x40] sm:$0xff] }
 0xd76   : > { %12375 = vmatprep.subr.bf16.mxu1 %v16186_v23  ;;  %12387 = vmatprep.subr.bf16.mxu0 %v16186_v23 }
 0xd77   : > { %v9760_v15 = vadd.f32 %v9750_v22, %v9725_v37 }
 0xd78   : > { %v9718_v16 = vpop.f32.mrb[232].mxu1 }
 0xd79   : > { %v9765_v18 = vmax.f32 %v9760_v15, 0.0  ;;  %v9726_v0 = vadd.f32 %v9718_v16, %v9503_v50  ;;  %v11471_v7 = vpop.f32.mrb[233].mxu1 }
 0xd7b   : > { %v12376_v43 = vpack.c.bf16 %v9765_v18, %v9764_v51  ;;  %v9761_v5 = vadd.f32 %v9755_v53, %v9726_v0 }
 0xd7d   : > { %12377 = vmatpush3.bf16.msra.mxu1 %v12376_v43  ;;  %12389 = vmatpush3.bf16.msra.mxu0 %v12376_v43  ;;  %v9766_v25 = vmax.f32 %v9761_v5, 0.0 }
 0xd7e   : > { %11480 = vmatprep.subr.mxu1 %v16187_v54  ;;  %11564 = vmatprep.subr.mxu0 %v16187_v54 }
 0xd81   : > { %11481 = vmatpush3.msra.mxu1 %v9766_v25  ;;  %11565 = vmatpush3.msra.mxu0 %v9766_v25 }
 0xd82   : > { %11483 = vmatmul.mubr.msk.f32.vlgmr.msra.gmra.mrb[234].mxu1 %vm2592_vm15, %v9767_v32  ;;  %12378 = vmatprep.subr.bf16.mxu1 %v16186_v23 }
 0xd83   : > { %12380 = vmatpush3.bf16.msra.mxu1 %v12373_v57  ;;  %11485 = vmatprep.mubr.msk.f32.mxu1 %vm13144_vm14, %v16187_v54 }
 0xd84   : > { %12381 = vmatprep.subr.bf16.mxu1 %v16186_v23  ;;  %11567 = vmatmul.mubr.msk.f32.vlgmr.msra.gmra.mrb[114].mxu0 %vm2592_vm15, %v10199_v61  ;;  %v10201_v23 = vld [vmem:[#allocation9 + $0x60] sm:$0xff] }
 0xd85   : > { %11569 = vmatprep.mubr.msk.f32.mxu0 %vm13144_vm14, %v16187_v54  ;;  %11581 = vmatprep.subr.mxu0 %v16187_v54 }
 0xd86   : > { %11486 = vmatmul.mubr.msk.f32.gmra.mrb[236].mxu1 %vm2592_vm15, %v9768_v39  ;;  %11582 = vmatpush3.msk.msra.mxu0 %vm8605_vm8, %v15730_v10 }
 0xd87   : > { %12383 = vmatpush3.bf16.msra.mxu1 %v12376_v43  ;;  %11488 = vmatprep.mubr.msk.f32.mxu1 %vm13144_vm14, %v16187_v54 }
 0xd88   : > { %11505 = vmatprep.subr.mxu1 %v16187_v54  ;;  %11570 = vmatmul.mubr.msk.f32.gmra.mrb[116].mxu0 %vm2592_vm15, %v10200_v12 }
 0xd89   : > { %11572 = vmatprep.mubr.msk.f32.mxu0 %vm13144_vm14, %v16187_v54 }
 0xd8a   : > { %11489 = vmatmul.mubr.msk.f32.gmra.mrb[238].mxu1 %vm2592_vm15, %v9769_v45 }
 0xd8b   : > { %11506 = vmatpush3.msra.mxu1 %v9766_v25  ;;  %11491 = vmatprep.mubr.msk.f32.mxu1 %vm13144_vm14, %v16187_v54  ;;  %v10427_v25 = vpop.permute.xlu1 %10426 }
 0xd8c   : > { %11573 = vmatmul.mubr.msk.f32.gmra.mrb[118].mxu0 %vm2592_vm15, %v10201_v23  ;;  %11522 = vmatprep.subr.mxu1 %v16187_v54  ;;  %v10432_v23 = vpop.permute.xlu0 %10431 }
 0xd8d   : > { %11575 = vmatprep.mubr.msk.f32.mxu0 %vm13144_vm14, %v16187_v54 }
 0xd8e   : > { %11492 = vmatmul.mubr.msk.f32.gmra.mrb[240].mxu1 %vm2592_vm15, %v9770_v55 }
 0xd8f   : > { %11494 = vmatprep.mubr.msk.f32.mxu1 %vm13144_vm14, %v16187_v54 }
 0xd90   : > { %11576 = vmatmul.mubr.msk.f32.gmra.mrb[120].mxu0 %vm2592_vm15, %v10202_v29 }
 0xd91   : > { %11578 = vmatprep.mubr.msk.f32.mxu0 %vm13144_vm14, %v16187_v54 }
 0xd92   : > { %11495 = vmatmul.mubr.msk.f32.gmra.mrb[242].mxu1 %vm2592_vm15, %v9771_v33 }
 0xd93   : > { %11507 = vmatprep.mubr.msk.f32.mxu1 %vm13144_vm14, %v16187_v54 }
 0xd94   : > { %11579 = vmatmul.mubr.msk.f32.gmra.mrb[122].mxu0 %vm2592_vm15, %v10203_v9 }
 0xd95   : > { %11583 = vmatprep.mubr.msk.f32.mxu0 %vm13144_vm14, %v16187_v54 }
 0xd96   : > { %11508 = vmatmul.mubr.msk.f32.vlgmr.msra.gmra.mrb[244].mxu1 %vm2592_vm15, %v9878_v3 }
 0xd97   : > { %11510 = vmatprep.mubr.msk.f32.mxu1 %vm13144_vm14, %v16187_v54  ;;  %11523 = vmatpush3.msk.msra.mxu1 %vm8605_vm8, %v15663_v27  ;;  %v9882_v27 = vld [vmem:[#allocation9 + $0x48] sm:$0xff] }
 0xd98   : > { %11539 = vmatprep.subr.mxu1 %v16187_v54 }
 0xd9a   : > { %11511 = vmatmul.mubr.msk.f32.gmra.mrb[246].mxu1 %vm2592_vm15, %v9879_v35 }
 0xd9b   : > { %11513 = vmatprep.mubr.msk.f32.mxu1 %vm13144_vm14, %v16187_v54 }
 0xd9e   : > { %11514 = vmatmul.mubr.msk.f32.gmra.mrb[248].mxu1 %vm2592_vm15, %v9880_v63 }
 0xd9f   : > { %11516 = vmatprep.mubr.msk.f32.mxu1 %vm13144_vm14, %v16187_v54 }
 0xda2   : > { %11517 = vmatmul.mubr.msk.f32.gmra.mrb[250].mxu1 %vm2592_vm15, %v9881_v56 }
 0xda3   : > { %11519 = vmatprep.mubr.msk.f32.mxu1 %vm13144_vm14, %v16187_v54 }
 0xda6   : > { %11520 = vmatmul.mubr.msk.f32.gmra.mrb[252].mxu1 %vm2592_vm15, %v9882_v27 }
 0xda7   : > { %11524 = vmatprep.mubr.msk.f32.mxu1 %vm13144_vm14, %v16187_v54 }
 0xe55   : > { %v9853_v14 = vpop.f32.mrb[234].mxu1 }
 0xe56   : > { %v11484_v46 = vpop.f32.mrb[235].mxu1 }
 0xe57   : > { %v10285_v50 = vpop.f32.mrb[114].mxu0 }
 0xe58   : > { %11584 = vmatmul.mubr.msk.f32.vlgmr.msra.gmra.mrb[124].mxu0 %vm8589_vm10, %v10285_v50  ;;  %v11568_v28 = vpop.f32.mrb[115].mxu0 }
 0xe59   : > { %v9858_v58 = vpop.f32.mrb[236].mxu1  ;;  %11586 = vmatprep.mubr.msk.f32.mxu0 %vm13144_vm14, %v16187_v54 }
 0xe5a   : > { %v11487_v13 = vpop.f32.mrb[237].mxu1 }
 0xe5b   : > { %v10290_v26 = vpop.f32.mrb[116].mxu0 }
 0xe5c   : > { %11587 = vmatmul.mubr.msk.f32.gmra.mrb[126].mxu0 %vm8589_vm10, %v10290_v26  ;;  %v11571_v60 = vpop.f32.mrb[117].mxu0 }
 0xe5d   : > { %v9863_v6 = vpop.f32.mrb[238].mxu1 }
 0xe5e   : > { %v11490_v62 = vpop.f32.mrb[239].mxu1 }
 0xe5f   : > { %v10295_v42 = vpop.f32.mrb[118].mxu0  ;;  %v10442_v62 = vpop.permute.xlu0 %10441 }
 0xe60   : > { %v11574_v24 = vpop.f32.mrb[119].mxu0 }
 0xe61   : > { %v9868_v20 = vpop.f32.mrb[240].mxu1 }
 0xe62   : > { %v11493_v34 = vpop.f32.mrb[241].mxu1 }
 0xe63   : > { %v10300_v1 = vpop.f32.mrb[120].mxu0 }
 0xe64   : > { %v11577_v52 = vpop.f32.mrb[121].mxu0 }
 0xe65   : > { %v9873_v4 = vpop.f32.mrb[242].mxu1 }
 0xe66   : > { %v11496_v40 = vpop.f32.mrb[243].mxu1 }
 0xe67   : > { %v10305_v59 = vpop.f32.mrb[122].mxu0 }
 0xe68   : > { %v11580_v17 = vpop.f32.mrb[123].mxu0 }
 0xe69   : > { %v9964_v47 = vpop.f32.mrb[244].mxu1 }
 0xe6a   : > { %11525 = vmatmul.mubr.msk.f32.vlgmr.msra.gmra.mrb[254].mxu1 %vm8589_vm10, %v9964_v47  ;;  %v11509_v41 = vpop.f32.mrb[245].mxu1 }
 0xe6b   : > { %11527 = vmatprep.mubr.msk.f32.mxu1 %vm13144_vm14, %v16187_v54  ;;  %11540 = vmatpush3.msk.msra.mxu1 %vm8605_vm8, %v15671_v38 }
 0xe6c   : > { %12390 = vmatprep.subr.mxu1 %v16187_v54 }
 0xe6d   : > { %v9969_v44 = vpop.f32.mrb[246].mxu1 }
 0xe6e   : > { %11528 = vmatmul.mubr.msk.f32.gmra.mrb[0].mxu1 %vm8589_vm10, %v9969_v44  ;;  %v11512_v2 = vpop.f32.mrb[247].mxu1 }
 0xe6f   : > { %11530 = vmatprep.mubr.msk.f32.mxu1 %vm13144_vm14, %v16187_v54 }
 0xe71   : > { %v9974_v31 = vpop.f32.mrb[248].mxu1 }
 0xe72   : > { %11531 = vmatmul.mubr.msk.f32.gmra.mrb[2].mxu1 %vm8589_vm10, %v9974_v31  ;;  %v11515_v49 = vpop.f32.mrb[249].mxu1 }
 0xe73   : > { %11533 = vmatprep.mubr.msk.f32.mxu1 %vm13144_vm14, %v16187_v54 }
 0xe75   : > { %v9979_v48 = vpop.f32.mrb[250].mxu1 }
 0xe76   : > { %11534 = vmatmul.mubr.msk.f32.gmra.mrb[4].mxu1 %vm8589_vm10, %v9979_v48  ;;  %v11518_v38 = vpop.f32.mrb[251].mxu1 }
 0xe77   : > { %11536 = vmatprep.mubr.msk.f32.mxu1 %vm13144_vm14, %v16187_v54 }
 0xe79   : > { %v9984_v30 = vpop.f32.mrb[252].mxu1 }
 0xe7a   : > { %11537 = vmatmul.mubr.msk.f32.gmra.mrb[6].mxu1 %vm8589_vm10, %v9984_v30  ;;  %v11521_v19 = vpop.f32.mrb[253].mxu1 }
 0xe7b   : > { %11541 = vmatprep.mubr.msk.f32.mxu1 %vm13144_vm14, %v16187_v54 }
 0xe7e   : > { %11542 = vmatmul.mubr.msk.f32.vlgmr.msra.gmra.mrb[8].mxu1 %vm8589_vm10, %v9853_v14 }
 0xe7f   : > { %11544 = vmatprep.mubr.msk.f32.mxu1 %vm13144_vm14, %v16187_v54  ;;  %12391 = vmatpush3.msk.msra.mxu1 %vm8605_vm8, %v15730_v10 }
 0xe82   : > { %11545 = vmatmul.mubr.msk.f32.gmra.mrb[10].mxu1 %vm8589_vm10, %v9858_v58  ;;  %v10437_v58 = vpop.permute.xlu1 %10436 }
 0xe83   : > { %11547 = vmatprep.mubr.msk.f32.mxu1 %vm13144_vm14, %v16187_v54 }
 0xe86   : > { %11548 = vmatmul.mubr.msk.f32.gmra.mrb[12].mxu1 %vm8589_vm10, %v9863_v6 }
 0xe87   : > { %11550 = vmatprep.mubr.msk.f32.mxu1 %vm13144_vm14, %v16187_v54 }
 0xe8a   : > { %11551 = vmatmul.mubr.msk.f32.gmra.mrb[14].mxu1 %vm8589_vm10, %v9868_v20 }
 0xe8b   : > { %11553 = vmatprep.mubr.msk.f32.mxu1 %vm13144_vm14, %v16187_v54 }
 0xe8e   : > { %11554 = vmatmul.mubr.msk.f32.gmra.mrb[16].mxu1 %vm8589_vm10, %v9873_v4 }
 0xe8f   : > { %11589 = vmatprep.mubr.msk.f32.mxu1 %vm13144_vm14, %v16187_v54 }
 0xe92   : > { %11590 = vmatmul.mubr.msk.f32.vlgmr.msra.gmra.mrb[18].mxu1 %vm8589_vm10, %v10295_v42 }
 0xe93   : > { %11592 = vmatprep.mubr.msk.f32.mxu1 %vm13144_vm14, %v16187_v54 }
 0xe96   : > { %11593 = vmatmul.mubr.msk.f32.gmra.mrb[20].mxu1 %vm8589_vm10, %v10300_v1  ;;  %v10447_v1 = vpop.permute.xlu1 %10446 }
 0xe97   : > { %11595 = vmatprep.mubr.msk.f32.mxu1 %vm13144_vm14, %v16187_v54 }
 0xe9a   : > { %11596 = vmatmul.mubr.msk.f32.gmra.mrb[22].mxu1 %vm8589_vm10, %v10305_v59 }
 0xf2b   : > { %v10390_v10 = vpop.f32.mrb[124].mxu0 }
 0xf2c   : > { %v11585_v57 = vpop.f32.mrb[125].mxu0 }
 0xf2f   : > { %v10395_v21 = vpop.f32.mrb[126].mxu0 }
 0xf30   : > { %v11588_v11 = vpop.f32.mrb[127].mxu0 }
 0xf3d   : > { %v10069_v36 = vpop.f32.mrb[254].mxu1 }
 0xf3e   : > { %v11526_v37 = vpop.f32.mrb[255].mxu1 }
 0xf41   : > { %v10074_v8 = vpop.f32.mrb[0].mxu1 }
 0xf42   : > { %v11529_v22 = vpop.f32.mrb[1].mxu1 }
 0xf45   : > { %v10079_v15 = vpop.f32.mrb[2].mxu1 }
 0xf46   : > { %v11532_v16 = vpop.f32.mrb[3].mxu1 }
 0xf49   : > { %v10084_v51 = vpop.f32.mrb[4].mxu1 }
 0xf4a   : > { %v11535_v18 = vpop.f32.mrb[5].mxu1 }
 0xf4d   : > { %v10089_v0 = vpop.f32.mrb[6].mxu1 }
 0xf4e   : > { %v11538_v7 = vpop.f32.mrb[7].mxu1 }
 0xf51   : > { %v10174_v54 = vpop.f32.mrb[8].mxu1 }
 0xf52   : > { %v10175_v53 = vadd.f32 %v10174_v54, %v10069_v36  ;;  %v11543_v43 = vpop.f32.mrb[9].mxu1 }
 0xf54   : > { %v10414_v5 = vadd.f32 %v10390_v10, %v10175_v53 }
 0xf55   : > { %v10179_v32 = vpop.f32.mrb[10].mxu1 }
 0xf56   : > { %v10449_v61 = vadd.f32 %v10427_v25, %v10414_v5  ;;  %v10180_v39 = vadd.f32 %v10179_v32, %v10074_v8  ;;  %v11546_v12 = vpop.f32.mrb[11].mxu1 }
 0xf58   : > { %10454 = vst.msk [vmem:[%s15983_s30] sm:$0xff] %vm8589_vm10, %v10449_v61  ;;  %v10415_v45 = vadd.f32 %v10395_v21, %v10180_v39 }
 0xf59   : > { %v10184_v55 = vpop.f32.mrb[12].mxu1 }
 0xf5a   : > { %v10450_v29 = vadd.f32 %v10432_v23, %v10415_v45  ;;  %v10185_v33 = vadd.f32 %v10184_v55, %v10079_v15  ;;  %v11549_v9 = vpop.f32.mrb[13].mxu1 }
 0xf5c   : > { %10455 = vst.msk [vmem:[%s15983_s30 + $0x8] sm:$0xff] %vm8589_vm10, %v10450_v29 }
 0xf5d   : > { %v10189_v3 = vpop.f32.mrb[14].mxu1 }
 0xf5e   : > { %v10190_v35 = vadd.f32 %v10189_v3, %v10084_v51  ;;  %v11552_v63 = vpop.f32.mrb[15].mxu1 }
 0xf61   : > { %v10194_v56 = vpop.f32.mrb[16].mxu1 }
 0xf62   : > { %v10195_v27 = vadd.f32 %v10194_v56, %v10089_v0  ;;  %v11555_v14 = vpop.f32.mrb[17].mxu1 }
 0xf65   : > { %v10400_v46 = vpop.f32.mrb[18].mxu1 }
 0xf66   : > { %v10416_v50 = vadd.f32 %v10400_v46, %v10185_v33  ;;  %v11591_v28 = vpop.f32.mrb[19].mxu1 }
 0xf68   : > { %v10451_v13 = vadd.f32 %v10437_v58, %v10416_v50 }
 0xf69   : > { %v10405_v26 = vpop.f32.mrb[20].mxu1 }
 0xf6a   : > { %10456 = vst.msk [vmem:[%s15983_s30 + $0x10] sm:$0xff] %vm8589_vm10, %v10451_v13  ;;  %v10417_v60 = vadd.f32 %v10405_v26, %v10190_v35  ;;  %v11594_v6 = vpop.f32.mrb[21].mxu1 }
 0xf6c   : > { %v10452_v42 = vadd.f32 %v10442_v62, %v10417_v60 }
 0xf6d   : > { %v10410_v24 = vpop.f32.mrb[22].mxu1 }
 0xf6e   : > { %10457 = vst.msk [vmem:[%s15983_s30 + $0x18] sm:$0xff] %vm8589_vm10, %v10452_v42  ;;  %v10418_v20 = vadd.f32 %v10410_v24, %v10195_v27  ;;  %v11597_v34 = vpop.f32.mrb[23].mxu1 }
 0xf70   : > { %v10453_v52 = vadd.f32 %v10447_v1, %v10418_v20 }
 0xf72   : > { %10458 = vst.msk [vmem:[%s15983_s30 + $0x20] sm:$0xff] %vm8589_vm10, %v10453_v52 }
 0xf73 PF: > { %p21_p4 = scmp.ge.s32.totalorder %s13328_s26, 4   ;;  %s16191_s30 = smov %s13121_s10 }
 0xf74   : > { %s16192_s10 = smov %s13125_s11  ;;  %s16193_s11 = smov %s13339_s19 }
 0xf75   : > { %s16194_s12 = smov %s13328_s26  ;;  %23 = sbr.rel (!%p21_p4) target bundleno = 8 (0x8), region = 120 }
 0xf7c   :  { %10480 = vsyncpa [#allocation3], 1 }
 0xf7d   :  { %10482 = vsyncpa [#allocation3 + $0x1], 1 }
 0xf7e   :  { %10483 = vsyncpa [#allocation5], 1 }
 0xf7f   :  { %10484 = vsyncpa [#allocation8], 1 }

</bundles_post_ra>
